<compile_context>
chip_gen: v7x
topology: tpu7x:2x2x1
jax: 0.10.0
libtpu: 0.0.40
codegen_flags: <defaults>
</compile_context>

<pallas_src>
import jax
import jax.numpy as jnp
from jax import lax
from jax.experimental import pallas as pl
from jax.experimental.pallas import tpu as pltpu

# ---- scaled-down configuration (reference: crop 256x128, ResNet-50, 128-d out) ----
CROP_H, CROP_W = 16, 8          # stand-in for crop_H=256, crop_W=128 (same aspect ratio)
HW = CROP_H * CROP_W            # 128  -> exactly one lane-group per ROI
C_IN = 3
C_HID = 8                       # stand-in backbone width (input channels padded to this)
EMB_DIM = 128                   # output_dim=128 as in the reference module
ROI_TILE = 32                   # ROIs per grid step -> n = 4096 lanes per block

NORM_MEAN = (0.485, 0.456, 0.406)
NORM_STD = (0.229, 0.224, 0.225)

# 3x3 tap offsets; this enumeration order defines both the im2col stack order and
# the weight-matrix column order built in init_params.
_OFFSETS = tuple((oh, ow) for oh in (-1, 0, 1) for ow in (-1, 0, 1))


# ----------------------------- fused Pallas kernel -----------------------------
def _fused_reid_kernel(x_ref, masks_ref, mean_ref, istd_ref,
                       w1_ref, b1_ref, w2_ref, b2_ref, w3_ref, b3_ref,
                       wfc_ref, bfc_ref, o_ref, stack_ref):
    n = ROI_TILE * HW

    # normalization fused into the kernel (padded channels: mean=0, istd=1 -> stay 0)
    x = (x_ref[...] - mean_ref[...]) * istd_ref[...]                   # [C_HID, n] f32

    def conv3x3(inp, w_ref_, b_ref_):
        # inp: [C_HID, n] f32 -> pre-activation [C_HID, n] f32.
        # Build the im2col stack in VMEM scratch (tap-major), then ONE bf16 MXU dot.
        for k, (oh, ow) in enumerate(_OFFSETS):
            s = oh * CROP_W + ow
            # y[..., i] = inp[..., i + s]; wrapped lanes are zeroed by the mask.
            shifted = inp if s == 0 else pltpu.roll(inp, shift=(-s) % n, axis=1)
            mk = masks_ref[pl.ds(k, 1), :]                             # [1, n] f32, short-lived
            stack_ref[pl.ds(k * C_HID, C_HID), :] = (shifted * mk).astype(jnp.bfloat16)
        acc = jnp.dot(w_ref_[...], stack_ref[...],
                      preferred_element_type=jnp.float32)              # [C_HID, n] f32
        return acc + b_ref_[...]

    h1 = jnp.maximum(conv3x3(x, w1_ref, b1_ref), 0.0)                  # conv stem
    h2 = jnp.maximum(conv3x3(h1, w2_ref, b2_ref), 0.0)                 # residual block
    h3 = jnp.maximum(conv3x3(h2, w3_ref, b3_ref) + h1, 0.0)            # + skip, relu

    # global average pool: segmented lane reduction (each ROI = one 128-lane group)
    pooled = jnp.sum(h3.reshape(C_HID, ROI_TILE, HW), axis=-1) * (1.0 / HW)  # [C_HID, ROI_TILE]

    # FC to the 128-d embedding; bf16 operands, f32 accumulation.
    emb = lax.dot_general(pooled.astype(jnp.bfloat16), wfc_ref[...],
                          (((0,), (0,)), ((), ())),
                          preferred_element_type=jnp.float32) + bfc_ref[...]  # [ROI_TILE, EMB]
    o_ref[...] = emb


def _const_spec(shape):
    nd = len(shape)
    return pl.BlockSpec(shape, lambda i, _nd=nd: (0,) * _nd)


def fused_reid_features(x_cn, params, r_pad):
    """x_cn: [C_HID, r_pad*HW] f32 (channels 3..7 zero) -> [r_pad, EMB_DIM] f32."""
    n = ROI_TILE * HW
    num_tiles = r_pad // ROI_TILE

    flops = r_pad * (3 * 2 * HW * (9 * C_HID) * C_HID + 2 * C_HID * EMB_DIM)
    param_bytes = (3 * (C_HID * 9 * C_HID) + C_HID * EMB_DIM) * 2 \
        + (3 * C_HID + 2 * C_HID + EMB_DIM) * 4 + 9 * n * 4
    bytes_accessed = x_cn.size * 4 + r_pad * EMB_DIM * 4 + param_bytes

    return pl.pallas_call(
        _fused_reid_kernel,
        out_shape=jax.ShapeDtypeStruct((r_pad, EMB_DIM), jnp.float32),
        grid=(num_tiles,),
        in_specs=[
            pl.BlockSpec((C_HID, n), lambda i: (0, i)),   # per-tile ROI pixels
            _const_spec((9, n)),                          # per-tap validity masks
            _const_spec((C_HID, 1)),                      # mean (padded)
            _const_spec((C_HID, 1)),                      # 1/std (padded)
            _const_spec((C_HID, 9 * C_HID)),              # w1 (fused im2col matrix, bf16)
            _const_spec((C_HID, 1)),                      # b1
            _const_spec((C_HID, 9 * C_HID)),              # w2
            _const_spec((C_HID, 1)),                      # b2
            _const_spec((C_HID, 9 * C_HID)),              # w3
            _const_spec((C_HID, 1)),                      # b3
            _const_spec((C_HID, EMB_DIM)),                # wfc (bf16)
            _const_spec((1, EMB_DIM)),                    # bfc
        ],
        out_specs=pl.BlockSpec((ROI_TILE, EMB_DIM), lambda i: (i, 0)),
        scratch_shapes=[pltpu.VMEM((9 * C_HID, n), jnp.bfloat16)],     # im2col stack
        compiler_params=pltpu.CompilerParams(
            dimension_semantics=("parallel",),
            vmem_limit_bytes=32 * 1024 * 1024),
        cost_estimate=pl.CostEstimate(flops=int(flops), transcendentals=0,
                                      bytes_accessed=int(bytes_accessed)),
    )(x_cn, params["masks"], params["mean"], params["istd"],
      params["w1"], params["b1"], params["w2"], params["b2"],
      params["w3"], params["b3"], params["wfc"], params["bfc"])


# ----------------------------- parameters -----------------------------
def init_params(key):
    ks = jax.random.split(key, 4)
    s = 0.1

    def conv_to_mat(wc):
        # [3,3,ci,co] -> [co, 9*ci] bf16, tap-major / channel-minor columns
        # (matches the stack order written by the kernel's tap loop).
        kh, kw, ci, co = wc.shape
        return jnp.transpose(wc.reshape(kh * kw, ci, co),
                             (2, 0, 1)).reshape(co, kh * kw * ci).astype(jnp.bfloat16)

    w1 = jax.random.normal(ks[0], (3, 3, C_IN, C_HID), jnp.float32) * s
    w1 = jnp.pad(w1, ((0, 0), (0, 0), (0, C_HID - C_IN), (0, 0)))  # zero weights for padded chans
    w2 = jax.random.normal(ks[1], (3, 3, C_HID, C_HID), jnp.float32) * s
    w3 = jax.random.normal(ks[2], (3, 3, C_HID, C_HID), jnp.float32) * s
    wfc = (jax.random.normal(ks[3], (C_HID, EMB_DIM), jnp.float32) * s).astype(jnp.bfloat16)

    # per-output-position validity masks for the 9 conv taps (shared by all layers)
    n = ROI_TILE * HW
    q = jnp.arange(n, dtype=jnp.int32)
    p = q % HW
    h = p // CROP_W
    w = p % CROP_W
    rows = []
    for oh, ow in _OFFSETS:
        ok = (h + oh >= 0) & (h + oh < CROP_H) & (w + ow >= 0) & (w + ow < CROP_W)
        rows.append(ok.astype(jnp.float32))
    masks = jnp.stack(rows, axis=0)                                    # [9, n]

    mean = jnp.zeros((C_HID, 1), jnp.float32).at[:C_IN, 0].set(
        jnp.array(NORM_MEAN, jnp.float32))
    istd = jnp.ones((C_HID, 1), jnp.float32).at[:C_IN, 0].set(
        1.0 / jnp.array(NORM_STD, jnp.float32))

    return {
        "w1": conv_to_mat(w1), "b1": jnp.zeros((C_HID, 1), jnp.float32),
        "w2": conv_to_mat(w2), "b2": jnp.zeros((C_HID, 1), jnp.float32),
        "w3": conv_to_mat(w3), "b3": jnp.zeros((C_HID, 1), jnp.float32),
        "wfc": wfc, "bfc": jnp.zeros((1, EMB_DIM), jnp.float32),
        "masks": masks, "mean": mean, "istd": istd,
    }


# ----------------------------- JAX glue -----------------------------
def _crop_and_resize(images_hwc, boxes, img_idx, out_h, out_w):
    # Bilinear crop-resize of [x1, y1, x2, y2] boxes (taken from image img_idx).
    _, H, W, _ = images_hwc.shape

    def sample_one(box, ii):
        img = images_hwc[ii]
        x1, y1, x2, y2 = box[0], box[1], box[2], box[3]
        ys = y1 + (y2 - y1) * (jnp.arange(out_h, dtype=jnp.float32) + 0.5) / out_h - 0.5
        xs = x1 + (x2 - x1) * (jnp.arange(out_w, dtype=jnp.float32) + 0.5) / out_w - 0.5
        y0f = jnp.floor(ys)
        x0f = jnp.floor(xs)
        wy = (ys - y0f)[:, None, None]
        wx = (xs - x0f)[None, :, None]
        y0 = jnp.clip(y0f, 0, H - 1).astype(jnp.int32)
        y1i = jnp.clip(y0 + 1, 0, H - 1)
        x0 = jnp.clip(x0f, 0, W - 1).astype(jnp.int32)
        x1i = jnp.clip(x0 + 1, 0, W - 1)

        def gat(yy, xx):
            return img[yy][:, xx, :]   # [out_h, out_w, C]

        top = gat(y0, x0) * (1.0 - wx) + gat(y0, x1i) * wx
        bot = gat(y1i, x0) * (1.0 - wx) + gat(y1i, x1i) * wx
        return top * (1.0 - wy) + bot * wy

    return jax.vmap(sample_one)(boxes, img_idx)


@jax.jit
def _batched_reid(images_chw, boxes_all, img_idx, params):
    """images_chw: [NI,3,H,W], boxes_all: [r_pad,4], img_idx: [r_pad] -> [r_pad, EMB_DIM]."""
    r_pad = boxes_all.shape[0]
    imgs_hwc = jnp.transpose(images_chw, (0, 2, 3, 1)).astype(jnp.float32)
    crops = _crop_and_resize(imgs_hwc, boxes_all.astype(jnp.float32), img_idx,
                             CROP_H, CROP_W)                      # [r_pad, H, W, C_IN]
    # channels-on-sublanes / (roi,h,w)-on-lanes layout; pad channels to C_HID for
    # sublane-aligned stores/loads and a uniform fused-conv K dimension.
    x_cn = jnp.transpose(crops, (3, 0, 1, 2)).reshape(C_IN, r_pad * HW)
    x_cn = jnp.pad(x_cn, ((0, C_HID - C_IN), (0, 0)))
    return fused_reid_features(x_cn, params, r_pad)


class REIDModelMotResnetPallas:
    """Pallas re-implementation of REID_model_mot_resnet.forward(imgs, boxes)."""

    def __init__(self, key):
        self.params = init_params(key)

    def __call__(self, imgs, boxes):
        counts = [int(b.shape[0]) for b in boxes]
        total = int(sum(counts))
        if total == 0:
            # torch.FloatTensor(0, 128).zero_() per image
            return [jnp.zeros((0, EMB_DIM), jnp.float32) for _ in boxes]

        images = jnp.stack([jnp.asarray(im, jnp.float32) for im in imgs], axis=0)
        box_chunks, idx_chunks = [], []
        for i, b in enumerate(boxes):
            if counts[i] > 0:
                box_chunks.append(jnp.asarray(b, jnp.float32))
                idx_chunks.append(jnp.full((counts[i],), i, jnp.int32))
        boxes_all = jnp.concatenate(box_chunks, axis=0)
        img_idx = jnp.concatenate(idx_chunks, axis=0)

        # pad ROI count to a multiple of the kernel's ROI tile (single batched launch)
        r_pad = ((total + ROI_TILE - 1) // ROI_TILE) * ROI_TILE
        pad = r_pad - total
        if pad:
            pad_boxes = jnp.tile(jnp.array([[0.0, 0.0, 1.0, 1.0]], jnp.float32), (pad, 1))
            boxes_all = jnp.concatenate([boxes_all, pad_boxes], axis=0)
            img_idx = jnp.concatenate([img_idx, jnp.zeros((pad,), jnp.int32)], axis=0)

        feats_all = _batched_reid(images, boxes_all, img_idx, self.params)

        out, off = [], 0
        for c in counts:
            out.append(feats_all[off:off + c])
            off += c
        return out


if __name__ == "__main__":
    key = jax.random.PRNGKey(0)
    k_img, k_param = jax.random.split(key, 2)

    H_IMG, W_IMG = 32, 32
    img0 = jax.random.uniform(k_img, (3, H_IMG, W_IMG), jnp.float32)       # CHW per image
    img1 = jax.random.uniform(jax.random.fold_in(k_img, 1), (3, H_IMG, W_IMG), jnp.float32)

    boxes0 = jnp.array([[2.0, 3.0, 20.0, 28.0],
                        [5.0, 1.0, 15.0, 30.0],
                        [0.0, 0.0, 31.0, 31.0],
                        [10.0, 5.0, 30.0, 29.0],
                        [1.0, 8.0, 12.0, 26.0],
                        [6.0, 6.0, 22.0, 31.0]], dtype=jnp.float32)
    boxes1 = jnp.array([[4.0, 4.0, 24.0, 24.0],
                        [8.0, 2.0, 18.0, 30.0],
                        [0.0, 5.0, 14.0, 27.0],
                        [12.0, 3.0, 28.0, 30.0],
                        [3.0, 10.0, 20.0, 31.0]], dtype=jnp.float32)

    model = REIDModelMotResnetPallas(k_param)
    feats = model([img0, img1], [boxes0, boxes1])

    for f in feats:
        jax.block_until_ready(f)

    assert feats[0].shape == (6, EMB_DIM)
    assert feats[1].shape == (5, EMB_DIM)
    assert feats[0].dtype == jnp.float32

    print("KERNEL_OK")
</pallas_src>

<mosaic_0001>
module attributes {stable_mosaic.version = 11 : i64} {
  func.func @_fused_reid_kernel(%arg0: i32, %arg1: memref<8x4096xf32, #tpu.memory_space<vmem>>, %arg2: memref<9x4096xf32, #tpu.memory_space<vmem>>, %arg3: memref<8x1xf32, #tpu.memory_space<vmem>>, %arg4: memref<8x1xf32, #tpu.memory_space<vmem>>, %arg5: memref<8x72xbf16, #tpu.memory_space<vmem>>, %arg6: memref<8x1xf32, #tpu.memory_space<vmem>>, %arg7: memref<8x72xbf16, #tpu.memory_space<vmem>>, %arg8: memref<8x1xf32, #tpu.memory_space<vmem>>, %arg9: memref<8x72xbf16, #tpu.memory_space<vmem>>, %arg10: memref<8x1xf32, #tpu.memory_space<vmem>>, %arg11: memref<8x128xbf16, #tpu.memory_space<vmem>>, %arg12: memref<1x128xf32, #tpu.memory_space<vmem>>, %arg13: memref<32x128xf32, #tpu.memory_space<vmem>>, %arg14: memref<72x4096xbf16, #tpu.memory_space<vmem>>) attributes {dimension_semantics = [#tpu.dimension_semantics<parallel>], iteration_bounds = array<i64: 1>, scalar_prefetch = 0 : i64, scratch_operands = 1 : i64, tpu.core_type = #tpu.core_type<tc>, window_params = [{transform_indices = @transform_0, window_bounds = array<i64: 8, 4096>}, {pipeline_mode = #tpu.pipeline_mode<synchronous>, transform_indices = @transform_1, window_bounds = array<i64: 9, 4096>}, {pipeline_mode = #tpu.pipeline_mode<synchronous>, transform_indices = @transform_2, window_bounds = array<i64: 8, 1>}, {pipeline_mode = #tpu.pipeline_mode<synchronous>, transform_indices = @transform_3, window_bounds = array<i64: 8, 1>}, {pipeline_mode = #tpu.pipeline_mode<synchronous>, transform_indices = @transform_4, window_bounds = array<i64: 8, 72>}, {pipeline_mode = #tpu.pipeline_mode<synchronous>, transform_indices = @transform_5, window_bounds = array<i64: 8, 1>}, {pipeline_mode = #tpu.pipeline_mode<synchronous>, transform_indices = @transform_6, window_bounds = array<i64: 8, 72>}, {pipeline_mode = #tpu.pipeline_mode<synchronous>, transform_indices = @transform_7, window_bounds = array<i64: 8, 1>}, {pipeline_mode = #tpu.pipeline_mode<synchronous>, transform_indices = @transform_8, window_bounds = array<i64: 8, 72>}, {pipeline_mode = #tpu.pipeline_mode<synchronous>, transform_indices = @transform_9, window_bounds = array<i64: 8, 1>}, {pipeline_mode = #tpu.pipeline_mode<synchronous>, transform_indices = @transform_10, window_bounds = array<i64: 8, 128>}, {pipeline_mode = #tpu.pipeline_mode<synchronous>, transform_indices = @transform_11, window_bounds = array<i64: 1, 128>}, {transform_indices = @transform_12, window_bounds = array<i64: 32, 128>}]} {
    %c0 = arith.constant 0 : index
    %c0_0 = arith.constant 0 : index
    %0 = vector.load %arg1[%c0, %c0_0] : memref<8x4096xf32, #tpu.memory_space<vmem>>, vector<8x4096xf32>
    %c0_1 = arith.constant 0 : index
    %c0_2 = arith.constant 0 : index
    %1 = vector.load %arg3[%c0_1, %c0_2] : memref<8x1xf32, #tpu.memory_space<vmem>>, vector<8x1xf32>
    %2 = vector.broadcast %1 : vector<8x1xf32> to vector<8x4096xf32>
    %3 = arith.subf %0, %2 : vector<8x4096xf32>
    %c0_3 = arith.constant 0 : index
    %c0_4 = arith.constant 0 : index
    %4 = vector.load %arg4[%c0_3, %c0_4] : memref<8x1xf32, #tpu.memory_space<vmem>>, vector<8x1xf32>
    %5 = vector.broadcast %4 : vector<8x1xf32> to vector<8x4096xf32>
    %6 = arith.mulf %3, %5 : vector<8x4096xf32>
    %c9_i32 = arith.constant 9 : i32
    %7 = tpu.dynamic_rotate %6 by %c9_i32 dim 1 : vector<8x4096xf32>, i32 -> vector<8x4096xf32>
    %c0_5 = arith.constant 0 : index
    %c0_6 = arith.constant 0 : index
    %8 = vector.load %arg2[%c0_5, %c0_6] : memref<9x4096xf32, #tpu.memory_space<vmem>>, vector<1x4096xf32>
    %9 = vector.broadcast %8 : vector<1x4096xf32> to vector<8x4096xf32>
    %10 = arith.mulf %7, %9 : vector<8x4096xf32>
    %11 = arith.truncf %10 : vector<8x4096xf32> to vector<8x4096xbf16>
    %c0_7 = arith.constant 0 : index
    %c0_8 = arith.constant 0 : index
    %12 = vector.load %arg14[%c0_7, %c0_8] : memref<72x4096xbf16, #tpu.memory_space<vmem>>, vector<8x4096xbf16>
    tpu.vector_store %arg14[%c0_7, %c0_8], %11 {strides = array<i32>} : memref<72x4096xbf16, #tpu.memory_space<vmem>>, vector<8x4096xbf16>,
    %c8_i32 = arith.constant 8 : i32
    %13 = tpu.dynamic_rotate %6 by %c8_i32 dim 1 : vector<8x4096xf32>, i32 -> vector<8x4096xf32>
    %c1 = arith.constant 1 : index
    %c0_9 = arith.constant 0 : index
    %14 = vector.load %arg2[%c1, %c0_9] : memref<9x4096xf32, #tpu.memory_space<vmem>>, vector<1x4096xf32>
    %15 = vector.broadcast %14 : vector<1x4096xf32> to vector<8x4096xf32>
    %16 = arith.mulf %13, %15 : vector<8x4096xf32>
    %17 = arith.truncf %16 : vector<8x4096xf32> to vector<8x4096xbf16>
    %c8 = arith.constant 8 : index
    %c0_10 = arith.constant 0 : index
    %18 = vector.load %arg14[%c8, %c0_10] : memref<72x4096xbf16, #tpu.memory_space<vmem>>, vector<8x4096xbf16>
    tpu.vector_store %arg14[%c8, %c0_10], %17 {strides = array<i32>} : memref<72x4096xbf16, #tpu.memory_space<vmem>>, vector<8x4096xbf16>,
    %c7_i32 = arith.constant 7 : i32
    %19 = tpu.dynamic_rotate %6 by %c7_i32 dim 1 : vector<8x4096xf32>, i32 -> vector<8x4096xf32>
    %c2 = arith.constant 2 : index
    %c0_11 = arith.constant 0 : index
    %20 = vector.load %arg2[%c2, %c0_11] : memref<9x4096xf32, #tpu.memory_space<vmem>>, vector<1x4096xf32>
    %21 = vector.broadcast %20 : vector<1x4096xf32> to vector<8x4096xf32>
    %22 = arith.mulf %19, %21 : vector<8x4096xf32>
    %23 = arith.truncf %22 : vector<8x4096xf32> to vector<8x4096xbf16>
    %c16 = arith.constant 16 : index
    %c0_12 = arith.constant 0 : index
    %24 = vector.load %arg14[%c16, %c0_12] : memref<72x4096xbf16, #tpu.memory_space<vmem>>, vector<8x4096xbf16>
    tpu.vector_store %arg14[%c16, %c0_12], %23 {strides = array<i32>} : memref<72x4096xbf16, #tpu.memory_space<vmem>>, vector<8x4096xbf16>,
    %c1_i32 = arith.constant 1 : i32
    %25 = tpu.dynamic_rotate %6 by %c1_i32 dim 1 : vector<8x4096xf32>, i32 -> vector<8x4096xf32>
    %c3 = arith.constant 3 : index
    %c0_13 = arith.constant 0 : index
    %26 = vector.load %arg2[%c3, %c0_13] : memref<9x4096xf32, #tpu.memory_space<vmem>>, vector<1x4096xf32>
    %27 = vector.broadcast %26 : vector<1x4096xf32> to vector<8x4096xf32>
    %28 = arith.mulf %25, %27 : vector<8x4096xf32>
    %29 = arith.truncf %28 : vector<8x4096xf32> to vector<8x4096xbf16>
    %c24 = arith.constant 24 : index
    %c0_14 = arith.constant 0 : index
    %30 = vector.load %arg14[%c24, %c0_14] : memref<72x4096xbf16, #tpu.memory_space<vmem>>, vector<8x4096xbf16>
    tpu.vector_store %arg14[%c24, %c0_14], %29 {strides = array<i32>} : memref<72x4096xbf16, #tpu.memory_space<vmem>>, vector<8x4096xbf16>,
    %c4 = arith.constant 4 : index
    %c0_15 = arith.constant 0 : index
    %31 = vector.load %arg2[%c4, %c0_15] : memref<9x4096xf32, #tpu.memory_space<vmem>>, vector<1x4096xf32>
    %32 = vector.broadcast %31 : vector<1x4096xf32> to vector<8x4096xf32>
    %33 = arith.mulf %6, %32 : vector<8x4096xf32>
    %34 = arith.truncf %33 : vector<8x4096xf32> to vector<8x4096xbf16>
    %c32 = arith.constant 32 : index
    %c0_16 = arith.constant 0 : index
    %35 = vector.load %arg14[%c32, %c0_16] : memref<72x4096xbf16, #tpu.memory_space<vmem>>, vector<8x4096xbf16>
    tpu.vector_store %arg14[%c32, %c0_16], %34 {strides = array<i32>} : memref<72x4096xbf16, #tpu.memory_space<vmem>>, vector<8x4096xbf16>,
    %c4095_i32 = arith.constant 4095 : i32
    %36 = tpu.dynamic_rotate %6 by %c4095_i32 dim 1 : vector<8x4096xf32>, i32 -> vector<8x4096xf32>
    %c5 = arith.constant 5 : index
    %c0_17 = arith.constant 0 : index
    %37 = vector.load %arg2[%c5, %c0_17] : memref<9x4096xf32, #tpu.memory_space<vmem>>, vector<1x4096xf32>
    %38 = vector.broadcast %37 : vector<1x4096xf32> to vector<8x4096xf32>
    %39 = arith.mulf %36, %38 : vector<8x4096xf32>
    %40 = arith.truncf %39 : vector<8x4096xf32> to vector<8x4096xbf16>
    %c40 = arith.constant 40 : index
    %c0_18 = arith.constant 0 : index
    %41 = vector.load %arg14[%c40, %c0_18] : memref<72x4096xbf16, #tpu.memory_space<vmem>>, vector<8x4096xbf16>
    tpu.vector_store %arg14[%c40, %c0_18], %40 {strides = array<i32>} : memref<72x4096xbf16, #tpu.memory_space<vmem>>, vector<8x4096xbf16>,
    %c4089_i32 = arith.constant 4089 : i32
    %42 = tpu.dynamic_rotate %6 by %c4089_i32 dim 1 : vector<8x4096xf32>, i32 -> vector<8x4096xf32>
    %c6 = arith.constant 6 : index
    %c0_19 = arith.constant 0 : index
    %43 = vector.load %arg2[%c6, %c0_19] : memref<9x4096xf32, #tpu.memory_space<vmem>>, vector<1x4096xf32>
    %44 = vector.broadcast %43 : vector<1x4096xf32> to vector<8x4096xf32>
    %45 = arith.mulf %42, %44 : vector<8x4096xf32>
    %46 = arith.truncf %45 : vector<8x4096xf32> to vector<8x4096xbf16>
    %c48 = arith.constant 48 : index
    %c0_20 = arith.constant 0 : index
    %47 = vector.load %arg14[%c48, %c0_20] : memref<72x4096xbf16, #tpu.memory_space<vmem>>, vector<8x4096xbf16>
    tpu.vector_store %arg14[%c48, %c0_20], %46 {strides = array<i32>} : memref<72x4096xbf16, #tpu.memory_space<vmem>>, vector<8x4096xbf16>,
    %c4088_i32 = arith.constant 4088 : i32
    %48 = tpu.dynamic_rotate %6 by %c4088_i32 dim 1 : vector<8x4096xf32>, i32 -> vector<8x4096xf32>
    %c7 = arith.constant 7 : index
    %c0_21 = arith.constant 0 : index
    %49 = vector.load %arg2[%c7, %c0_21] : memref<9x4096xf32, #tpu.memory_space<vmem>>, vector<1x4096xf32>
    %50 = vector.broadcast %49 : vector<1x4096xf32> to vector<8x4096xf32>
    %51 = arith.mulf %48, %50 : vector<8x4096xf32>
    %52 = arith.truncf %51 : vector<8x4096xf32> to vector<8x4096xbf16>
    %c56 = arith.constant 56 : index
    %c0_22 = arith.constant 0 : index
    %53 = vector.load %arg14[%c56, %c0_22] : memref<72x4096xbf16, #tpu.memory_space<vmem>>, vector<8x4096xbf16>
    tpu.vector_store %arg14[%c56, %c0_22], %52 {strides = array<i32>} : memref<72x4096xbf16, #tpu.memory_space<vmem>>, vector<8x4096xbf16>,
    %c4087_i32 = arith.constant 4087 : i32
    %54 = tpu.dynamic_rotate %6 by %c4087_i32 dim 1 : vector<8x4096xf32>, i32 -> vector<8x4096xf32>
    %c8_23 = arith.constant 8 : index
    %c0_24 = arith.constant 0 : index
    %55 = vector.load %arg2[%c8_23, %c0_24] : memref<9x4096xf32, #tpu.memory_space<vmem>>, vector<1x4096xf32>
    %56 = vector.broadcast %55 : vector<1x4096xf32> to vector<8x4096xf32>
    %57 = arith.mulf %54, %56 : vector<8x4096xf32>
    %58 = arith.truncf %57 : vector<8x4096xf32> to vector<8x4096xbf16>
    %c64 = arith.constant 64 : index
    %c0_25 = arith.constant 0 : index
    %59 = vector.load %arg14[%c64, %c0_25] : memref<72x4096xbf16, #tpu.memory_space<vmem>>, vector<8x4096xbf16>
    tpu.vector_store %arg14[%c64, %c0_25], %58 {strides = array<i32>} : memref<72x4096xbf16, #tpu.memory_space<vmem>>, vector<8x4096xbf16>,
    %c0_26 = arith.constant 0 : index
    %c0_27 = arith.constant 0 : index
    %60 = vector.load %arg5[%c0_26, %c0_27] : memref<8x72xbf16, #tpu.memory_space<vmem>>, vector<8x72xbf16>
    %c0_28 = arith.constant 0 : index
    %c0_29 = arith.constant 0 : index
    %61 = vector.load %arg14[%c0_28, %c0_29] : memref<72x4096xbf16, #tpu.memory_space<vmem>>, vector<72x4096xbf16>
    %cst = arith.constant dense<0.000000e+00> : vector<8x4096xf32>
    %62 = tpu.matmul %60, %61, %cst {dimension_numbers = #tpu.dot_dimension_numbers<[1], [0], [0], [1], [0, 0, 1, 1], [], []>} : vector<8x72xbf16>, vector<72x4096xbf16>, vector<8x4096xf32> -> vector<8x4096xf32>
    %c0_30 = arith.constant 0 : index
    %c0_31 = arith.constant 0 : index
    %63 = vector.load %arg6[%c0_30, %c0_31] : memref<8x1xf32, #tpu.memory_space<vmem>>, vector<8x1xf32>
    %64 = vector.broadcast %63 : vector<8x1xf32> to vector<8x4096xf32>
    %65 = arith.addf %62, %64 : vector<8x4096xf32>
    %cst_32 = arith.constant 0.000000e+00 : f32
    %66 = vector.broadcast %cst_32 : f32 to vector<8x4096xf32>
    %67 = arith.maximumf %65, %66 : vector<8x4096xf32>
    %c9_i32_33 = arith.constant 9 : i32
    %68 = tpu.dynamic_rotate %67 by %c9_i32_33 dim 1 : vector<8x4096xf32>, i32 -> vector<8x4096xf32>
    %c0_34 = arith.constant 0 : index
    %c0_35 = arith.constant 0 : index
    %69 = vector.load %arg2[%c0_34, %c0_35] : memref<9x4096xf32, #tpu.memory_space<vmem>>, vector<1x4096xf32>
    %70 = vector.broadcast %69 : vector<1x4096xf32> to vector<8x4096xf32>
    %71 = arith.mulf %68, %70 : vector<8x4096xf32>
    %72 = arith.truncf %71 : vector<8x4096xf32> to vector<8x4096xbf16>
    %c0_36 = arith.constant 0 : index
    %c0_37 = arith.constant 0 : index
    %73 = vector.load %arg14[%c0_36, %c0_37] : memref<72x4096xbf16, #tpu.memory_space<vmem>>, vector<8x4096xbf16>
    tpu.vector_store %arg14[%c0_36, %c0_37], %72 {strides = array<i32>} : memref<72x4096xbf16, #tpu.memory_space<vmem>>, vector<8x4096xbf16>,
    %c8_i32_38 = arith.constant 8 : i32
    %74 = tpu.dynamic_rotate %67 by %c8_i32_38 dim 1 : vector<8x4096xf32>, i32 -> vector<8x4096xf32>
    %c1_39 = arith.constant 1 : index
    %c0_40 = arith.constant 0 : index
    %75 = vector.load %arg2[%c1_39, %c0_40] : memref<9x4096xf32, #tpu.memory_space<vmem>>, vector<1x4096xf32>
    %76 = vector.broadcast %75 : vector<1x4096xf32> to vector<8x4096xf32>
    %77 = arith.mulf %74, %76 : vector<8x4096xf32>
    %78 = arith.truncf %77 : vector<8x4096xf32> to vector<8x4096xbf16>
    %c8_41 = arith.constant 8 : index
    %c0_42 = arith.constant 0 : index
    %79 = vector.load %arg14[%c8_41, %c0_42] : memref<72x4096xbf16, #tpu.memory_space<vmem>>, vector<8x4096xbf16>
    tpu.vector_store %arg14[%c8_41, %c0_42], %78 {strides = array<i32>} : memref<72x4096xbf16, #tpu.memory_space<vmem>>, vector<8x4096xbf16>,
    %c7_i32_43 = arith.constant 7 : i32
    %80 = tpu.dynamic_rotate %67 by %c7_i32_43 dim 1 : vector<8x4096xf32>, i32 -> vector<8x4096xf32>
    %c2_44 = arith.constant 2 : index
    %c0_45 = arith.constant 0 : index
    %81 = vector.load %arg2[%c2_44, %c0_45] : memref<9x4096xf32, #tpu.memory_space<vmem>>, vector<1x4096xf32>
    %82 = vector.broadcast %81 : vector<1x4096xf32> to vector<8x4096xf32>
    %83 = arith.mulf %80, %82 : vector<8x4096xf32>
    %84 = arith.truncf %83 : vector<8x4096xf32> to vector<8x4096xbf16>
    %c16_46 = arith.constant 16 : index
    %c0_47 = arith.constant 0 : index
    %85 = vector.load %arg14[%c16_46, %c0_47] : memref<72x4096xbf16, #tpu.memory_space<vmem>>, vector<8x4096xbf16>
    tpu.vector_store %arg14[%c16_46, %c0_47], %84 {strides = array<i32>} : memref<72x4096xbf16, #tpu.memory_space<vmem>>, vector<8x4096xbf16>,
    %c1_i32_48 = arith.constant 1 : i32
    %86 = tpu.dynamic_rotate %67 by %c1_i32_48 dim 1 : vector<8x4096xf32>, i32 -> vector<8x4096xf32>
    %c3_49 = arith.constant 3 : index
    %c0_50 = arith.constant 0 : index
    %87 = vector.load %arg2[%c3_49, %c0_50] : memref<9x4096xf32, #tpu.memory_space<vmem>>, vector<1x4096xf32>
    %88 = vector.broadcast %87 : vector<1x4096xf32> to vector<8x4096xf32>
    %89 = arith.mulf %86, %88 : vector<8x4096xf32>
    %90 = arith.truncf %89 : vector<8x4096xf32> to vector<8x4096xbf16>
    %c24_51 = arith.constant 24 : index
    %c0_52 = arith.constant 0 : index
    %91 = vector.load %arg14[%c24_51, %c0_52] : memref<72x4096xbf16, #tpu.memory_space<vmem>>, vector<8x4096xbf16>
    tpu.vector_store %arg14[%c24_51, %c0_52], %90 {strides = array<i32>} : memref<72x4096xbf16, #tpu.memory_space<vmem>>, vector<8x4096xbf16>,
    %c4_53 = arith.constant 4 : index
    %c0_54 = arith.constant 0 : index
    %92 = vector.load %arg2[%c4_53, %c0_54] : memref<9x4096xf32, #tpu.memory_space<vmem>>, vector<1x4096xf32>
    %93 = vector.broadcast %92 : vector<1x4096xf32> to vector<8x4096xf32>
    %94 = arith.mulf %67, %93 : vector<8x4096xf32>
    %95 = arith.truncf %94 : vector<8x4096xf32> to vector<8x4096xbf16>
    %c32_55 = arith.constant 32 : index
    %c0_56 = arith.constant 0 : index
    %96 = vector.load %arg14[%c32_55, %c0_56] : memref<72x4096xbf16, #tpu.memory_space<vmem>>, vector<8x4096xbf16>
    tpu.vector_store %arg14[%c32_55, %c0_56], %95 {strides = array<i32>} : memref<72x4096xbf16, #tpu.memory_space<vmem>>, vector<8x4096xbf16>,
    %c4095_i32_57 = arith.constant 4095 : i32
    %97 = tpu.dynamic_rotate %67 by %c4095_i32_57 dim 1 : vector<8x4096xf32>, i32 -> vector<8x4096xf32>
    %c5_58 = arith.constant 5 : index
    %c0_59 = arith.constant 0 : index
    %98 = vector.load %arg2[%c5_58, %c0_59] : memref<9x4096xf32, #tpu.memory_space<vmem>>, vector<1x4096xf32>
    %99 = vector.broadcast %98 : vector<1x4096xf32> to vector<8x4096xf32>
    %100 = arith.mulf %97, %99 : vector<8x4096xf32>
    %101 = arith.truncf %100 : vector<8x4096xf32> to vector<8x4096xbf16>
    %c40_60 = arith.constant 40 : index
    %c0_61 = arith.constant 0 : index
    %102 = vector.load %arg14[%c40_60, %c0_61] : memref<72x4096xbf16, #tpu.memory_space<vmem>>, vector<8x4096xbf16>
    tpu.vector_store %arg14[%c40_60, %c0_61], %101 {strides = array<i32>} : memref<72x4096xbf16, #tpu.memory_space<vmem>>, vector<8x4096xbf16>,
    %c4089_i32_62 = arith.constant 4089 : i32
    %103 = tpu.dynamic_rotate %67 by %c4089_i32_62 dim 1 : vector<8x4096xf32>, i32 -> vector<8x4096xf32>
    %c6_63 = arith.constant 6 : index
    %c0_64 = arith.constant 0 : index
    %104 = vector.load %arg2[%c6_63, %c0_64] : memref<9x4096xf32, #tpu.memory_space<vmem>>, vector<1x4096xf32>
    %105 = vector.broadcast %104 : vector<1x4096xf32> to vector<8x4096xf32>
    %106 = arith.mulf %103, %105 : vector<8x4096xf32>
    %107 = arith.truncf %106 : vector<8x4096xf32> to vector<8x4096xbf16>
    %c48_65 = arith.constant 48 : index
    %c0_66 = arith.constant 0 : index
    %108 = vector.load %arg14[%c48_65, %c0_66] : memref<72x4096xbf16, #tpu.memory_space<vmem>>, vector<8x4096xbf16>
    tpu.vector_store %arg14[%c48_65, %c0_66], %107 {strides = array<i32>} : memref<72x4096xbf16, #tpu.memory_space<vmem>>, vector<8x4096xbf16>,
    %c4088_i32_67 = arith.constant 4088 : i32
    %109 = tpu.dynamic_rotate %67 by %c4088_i32_67 dim 1 : vector<8x4096xf32>, i32 -> vector<8x4096xf32>
    %c7_68 = arith.constant 7 : index
    %c0_69 = arith.constant 0 : index
    %110 = vector.load %arg2[%c7_68, %c0_69] : memref<9x4096xf32, #tpu.memory_space<vmem>>, vector<1x4096xf32>
    %111 = vector.broadcast %110 : vector<1x4096xf32> to vector<8x4096xf32>
    %112 = arith.mulf %109, %111 : vector<8x4096xf32>
    %113 = arith.truncf %112 : vector<8x4096xf32> to vector<8x4096xbf16>
    %c56_70 = arith.constant 56 : index
    %c0_71 = arith.constant 0 : index
    %114 = vector.load %arg14[%c56_70, %c0_71] : memref<72x4096xbf16, #tpu.memory_space<vmem>>, vector<8x4096xbf16>
    tpu.vector_store %arg14[%c56_70, %c0_71], %113 {strides = array<i32>} : memref<72x4096xbf16, #tpu.memory_space<vmem>>, vector<8x4096xbf16>,
    %c4087_i32_72 = arith.constant 4087 : i32
    %115 = tpu.dynamic_rotate %67 by %c4087_i32_72 dim 1 : vector<8x4096xf32>, i32 -> vector<8x4096xf32>
    %c8_73 = arith.constant 8 : index
    %c0_74 = arith.constant 0 : index
    %116 = vector.load %arg2[%c8_73, %c0_74] : memref<9x4096xf32, #tpu.memory_space<vmem>>, vector<1x4096xf32>
    %117 = vector.broadcast %116 : vector<1x4096xf32> to vector<8x4096xf32>
    %118 = arith.mulf %115, %117 : vector<8x4096xf32>
    %119 = arith.truncf %118 : vector<8x4096xf32> to vector<8x4096xbf16>
    %c64_75 = arith.constant 64 : index
    %c0_76 = arith.constant 0 : index
    %120 = vector.load %arg14[%c64_75, %c0_76] : memref<72x4096xbf16, #tpu.memory_space<vmem>>, vector<8x4096xbf16>
    tpu.vector_store %arg14[%c64_75, %c0_76], %119 {strides = array<i32>} : memref<72x4096xbf16, #tpu.memory_space<vmem>>, vector<8x4096xbf16>,
    %c0_77 = arith.constant 0 : index
    %c0_78 = arith.constant 0 : index
    %121 = vector.load %arg7[%c0_77, %c0_78] : memref<8x72xbf16, #tpu.memory_space<vmem>>, vector<8x72xbf16>
    %c0_79 = arith.constant 0 : index
    %c0_80 = arith.constant 0 : index
    %122 = vector.load %arg14[%c0_79, %c0_80] : memref<72x4096xbf16, #tpu.memory_space<vmem>>, vector<72x4096xbf16>
    %cst_81 = arith.constant dense<0.000000e+00> : vector<8x4096xf32>
    %123 = tpu.matmul %121, %122, %cst_81 {dimension_numbers = #tpu.dot_dimension_numbers<[1], [0], [0], [1], [0, 0, 1, 1], [], []>} : vector<8x72xbf16>, vector<72x4096xbf16>, vector<8x4096xf32> -> vector<8x4096xf32>
    %c0_82 = arith.constant 0 : index
    %c0_83 = arith.constant 0 : index
    %124 = vector.load %arg8[%c0_82, %c0_83] : memref<8x1xf32, #tpu.memory_space<vmem>>, vector<8x1xf32>
    %125 = vector.broadcast %124 : vector<8x1xf32> to vector<8x4096xf32>
    %126 = arith.addf %123, %125 : vector<8x4096xf32>
    %cst_84 = arith.constant 0.000000e+00 : f32
    %127 = vector.broadcast %cst_84 : f32 to vector<8x4096xf32>
    %128 = arith.maximumf %126, %127 : vector<8x4096xf32>
    %c9_i32_85 = arith.constant 9 : i32
    %129 = tpu.dynamic_rotate %128 by %c9_i32_85 dim 1 : vector<8x4096xf32>, i32 -> vector<8x4096xf32>
    %c0_86 = arith.constant 0 : index
    %c0_87 = arith.constant 0 : index
    %130 = vector.load %arg2[%c0_86, %c0_87] : memref<9x4096xf32, #tpu.memory_space<vmem>>, vector<1x4096xf32>
    %131 = vector.broadcast %130 : vector<1x4096xf32> to vector<8x4096xf32>
    %132 = arith.mulf %129, %131 : vector<8x4096xf32>
    %133 = arith.truncf %132 : vector<8x4096xf32> to vector<8x4096xbf16>
    %c0_88 = arith.constant 0 : index
    %c0_89 = arith.constant 0 : index
    %134 = vector.load %arg14[%c0_88, %c0_89] : memref<72x4096xbf16, #tpu.memory_space<vmem>>, vector<8x4096xbf16>
    tpu.vector_store %arg14[%c0_88, %c0_89], %133 {strides = array<i32>} : memref<72x4096xbf16, #tpu.memory_space<vmem>>, vector<8x4096xbf16>,
    %c8_i32_90 = arith.constant 8 : i32
    %135 = tpu.dynamic_rotate %128 by %c8_i32_90 dim 1 : vector<8x4096xf32>, i32 -> vector<8x4096xf32>
    %c1_91 = arith.constant 1 : index
    %c0_92 = arith.constant 0 : index
    %136 = vector.load %arg2[%c1_91, %c0_92] : memref<9x4096xf32, #tpu.memory_space<vmem>>, vector<1x4096xf32>
    %137 = vector.broadcast %136 : vector<1x4096xf32> to vector<8x4096xf32>
    %138 = arith.mulf %135, %137 : vector<8x4096xf32>
    %139 = arith.truncf %138 : vector<8x4096xf32> to vector<8x4096xbf16>
    %c8_93 = arith.constant 8 : index
    %c0_94 = arith.constant 0 : index
    %140 = vector.load %arg14[%c8_93, %c0_94] : memref<72x4096xbf16, #tpu.memory_space<vmem>>, vector<8x4096xbf16>
    tpu.vector_store %arg14[%c8_93, %c0_94], %139 {strides = array<i32>} : memref<72x4096xbf16, #tpu.memory_space<vmem>>, vector<8x4096xbf16>,
    %c7_i32_95 = arith.constant 7 : i32
    %141 = tpu.dynamic_rotate %128 by %c7_i32_95 dim 1 : vector<8x4096xf32>, i32 -> vector<8x4096xf32>
    %c2_96 = arith.constant 2 : index
    %c0_97 = arith.constant 0 : index
    %142 = vector.load %arg2[%c2_96, %c0_97] : memref<9x4096xf32, #tpu.memory_space<vmem>>, vector<1x4096xf32>
    %143 = vector.broadcast %142 : vector<1x4096xf32> to vector<8x4096xf32>
    %144 = arith.mulf %141, %143 : vector<8x4096xf32>
    %145 = arith.truncf %144 : vector<8x4096xf32> to vector<8x4096xbf16>
    %c16_98 = arith.constant 16 : index
    %c0_99 = arith.constant 0 : index
    %146 = vector.load %arg14[%c16_98, %c0_99] : memref<72x4096xbf16, #tpu.memory_space<vmem>>, vector<8x4096xbf16>
    tpu.vector_store %arg14[%c16_98, %c0_99], %145 {strides = array<i32>} : memref<72x4096xbf16, #tpu.memory_space<vmem>>, vector<8x4096xbf16>,
    %c1_i32_100 = arith.constant 1 : i32
    %147 = tpu.dynamic_rotate %128 by %c1_i32_100 dim 1 : vector<8x4096xf32>, i32 -> vector<8x4096xf32>
    %c3_101 = arith.constant 3 : index
    %c0_102 = arith.constant 0 : index
    %148 = vector.load %arg2[%c3_101, %c0_102] : memref<9x4096xf32, #tpu.memory_space<vmem>>, vector<1x4096xf32>
    %149 = vector.broadcast %148 : vector<1x4096xf32> to vector<8x4096xf32>
    %150 = arith.mulf %147, %149 : vector<8x4096xf32>
    %151 = arith.truncf %150 : vector<8x4096xf32> to vector<8x4096xbf16>
    %c24_103 = arith.constant 24 : index
    %c0_104 = arith.constant 0 : index
    %152 = vector.load %arg14[%c24_103, %c0_104] : memref<72x4096xbf16, #tpu.memory_space<vmem>>, vector<8x4096xbf16>
    tpu.vector_store %arg14[%c24_103, %c0_104], %151 {strides = array<i32>} : memref<72x4096xbf16, #tpu.memory_space<vmem>>, vector<8x4096xbf16>,
    %c4_105 = arith.constant 4 : index
    %c0_106 = arith.constant 0 : index
    %153 = vector.load %arg2[%c4_105, %c0_106] : memref<9x4096xf32, #tpu.memory_space<vmem>>, vector<1x4096xf32>
    %154 = vector.broadcast %153 : vector<1x4096xf32> to vector<8x4096xf32>
    %155 = arith.mulf %128, %154 : vector<8x4096xf32>
    %156 = arith.truncf %155 : vector<8x4096xf32> to vector<8x4096xbf16>
    %c32_107 = arith.constant 32 : index
    %c0_108 = arith.constant 0 : index
    %157 = vector.load %arg14[%c32_107, %c0_108] : memref<72x4096xbf16, #tpu.memory_space<vmem>>, vector<8x4096xbf16>
    tpu.vector_store %arg14[%c32_107, %c0_108], %156 {strides = array<i32>} : memref<72x4096xbf16, #tpu.memory_space<vmem>>, vector<8x4096xbf16>,
    %c4095_i32_109 = arith.constant 4095 : i32
    %158 = tpu.dynamic_rotate %128 by %c4095_i32_109 dim 1 : vector<8x4096xf32>, i32 -> vector<8x4096xf32>
    %c5_110 = arith.constant 5 : index
    %c0_111 = arith.constant 0 : index
    %159 = vector.load %arg2[%c5_110, %c0_111] : memref<9x4096xf32, #tpu.memory_space<vmem>>, vector<1x4096xf32>
    %160 = vector.broadcast %159 : vector<1x4096xf32> to vector<8x4096xf32>
    %161 = arith.mulf %158, %160 : vector<8x4096xf32>
    %162 = arith.truncf %161 : vector<8x4096xf32> to vector<8x4096xbf16>
    %c40_112 = arith.constant 40 : index
    %c0_113 = arith.constant 0 : index
    %163 = vector.load %arg14[%c40_112, %c0_113] : memref<72x4096xbf16, #tpu.memory_space<vmem>>, vector<8x4096xbf16>
    tpu.vector_store %arg14[%c40_112, %c0_113], %162 {strides = array<i32>} : memref<72x4096xbf16, #tpu.memory_space<vmem>>, vector<8x4096xbf16>,
    %c4089_i32_114 = arith.constant 4089 : i32
    %164 = tpu.dynamic_rotate %128 by %c4089_i32_114 dim 1 : vector<8x4096xf32>, i32 -> vector<8x4096xf32>
    %c6_115 = arith.constant 6 : index
    %c0_116 = arith.constant 0 : index
    %165 = vector.load %arg2[%c6_115, %c0_116] : memref<9x4096xf32, #tpu.memory_space<vmem>>, vector<1x4096xf32>
    %166 = vector.broadcast %165 : vector<1x4096xf32> to vector<8x4096xf32>
    %167 = arith.mulf %164, %166 : vector<8x4096xf32>
    %168 = arith.truncf %167 : vector<8x4096xf32> to vector<8x4096xbf16>
    %c48_117 = arith.constant 48 : index
    %c0_118 = arith.constant 0 : index
    %169 = vector.load %arg14[%c48_117, %c0_118] : memref<72x4096xbf16, #tpu.memory_space<vmem>>, vector<8x4096xbf16>
    tpu.vector_store %arg14[%c48_117, %c0_118], %168 {strides = array<i32>} : memref<72x4096xbf16, #tpu.memory_space<vmem>>, vector<8x4096xbf16>,
    %c4088_i32_119 = arith.constant 4088 : i32
    %170 = tpu.dynamic_rotate %128 by %c4088_i32_119 dim 1 : vector<8x4096xf32>, i32 -> vector<8x4096xf32>
    %c7_120 = arith.constant 7 : index
    %c0_121 = arith.constant 0 : index
    %171 = vector.load %arg2[%c7_120, %c0_121] : memref<9x4096xf32, #tpu.memory_space<vmem>>, vector<1x4096xf32>
    %172 = vector.broadcast %171 : vector<1x4096xf32> to vector<8x4096xf32>
    %173 = arith.mulf %170, %172 : vector<8x4096xf32>
    %174 = arith.truncf %173 : vector<8x4096xf32> to vector<8x4096xbf16>
    %c56_122 = arith.constant 56 : index
    %c0_123 = arith.constant 0 : index
    %175 = vector.load %arg14[%c56_122, %c0_123] : memref<72x4096xbf16, #tpu.memory_space<vmem>>, vector<8x4096xbf16>
    tpu.vector_store %arg14[%c56_122, %c0_123], %174 {strides = array<i32>} : memref<72x4096xbf16, #tpu.memory_space<vmem>>, vector<8x4096xbf16>,
    %c4087_i32_124 = arith.constant 4087 : i32
    %176 = tpu.dynamic_rotate %128 by %c4087_i32_124 dim 1 : vector<8x4096xf32>, i32 -> vector<8x4096xf32>
    %c8_125 = arith.constant 8 : index
    %c0_126 = arith.constant 0 : index
    %177 = vector.load %arg2[%c8_125, %c0_126] : memref<9x4096xf32, #tpu.memory_space<vmem>>, vector<1x4096xf32>
    %178 = vector.broadcast %177 : vector<1x4096xf32> to vector<8x4096xf32>
    %179 = arith.mulf %176, %178 : vector<8x4096xf32>
    %180 = arith.truncf %179 : vector<8x4096xf32> to vector<8x4096xbf16>
    %c64_127 = arith.constant 64 : index
    %c0_128 = arith.constant 0 : index
    %181 = vector.load %arg14[%c64_127, %c0_128] : memref<72x4096xbf16, #tpu.memory_space<vmem>>, vector<8x4096xbf16>
    tpu.vector_store %arg14[%c64_127, %c0_128], %180 {strides = array<i32>} : memref<72x4096xbf16, #tpu.memory_space<vmem>>, vector<8x4096xbf16>,
    %c0_129 = arith.constant 0 : index
    %c0_130 = arith.constant 0 : index
    %182 = vector.load %arg9[%c0_129, %c0_130] : memref<8x72xbf16, #tpu.memory_space<vmem>>, vector<8x72xbf16>
    %c0_131 = arith.constant 0 : index
    %c0_132 = arith.constant 0 : index
    %183 = vector.load %arg14[%c0_131, %c0_132] : memref<72x4096xbf16, #tpu.memory_space<vmem>>, vector<72x4096xbf16>
    %cst_133 = arith.constant dense<0.000000e+00> : vector<8x4096xf32>
    %184 = tpu.matmul %182, %183, %cst_133 {dimension_numbers = #tpu.dot_dimension_numbers<[1], [0], [0], [1], [0, 0, 1, 1], [], []>} : vector<8x72xbf16>, vector<72x4096xbf16>, vector<8x4096xf32> -> vector<8x4096xf32>
    %c0_134 = arith.constant 0 : index
    %c0_135 = arith.constant 0 : index
    %185 = vector.load %arg10[%c0_134, %c0_135] : memref<8x1xf32, #tpu.memory_space<vmem>>, vector<8x1xf32>
    %186 = vector.broadcast %185 : vector<8x1xf32> to vector<8x4096xf32>
    %187 = arith.addf %184, %186 : vector<8x4096xf32>
    %188 = arith.addf %187, %67 : vector<8x4096xf32>
    %cst_136 = arith.constant 0.000000e+00 : f32
    %189 = vector.broadcast %cst_136 : f32 to vector<8x4096xf32>
    %190 = arith.maximumf %188, %189 : vector<8x4096xf32>
    %191 = vector.shape_cast %190 : vector<8x4096xf32> to vector<8x32x128xf32>
    %cst_137 = arith.constant dense<0.000000e+00> : vector<8x32xf32>
    %192 = vector.multi_reduction <add>, %191, %cst_137 [2] : vector<8x32x128xf32> to vector<8x32xf32>
    %cst_138 = arith.constant 7.812500e-03 : f32
    %193 = vector.broadcast %cst_138 : f32 to vector<8x32xf32>
    %194 = arith.mulf %192, %193 : vector<8x32xf32>
    %195 = arith.truncf %194 : vector<8x32xf32> to vector<8x32xbf16>
    %c0_139 = arith.constant 0 : index
    %c0_140 = arith.constant 0 : index
    %196 = vector.load %arg11[%c0_139, %c0_140] : memref<8x128xbf16, #tpu.memory_space<vmem>>, vector<8x128xbf16>
    %cst_141 = arith.constant dense<0.000000e+00> : vector<32x128xf32>
    %197 = tpu.matmul %195, %196, %cst_141 {dimension_numbers = #tpu.dot_dimension_numbers<[0], [0], [1], [1], [0, 1, 1, 1], [], []>} : vector<8x32xbf16>, vector<8x128xbf16>, vector<32x128xf32> -> vector<32x128xf32>
    %c0_142 = arith.constant 0 : index
    %c0_143 = arith.constant 0 : index
    %198 = vector.load %arg12[%c0_142, %c0_143] : memref<1x128xf32, #tpu.memory_space<vmem>>, vector<1x128xf32>
    %199 = vector.broadcast %198 : vector<1x128xf32> to vector<32x128xf32>
    %200 = arith.addf %197, %199 : vector<32x128xf32>
    %c0_144 = arith.constant 0 : index
    %c0_145 = arith.constant 0 : index
    %201 = vector.load %arg13[%c0_144, %c0_145] : memref<32x128xf32, #tpu.memory_space<vmem>>, vector<32x128xf32>
    tpu.vector_store %arg13[%c0_144, %c0_145], %200 {strides = array<i32>} : memref<32x128xf32, #tpu.memory_space<vmem>>, vector<32x128xf32>,
    return
  }
  func.func @transform_0(%arg0: i32) -> (i32, i32) {
    %c0_i32 = arith.constant 0 : i32
    %c0_i32_0 = arith.constant 0 : i32
    return %c0_i32, %arg0 : i32, i32
  }
  func.func @transform_1(%arg0: i32) -> (i32, i32) {
    %c0_i32 = arith.constant 0 : i32
    %c0_i32_0 = arith.constant 0 : i32
    %c0_i32_1 = arith.constant 0 : i32
    return %c0_i32, %c0_i32_0 : i32, i32
  }
  func.func @transform_2(%arg0: i32) -> (i32, i32) {
    %c0_i32 = arith.constant 0 : i32
    %c0_i32_0 = arith.constant 0 : i32
    %c0_i32_1 = arith.constant 0 : i32
    return %c0_i32, %c0_i32_0 : i32, i32
  }
  func.func @transform_3(%arg0: i32) -> (i32, i32) {
    %c0_i32 = arith.constant 0 : i32
    %c0_i32_0 = arith.constant 0 : i32
    %c0_i32_1 = arith.constant 0 : i32
    return %c0_i32, %c0_i32_0 : i32, i32
  }
  func.func @transform_4(%arg0: i32) -> (i32, i32) {
    %c0_i32 = arith.constant 0 : i32
    %c0_i32_0 = arith.constant 0 : i32
    %c0_i32_1 = arith.constant 0 : i32
    return %c0_i32, %c0_i32_0 : i32, i32
  }
  func.func @transform_5(%arg0: i32) -> (i32, i32) {
    %c0_i32 = arith.constant 0 : i32
    %c0_i32_0 = arith.constant 0 : i32
    %c0_i32_1 = arith.constant 0 : i32
    return %c0_i32, %c0_i32_0 : i32, i32
  }
  func.func @transform_6(%arg0: i32) -> (i32, i32) {
    %c0_i32 = arith.constant 0 : i32
    %c0_i32_0 = arith.constant 0 : i32
    %c0_i32_1 = arith.constant 0 : i32
    return %c0_i32, %c0_i32_0 : i32, i32
  }
  func.func @transform_7(%arg0: i32) -> (i32, i32) {
    %c0_i32 = arith.constant 0 : i32
    %c0_i32_0 = arith.constant 0 : i32
    %c0_i32_1 = arith.constant 0 : i32
    return %c0_i32, %c0_i32_0 : i32, i32
  }
  func.func @transform_8(%arg0: i32) -> (i32, i32) {
    %c0_i32 = arith.constant 0 : i32
    %c0_i32_0 = arith.constant 0 : i32
    %c0_i32_1 = arith.constant 0 : i32
    return %c0_i32, %c0_i32_0 : i32, i32
  }
  func.func @transform_9(%arg0: i32) -> (i32, i32) {
    %c0_i32 = arith.constant 0 : i32
    %c0_i32_0 = arith.constant 0 : i32
    %c0_i32_1 = arith.constant 0 : i32
    return %c0_i32, %c0_i32_0 : i32, i32
  }
  func.func @transform_10(%arg0: i32) -> (i32, i32) {
    %c0_i32 = arith.constant 0 : i32
    %c0_i32_0 = arith.constant 0 : i32
    %c0_i32_1 = arith.constant 0 : i32
    return %c0_i32, %c0_i32_0 : i32, i32
  }
  func.func @transform_11(%arg0: i32) -> (i32, i32) {
    %c0_i32 = arith.constant 0 : i32
    %c0_i32_0 = arith.constant 0 : i32
    %c0_i32_1 = arith.constant 0 : i32
    return %c0_i32, %c0_i32_0 : i32, i32
  }
  func.func @transform_12(%arg0: i32) -> (i32, i32) {
    %c0_i32 = arith.constant 0 : i32
    %c0_i32_0 = arith.constant 0 : i32
    return %arg0, %c0_i32 : i32, i32
  }
}

</mosaic_0001>

<bundles_post_ra>
// kernel: _batched_reid.1
= control target key start
LH: loop header
LB: loop body
LE: loop exit
PB: predicated region body
PF: predicated region fallthrough
CT: control target
= control target key end

     0   :  { %s28624_s0 = inlined_call_operand.vmem [shape: f32[8,4096], index: 0, kind: input, shape index: {}]   ;;  %s28625_s1 = inlined_call_operand.vmem [shape: f32[9,4096], index: 1, kind: input, shape index: {}]   ;;  %s28626_s2 = inlined_call_operand.vmem [shape: f32[8,1], index: 2, kind: input, shape index: {}]   ;;  %s28627_s3 = inlined_call_operand.vmem [shape: f32[8,1], index: 3, kind: input, shape index: {}]   ;;  %s28628_s4 = inlined_call_operand.vmem [shape: bf16[8,72], index: 4, kind: input, shape index: {}]   ;;  %s28629_s5 = inlined_call_operand.vmem [shape: f32[8,1], index: 5, kind: input, shape index: {}]   ;;  %s28630_s6 = inlined_call_operand.vmem [shape: bf16[8,72], index: 6, kind: input, shape index: {}]   ;;  %s28631_s7 = inlined_call_operand.vmem [shape: f32[8,1], index: 7, kind: input, shape index: {}]   ;;  %s28632_s8 = inlined_call_operand.vmem [shape: bf16[8,72], index: 8, kind: input, shape index: {}]   ;;  %s28633_s9 = inlined_call_operand.vmem [shape: f32[8,1], index: 9, kind: input, shape index: {}]   ;;  %s28634_s10 = inlined_call_operand.vmem [shape: bf16[8,128], index: 10, kind: input, shape index: {}]   ;;  %s28635_s11 = inlined_call_operand.vmem [shape: f32[1,128], index: 11, kind: input, shape index: {}]   ;;  %s28636_s12 = inlined_call_operand.hbm [shape: f32[32,128], index: 12, kind: output, shape index: {}]  }
   0x1   :  { %v75_v0 = vld [vmem:[%s28626_s2] sm:$0xff] }
   0x2   :  { %17 = vsyncpa [#allocation4], 0  ;;  %v28637_v1 = vmov 0   ;;  %v113_v2 = vld [vmem:[%s28627_s3] sm:$0xff]  ;;  %v45_v4 = vld [vmem:[%s28624_s0 + $0x10] sm:$0xff]  ;;  %s20182_s13 = smov 9  }
   0x3   :  { %20149 = vset.pattern.permute.xlu0 %v28637_v1  ;;  %5136 = vmatprep.mubr.bf16.mxu0 %v28637_v1  ;;  %v43_v5 = vld [vmem:[%s28624_s0] sm:$0xff]  ;;  %v44_v10 = vld [vmem:[%s28624_s0 + $0x8] sm:$0xff]  ;;  %v49_v15 = vld [vmem:[%s28624_s0 + $0x30] sm:$0xff]  ;;  %s20183_s30 = smov 8   ;;  %s20185_s14 = smov 1   ;;  %vm5007_vm8 = vcmask 1043456  }
   0x4   :  { %78 = vperm.xlu0 %20149, %v75_v0   ;;  %5177 = vmatprep.mubr.bf16.mxu1 %v28637_v1  ;;  %v47_v9 = vld [vmem:[%s28624_s0 + $0x20] sm:$0xff]  ;;  %v46_v16 = vld [vmem:[%s28624_s0 + $0x18] sm:$0xff]  ;;  %v48_v22 = vld [vmem:[%s28624_s0 + $0x28] sm:$0xff]  ;;  %s20186_s15 = smov 127   ;;  %s20187_s16 = smov 121   ;;  %vm5003_vm9 = vcmask 588800  }
   0x5   :  { %20150 = vset.pattern.permute.xlu1 %v28637_v1  ;;  %v51_v21 = vld [vmem:[%s28624_s0 + $0x40] sm:$0xff]  ;;  %v53_v27 = vld [vmem:[%s28624_s0 + $0x50] sm:$0xff]  ;;  %v50_v28 = vld [vmem:[%s28624_s0 + $0x38] sm:$0xff]  ;;  %s20188_s17 = smov 120   ;;  %s20189_s18 = smov 119   ;;  %vm17733_vm10 = vcmask 130112  }
   0x6   :  { %v55_v33 = vld [vmem:[%s28624_s0 + $0x60] sm:$0xff]  ;;  %v52_v34 = vld [vmem:[%s28624_s0 + $0x48] sm:$0xff]  ;;  %v57_v39 = vld [vmem:[%s28624_s0 + $0x70] sm:$0xff]  ;;  %vm17740_vm11 = vcmask 195712   ;;  %vm17747_vm12 = vcmask 261312   ;;  %vm17882_vm13 = vcmask 1041409  }
   0x7   :  { %v54_v40 = vld [vmem:[%s28624_s0 + $0x58] sm:$0xff]  ;;  %v59_v45 = vld [vmem:[%s28624_s0 + $0x80] sm:$0xff]  ;;  %v56_v46 = vld [vmem:[%s28624_s0 + $0x68] sm:$0xff]  ;;  %vm17884_vm14 = vcmask 1042434   ;;  %vm17886_vm15 = vcmask 1043459   ;;  %s20192_s25 = smov [#allocation3]  }
   0x8   :  { %116 = vperm.xlu0 %20149, %v113_v2   ;;  %v61_v51 = vld [vmem:[%s28624_s0 + $0x90] sm:$0xff]  ;;  %v58_v52 = vld [vmem:[%s28624_s0 + $0x78] sm:$0xff]  ;;  %v63_v57 = vld [vmem:[%s28624_s0 + $0xa0] sm:$0xff]  ;;  %s17982_s2 = sshll.u32 %s20192_s25, 4  ;;  %s17983_s2 = int_to_ptr.vmem [resolvable:$true] %s17982_s2 }
   0x9   :  { %v60_v58 = vld [vmem:[%s28624_s0 + $0x88] sm:$0xff]  ;;  %v65_v63 = vld [vmem:[%s28624_s0 + $0xb0] sm:$0xff]  ;;  %v62_v0 = vld [vmem:[%s28624_s0 + $0x98] sm:$0xff]  ;;  %s20157_s26 = scalar_lea.vmem %s17983_s2, 512  ;;  %p20162_p1 = scmp.lt.s32.totalorder %s17983_s2, %s17983_s2 }
   0xa   :  { %v250_v1 = vld [vmem:[%s28625_s1] ss:$8 sm:$0xf]  ;;  %p20158_p0 = scmp.ne.s32.totalorder %s17983_s2, %s20157_s26  ;;  %p20163_p2 = scmp.lt.s32.totalorder %s20157_s26, %s20157_s26 }
   0xc   :  { %p20164_p3 = por %p20163_p2, %p20162_p1 }
   0xe   :  { %p20165_p4 = pnand %p20164_p3, %p20158_p0 }
  0x83   :  { %v20269_v3 = vpop.permute.xlu0 %78 }
  0x84   :  { %v83_v6 = vsub.f32 %v45_v4, %v20269_v3  ;;  %v81_v7 = vsub.f32 %v43_v5, %v20269_v3  ;;  %v85_v13 = vsub.f32 %v47_v9, %v20269_v3  ;;  %v82_v14 = vsub.f32 %v44_v10, %v20269_v3  ;;  %v64_v9 = vld [vmem:[%s28624_s0 + $0xa8] sm:$0xff] }
  0x85   :  { %v87_v19 = vsub.f32 %v49_v15, %v20269_v3  ;;  %v84_v20 = vsub.f32 %v46_v16, %v20269_v3  ;;  %v89_v25 = vsub.f32 %v51_v21, %v20269_v3  ;;  %v86_v26 = vsub.f32 %v48_v22, %v20269_v3  ;;  %v69_v16 = vld [vmem:[%s28624_s0 + $0xd0] sm:$0xff] }
  0x86   :  { %v91_v31 = vsub.f32 %v53_v27, %v20269_v3  ;;  %v88_v32 = vsub.f32 %v50_v28, %v20269_v3  ;;  %v93_v37 = vsub.f32 %v55_v33, %v20269_v3  ;;  %v90_v38 = vsub.f32 %v52_v34, %v20269_v3  ;;  %v68_v27 = vld [vmem:[%s28624_s0 + $0xc8] sm:$0xff]  ;;  %v73_v34 = vld [vmem:[%s28624_s0 + $0xf0] sm:$0xff] }
  0x87   :  { %v20279_v8 = vpop.permute.xlu0 %116  ;;  %v95_v43 = vsub.f32 %v57_v39, %v20269_v3  ;;  %v92_v44 = vsub.f32 %v54_v40, %v20269_v3  ;;  %v97_v49 = vsub.f32 %v59_v45, %v20269_v3  ;;  %v94_v50 = vsub.f32 %v56_v46, %v20269_v3 }
  0x88   :  { %v20288_v11 = vmul.f32 %v20279_v8, %v83_v6  ;;  %v20291_v12 = vmul.f32 %v20279_v8, %v81_v7  ;;  %v20306_v17 = vmul.f32 %v20279_v8, %v85_v13  ;;  %v20309_v18 = vmul.f32 %v20279_v8, %v82_v14  ;;  %v67_v7 = vld [vmem:[%s28624_s0 + $0xc0] sm:$0xff] }
  0x89   :  { %v20324_v23 = vmul.f32 %v20279_v8, %v87_v19  ;;  %v20327_v24 = vmul.f32 %v20279_v8, %v84_v20  ;;  %v20342_v29 = vmul.f32 %v20279_v8, %v89_v25  ;;  %v20345_v30 = vmul.f32 %v20279_v8, %v86_v26  ;;  %v66_v19 = vld [vmem:[%s28624_s0 + $0xb8] sm:$0xff]  ;;  %v71_v26 = vld [vmem:[%s28624_s0 + $0xe0] sm:$0xff] }
  0x8a   :  { %155 = vrot.lane.b32.xlu0 %v20288_v11, %s20182_s13  ;;  %151 = vrot.lane.b32.xlu1 %v20291_v12, %s20182_s13  ;;  %v20360_v35 = vmul.f32 %v20279_v8, %v91_v31  ;;  %v20363_v36 = vmul.f32 %v20279_v8, %v88_v32  ;;  %v20378_v41 = vmul.f32 %v20279_v8, %v93_v37  ;;  %v70_v37 = vld [vmem:[%s28624_s0 + $0xd8] sm:$0xff] }
  0x8b   :  { %28952 = vst [vmem:[#allocation6_spill] sm:$0xff] %v20342_v29  ;;  %v20381_v42 = vmul.f32 %v20279_v8, %v90_v38  ;;  %v20396_v47 = vmul.f32 %v20279_v8, %v95_v43  ;;  %v20399_v48 = vmul.f32 %v20279_v8, %v92_v44  ;;  %v20414_v53 = vmul.f32 %v20279_v8, %v97_v49  ;;  %v72_v44 = vld [vmem:[%s28624_s0 + $0xe8] sm:$0xff] }
  0x8c   :  { %28953 = vst [vmem:[#allocation7_spill] sm:$0xff] %v20363_v36  ;;  %v20417_v54 = vmul.f32 %v20279_v8, %v94_v50  ;;  %v99_v55 = vsub.f32 %v61_v51, %v20269_v3  ;;  %v96_v56 = vsub.f32 %v58_v52, %v20269_v3  ;;  %v101_v61 = vsub.f32 %v63_v57, %v20269_v3  ;;  %v74_v50 = vld [vmem:[%s28624_s0 + $0xf8] sm:$0xff]  ;;  %s20184_s0 = smov 7  }
  0x8d   :  { %28954 = vst [vmem:[#allocation8_spill] sm:$0xff] %v20399_v48  ;;  %28955 = vst [vmem:[#allocation9_spill] sm:$0xff] %v20414_v53  ;;  %v98_v62 = vsub.f32 %v60_v58, %v20269_v3  ;;  %v103_v5 = vsub.f32 %v65_v63, %v20269_v3  ;;  %v100_v6 = vsub.f32 %v62_v0, %v20269_v3 }
  0x8e   :  { %159 = vrot.lane.b32.xlu0 %v20306_v17, %s20182_s13  ;;  %153 = vrot.lane.b32.xlu1 %v20309_v18, %s20182_s13  ;;  %v20432_v59 = vmul.f32 %v20279_v8, %v99_v55  ;;  %v20435_v60 = vmul.f32 %v20279_v8, %v96_v56  ;;  %v20450_v2 = vmul.f32 %v20279_v8, %v101_v61 }
  0x8f   :  { %v20453_v4 = vmul.f32 %v20279_v8, %v98_v62  ;;  %v20468_v10 = vmul.f32 %v20279_v8, %v103_v5  ;;  %v20471_v13 = vmul.f32 %v20279_v8, %v100_v6  ;;  %v105_v14 = vsub.f32 %v67_v7, %v20269_v3 }
  0x90   :  { %28956 = vst [vmem:[#allocation10_spill] sm:$0xff] %v20432_v59  ;;  %28957 = vst [vmem:[#allocation11_spill] sm:$0xff] %v20450_v2  ;;  %v102_v15 = vsub.f32 %v64_v9, %v20269_v3  ;;  %v107_v22 = vsub.f32 %v69_v16, %v20269_v3  ;;  %v104_v25 = vsub.f32 %v66_v19, %v20269_v3 }
  0x91   :  { %28958 = vst [vmem:[#allocation12_spill] sm:$0xff] %v20453_v4  ;;  %28959 = vst [vmem:[#allocation13_spill] sm:$0xff] %v20468_v10  ;;  %v20486_v20 = vmul.f32 %v20279_v8, %v105_v14  ;;  %v109_v32 = vsub.f32 %v71_v26, %v20269_v3  ;;  %v106_v33 = vsub.f32 %v68_v27, %v20269_v3 }
  0x92   :  { %163 = vrot.lane.b32.xlu0 %v20324_v23, %s20182_s13  ;;  %157 = vrot.lane.b32.xlu1 %v20327_v24, %s20182_s13  ;;  %28960 = vst [vmem:[#allocation14_spill] sm:$0xff] %v20471_v13  ;;  %v20489_v21 = vmul.f32 %v20279_v8, %v102_v15  ;;  %v20504_v28 = vmul.f32 %v20279_v8, %v107_v22 }
  0x93   :  { %28961 = vst [vmem:[#allocation15_spill] sm:$0xff] %v20486_v20  ;;  %v20507_v31 = vmul.f32 %v20279_v8, %v104_v25  ;;  %v20522_v38 = vmul.f32 %v20279_v8, %v109_v32  ;;  %v20525_v39 = vmul.f32 %v20279_v8, %v106_v33  ;;  %v111_v40 = vsub.f32 %v73_v34, %v20269_v3 }
  0x94   :  { %28962 = vst [vmem:[#allocation16_spill] sm:$0xff] %v20489_v21  ;;  %28963 = vst [vmem:[#allocation17_spill] sm:$0xff] %v20504_v28  ;;  %v108_v43 = vsub.f32 %v70_v37, %v20269_v3  ;;  %v110_v49 = vsub.f32 %v72_v44, %v20269_v3  ;;  %v112_v52 = vsub.f32 %v74_v50, %v20269_v3 }
  0x95   :  { %28964 = vst [vmem:[#allocation18_spill] sm:$0xff] %v20507_v31  ;;  %28965 = vst [vmem:[#allocation19_spill] sm:$0xff] %v20522_v38  ;;  %v20537_v45 = vmul.f32 %v20279_v8, %v111_v40 }
  0x96   :  { %167 = vrot.lane.b32.xlu0 %v20342_v29, %s20182_s13  ;;  %161 = vrot.lane.b32.xlu1 %v20345_v30, %s20182_s13  ;;  %28966 = vst [vmem:[#allocation20_spill] sm:$0xff] %v20525_v39  ;;  %v20540_v46 = vmul.f32 %v20279_v8, %v108_v43  ;;  %v20551_v51 = vmul.f32 %v20279_v8, %v110_v49  ;;  %v215_v49 = vlaneseq }
  0x97   :  { %28967 = vst [vmem:[#allocation21_spill] sm:$0xff] %v20537_v45  ;;  %v20559_v55 = vmul.f32 %v20279_v8, %v112_v52 }
  0x98   :  { %28968 = vst [vmem:[#allocation22_spill] sm:$0xff] %v20540_v46  ;;  %28969 = vst [vmem:[#allocation23_spill] sm:$0xff] %v20551_v51 }
  0x99   :  { %28970 = vst [vmem:[#allocation24_spill] sm:$0xff] %v20559_v55 }
  0x9a   :  { %171 = vrot.lane.b32.xlu0 %v20360_v35, %s20182_s13  ;;  %165 = vrot.lane.b32.xlu1 %v20363_v36, %s20182_s13 }
  0x9e   :  { %175 = vrot.lane.b32.xlu0 %v20378_v41, %s20182_s13  ;;  %169 = vrot.lane.b32.xlu1 %v20381_v42, %s20182_s13 }
  0xa2   :  { %179 = vrot.lane.b32.xlu0 %v20396_v47, %s20182_s13  ;;  %173 = vrot.lane.b32.xlu1 %v20399_v48, %s20182_s13 }
  0xa6   :  { %183 = vrot.lane.b32.xlu0 %v20414_v53, %s20182_s13  ;;  %177 = vrot.lane.b32.xlu1 %v20417_v54, %s20182_s13 }
  0xaa   :  { %187 = vrot.lane.b32.xlu0 %v20432_v59, %s20182_s13  ;;  %181 = vrot.lane.b32.xlu1 %v20435_v60, %s20182_s13 }
  0xae   :  { %191 = vrot.lane.b32.xlu0 %v20450_v2, %s20182_s13  ;;  %185 = vrot.lane.b32.xlu1 %v20453_v4, %s20182_s13 }
  0xb2   :  { %195 = vrot.lane.b32.xlu0 %v20468_v10, %s20182_s13  ;;  %189 = vrot.lane.b32.xlu1 %v20471_v13, %s20182_s13 }
  0xb6   :  { %199 = vrot.lane.b32.xlu0 %v20486_v20, %s20182_s13  ;;  %193 = vrot.lane.b32.xlu1 %v20489_v21, %s20182_s13 }
  0xba   :  { %203 = vrot.lane.b32.xlu0 %v20504_v28, %s20182_s13  ;;  %197 = vrot.lane.b32.xlu1 %v20507_v31, %s20182_s13 }
  0xbe   :  { %207 = vrot.lane.b32.xlu0 %v20522_v38, %s20182_s13  ;;  %201 = vrot.lane.b32.xlu1 %v20525_v39, %s20182_s13 }
  0xc2   :  { %211 = vrot.lane.b32.xlu0 %v20537_v45, %s20182_s13  ;;  %205 = vrot.lane.b32.xlu1 %v20540_v46, %s20182_s13 }
  0xc6   :  { %605 = vrot.lane.b32.xlu0 %v20291_v12, %s20183_s30  ;;  %209 = vrot.lane.b32.xlu1 %v20551_v51, %s20182_s13 }
  0xca   :  { %609 = vrot.lane.b32.xlu0 %v20288_v11, %s20183_s30  ;;  %213 = vrot.lane.b32.xlu1 %v20559_v55, %s20182_s13 }
  0xce   :  { %613 = vrot.lane.b32.xlu0 %v20306_v17, %s20183_s30  ;;  %607 = vrot.lane.b32.xlu1 %v20309_v18, %s20183_s30 }
  0xd2   :  { %617 = vrot.lane.b32.xlu0 %v20324_v23, %s20183_s30  ;;  %611 = vrot.lane.b32.xlu1 %v20327_v24, %s20183_s30 }
  0xd6   :  { %621 = vrot.lane.b32.xlu0 %v20342_v29, %s20183_s30  ;;  %615 = vrot.lane.b32.xlu1 %v20345_v30, %s20183_s30 }
  0xda   :  { %625 = vrot.lane.b32.xlu0 %v20360_v35, %s20183_s30  ;;  %619 = vrot.lane.b32.xlu1 %v20363_v36, %s20183_s30 }
  0xde   :  { %629 = vrot.lane.b32.xlu0 %v20378_v41, %s20183_s30  ;;  %623 = vrot.lane.b32.xlu1 %v20381_v42, %s20183_s30 }
  0xe2   :  { %633 = vrot.lane.b32.xlu0 %v20396_v47, %s20183_s30  ;;  %627 = vrot.lane.b32.xlu1 %v20399_v48, %s20183_s30 }
  0xe6   :  { %637 = vrot.lane.b32.xlu0 %v20414_v53, %s20183_s30  ;;  %631 = vrot.lane.b32.xlu1 %v20417_v54, %s20183_s30 }
  0xea   :  { %667 = vrot.lane.b32.xlu0 %v20559_v55, %s20183_s30  ;;  %635 = vrot.lane.b32.xlu1 %v20435_v60, %s20183_s30 }
  0xee   :  { %1060 = vrot.lane.b32.xlu0 %v20309_v18, %s20184_s0  ;;  %639 = vrot.lane.b32.xlu1 %v20453_v4, %s20183_s30 }
  0xf2   :  { %1064 = vrot.lane.b32.xlu0 %v20327_v24, %s20184_s0  ;;  %1058 = vrot.lane.b32.xlu1 %v20291_v12, %s20184_s0 }
  0xf6   :  { %1513 = vrot.lane.b32.xlu0 %v20309_v18, %s20185_s14  ;;  %1062 = vrot.lane.b32.xlu1 %v20288_v11, %s20184_s0 }
  0xfa   :  { %1517 = vrot.lane.b32.xlu0 %v20327_v24, %s20185_s14  ;;  %1511 = vrot.lane.b32.xlu1 %v20291_v12, %s20185_s14 }
  0xfc   :  { %v20613_v3 = vpop.permute.xlu0 %155  ;;  %v20615_v8 = vpop.permute.xlu1 %151 }
  0xfe   :  { %1573 = vrot.lane.b32.xlu0 %v20559_v55, %s20185_s14  ;;  %1515 = vrot.lane.b32.xlu1 %v20288_v11, %s20185_s14 }
 0x100   :  { %v20621_v56 = vpop.permute.xlu0 %159  ;;  %v20623_v57 = vpop.permute.xlu1 %153 }
 0x102   :  { %2324 = vrot.lane.b32.xlu0 %v20288_v11, %s20186_s15  ;;  %1120 = vrot.lane.b32.xlu1 %v20559_v55, %s20184_s0 }
 0x104   :  { %v20629_v58 = vpop.permute.xlu0 %163  ;;  %v20631_v61 = vpop.permute.xlu1 %157 }
 0x106   :  { %2328 = vrot.lane.b32.xlu0 %v20306_v17, %s20186_s15  ;;  %2322 = vrot.lane.b32.xlu1 %v20309_v18, %s20186_s15 }
 0x108   :  { %v20637_v62 = vpop.permute.xlu0 %167  ;;  %v20639_v63 = vpop.permute.xlu1 %161 }
 0x109   :  { %28971 = vst [vmem:[#allocation25_spill] sm:$0xff] %v20637_v62 }
 0x10a   :  { %2775 = vrot.lane.b32.xlu0 %v20309_v18, %s20187_s16  ;;  %2326 = vrot.lane.b32.xlu1 %v20327_v24, %s20186_s15 }
 0x10c   :  { %v20645_v0 = vpop.permute.xlu0 %171  ;;  %v20647_v5 = vpop.permute.xlu1 %165 }
 0x10d   :  { %28972 = vst [vmem:[#allocation26_spill] sm:$0xff] %v20645_v0  ;;  %28973 = vst [vmem:[#allocation27_spill] sm:$0xff] %v20647_v5 }
 0x10e   :  { %2779 = vrot.lane.b32.xlu0 %v20327_v24, %s20187_s16  ;;  %2320 = vrot.lane.b32.xlu1 %v20291_v12, %s20186_s15 }
 0x110   :  { %v20653_v6 = vpop.permute.xlu0 %175  ;;  %v20655_v7 = vpop.permute.xlu1 %169 }
 0x111   :  { %28974 = vst [vmem:[#allocation28_spill] sm:$0xff] %v20653_v6  ;;  %28975 = vst [vmem:[#allocation29_spill] sm:$0xff] %v20655_v7 }
 0x112   :  { %3228 = vrot.lane.b32.xlu0 %v20309_v18, %s20188_s17  ;;  %2777 = vrot.lane.b32.xlu1 %v20288_v11, %s20187_s16 }
 0x114   :  { %v20661_v9 = vpop.permute.xlu0 %179  ;;  %v20663_v14 = vpop.permute.xlu1 %173 }
 0x115   :  { %28976 = vst [vmem:[#allocation30_spill] sm:$0xff] %v20661_v9  ;;  %28977 = vst [vmem:[#allocation31_spill] sm:$0xff] %v20663_v14 }
 0x116   :  { %3232 = vrot.lane.b32.xlu0 %v20327_v24, %s20188_s17  ;;  %2781 = vrot.lane.b32.xlu1 %v20306_v17, %s20187_s16 }
 0x118   :  { %v20669_v15 = vpop.permute.xlu0 %183  ;;  %v20671_v16 = vpop.permute.xlu1 %177 }
 0x119   :  { %28978 = vst [vmem:[#allocation32_spill] sm:$0xff] %v20669_v15  ;;  %28979 = vst [vmem:[#allocation33_spill] sm:$0xff] %v20671_v16 }
 0x11a   :  { %2773 = vrot.lane.b32.xlu0 %v20291_v12, %s20187_s16  ;;  %3230 = vrot.lane.b32.xlu1 %v20288_v11, %s20188_s17 }
 0x11c   :  { %v20677_v19 = vpop.permute.xlu0 %187  ;;  %v20679_v22 = vpop.permute.xlu1 %181 }
 0x11d   :  { %28980 = vst [vmem:[#allocation34_spill] sm:$0xff] %v20677_v19  ;;  %28981 = vst [vmem:[#allocation35_spill] sm:$0xff] %v20679_v22 }
 0x11e   :  { %3679 = vrot.lane.b32.xlu0 %v20291_v12, %s20189_s18  ;;  %3234 = vrot.lane.b32.xlu1 %v20306_v17, %s20188_s17 }
 0x120   :  { %v20685_v25 = vpop.permute.xlu0 %191  ;;  %v20687_v26 = vpop.permute.xlu1 %185 }
 0x121   :  { %28982 = vst [vmem:[#allocation36_spill] sm:$0xff] %v20685_v25  ;;  %28983 = vst [vmem:[#allocation37_spill] sm:$0xff] %v20687_v26 }
 0x122   :  { %3683 = vrot.lane.b32.xlu0 %v20288_v11, %s20189_s18  ;;  %3226 = vrot.lane.b32.xlu1 %v20291_v12, %s20188_s17 }
 0x124   :  { %v20693_v27 = vpop.permute.xlu0 %195  ;;  %v20695_v32 = vpop.permute.xlu1 %189 }
 0x125   :  { %28984 = vst [vmem:[#allocation38_spill] sm:$0xff] %v20693_v27  ;;  %28985 = vst [vmem:[#allocation39_spill] sm:$0xff] %v20695_v32 }
 0x126   :  { %3687 = vrot.lane.b32.xlu0 %v20306_v17, %s20189_s18  ;;  %3681 = vrot.lane.b32.xlu1 %v20309_v18, %s20189_s18 }
 0x128   :  { %v20701_v33 = vpop.permute.xlu0 %199  ;;  %v20703_v34 = vpop.permute.xlu1 %193 }
 0x129   :  { %28986 = vst [vmem:[#allocation40_spill] sm:$0xff] %v20701_v33  ;;  %28987 = vst [vmem:[#allocation41_spill] sm:$0xff] %v20703_v34 }
 0x12a   :  { %1068 = vrot.lane.b32.xlu0 %v20345_v30, %s20184_s0  ;;  %3685 = vrot.lane.b32.xlu1 %v20327_v24, %s20189_s18 }
 0x12c   :  { %v20709_v37 = vpop.permute.xlu0 %203  ;;  %v20711_v40 = vpop.permute.xlu1 %197 }
 0x12d   :  { %28988 = vst [vmem:[#allocation42_spill] sm:$0xff] %v20709_v37  ;;  %28989 = vst [vmem:[#allocation43_spill] sm:$0xff] %v20711_v40  ;;  %v20745_v37 = vand.u32 127, %v215_v49 }
 0x12e   :  { %1072 = vrot.lane.b32.xlu0 %v20363_v36, %s20184_s0  ;;  %1066 = vrot.lane.b32.xlu1 %v20306_v17, %s20184_s0 }
 0x12f   :  { %vm217_vm0 = vcmp.lt.s32.totalorder %v20745_v37, 9  ;;  %vm669_vm1 = vcmp.lt.s32.totalorder %v20745_v37, 8  ;;  %vm1122_vm2 = vcmp.lt.s32.totalorder %v20745_v37, 7  ;;  %vm1575_vm3 = vcmp.lt.s32.totalorder %v20745_v37, 1 }
 0x130   :  { %v20717_v43 = vpop.permute.xlu0 %207  ;;  %v20719_v44 = vpop.permute.xlu1 %201  ;;  %v248_v28 = vsel %vm217_vm0, %v20615_v8, %v20623_v57  ;;  %v245_v20 = vsel %vm217_vm0, %v20631_v61, %v20621_v56  ;;  %v246_v22 = vsel %vm217_vm0, %v20613_v3, %v20631_v61  ;;  %v243_v7 = vsel %vm217_vm0, %v20639_v63, %v20629_v58 }
 0x131   :  { %28990 = vst [vmem:[#allocation44_spill] sm:$0xff] %v20717_v43  ;;  %28991 = vst [vmem:[#allocation45_spill] sm:$0xff] %v20719_v44  ;;  %v251_v43 = vld [vmem:[%s28625_s1] ss:$8 sm:$0xf0]  ;;  %v20747_v44 = vshrl.u32 %v215_v49, 7  ;;  %v244_v59 = vsel %vm217_vm0, %v20621_v56, %v20639_v63 }
 0x132   :  { %1521 = vrot.lane.b32.xlu0 %v20345_v30, %s20185_s14  ;;  %1070 = vrot.lane.b32.xlu1 %v20324_v23, %s20184_s0  ;;  %v20753_v40 = vor.u32 %v251_v43, %v250_v1  ;;  %vm2384_vm4 = vcmp.lt.s32.totalorder %v20745_v37, 127  ;;  %vm2837_vm5 = vcmp.lt.s32.totalorder %v20745_v37, 121  ;;  %vm3290_vm6 = vcmp.lt.s32.totalorder %v20745_v37, 120 }
 0x133   :  { %28994 = vst [vmem:[#allocation48_spill] sm:$0xff] %v20747_v44  ;;  %v20763_v27 = vsub.s32 1, %v20747_v44  ;;  %v20771_v1 = vsub.s32 5, %v20747_v44  ;;  %v20774_v43 = vsub.s32 6, %v20747_v44  ;;  %v20791_v38 = vsub.s32 2, %v20747_v44 }
 0x134   :  { %v20725_v50 = vpop.permute.xlu0 %211  ;;  %v20727_v52 = vpop.permute.xlu1 %205  ;;  %v20819_v16 = vsub.s32 7, %v20747_v44  ;;  %vm3743_vm7 = vcmp.lt.s32.totalorder %v20745_v37, 119 }
 0x135   :  { %28992 = vst [vmem:[#allocation46_spill] sm:$0xff] %v20725_v50  ;;  %28993 = vst [vmem:[#allocation47_spill] sm:$0xff] %v20727_v52  ;;  %v18015_v50 = vld [vmem:[%s28625_s1 + $0x1] ss:$8 sm:$0xf]  ;;  %v292_v32 = vrot.slane %v20753_v40, %v20771_v1  ;;  %v296_v19 = vrot.slane %v20753_v40, %v20774_v43  ;;  %v280_v14 = vrot.slane %v20753_v40, %v20791_v38 }
 0x136   :  { %1525 = vrot.lane.b32.xlu0 %v20363_v36, %s20185_s14  ;;  %1519 = vrot.lane.b32.xlu1 %v20306_v17, %s20185_s14  ;;  %v18016_v52 = vld [vmem:[%s28625_s1 + $0x1] ss:$8 sm:$0xf0]  ;;  %28996 = vst [vmem:[#allocation50_spill] sm:$0xff] %v20763_v27  ;;  %28999 = vst [vmem:[#allocation53_spill] sm:$0xff] %v20771_v1 }
 0x137   :  { %v20759_v45 = vor.u32 %v18016_v52, %v18015_v50  ;;  %29000 = vst [vmem:[#allocation54_spill] sm:$0xff] %v20774_v43  ;;  %v20777_v50 = vsub.s32 3, %v20747_v44  ;;  %v276_v52 = vrot.slane %v20753_v40, %v20763_v27  ;;  %29002 = vst [vmem:[#allocation56_spill] sm:$0xff] %v20791_v38 }
 0x138   :  { %v20749_v33 = vpop.permute.xlu0 %605  ;;  %v20751_v55 = vpop.permute.xlu1 %209  ;;  %29003 = vst [vmem:[#allocation57_spill] sm:$0xff] %v20819_v16 }
 0x139   :  { %28995 = vst [vmem:[#allocation49_spill] sm:$0xff] %v20751_v55  ;;  %v20768_v55 = vsub.s32 4, %v20747_v44  ;;  %29001 = vst [vmem:[#allocation55_spill] sm:$0xff] %v20777_v50  ;;  %v729_v25 = vrot.slane %v20759_v45, %v20763_v27  ;;  %v284_v39 = vrot.slane %v20753_v40, %v20777_v50  ;;  %v737_v6 = vrot.slane %v20759_v45, %v20777_v50 }
 0x13a   :  { %2332 = vrot.lane.b32.xlu0 %v20324_v23, %s20186_s15  ;;  %1523 = vrot.lane.b32.xlu1 %v20324_v23, %s20185_s14  ;;  %v430_v10 = vmul.f32 %v276_v52, %v248_v28  ;;  %v733_v21 = vrot.slane %v20759_v45, %v20791_v38  ;;  %v745_v2 = vrot.slane %v20759_v45, %v20771_v1 }
 0x13b   :  { %28998 = vst [vmem:[#allocation52_spill] sm:$0xff] %v20768_v55  ;;  %v288_v51 = vrot.slane %v20753_v40, %v20768_v55  ;;  %v741_v26 = vrot.slane %v20759_v45, %v20768_v55  ;;  %v749_v0 = vrot.slane %v20759_v45, %v20774_v43  ;;  %v247_v28 = vsel %vm217_vm0, %v20623_v57, %v20613_v3 }
 0x13c   :  { %v610_v49 = vpop.permute.xlu0 %609  ;;  %v20765_v34 = vpop.permute.xlu1 %213  ;;  %v431_v63 = vmul.f32 %v280_v14, %v247_v28 }
 0x13d   :  { %28997 = vst [vmem:[#allocation51_spill] sm:$0xff] %v20765_v34 }
 0x13e   :  { %2336 = vrot.lane.b32.xlu0 %v20342_v29, %s20186_s15  ;;  %2330 = vrot.lane.b32.xlu1 %v20345_v30, %s20186_s15 }
 0x140   :  { %v614_v46 = vpop.permute.xlu0 %613  ;;  %v608_v15 = vpop.permute.xlu1 %607 }
 0x141   :  { %v700_v9 = vsel %vm669_vm1, %v20749_v33, %v608_v15  ;;  %v699_v61 = vsel %vm669_vm1, %v608_v15, %v610_v49  ;;  %v432_v15 = vmul.f32 %v284_v39, %v246_v22  ;;  %v300_v39 = vrot.slane %v20753_v40, %v20819_v16 }
 0x142   :  { %2785 = vrot.lane.b32.xlu0 %v20324_v23, %s20187_s16  ;;  %2334 = vrot.lane.b32.xlu1 %v20363_v36, %s20186_s15  ;;  %v883_v31 = vmul.f32 %v729_v25, %v700_v9  ;;  %v20839_v9 = vmul.f32 %v288_v51, %v245_v20  ;;  %v753_v22 = vrot.slane %v20759_v45, %v20819_v16 }
 0x144   :  { %v618_v25 = vpop.permute.xlu0 %617  ;;  %v612_v52 = vpop.permute.xlu1 %611  ;;  %v19647_v62 = vpack.c.bf16 %v883_v31, %v430_v10  ;;  %v884_v31 = vmul.f32 %v733_v21, %v699_v61 }
 0x145   :  { %v697_v4 = vsel %vm669_vm1, %v612_v52, %v614_v46  ;;  %v698_v20 = vsel %vm669_vm1, %v610_v49, %v612_v52  ;;  %v20869_v49 = vmul.f32 %v296_v19, %v243_v7  ;;  %v242_v7 = vsel %vm217_vm0, %v20629_v58, %v20647_v5 }
 0x146   :  { %v20853_v51 = vmul.f32 %v741_v26, %v697_v4  ;;  %2789 = vrot.lane.b32.xlu0 %v20342_v29, %s20187_s16  ;;  %2783 = vrot.lane.b32.xlu1 %v20345_v30, %s20187_s16  ;;  %v885_v10 = vmul.f32 %v737_v6, %v698_v20  ;;  %v20867_v26 = vmul.f32 %v292_v32, %v244_v59 }
 0x147   :  { %5104 = vmatprep.subr.bf16.mxu0 %v19647_v62  ;;  %v19648_v59 = vpack.c.bf16 %v884_v31, %v431_v63  ;;  %v20898_v32 = vmul.f32 %v300_v39, %v242_v7  ;;  %v249_v63 = vsel %vm217_vm0, %v20765_v34, %v20615_v8 }
 0x148   :  { %v20863_v56 = vpop.permute.xlu0 %621  ;;  %v616_v57 = vpop.permute.xlu1 %615  ;;  %v19649_v4 = vpack.c.bf16 %v885_v10, %v432_v15  ;;  %v20925_v10 = vsub.s32 0, %v20747_v44 }
 0x149   :  { %29004 = vst [vmem:[#allocation58_spill] sm:$0xff] %v20863_v56  ;;  %v695_v21 = vsel %vm669_vm1, %v616_v57, %v618_v25  ;;  %v696_v62 = vsel %vm669_vm1, %v614_v46, %v616_v57 }
 0x14a   :  { %v20875_v6 = vmul.f32 %v745_v2, %v696_v62  ;;  %v20877_v61 = vmul.f32 %v749_v0, %v695_v21  ;;  %3238 = vrot.lane.b32.xlu0 %v20324_v23, %s20188_s17  ;;  %2787 = vrot.lane.b32.xlu1 %v20363_v36, %s20187_s16  ;;  %v272_v57 = vrot.slane %v20753_v40, %v20925_v10 }
 0x14b   :  { %5145 = vmatprep.subr.bf16.mxu1 %v19649_v4  ;;  %v725_v4 = vrot.slane %v20759_v45, %v20925_v10 }
 0x14c   :  { %5146 = vmatpush1.bf16.msra.mxu1 %v19648_v59  ;;  %v20889_v2 = vpop.permute.xlu0 %625  ;;  %v20891_v0 = vpop.permute.xlu1 %619  ;;  %v429_v45 = vmul.f32 %v272_v57, %v249_v63  ;;  %v18063_v57 = vld [vmem:[%s28625_s1 + $0x3] ss:$8 sm:$0xf] }
 0x14d   :  { %29005 = vst [vmem:[#allocation59_spill] sm:$0xff] %v20889_v2  ;;  %29006 = vst [vmem:[#allocation60_spill] sm:$0xff] %v20891_v0  ;;  %v694_v19 = vsel %vm669_vm1, %v618_v25, %v20891_v0 }
 0x14e   :  { %v20900_v28 = vmul.f32 %v753_v22, %v694_v19  ;;  %3242 = vrot.lane.b32.xlu0 %v20342_v29, %s20188_s17  ;;  %3236 = vrot.lane.b32.xlu1 %v20345_v30, %s20188_s17  ;;  %v18040_v19 = vld [vmem:[%s28625_s1 + $0x2] ss:$8 sm:$0xf0] }
 0x150   :  { %v20906_v58 = vpop.permute.xlu0 %629  ;;  %v20908_v52 = vpop.permute.xlu1 %623 }
 0x151   :  { %29007 = vst [vmem:[#allocation61_spill] sm:$0xff] %v20906_v58  ;;  %29008 = vst [vmem:[#allocation62_spill] sm:$0xff] %v20908_v52 }
 0x152   :  { %3691 = vrot.lane.b32.xlu0 %v20324_v23, %s20189_s18  ;;  %3240 = vrot.lane.b32.xlu1 %v20363_v36, %s20188_s17 }
 0x154   :  { %v20916_v25 = vpop.permute.xlu0 %633  ;;  %v20918_v20 = vpop.permute.xlu1 %627 }
 0x155   :  { %29009 = vst [vmem:[#allocation63_spill] sm:$0xff] %v20916_v25  ;;  %29010 = vst [vmem:[#allocation64_spill] sm:$0xff] %v20918_v20 }
 0x156   :  { %3695 = vrot.lane.b32.xlu0 %v20342_v29, %s20189_s18  ;;  %3689 = vrot.lane.b32.xlu1 %v20345_v30, %s20189_s18 }
 0x158   :  { %v20927_v31 = vpop.permute.xlu0 %637  ;;  %v20929_v39 = vpop.permute.xlu1 %631 }
 0x159   :  { %29011 = vst [vmem:[#allocation65_spill] sm:$0xff] %v20927_v31  ;;  %29012 = vst [vmem:[#allocation66_spill] sm:$0xff] %v20929_v39  ;;  %v18087_v31 = vld [vmem:[%s28625_s1 + $0x4] ss:$8 sm:$0xf] }
 0x15a   :  { %1076 = vrot.lane.b32.xlu0 %v20381_v42, %s20184_s0  ;;  %3693 = vrot.lane.b32.xlu1 %v20363_v36, %s20189_s18  ;;  %v18111_v39 = vld [vmem:[%s28625_s1 + $0x5] ss:$8 sm:$0xf] }
 0x15c   :  { %v20943_v22 = vpop.permute.xlu0 %667  ;;  %v20945_v21 = vpop.permute.xlu1 %635 }
 0x15d   :  { %29013 = vst [vmem:[#allocation67_spill] sm:$0xff] %v20943_v22  ;;  %29014 = vst [vmem:[#allocation68_spill] sm:$0xff] %v20945_v21  ;;  %v701_v62 = vsel %vm669_vm1, %v20943_v22, %v20749_v33  ;;  %v18039_v33 = vld [vmem:[%s28625_s1 + $0x2] ss:$8 sm:$0xf] }
 0x15e   :  { %1080 = vrot.lane.b32.xlu0 %v20399_v48, %s20184_s0  ;;  %1074 = vrot.lane.b32.xlu1 %v20342_v29, %s20184_s0  ;;  %v882_v40 = vmul.f32 %v725_v4, %v701_v62  ;;  %v18064_v4 = vld [vmem:[%s28625_s1 + $0x3] ss:$8 sm:$0xf0] }
 0x160   :  { %v1061_v59 = vpop.permute.xlu0 %1060  ;;  %v20955_v7 = vpop.permute.xlu1 %639  ;;  %v19646_v8 = vpack.c.bf16 %v882_v40, %v429_v45  ;;  %v20975_v45 = vor.u32 %v18040_v19, %v18039_v33  ;;  %v20981_v40 = vor.u32 %v18064_v4, %v18063_v57 }
 0x161   :  { %29015 = vst [vmem:[#allocation69_spill] sm:$0xff] %v20955_v7  ;;  %v18088_v7 = vld [vmem:[%s28625_s1 + $0x4] ss:$8 sm:$0xf0] }
 0x162   :  { %1529 = vrot.lane.b32.xlu0 %v20381_v42, %s20185_s14  ;;  %1078 = vrot.lane.b32.xlu1 %v20360_v35, %s20184_s0  ;;  %v1182_v15 = vrot.slane %v20975_v45, %v20763_v27  ;;  %v1635_v33 = vrot.slane %v20981_v40, %v20763_v27  ;;  %v1186_v57 = vrot.slane %v20975_v45, %v20791_v38 }
 0x163   :  { %5105 = vmatpush1.bf16.msra.mxu0 %v19646_v8  ;;  %v1190_v14 = vrot.slane %v20975_v45, %v20777_v50  ;;  %v1639_v22 = vrot.slane %v20981_v40, %v20791_v38  ;;  %v1643_v34 = vrot.slane %v20981_v40, %v20777_v50  ;;  %v1178_v2 = vrot.slane %v20975_v45, %v20925_v10 }
 0x164   :  { %v20973_v63 = vpop.permute.xlu0 %1064  ;;  %v1059_v62 = vpop.permute.xlu1 %1058  ;;  %v21034_v20 = vor.u32 %v18088_v7, %v18087_v31 }
 0x165   :  { %v1153_v19 = vsel %vm1122_vm2, %v1059_v62, %v1061_v59 }
 0x166   :  { %1533 = vrot.lane.b32.xlu0 %v20399_v48, %s20185_s14  ;;  %1527 = vrot.lane.b32.xlu1 %v20342_v29, %s20185_s14  ;;  %v1336_v25 = vmul.f32 %v1182_v15, %v1153_v19  ;;  %v18112_v29 = vld [vmem:[%s28625_s1 + $0x5] ss:$8 sm:$0xf0]  ;;  %v1995_v7 = vrot.slane %v21034_v20, %v20791_v38 }
 0x167   :  { %v21041_v56 = vor.u32 %v18112_v29, %v18111_v39 }
 0x168   :  { %v1514_v8 = vpop.permute.xlu0 %1513  ;;  %v1063_v46 = vpop.permute.xlu1 %1062 }
 0x169   :  { %v1152_v21 = vsel %vm1122_vm2, %v1061_v59, %v1063_v46  ;;  %v1151_v15 = vsel %vm1122_vm2, %v1063_v46, %v20973_v63 }
 0x16a   :  { %2340 = vrot.lane.b32.xlu0 %v20360_v35, %s20186_s15  ;;  %1531 = vrot.lane.b32.xlu1 %v20360_v35, %s20185_s14  ;;  %v1337_v5 = vmul.f32 %v1186_v57, %v1152_v21  ;;  %v1338_v52 = vmul.f32 %v1190_v14, %v1151_v15  ;;  %v2452_v57 = vrot.slane %v21041_v56, %v20777_v50 }
 0x16c   :  { %v20997_v4 = vpop.permute.xlu0 %1517  ;;  %v1512_v3 = vpop.permute.xlu1 %1511 }
 0x16d   :  { %v1606_v44 = vsel %vm1575_vm3, %v1512_v3, %v1514_v8 }
 0x16e   :  { %v1789_v58 = vmul.f32 %v1635_v33, %v1606_v44  ;;  %2344 = vrot.lane.b32.xlu0 %v20378_v41, %s20186_s15  ;;  %2338 = vrot.lane.b32.xlu1 %v20381_v42, %s20186_s15  ;;  %v1631_v44 = vrot.slane %v20981_v40, %v20925_v10 }
 0x170   :  { %v21030_v59 = vpop.permute.xlu0 %1573  ;;  %v1516_v33 = vpop.permute.xlu1 %1515  ;;  %v19679_v19 = vpack.c.bf16 %v1789_v58, %v1336_v25 }
 0x171   :  { %29016 = vst [vmem:[#allocation70_spill] sm:$0xff] %v21030_v59  ;;  %v1604_v0 = vsel %vm1575_vm3, %v1516_v33, %v20997_v4  ;;  %v1605_v46 = vsel %vm1575_vm3, %v1514_v8, %v1516_v33  ;;  %v1607_v58 = vsel %vm1575_vm3, %v21030_v59, %v1512_v3  ;;  %v2448_v8 = vrot.slane %v21041_v56, %v20791_v38 }
 0x172   :  { %v1790_v13 = vmul.f32 %v1639_v22, %v1605_v46  ;;  %v1791_v36 = vmul.f32 %v1643_v34, %v1604_v0  ;;  %2793 = vrot.lane.b32.xlu0 %v20360_v35, %s20187_s16  ;;  %2342 = vrot.lane.b32.xlu1 %v20399_v48, %s20186_s15  ;;  %v1991_v0 = vrot.slane %v21034_v20, %v20763_v27 }
 0x173   :  { %5106 = vmatprep.subr.bf16.mxu0 %v19679_v19  ;;  %v1788_v14 = vmul.f32 %v1631_v44, %v1607_v58  ;;  %v1999_v22 = vrot.slane %v21034_v20, %v20777_v50  ;;  %v1987_v33 = vrot.slane %v21034_v20, %v20925_v10 }
 0x174   :  { %v2325_v25 = vpop.permute.xlu0 %2324  ;;  %v21050_v31 = vpop.permute.xlu1 %1120  ;;  %v19681_v21 = vpack.c.bf16 %v1791_v36, %v1338_v52  ;;  %v19680_v29 = vpack.c.bf16 %v1790_v13, %v1337_v5  ;;  %v2444_v36 = vrot.slane %v21041_v56, %v20763_v27  ;;  %v2145_v52 = vmul.f32 %v1991_v0, %v20309_v18 }
 0x175   :  { %29017 = vst [vmem:[#allocation71_spill] sm:$0xff] %v21050_v31  ;;  %v1154_v34 = vsel %vm1122_vm2, %v21050_v31, %v1059_v62  ;;  %v2147_v58 = vmul.f32 %v1999_v22, %v20327_v24  ;;  %v2440_v0 = vrot.slane %v21041_v56, %v20925_v10  ;;  %v18160_v22 = vld [vmem:[%s28625_s1 + $0x7] ss:$8 sm:$0xf0] }
 0x176   :  { %v1335_v39 = vmul.f32 %v1178_v2, %v1154_v34  ;;  %2797 = vrot.lane.b32.xlu0 %v20378_v41, %s20187_s16  ;;  %2791 = vrot.lane.b32.xlu1 %v20381_v42, %s20187_s16 }
 0x177   :  { %5147 = vmatprep.subr.bf16.mxu1 %v19681_v21  ;;  %v2146_v21 = vmul.f32 %v1995_v7, %v20288_v11 }
 0x178   :  { %5148 = vmatpush1.bf16.msra.mxu1 %v19680_v29  ;;  %v21064_v13 = vpop.permute.xlu0 %2328  ;;  %v2323_v5 = vpop.permute.xlu1 %2322  ;;  %v19678_v3 = vpack.c.bf16 %v1788_v14, %v1335_v39 }
 0x179   :  { %v2414_v2 = vsel %vm2384_vm4, %v2323_v5, %v2325_v25 }
 0x17a   :  { %v2598_v62 = vmul.f32 %v2444_v36, %v2414_v2  ;;  %3246 = vrot.lane.b32.xlu0 %v20360_v35, %s20188_s17  ;;  %2795 = vrot.lane.b32.xlu1 %v20399_v48, %s20187_s16  ;;  %v18136_v2 = vld [vmem:[%s28625_s1 + $0x6] ss:$8 sm:$0xf0] }
 0x17b   :  { %5107 = vmatpush1.bf16.msra.mxu0 %v19678_v3  ;;  %v18135_v3 = vld [vmem:[%s28625_s1 + $0x6] ss:$8 sm:$0xf] }
 0x17c   :  { %v21081_v18 = vpop.permute.xlu0 %2775  ;;  %v2327_v15 = vpop.permute.xlu1 %2326  ;;  %v19711_v44 = vpack.c.bf16 %v2598_v62, %v2145_v52  ;;  %v2144_v52 = vmul.f32 %v1987_v33, %v20291_v12 }
 0x17d   :  { %v2412_v19 = vsel %vm2384_vm4, %v2327_v15, %v21064_v13  ;;  %v2413_v46 = vsel %vm2384_vm4, %v2325_v25, %v2327_v15 }
 0x17e   :  { %v2599_v29 = vmul.f32 %v2448_v8, %v2413_v46  ;;  %v2600_v34 = vmul.f32 %v2452_v57, %v2412_v19  ;;  %3250 = vrot.lane.b32.xlu0 %v20378_v41, %s20188_s17  ;;  %3244 = vrot.lane.b32.xlu1 %v20381_v42, %s20188_s17  ;;  %v21120_v57 = vor.u32 %v18136_v2, %v18135_v3  ;;  %v18184_v3 = vld [vmem:[%s28625_s1 + $0x100] ss:$8 sm:$0xf0] }
 0x17f   :  { %5108 = vmatprep.subr.bf16.mxu0 %v19711_v44 }
 0x180   :  { %v2780_v14 = vpop.permute.xlu0 %2779  ;;  %v21098_v39 = vpop.permute.xlu1 %2320  ;;  %v19713_v25 = vpack.c.bf16 %v2600_v34, %v2147_v58  ;;  %v19712_v36 = vpack.c.bf16 %v2599_v29, %v2146_v21  ;;  %v2897_v33 = vrot.slane %v21120_v57, %v20763_v27  ;;  %v2905_v29 = vrot.slane %v21120_v57, %v20777_v50 }
 0x181   :  { %29018 = vst [vmem:[#allocation72_spill] sm:$0xff] %v21098_v39  ;;  %v2415_v11 = vsel %vm2384_vm4, %v21098_v39, %v2323_v5  ;;  %v18159_v5 = vld [vmem:[%s28625_s1 + $0x7] ss:$8 sm:$0xf] }
 0x182   :  { %v2597_v24 = vmul.f32 %v2440_v0, %v2415_v11  ;;  %3699 = vrot.lane.b32.xlu0 %v20360_v35, %s20189_s18  ;;  %3248 = vrot.lane.b32.xlu1 %v20399_v48, %s20188_s17  ;;  %v21126_v12 = vor.u32 %v18160_v22, %v18159_v5  ;;  %v2901_v5 = vrot.slane %v21120_v57, %v20791_v38 }
 0x183   :  { %5149 = vmatprep.subr.bf16.mxu1 %v19713_v25  ;;  %v2893_v22 = vrot.slane %v21120_v57, %v20925_v10 }
 0x184   :  { %5150 = vmatpush1.bf16.msra.mxu1 %v19712_v36  ;;  %v3229_v7 = vpop.permute.xlu0 %3228  ;;  %v2778_v62 = vpop.permute.xlu1 %2777  ;;  %v19710_v8 = vpack.c.bf16 %v2597_v24, %v2144_v52  ;;  %v3350_v19 = vrot.slane %v21126_v12, %v20763_v27  ;;  %v3354_v34 = vrot.slane %v21126_v12, %v20791_v38  ;;  %v3358_v11 = vrot.slane %v21126_v12, %v20777_v50  ;;  %v18183_v24 = vld [vmem:[%s28625_s1 + $0x100] ss:$8 sm:$0xf] }
 0x185   :  { %v2867_v46 = vsel %vm2837_vm5, %v21081_v18, %v2778_v62  ;;  %v21183_v59 = vor.u32 %v18184_v3, %v18183_v24 }
 0x186   :  { %3703 = vrot.lane.b32.xlu0 %v20378_v41, %s20189_s18  ;;  %3697 = vrot.lane.b32.xlu1 %v20381_v42, %s20189_s18  ;;  %v3051_v25 = vmul.f32 %v2897_v33, %v2867_v46  ;;  %v2866_v46 = vsel %vm2837_vm5, %v2778_v62, %v2780_v14 }
 0x187   :  { %5109 = vmatpush1.bf16.msra.mxu0 %v19710_v8  ;;  %v3052_v62 = vmul.f32 %v2901_v5, %v2866_v46  ;;  %v3811_v5 = vrot.slane %v21183_v59, %v20777_v50 }
 0x188   :  { %v3233_v15 = vpop.permute.xlu0 %3232  ;;  %v21129_v44 = vpop.permute.xlu1 %2781 }
 0x189   :  { %v2865_v2 = vsel %vm2837_vm5, %v2780_v14, %v21129_v44 }
 0x18a   :  { %1084 = vrot.lane.b32.xlu0 %v20417_v54, %s20184_s0  ;;  %3701 = vrot.lane.b32.xlu1 %v20399_v48, %s20189_s18  ;;  %v3053_v39 = vmul.f32 %v2905_v29, %v2865_v2 }
 0x18c   :  { %v21143_v58 = vpop.permute.xlu0 %2773  ;;  %v3231_v21 = vpop.permute.xlu1 %3230 }
 0x18d   :  { %29019 = vst [vmem:[#allocation73_spill] sm:$0xff] %v21143_v58  ;;  %v3320_v0 = vsel %vm3290_vm6, %v3229_v7, %v3231_v21  ;;  %v3319_v52 = vsel %vm3290_vm6, %v3231_v21, %v3233_v15  ;;  %v3346_v21 = vrot.slane %v21126_v12, %v20925_v10  ;;  %v2868_v14 = vsel %vm2837_vm5, %v21143_v58, %v21081_v18 }
 0x18e   :  { %v3504_v36 = vmul.f32 %v3350_v19, %v3320_v0  ;;  %1088 = vrot.lane.b32.xlu0 %v20435_v60, %s20184_s0  ;;  %1082 = vrot.lane.b32.xlu1 %v20378_v41, %s20184_s0  ;;  %v3505_v31 = vmul.f32 %v3354_v34, %v3319_v52  ;;  %v3803_v34 = vrot.slane %v21183_v59, %v20763_v27 }
 0x18f   :  { %v3050_v24 = vmul.f32 %v2893_v22, %v2868_v14 }
 0x190   :  { %v21172_v8 = vpop.permute.xlu0 %3679  ;;  %v21174_v33 = vpop.permute.xlu1 %3234  ;;  %v19743_v19 = vpack.c.bf16 %v3504_v36, %v3051_v25  ;;  %v19744_v18 = vpack.c.bf16 %v3505_v31, %v3052_v62 }
 0x191   :  { %29020 = vst [vmem:[#allocation74_spill] sm:$0xff] %v21172_v8  ;;  %v3318_v0 = vsel %vm3290_vm6, %v3233_v15, %v21174_v33 }
 0x192   :  { %v3506_v48 = vmul.f32 %v3358_v11, %v3318_v0  ;;  %1537 = vrot.lane.b32.xlu0 %v20417_v54, %s20185_s14  ;;  %1086 = vrot.lane.b32.xlu1 %v20396_v47, %s20184_s0  ;;  %v3799_v11 = vrot.slane %v21183_v59, %v20925_v10 }
 0x193   :  { %5110 = vmatprep.subr.bf16.mxu0 %v19743_v19  ;;  %v3807_v19 = vrot.slane %v21183_v59, %v20791_v38 }
 0x194   :  { %v3684_v15 = vpop.permute.xlu0 %3683  ;;  %v21193_v25 = vpop.permute.xlu1 %3226  ;;  %v19745_v36 = vpack.c.bf16 %v3506_v48, %v3053_v39 }
 0x195   :  { %29021 = vst [vmem:[#allocation75_spill] sm:$0xff] %v21193_v25  ;;  %v3321_v29 = vsel %vm3290_vm6, %v21193_v25, %v3229_v7  ;;  %v29050_v25 = vld [vmem:[#allocation28_spill] sm:$0xff] }
 0x196   :  { %v3503_v3 = vmul.f32 %v3346_v21, %v3321_v29  ;;  %1541 = vrot.lane.b32.xlu0 %v20435_v60, %s20185_s14  ;;  %1535 = vrot.lane.b32.xlu1 %v20378_v41, %s20185_s14 }
 0x197   :  { %5151 = vmatprep.subr.bf16.mxu1 %v19745_v36 }
 0x198   :  { %5152 = vmatpush1.bf16.msra.mxu1 %v19744_v18  ;;  %v21207_v48 = vpop.permute.xlu0 %3687  ;;  %v3682_v39 = vpop.permute.xlu1 %3681  ;;  %v19742_v7 = vpack.c.bf16 %v3503_v3, %v3050_v24 }
 0x199   :  { %v3773_v2 = vsel %vm3743_vm7, %v3682_v39, %v3684_v15  ;;  %v3774_v52 = vsel %vm3743_vm7, %v21172_v8, %v3682_v39 }
 0x19a   :  { %v3957_v22 = vmul.f32 %v3803_v34, %v3773_v2  ;;  %2348 = vrot.lane.b32.xlu0 %v20396_v47, %s20186_s15  ;;  %1539 = vrot.lane.b32.xlu1 %v20396_v47, %s20185_s14  ;;  %v3956_v31 = vmul.f32 %v3799_v11, %v3774_v52  ;;  %v29023_v52 = vpack.c.bf16 %v20853_v51, %v20839_v9 }
 0x19b   :  { %5111 = vmatpush1.bf16.msra.mxu0 %v19742_v7  ;;  %v29022_v7 = vpack.c.bf16 %v20875_v6, %v20867_v26 }
 0x19c   :  { %v19775_v46 = vpack.c.bf16 %v3957_v22, %v3957_v22  ;;  %v1069_v0 = vpop.permute.xlu0 %1068  ;;  %v3686_v21 = vpop.permute.xlu1 %3685  ;;  %v19774_v14 = vpack.c.bf16 %v3956_v31, %v3956_v31  ;;  %v1198_v22 = vrot.slane %v20975_v45, %v20771_v1  ;;  %v29024_v31 = vpack.c.bf16 %v20900_v28, %v20898_v32 }
 0x19d   :  { %v3771_v62 = vsel %vm3743_vm7, %v3686_v21, %v21207_v48  ;;  %v3772_v36 = vsel %vm3743_vm7, %v3684_v15, %v3686_v21  ;;  %v21238_v15 = vld [vmem:[%s28628_s4] sm:$0xf]  ;;  %v1651_v32 = vrot.slane %v20981_v40, %v20771_v1  ;;  %v1202_v28 = vrot.slane %v20975_v45, %v20774_v43 }
 0x19e   :  { %v3959_v29 = vmul.f32 %v3811_v5, %v3771_v62  ;;  %2352 = vrot.lane.b32.xlu0 %v20414_v53, %s20186_s15  ;;  %2346 = vrot.lane.b32.xlu1 %v20417_v54, %s20186_s15  ;;  %v5009_v34 = vsel %vm5007_vm8, %v19774_v14, 0  ;;  %v3958_v11 = vmul.f32 %v3807_v19, %v3772_v36  ;;  %v1194_v5 = vrot.slane %v20975_v45, %v20768_v55 }
 0x19f   :  { %18367 = vmatprep.subr.msk.bf16.mxu0 %vm5007_vm8, %v19775_v46  ;;  %v1647_v19 = vrot.slane %v20981_v40, %v20768_v55  ;;  %v29025_v46 = vmov 0   ;;  %v1206_v21 = vrot.slane %v20975_v45, %v20819_v16  ;;  %v1655_v36 = vrot.slane %v20981_v40, %v20774_v43 }
 0x1a0   :  { %v19777_v24 = vpack.c.bf16 %v3959_v29, %v3959_v29  ;;  %5113 = vmatpush1.bf16.msra.mxu0 %v5009_v34  ;;  %v21233_v3 = vpop.permute.xlu0 %1072  ;;  %v1067_v18 = vpop.permute.xlu1 %1066  ;;  %v19776_v39 = vpack.c.bf16 %v3958_v11, %v3958_v11  ;;  %v1659_v29 = vrot.slane %v20981_v40, %v20819_v16 }
 0x1a1   :  { %5186 = vmatprep.subr.bf16.mxu0 %v29022_v7  ;;  %v1149_v9 = vsel %vm1122_vm2, %v1067_v18, %v1069_v0  ;;  %v1150_v51 = vsel %vm1122_vm2, %v20973_v63, %v1067_v18  ;;  %v29026_v63 = vpack.c.bf16 %v20877_v61, %v20869_v49 }
 0x1a2   :  { %2801 = vrot.lane.b32.xlu0 %v20396_v47, %s20187_s16  ;;  %2350 = vrot.lane.b32.xlu1 %v20435_v60, %s20186_s15  ;;  %v5015_v2 = vsel %vm5007_vm8, %v19776_v39, 0  ;;  %v1339_v34 = vmul.f32 %v1194_v5, %v1150_v51  ;;  %v1340_v11 = vmul.f32 %v1198_v22, %v1149_v9  ;;  %v2003_v39 = vrot.slane %v21034_v20, %v20768_v55 }
 0x1a3   :  { %18369 = vmatprep.subr.msk.bf16.mxu1 %vm5007_vm8, %v19777_v24  ;;  %18368 = vmatmul.mubr.msk.bf16.vlgmr.msra.gmra.mrb[0].mxu0 %vm5003_vm9, %v21238_v15  ;;  %v2007_v5 = vrot.slane %v21034_v20, %v20771_v1 }
 0x1a4   :  { %5154 = vmatpush1.bf16.msra.mxu1 %v5015_v2  ;;  %5187 = vmatpush1.bf16.msra.mxu0 %v29023_v52  ;;  %v1522_v26 = vpop.permute.xlu0 %1521  ;;  %v1071_v6 = vpop.permute.xlu1 %1070 }
 0x1a5   :  { %5227 = vmatprep.subr.bf16.mxu1 %v29024_v31  ;;  %5218 = vmatprep.mubr.bf16.mxu0 %v29025_v46  ;;  %v1148_v61 = vsel %vm1122_vm2, %v1069_v0, %v1071_v6  ;;  %v1147_v40 = vsel %vm1122_vm2, %v1071_v6, %v21233_v3  ;;  %v2456_v0 = vrot.slane %v21041_v56, %v20768_v55 }
 0x1a6   :  { %2805 = vrot.lane.b32.xlu0 %v20414_v53, %s20187_s16  ;;  %2799 = vrot.lane.b32.xlu1 %v20417_v54, %s20187_s16  ;;  %v1341_v22 = vmul.f32 %v1202_v28, %v1148_v61  ;;  %v1342_v9 = vmul.f32 %v1206_v21, %v1147_v40  ;;  %v2011_v28 = vrot.slane %v21034_v20, %v20774_v43 }
 0x1a7   :  { %18370 = vmatmul.mubr.msk.bf16.vlgmr.msra.gmra.mrb[0].mxu1 %vm5003_vm9, %v21238_v15 }
 0x1a8   :  { %5228 = vmatpush1.bf16.msra.mxu1 %v29026_v63  ;;  %v21284_v14 = vpop.permute.xlu0 %1525  ;;  %v1520_v62 = vpop.permute.xlu1 %1519  ;;  %5259 = vmatprep.mubr.bf16.mxu1 %v29025_v46 }
 0x1a9   :  { %v1602_v45 = vsel %vm1575_vm3, %v1520_v62, %v1522_v26  ;;  %v1603_v49 = vsel %vm1575_vm3, %v20997_v4, %v1520_v62 }
 0x1aa   :  { %v1792_v24 = vmul.f32 %v1647_v19, %v1603_v49  ;;  %v1793_v18 = vmul.f32 %v1651_v32, %v1602_v45  ;;  %3254 = vrot.lane.b32.xlu0 %v20396_v47, %s20188_s17  ;;  %2803 = vrot.lane.b32.xlu1 %v20435_v60, %s20187_s16  ;;  %v2460_v19 = vrot.slane %v21041_v56, %v20771_v1 }
 0x1ab   :  { %v2464_v45 = vrot.slane %v21041_v56, %v20774_v43  ;;  %v2149_v49 = vmul.f32 %v2007_v5, %v20345_v30 }
 0x1ac   :  { %v19682_v7 = vpack.c.bf16 %v1792_v24, %v1339_v34  ;;  %v2333_v4 = vpop.permute.xlu0 %2332  ;;  %v1524_v2 = vpop.permute.xlu1 %1523  ;;  %v19683_v52 = vpack.c.bf16 %v1793_v18, %v1340_v11 }
 0x1ad   :  { %v1600_v31 = vsel %vm1575_vm3, %v1524_v2, %v21284_v14  ;;  %v1601_v6 = vsel %vm1575_vm3, %v1522_v26, %v1524_v2  ;;  %v2148_v26 = vmul.f32 %v2003_v39, %v20306_v17  ;;  %v2468_v17 = vrot.slane %v21041_v56, %v20819_v16  ;;  %v29027_v56 = vld [vmem:[#allocation7_spill] sm:$0xff] }
 0x1ae   :  { %v1794_v51 = vmul.f32 %v1655_v36, %v1601_v6  ;;  %v1795_v32 = vmul.f32 %v1659_v29, %v1600_v31  ;;  %3258 = vrot.lane.b32.xlu0 %v20414_v53, %s20188_s17  ;;  %3252 = vrot.lane.b32.xlu1 %v20417_v54, %s20188_s17  ;;  %v2015_v36 = vrot.slane %v21034_v20, %v20819_v16  ;;  %v29028_v6 = vld [vmem:[#allocation14_spill] sm:$0xff] }
 0x1af   :  { %5188 = vmatprep.subr.bf16.mxu0 %v19683_v52  ;;  %v2150_v39 = vmul.f32 %v2011_v28, %v20324_v23  ;;  %v2913_v28 = vrot.slane %v21120_v57, %v20771_v1 }
 0x1b0   :  { %v19684_v63 = vpack.c.bf16 %v1794_v51, %v1341_v22  ;;  %5189 = vmatpush1.bf16.msra.mxu0 %v19682_v7  ;;  %v21324_v62 = vpop.permute.xlu0 %2336  ;;  %v2331_v34 = vpop.permute.xlu1 %2330  ;;  %v19685_v21 = vpack.c.bf16 %v1795_v32, %v1342_v9  ;;  %v2909_v32 = vrot.slane %v21120_v57, %v20768_v55 }
 0x1b1   :  { %v2410_v29 = vsel %vm2384_vm4, %v2331_v34, %v2333_v4  ;;  %v2411_v11 = vsel %vm2384_vm4, %v21064_v13, %v2331_v34 }
 0x1b2   :  { %v2601_v61 = vmul.f32 %v2456_v0, %v2411_v11  ;;  %v2602_v24 = vmul.f32 %v2460_v19, %v2410_v29  ;;  %3707 = vrot.lane.b32.xlu0 %v20396_v47, %s20189_s18  ;;  %3256 = vrot.lane.b32.xlu1 %v20435_v60, %s20188_s17  ;;  %v2151_v0 = vmul.f32 %v2015_v36, %v29027_v56  ;;  %v17994_v19 = vld [vmem:[%s28625_s1 + $0x40] ss:$8 sm:$0xf0] }
 0x1b3   :  { %5229 = vmatprep.subr.bf16.mxu1 %v19685_v21  ;;  %v29029_v21 = vld [vmem:[#allocation12_spill] sm:$0xff]  ;;  %v29030_v36 = vld [vmem:[#allocation10_spill] sm:$0xff]  ;;  %v3366_v29 = vrot.slane %v21126_v12, %v20771_v1 }
 0x1b4   :  { %v19714_v20 = vpack.c.bf16 %v2601_v61, %v2148_v26  ;;  %5230 = vmatpush1.bf16.msra.mxu1 %v19684_v63  ;;  %v2786_v13 = vpop.permute.xlu0 %2785  ;;  %v2335_v18 = vpop.permute.xlu1 %2334  ;;  %v19715_v40 = vpack.c.bf16 %v2602_v24, %v2149_v49  ;;  %v3362_v63 = vrot.slane %v21126_v12, %v20768_v55  ;;  %v18018_v49 = vld [vmem:[%s28625_s1 + $0x41] ss:$8 sm:$0xf0]  ;;  %v2921_v61 = vrot.slane %v21120_v57, %v20819_v16 }
 0x1b5   :  { %v2408_v30 = vsel %vm2384_vm4, %v2335_v18, %v21324_v62  ;;  %v2409_v7 = vsel %vm2384_vm4, %v2333_v4, %v2335_v18  ;;  %v17993_v4 = vld [vmem:[%s28625_s1 + $0x40] ss:$8 sm:$0xf]  ;;  %v3374_v18 = vrot.slane %v21126_v12, %v20819_v16 }
 0x1b6   :  { %v2603_v2 = vmul.f32 %v2464_v45, %v2409_v7  ;;  %v2604_v52 = vmul.f32 %v2468_v17, %v2408_v30  ;;  %3711 = vrot.lane.b32.xlu0 %v20414_v53, %s20189_s18  ;;  %3705 = vrot.lane.b32.xlu1 %v20417_v54, %s20189_s18  ;;  %v21383_v11 = vor.u32 %v17994_v19, %v17993_v4  ;;  %v18017_v45 = vld [vmem:[%s28625_s1 + $0x41] ss:$8 sm:$0xf] }
 0x1b7   :  { %5190 = vmatprep.subr.bf16.mxu0 %v19715_v40 }
 0x1b8   :  { %v19716_v5 = vpack.c.bf16 %v2603_v2, %v2150_v39  ;;  %5191 = vmatpush1.bf16.msra.mxu0 %v19714_v20  ;;  %v21354_v23 = vpop.permute.xlu0 %2789  ;;  %v2784_v22 = vpop.permute.xlu1 %2783  ;;  %v19717_v31 = vpack.c.bf16 %v2604_v52, %v2151_v0  ;;  %v3370_v20 = vrot.slane %v21126_v12, %v20774_v43  ;;  %v21412_v12 = vor.u32 %v18018_v49, %v18017_v45  ;;  %v29031_v49 = vld [vmem:[#allocation29_spill] sm:$0xff] }
 0x1b9   :  { %v2863_v26 = vsel %vm2837_vm5, %v2784_v22, %v2786_v13  ;;  %v2864_v34 = vsel %vm2837_vm5, %v21129_v44, %v2784_v22  ;;  %v2917_v44 = vrot.slane %v21120_v57, %v20774_v43  ;;  %v312_v8 = vrot.slane %v21383_v11, %v20791_v38 }
 0x1ba   :  { %643 = vrot.lane.b32.xlu0 %v29028_v6, %s20183_s30  ;;  %3709 = vrot.lane.b32.xlu1 %v20435_v60, %s20189_s18  ;;  %v3054_v40 = vmul.f32 %v2909_v32, %v2864_v34  ;;  %v3055_v39 = vmul.f32 %v2913_v28, %v2863_v26  ;;  %v308_v34 = vrot.slane %v21383_v11, %v20763_v27 }
 0x1bb   :  { %5231 = vmatprep.subr.bf16.mxu1 %v19717_v31  ;;  %v3815_v31 = vrot.slane %v21183_v59, %v20768_v55  ;;  %v761_v45 = vrot.slane %v21412_v12, %v20763_v27 }
 0x1bc   :  { %5232 = vmatpush1.bf16.msra.mxu1 %v19716_v5  ;;  %v3239_v9 = vpop.permute.xlu0 %3238  ;;  %v2788_v51 = vpop.permute.xlu1 %2787 }
 0x1bd   :  { %v2862_v57 = vsel %vm2837_vm5, %v2786_v13, %v2788_v51  ;;  %v2861_v56 = vsel %vm2837_vm5, %v2788_v51, %v21354_v23  ;;  %v3819_v51 = vrot.slane %v21183_v59, %v20771_v1 }
 0x1be   :  { %1092 = vrot.lane.b32.xlu0 %v29029_v21, %s20184_s0  ;;  %641 = vrot.lane.b32.xlu1 %v29030_v36, %s20183_s30  ;;  %v3056_v4 = vmul.f32 %v2917_v44, %v2862_v57  ;;  %v3057_v28 = vmul.f32 %v2921_v61, %v2861_v56  ;;  %v29032_v44 = vld [vmem:[#allocation25_spill] sm:$0xff]  ;;  %v3827_v56 = vrot.slane %v21183_v59, %v20819_v16 }
 0x1bf   :  { %v240_v61 = vsel %vm217_vm0, %v29032_v44, %v29031_v49 }
 0x1c0   :  { %v21395_v24 = vpop.permute.xlu0 %3242  ;;  %v3237_v17 = vpop.permute.xlu1 %3236 }
 0x1c1   :  { %v3316_v30 = vsel %vm3290_vm6, %v3237_v17, %v3239_v9  ;;  %v3317_v7 = vsel %vm3290_vm6, %v21174_v33, %v3237_v17  ;;  %v304_v33 = vrot.slane %v21383_v11, %v20925_v10  ;;  %v29033_v17 = vld [vmem:[#allocation62_spill] sm:$0xff] }
 0x1c2   :  { %v3507_v2 = vmul.f32 %v3362_v63, %v3317_v7  ;;  %v3508_v52 = vmul.f32 %v3366_v29, %v3316_v30  ;;  %1096 = vrot.lane.b32.xlu0 %v29028_v6, %s20184_s0  ;;  %1090 = vrot.lane.b32.xlu1 %v20414_v53, %s20184_s0  ;;  %v316_v29 = vrot.slane %v21383_v11, %v20777_v50 }
 0x1c4   :  { %v19746_v0 = vpack.c.bf16 %v3507_v2, %v3054_v40  ;;  %v3692_v5 = vpop.permute.xlu0 %3691  ;;  %v3241_v13 = vpop.permute.xlu1 %3240  ;;  %v19747_v22 = vpack.c.bf16 %v3508_v52, %v3055_v39  ;;  %v3823_v52 = vrot.slane %v21183_v59, %v20774_v43  ;;  %v765_v59 = vrot.slane %v21412_v12, %v20791_v38 }
 0x1c5   :  { %v3314_v19 = vsel %vm3290_vm6, %v3241_v13, %v21395_v24  ;;  %v3315_v32 = vsel %vm3290_vm6, %v3239_v9, %v3241_v13  ;;  %v757_v9 = vrot.slane %v21412_v12, %v20925_v10  ;;  %v29035_v13 = vld [vmem:[#allocation60_spill] sm:$0xff] }
 0x1c6   :  { %v3509_v63 = vmul.f32 %v3370_v20, %v3315_v32  ;;  %v3510_v26 = vmul.f32 %v3374_v18, %v3314_v19  ;;  %1545 = vrot.lane.b32.xlu0 %v29029_v21, %s20185_s14  ;;  %1094 = vrot.lane.b32.xlu1 %v29030_v36, %s20184_s0  ;;  %v29034_v20 = vld [vmem:[#allocation58_spill] sm:$0xff] }
 0x1c7   :  { %5192 = vmatprep.subr.bf16.mxu0 %v19747_v22  ;;  %v692_v18 = vsel %vm669_vm1, %v29034_v20, %v29033_v17 }
 0x1c8   :  { %v19748_v40 = vpack.c.bf16 %v3509_v63, %v3056_v4  ;;  %5193 = vmatpush1.bf16.msra.mxu0 %v19746_v0  ;;  %v21448_v39 = vpop.permute.xlu0 %3695  ;;  %v3690_v30 = vpop.permute.xlu1 %3689  ;;  %v19749_v7 = vpack.c.bf16 %v3510_v26, %v3057_v28  ;;  %v693_v0 = vsel %vm669_vm1, %v29035_v13, %v29034_v20  ;;  %v891_v32 = vmul.f32 %v761_v45, %v692_v18  ;;  %v29038_v63 = vld [vmem:[#allocation59_spill] sm:$0xff] }
 0x1c9   :  { %v3769_v57 = vsel %vm3743_vm7, %v3690_v30, %v3692_v5  ;;  %v3770_v2 = vsel %vm3743_vm7, %v21207_v48, %v3690_v30  ;;  %v29036_v48 = vld [vmem:[#allocation27_spill] sm:$0xff]  ;;  %v769_v28 = vrot.slane %v21412_v12, %v20777_v50 }
 0x1ca   :  { %v3960_v22 = vmul.f32 %v3815_v31, %v3770_v2  ;;  %v3961_v4 = vmul.f32 %v3819_v51, %v3769_v57  ;;  %1549 = vrot.lane.b32.xlu0 %v29028_v6, %s20185_s14  ;;  %1543 = vrot.lane.b32.xlu1 %v20414_v53, %s20185_s14  ;;  %v241_v19 = vsel %vm217_vm0, %v29036_v48, %v29032_v44  ;;  %v29037_v51 = vld [vmem:[#allocation64_spill] sm:$0xff]  ;;  %v29039_v18 = vld [vmem:[#allocation31_spill] sm:$0xff]  ;;  %v29040_v2 = vld [vmem:[#allocation26_spill] sm:$0xff] }
 0x1cb   :  { %5233 = vmatprep.subr.bf16.mxu1 %v19749_v7  ;;  %v438_v31 = vmul.f32 %v308_v34, %v240_v61  ;;  %v690_v26 = vsel %vm669_vm1, %v29038_v63, %v29037_v51  ;;  %v18041_v45 = vld [vmem:[%s28625_s1 + $0x42] ss:$8 sm:$0xf]  ;;  %v238_v34 = vsel %vm217_vm0, %v29040_v2, %v29039_v18  ;;  %v890_v61 = vmul.f32 %v757_v9, %v693_v0  ;;  %v18066_v48 = vld [vmem:[%s28625_s1 + $0x43] ss:$8 sm:$0xf0] }
 0x1cc   :  { %v19778_v20 = vpack.c.bf16 %v3960_v22, %v3960_v22  ;;  %v19779_v30 = vpack.c.bf16 %v3961_v4, %v3961_v4  ;;  %5234 = vmatpush1.bf16.msra.mxu1 %v19748_v40  ;;  %v21479_v57 = vpop.permute.xlu0 %1076  ;;  %v3694_v44 = vpop.permute.xlu1 %3693  ;;  %v18042_v13 = vld [vmem:[%s28625_s1 + $0x42] ss:$8 sm:$0xf0]  ;;  %v18065_v22 = vld [vmem:[%s28625_s1 + $0x43] ss:$8 sm:$0xf]  ;;  %v691_v9 = vsel %vm669_vm1, %v29033_v17, %v29038_v63  ;;  %v893_v58 = vmul.f32 %v769_v28, %v690_v26 }
 0x1cd   :  { %v3767_v7 = vsel %vm3743_vm7, %v3694_v44, %v21448_v39  ;;  %v3768_v40 = vsel %vm3743_vm7, %v3692_v5, %v3694_v44  ;;  %v437_v44 = vmul.f32 %v304_v33, %v241_v19  ;;  %v19655_v17 = vpack.c.bf16 %v891_v32, %v438_v31  ;;  %v29041_v32 = vld [vmem:[#allocation11_spill] sm:$0xff] }
 0x1ce   :  { %v3962_v0 = vmul.f32 %v3823_v52, %v3768_v40  ;;  %v3963_v4 = vmul.f32 %v3827_v56, %v3767_v7  ;;  %2356 = vrot.lane.b32.xlu0 %v29030_v36, %s20186_s15  ;;  %1547 = vrot.lane.b32.xlu1 %v29030_v36, %s20185_s14  ;;  %v5021_v5 = vsel %vm5007_vm8, %v19778_v20, 0  ;;  %v239_v52 = vsel %vm217_vm0, %v29031_v49, %v29040_v2  ;;  %v18089_v2 = vld [vmem:[%s28625_s1 + $0x44] ss:$8 sm:$0xf] }
 0x1cf   :  { %18371 = vmatprep.subr.msk.bf16.mxu0 %vm5007_vm8, %v19779_v30  ;;  %v21520_v7 = vor.u32 %v18042_v13, %v18041_v45  ;;  %v440_v19 = vmul.f32 %v316_v29, %v238_v34  ;;  %v892_v40 = vmul.f32 %v765_v59, %v691_v9  ;;  %v21522_v28 = vor.u32 %v18066_v48, %v18065_v22  ;;  %v18113_v13 = vld [vmem:[%s28625_s1 + $0x45] ss:$8 sm:$0xf] }
 0x1d0   :  { %v19780_v56 = vpack.c.bf16 %v3962_v0, %v3962_v0  ;;  %v19781_v63 = vpack.c.bf16 %v3963_v4, %v3963_v4  ;;  %5195 = vmatpush1.bf16.msra.mxu0 %v5021_v5  ;;  %v21518_v20 = vpop.permute.xlu0 %1080  ;;  %v1075_v33 = vpop.permute.xlu1 %1074  ;;  %v19654_v26 = vpack.c.bf16 %v890_v61, %v437_v44  ;;  %v439_v31 = vmul.f32 %v312_v8, %v239_v52  ;;  %v18090_v8 = vld [vmem:[%s28625_s1 + $0x44] ss:$8 sm:$0xf0]  ;;  %v18114_v22 = vld [vmem:[%s28625_s1 + $0x45] ss:$8 sm:$0xf0] }
 0x1d1   :  { %5268 = vmatprep.subr.bf16.mxu0 %v19655_v17  ;;  %v19657_v29 = vpack.c.bf16 %v893_v58, %v440_v19  ;;  %v1210_v59 = vrot.slane %v21520_v7, %v20925_v10  ;;  %v1214_v61 = vrot.slane %v21520_v7, %v20763_v27  ;;  %v1663_v58 = vrot.slane %v21522_v28, %v20925_v10 }
 0x1d2   :  { %2360 = vrot.lane.b32.xlu0 %v29041_v32, %s20186_s15  ;;  %2354 = vrot.lane.b32.xlu1 %v29029_v21, %s20186_s15  ;;  %v5027_v49 = vsel %vm5007_vm8, %v19780_v56, 0  ;;  %v19656_v34 = vpack.c.bf16 %v892_v40, %v439_v31  ;;  %v1145_v9 = vsel %vm1122_vm2, %v1075_v33, %v21479_v57  ;;  %v1146_v0 = vsel %vm1122_vm2, %v21233_v3, %v1075_v33 }
 0x1d3   :  { %18373 = vmatprep.subr.msk.bf16.mxu1 %vm5007_vm8, %v19781_v63  ;;  %18372 = vmatmul.mubr.msk.bf16.vlgmr.msra.gmra.mrb[4].mxu0 %vm5003_vm9, %v21238_v15  ;;  %v1667_v4 = vrot.slane %v21522_v28, %v20763_v27  ;;  %v1218_v5 = vrot.slane %v21520_v7, %v20791_v38  ;;  %v1222_v48 = vrot.slane %v21520_v7, %v20777_v50 }
 0x1d4   :  { %5236 = vmatpush1.bf16.msra.mxu1 %v5027_v49  ;;  %5269 = vmatpush1.bf16.msra.mxu0 %v19654_v26  ;;  %v1530_v30 = vpop.permute.xlu0 %1529  ;;  %v1079_v45 = vpop.permute.xlu1 %1078  ;;  %v21569_v44 = vor.u32 %v18090_v8, %v18089_v2  ;;  %v1671_v52 = vrot.slane %v21522_v28, %v20791_v38  ;;  %v1675_v56 = vrot.slane %v21522_v28, %v20777_v50 }
 0x1d5   :  { %5309 = vmatprep.subr.bf16.mxu1 %v19657_v29  ;;  %5300 = vmatprep.mubr.bf16.mxu0 %v29025_v46  ;;  %v21577_v63 = vor.u32 %v18114_v22, %v18113_v13  ;;  %v1343_v33 = vmul.f32 %v1210_v59, %v1146_v0  ;;  %v1344_v19 = vmul.f32 %v1214_v61, %v1145_v9 }
 0x1d6   :  { %2809 = vrot.lane.b32.xlu0 %v29030_v36, %s20187_s16  ;;  %2358 = vrot.lane.b32.xlu1 %v29028_v6, %s20186_s15  ;;  %v1144_v49 = vsel %vm1122_vm2, %v21479_v57, %v1079_v45  ;;  %v1143_v59 = vsel %vm1122_vm2, %v1079_v45, %v21518_v20  ;;  %v2019_v2 = vrot.slane %v21569_v44, %v20925_v10 }
 0x1d7   :  { %18374 = vmatmul.mubr.msk.bf16.vlgmr.msra.gmra.mrb[4].mxu1 %vm5003_vm9, %v21238_v15  ;;  %v2472_v57 = vrot.slane %v21577_v63, %v20925_v10  ;;  %v1345_v13 = vmul.f32 %v1218_v5, %v1144_v49  ;;  %v2476_v9 = vrot.slane %v21577_v63, %v20763_v27  ;;  %v1346_v0 = vmul.f32 %v1222_v48, %v1143_v59 }
 0x1d8   :  { %5310 = vmatpush1.bf16.msra.mxu1 %v19656_v34  ;;  %v21571_v3 = vpop.permute.xlu0 %1533  ;;  %v1528_v17 = vpop.permute.xlu1 %1527  ;;  %5341 = vmatprep.mubr.bf16.mxu1 %v29025_v46  ;;  %v2027_v5 = vrot.slane %v21569_v44, %v20791_v38 }
 0x1d9   :  { %v1598_v40 = vsel %vm1575_vm3, %v1528_v17, %v1530_v30  ;;  %v1599_v26 = vsel %vm1575_vm3, %v21284_v14, %v1528_v17 }
 0x1da   :  { %v1796_v31 = vmul.f32 %v1663_v58, %v1599_v26  ;;  %v1797_v29 = vmul.f32 %v1667_v4, %v1598_v40  ;;  %2813 = vrot.lane.b32.xlu0 %v29041_v32, %s20187_s16  ;;  %2807 = vrot.lane.b32.xlu1 %v29029_v21, %s20187_s16  ;;  %v2023_v58 = vrot.slane %v21569_v44, %v20763_v27 }
 0x1dc   :  { %v19686_v14 = vpack.c.bf16 %v1796_v31, %v1343_v33  ;;  %v2341_v8 = vpop.permute.xlu0 %2340  ;;  %v1532_v34 = vpop.permute.xlu1 %1531  ;;  %v19687_v61 = vpack.c.bf16 %v1797_v29, %v1344_v19  ;;  %v2480_v31 = vrot.slane %v21577_v63, %v20791_v38  ;;  %v2153_v29 = vmul.f32 %v2023_v58, %v20381_v42  ;;  %v18137_v58 = vld [vmem:[%s28625_s1 + $0x46] ss:$8 sm:$0xf] }
 0x1dd   :  { %v1596_v22 = vsel %vm1575_vm3, %v1532_v34, %v21571_v3  ;;  %v1597_v45 = vsel %vm1575_vm3, %v1530_v30, %v1532_v34  ;;  %v29042_v30 = vld [vmem:[#allocation6_spill] sm:$0xff] }
 0x1de   :  { %v1798_v4 = vmul.f32 %v1671_v52, %v1597_v45  ;;  %v1799_v17 = vmul.f32 %v1675_v56, %v1596_v22  ;;  %3262 = vrot.lane.b32.xlu0 %v29030_v36, %s20188_s17  ;;  %2811 = vrot.lane.b32.xlu1 %v29028_v6, %s20187_s16  ;;  %v2152_v40 = vmul.f32 %v2019_v2, %v29042_v30  ;;  %v18138_v45 = vld [vmem:[%s28625_s1 + $0x46] ss:$8 sm:$0xf0] }
 0x1df   :  { %5270 = vmatprep.subr.bf16.mxu0 %v19687_v61  ;;  %v2031_v52 = vrot.slane %v21569_v44, %v20777_v50  ;;  %v2484_v2 = vrot.slane %v21577_v63, %v20777_v50  ;;  %v2154_v22 = vmul.f32 %v2027_v5, %v20360_v35  ;;  %v29043_v35 = vld [vmem:[#allocation8_spill] sm:$0xff] }
 0x1e0   :  { %v19688_v33 = vpack.c.bf16 %v1798_v4, %v1345_v13  ;;  %5271 = vmatpush1.bf16.msra.mxu0 %v19686_v14  ;;  %v21614_v19 = vpop.permute.xlu0 %2344  ;;  %v2339_v26 = vpop.permute.xlu1 %2338  ;;  %v19689_v48 = vpack.c.bf16 %v1799_v17, %v1346_v0  ;;  %v18162_v17 = vld [vmem:[%s28625_s1 + $0x47] ss:$8 sm:$0xf0] }
 0x1e1   :  { %v2406_v56 = vsel %vm2384_vm4, %v2339_v26, %v2341_v8  ;;  %v2407_v49 = vsel %vm2384_vm4, %v21324_v62, %v2339_v26  ;;  %v2155_v4 = vmul.f32 %v2031_v52, %v29043_v35  ;;  %v21658_v26 = vor.u32 %v18138_v45, %v18137_v58 }
 0x1e2   :  { %v2605_v59 = vmul.f32 %v2472_v57, %v2407_v49  ;;  %v2606_v14 = vmul.f32 %v2476_v9, %v2406_v56  ;;  %3266 = vrot.lane.b32.xlu0 %v29041_v32, %s20188_s17  ;;  %3260 = vrot.lane.b32.xlu1 %v29029_v21, %s20188_s17 }
 0x1e3   :  { %5311 = vmatprep.subr.bf16.mxu1 %v19689_v48  ;;  %v2925_v49 = vrot.slane %v21658_v26, %v20925_v10 }
 0x1e4   :  { %v19718_v34 = vpack.c.bf16 %v2605_v59, %v2152_v40  ;;  %5312 = vmatpush1.bf16.msra.mxu1 %v19688_v33  ;;  %v2794_v62 = vpop.permute.xlu0 %2793  ;;  %v2343_v61 = vpop.permute.xlu1 %2342  ;;  %v19719_v13 = vpack.c.bf16 %v2606_v14, %v2153_v29  ;;  %v18185_v59 = vld [vmem:[%s28625_s1 + $0x140] ss:$8 sm:$0xf] }
 0x1e5   :  { %v2404_v42 = vsel %vm2384_vm4, %v2343_v61, %v21614_v19  ;;  %v2405_v57 = vsel %vm2384_vm4, %v2341_v8, %v2343_v61  ;;  %v18161_v8 = vld [vmem:[%s28625_s1 + $0x47] ss:$8 sm:$0xf]  ;;  %v18186_v14 = vld [vmem:[%s28625_s1 + $0x140] ss:$8 sm:$0xf0] }
 0x1e6   :  { %v2607_v9 = vmul.f32 %v2480_v31, %v2405_v57  ;;  %v2608_v0 = vmul.f32 %v2484_v2, %v2404_v42  ;;  %3715 = vrot.lane.b32.xlu0 %v29030_v36, %s20189_s18  ;;  %3264 = vrot.lane.b32.xlu1 %v29028_v6, %s20188_s17  ;;  %v21660_v48 = vor.u32 %v18162_v17, %v18161_v8  ;;  %v29044_v61 = vld [vmem:[#allocation16_spill] sm:$0xff] }
 0x1e7   :  { %5272 = vmatprep.subr.bf16.mxu0 %v19719_v13  ;;  %v2929_v31 = vrot.slane %v21658_v26, %v20763_v27  ;;  %v2937_v42 = vrot.slane %v21658_v26, %v20777_v50 }
 0x1e8   :  { %v19720_v5 = vpack.c.bf16 %v2607_v9, %v2154_v22  ;;  %5273 = vmatpush1.bf16.msra.mxu0 %v19718_v34  ;;  %v21656_v33 = vpop.permute.xlu0 %2797  ;;  %v2792_v30 = vpop.permute.xlu1 %2791  ;;  %v19721_v40 = vpack.c.bf16 %v2608_v0, %v2155_v4  ;;  %v3378_v29 = vrot.slane %v21660_v48, %v20925_v10  ;;  %v3382_v13 = vrot.slane %v21660_v48, %v20763_v27 }
 0x1e9   :  { %v2859_v2 = vsel %vm2837_vm5, %v2792_v30, %v2794_v62  ;;  %v2860_v34 = vsel %vm2837_vm5, %v21354_v23, %v2792_v30  ;;  %v2933_v22 = vrot.slane %v21658_v26, %v20791_v38  ;;  %v3386_v23 = vrot.slane %v21660_v48, %v20791_v38 }
 0x1ea   :  { %3719 = vrot.lane.b32.xlu0 %v29041_v32, %s20189_s18  ;;  %3713 = vrot.lane.b32.xlu1 %v29029_v21, %s20189_s18  ;;  %v3390_v45 = vrot.slane %v21660_v48, %v20777_v50  ;;  %v21699_v9 = vor.u32 %v18186_v14, %v18185_v59  ;;  %v3058_v0 = vmul.f32 %v2925_v49, %v2860_v34  ;;  %v29049_v49 = vld [vmem:[#allocation33_spill] sm:$0xff] }
 0x1eb   :  { %5313 = vmatprep.subr.bf16.mxu1 %v19721_v40  ;;  %v3059_v35 = vmul.f32 %v2929_v31, %v2859_v2  ;;  %v29045_v40 = vld [vmem:[#allocation18_spill] sm:$0xff] }
 0x1ec   :  { %5314 = vmatpush1.bf16.msra.mxu1 %v19720_v5  ;;  %v3247_v52 = vpop.permute.xlu0 %3246  ;;  %v2796_v56 = vpop.permute.xlu1 %2795  ;;  %v3831_v2 = vrot.slane %v21699_v9, %v20925_v10 }
 0x1ed   :  { %v2858_v17 = vsel %vm2837_vm5, %v2794_v62, %v2796_v56  ;;  %v2857_v31 = vsel %vm2837_vm5, %v2796_v56, %v21656_v33  ;;  %v3835_v56 = vrot.slane %v21699_v9, %v20763_v27  ;;  %v29054_v27 = vld [vmem:[#allocation30_spill] sm:$0xff] }
 0x1ee   :  { %647 = vrot.lane.b32.xlu0 %v29044_v61, %s20183_s30  ;;  %3717 = vrot.lane.b32.xlu1 %v29028_v6, %s20189_s18  ;;  %v3060_v34 = vmul.f32 %v2933_v22, %v2858_v17  ;;  %v328_v22 = vrot.slane %v21383_v11, %v20774_v43  ;;  %v332_v17 = vrot.slane %v21383_v11, %v20819_v16 }
 0x1ef   :  { %v236_v6 = vsel %vm217_vm0, %v29050_v25, %v29049_v49 }
 0x1f0   :  { %v21693_v57 = vpop.permute.xlu0 %3250  ;;  %v3245_v58 = vpop.permute.xlu1 %3244 }
 0x1f1   :  { %v3312_v4 = vsel %vm3290_vm6, %v3245_v58, %v3247_v52  ;;  %v3313_v8 = vsel %vm3290_vm6, %v21395_v24, %v3245_v58  ;;  %v324_v24 = vrot.slane %v21383_v11, %v20771_v1 }
 0x1f2   :  { %v3511_v5 = vmul.f32 %v3378_v29, %v3313_v8  ;;  %v3512_v30 = vmul.f32 %v3382_v13, %v3312_v4  ;;  %651 = vrot.lane.b32.xlu0 %v29045_v40, %s20183_s30  ;;  %645 = vrot.lane.b32.xlu1 %v29041_v32, %s20183_s30  ;;  %v3061_v4 = vmul.f32 %v2937_v42, %v2857_v31 }
 0x1f3   :  { %v777_v42 = vrot.slane %v21412_v12, %v20771_v1 }
 0x1f4   :  { %v19750_v59 = vpack.c.bf16 %v3511_v5, %v3058_v0  ;;  %v3700_v62 = vpop.permute.xlu0 %3699  ;;  %v3249_v29 = vpop.permute.xlu1 %3248  ;;  %v19751_v14 = vpack.c.bf16 %v3512_v30, %v3059_v35  ;;  %v29046_v35 = vld [vmem:[#allocation13_spill] sm:$0xff] }
 0x1f5   :  { %v3310_v13 = vsel %vm3290_vm6, %v3249_v29, %v21693_v57  ;;  %v3311_v58 = vsel %vm3290_vm6, %v3247_v52, %v3249_v29  ;;  %v773_v52 = vrot.slane %v21412_v12, %v20768_v55  ;;  %v29048_v5 = vld [vmem:[#allocation61_spill] sm:$0xff] }
 0x1f6   :  { %v3513_v8 = vmul.f32 %v3386_v23, %v3311_v58  ;;  %v3514_v0 = vmul.f32 %v3390_v45, %v3310_v13  ;;  %1100 = vrot.lane.b32.xlu0 %v29044_v61, %s20184_s0  ;;  %649 = vrot.lane.b32.xlu1 %v29046_v35, %s20183_s30  ;;  %v781_v23 = vrot.slane %v21412_v12, %v20774_v43  ;;  %v29047_v45 = vld [vmem:[#allocation66_spill] sm:$0xff] }
 0x1f7   :  { %5274 = vmatprep.subr.bf16.mxu0 %v19751_v14  ;;  %v688_v30 = vsel %vm669_vm1, %v29048_v5, %v29047_v45 }
 0x1f8   :  { %v19752_v31 = vpack.c.bf16 %v3513_v8, %v3060_v34  ;;  %5275 = vmatpush1.bf16.msra.mxu0 %v19750_v59  ;;  %v21746_v29 = vpop.permute.xlu0 %3703  ;;  %v3698_v13 = vpop.permute.xlu1 %3697  ;;  %v19753_v58 = vpack.c.bf16 %v3514_v0, %v3061_v4  ;;  %v3839_v34 = vrot.slane %v21699_v9, %v20791_v38  ;;  %v3843_v4 = vrot.slane %v21699_v9, %v20777_v50  ;;  %v29053_v38 = vld [vmem:[#allocation35_spill] sm:$0xff] }
 0x1f9   :  { %v3765_v14 = vsel %vm3743_vm7, %v3698_v13, %v3700_v62  ;;  %v3766_v36 = vsel %vm3743_vm7, %v21448_v39, %v3698_v13  ;;  %v237_v0 = vsel %vm217_vm0, %v29039_v18, %v29050_v25  ;;  %v895_v39 = vmul.f32 %v777_v42, %v688_v30  ;;  %v29051_v13 = vld [vmem:[#allocation68_spill] sm:$0xff] }
 0x1fa   :  { %v3964_v59 = vmul.f32 %v3831_v2, %v3766_v36  ;;  %v3965_v8 = vmul.f32 %v3835_v56, %v3765_v14  ;;  %1104 = vrot.lane.b32.xlu0 %v29045_v40, %s20184_s0  ;;  %1098 = vrot.lane.b32.xlu1 %v29041_v32, %s20184_s0  ;;  %v689_v36 = vsel %vm669_vm1, %v29037_v51, %v29048_v5  ;;  %v29052_v14 = vld [vmem:[#allocation63_spill] sm:$0xff] }
 0x1fb   :  { %v785_v2 = vrot.slane %v21412_v12, %v20819_v16  ;;  %5315 = vmatprep.subr.bf16.mxu1 %v19753_v58  ;;  %v442_v56 = vmul.f32 %v324_v24, %v236_v6  ;;  %v686_v21 = vsel %vm669_vm1, %v29052_v14, %v29051_v13  ;;  %v234_v51 = vsel %vm217_vm0, %v29054_v27, %v29053_v38 }
 0x1fc   :  { %v19782_v53 = vpack.c.bf16 %v3964_v59, %v3964_v59  ;;  %v19783_v50 = vpack.c.bf16 %v3965_v8, %v3965_v8  ;;  %5316 = vmatpush1.bf16.msra.mxu1 %v19752_v31  ;;  %v1085_v25 = vpop.permute.xlu0 %1084  ;;  %v3702_v18 = vpop.permute.xlu1 %3701  ;;  %v687_v6 = vsel %vm669_vm1, %v29047_v45, %v29052_v14  ;;  %v894_v42 = vmul.f32 %v773_v52, %v689_v36 }
 0x1fd   :  { %v3763_v12 = vsel %vm3743_vm7, %v3702_v18, %v21746_v29  ;;  %v3764_v24 = vsel %vm3743_vm7, %v3700_v62, %v3702_v18  ;;  %v235_v45 = vsel %vm217_vm0, %v29049_v49, %v29054_v27  ;;  %v897_v58 = vmul.f32 %v785_v2, %v686_v21 }
 0x1fe   :  { %v3966_v5 = vmul.f32 %v3839_v34, %v3764_v24  ;;  %v3967_v30 = vmul.f32 %v3843_v4, %v3763_v12  ;;  %1553 = vrot.lane.b32.xlu0 %v29044_v61, %s20185_s14  ;;  %1102 = vrot.lane.b32.xlu1 %v29046_v35, %s20184_s0  ;;  %v5033_v31 = vsel %vm5007_vm8, %v19782_v53, 0  ;;  %v19659_v62 = vpack.c.bf16 %v895_v39, %v442_v56 }
 0x1ff   :  { %18375 = vmatprep.subr.msk.bf16.mxu0 %vm5007_vm8, %v19783_v50  ;;  %v29055_v52 = vrot.slane %v21383_v11, %v20768_v55  ;;  %v896_v59 = vmul.f32 %v781_v23, %v687_v6  ;;  %v444_v14 = vmul.f32 %v332_v17, %v234_v51  ;;  %v443_v18 = vmul.f32 %v328_v22, %v235_v45 }
 0x200   :  { %v19784_v8 = vpack.c.bf16 %v3966_v5, %v3966_v5  ;;  %v19785_v4 = vpack.c.bf16 %v3967_v30, %v3967_v30  ;;  %5277 = vmatpush1.bf16.msra.mxu0 %v5033_v31  ;;  %v21805_v36 = vpop.permute.xlu0 %1088  ;;  %v1083_v53 = vpop.permute.xlu1 %1082  ;;  %v1226_v22 = vrot.slane %v21520_v7, %v20768_v55  ;;  %v1230_v17 = vrot.slane %v21520_v7, %v20771_v1 }
 0x201   :  { %v441_v34 = vmul.f32 %v29055_v52, %v237_v0  ;;  %5350 = vmatprep.subr.bf16.mxu0 %v19659_v62  ;;  %v19661_v50 = vpack.c.bf16 %v897_v58, %v444_v14  ;;  %v19660_v21 = vpack.c.bf16 %v896_v59, %v443_v18  ;;  %v1679_v23 = vrot.slane %v21522_v28, %v20768_v55  ;;  %v29056_v62 = vld [vmem:[#allocation15_spill] sm:$0xff] }
 0x202   :  { %1557 = vrot.lane.b32.xlu0 %v29045_v40, %s20185_s14  ;;  %1551 = vrot.lane.b32.xlu1 %v29041_v32, %s20185_s14  ;;  %v5039_v27 = vsel %vm5007_vm8, %v19784_v8, 0  ;;  %v1141_v0 = vsel %vm1122_vm2, %v1083_v53, %v1085_v25  ;;  %v1142_v39 = vsel %vm1122_vm2, %v21518_v20, %v1083_v53  ;;  %v1683_v2 = vrot.slane %v21522_v28, %v20771_v1 }
 0x203   :  { %v19658_v12 = vpack.c.bf16 %v894_v42, %v441_v34  ;;  %18377 = vmatprep.subr.msk.bf16.mxu1 %vm5007_vm8, %v19785_v4  ;;  %18376 = vmatmul.mubr.msk.bf16.vlgmr.msra.gmra.mrb[8].mxu0 %vm5003_vm9, %v21238_v15  ;;  %v1234_v56 = vrot.slane %v21520_v7, %v20774_v43  ;;  %v1238_v51 = vrot.slane %v21520_v7, %v20819_v16 }
 0x204   :  { %5318 = vmatpush1.bf16.msra.mxu1 %v5039_v27  ;;  %v1538_v11 = vpop.permute.xlu0 %1537  ;;  %v1087_v49 = vpop.permute.xlu1 %1086  ;;  %5382 = vmatprep.mubr.bf16.mxu0 %v29025_v46  ;;  %v1687_v24 = vrot.slane %v21522_v28, %v20774_v43  ;;  %v1691_v42 = vrot.slane %v21522_v28, %v20819_v16  ;;  %v1347_v5 = vmul.f32 %v1226_v22, %v1142_v39 }
 0x205   :  { %5351 = vmatpush1.bf16.msra.mxu0 %v19658_v12  ;;  %5391 = vmatprep.subr.bf16.mxu1 %v19661_v50  ;;  %v1348_v30 = vmul.f32 %v1230_v17, %v1141_v0  ;;  %v1140_v31 = vsel %vm1122_vm2, %v1085_v25, %v1087_v49  ;;  %v1139_v28 = vsel %vm1122_vm2, %v1087_v49, %v21805_v36 }
 0x206   :  { %2364 = vrot.lane.b32.xlu0 %v29046_v35, %s20186_s15  ;;  %1555 = vrot.lane.b32.xlu1 %v29046_v35, %s20185_s14  ;;  %v2035_v52 = vrot.slane %v21569_v44, %v20768_v55  ;;  %v2488_v25 = vrot.slane %v21577_v63, %v20768_v55  ;;  %v2039_v4 = vrot.slane %v21569_v44, %v20771_v1 }
 0x207   :  { %18378 = vmatmul.mubr.msk.bf16.vlgmr.msra.gmra.mrb[8].mxu1 %vm5003_vm9, %v21238_v15  ;;  %v1349_v53 = vmul.f32 %v1234_v56, %v1140_v31  ;;  %v2492_v12 = vrot.slane %v21577_v63, %v20771_v1  ;;  %v1350_v27 = vmul.f32 %v1238_v51, %v1139_v28  ;;  %v2043_v49 = vrot.slane %v21569_v44, %v20774_v43 }
 0x208   :  { %5392 = vmatpush1.bf16.msra.mxu1 %v19660_v21  ;;  %v21839_v20 = vpop.permute.xlu0 %1541  ;;  %v1536_v6 = vpop.permute.xlu1 %1535  ;;  %5423 = vmatprep.mubr.bf16.mxu1 %v29025_v46  ;;  %v2047_v39 = vrot.slane %v21569_v44, %v20819_v16  ;;  %v2496_v51 = vrot.slane %v21577_v63, %v20774_v43 }
 0x209   :  { %v1594_v15 = vsel %vm1575_vm3, %v1536_v6, %v1538_v11  ;;  %v1595_v7 = vsel %vm1575_vm3, %v21571_v3, %v1536_v6  ;;  %v2157_v6 = vmul.f32 %v2039_v4, %v20417_v54  ;;  %v3394_v4 = vrot.slane %v21660_v48, %v20768_v55 }
 0x20a   :  { %v1800_v45 = vmul.f32 %v1679_v23, %v1595_v7  ;;  %v1801_v58 = vmul.f32 %v1683_v2, %v1594_v15  ;;  %2368 = vrot.lane.b32.xlu0 %v29056_v62, %s20186_s15  ;;  %2362 = vrot.lane.b32.xlu1 %v29044_v61, %s20186_s15  ;;  %v2158_v15 = vmul.f32 %v2043_v49, %v20396_v47 }
 0x20c   :  { %v19690_v34 = vpack.c.bf16 %v1800_v45, %v1347_v5  ;;  %v2349_v3 = vpop.permute.xlu0 %2348  ;;  %v1540_v59 = vpop.permute.xlu1 %1539  ;;  %v19691_v8 = vpack.c.bf16 %v1801_v58, %v1348_v30 }
 0x20d   :  { %v1592_v14 = vsel %vm1575_vm3, %v1540_v59, %v21839_v20  ;;  %v1593_v18 = vsel %vm1575_vm3, %v1538_v11, %v1540_v59  ;;  %v2156_v11 = vmul.f32 %v2035_v52, %v20378_v41  ;;  %v2500_v41 = vrot.slane %v21577_v63, %v20819_v16 }
 0x20e   :  { %v1802_v50 = vmul.f32 %v1687_v24, %v1593_v18  ;;  %v1803_v21 = vmul.f32 %v1691_v42, %v1592_v14  ;;  %2817 = vrot.lane.b32.xlu0 %v29046_v35, %s20187_s16  ;;  %2366 = vrot.lane.b32.xlu1 %v29045_v40, %s20186_s15  ;;  %v2159_v63 = vmul.f32 %v2047_v39, %v20435_v60  ;;  %v17996_v60 = vld [vmem:[%s28625_s1 + $0x80] ss:$8 sm:$0xf0] }
 0x20f   :  { %5352 = vmatprep.subr.bf16.mxu0 %v19691_v8  ;;  %v2941_v8 = vrot.slane %v21658_v26, %v20768_v55  ;;  %v3398_v18 = vrot.slane %v21660_v48, %v20771_v1 }
 0x210   :  { %v19692_v22 = vpack.c.bf16 %v1802_v50, %v1349_v53  ;;  %5353 = vmatpush1.bf16.msra.mxu0 %v19690_v34  ;;  %v21879_v17 = vpop.permute.xlu0 %2352  ;;  %v2347_v23 = vpop.permute.xlu1 %2346  ;;  %v19693_v0 = vpack.c.bf16 %v1803_v21, %v1350_v27  ;;  %v17995_v34 = vld [vmem:[%s28625_s1 + $0x80] ss:$8 sm:$0xf]  ;;  %v18019_v27 = vld [vmem:[%s28625_s1 + $0x81] ss:$8 sm:$0xf]  ;;  %v2953_v21 = vrot.slane %v21658_v26, %v20819_v16 }
 0x211   :  { %v2402_v2 = vsel %vm2384_vm4, %v2347_v23, %v2349_v3  ;;  %v2403_v56 = vsel %vm2384_vm4, %v21614_v19, %v2347_v23  ;;  %v18020_v50 = vld [vmem:[%s28625_s1 + $0x81] ss:$8 sm:$0xf0]  ;;  %v3406_v23 = vrot.slane %v21660_v48, %v20819_v16 }
 0x212   :  { %v2609_v24 = vmul.f32 %v2488_v25, %v2403_v56  ;;  %v2610_v42 = vmul.f32 %v2492_v12, %v2402_v2  ;;  %2821 = vrot.lane.b32.xlu0 %v29056_v62, %s20187_s16  ;;  %2815 = vrot.lane.b32.xlu1 %v29044_v61, %s20187_s16  ;;  %v2945_v25 = vrot.slane %v21658_v26, %v20771_v1 }
 0x213   :  { %5393 = vmatprep.subr.bf16.mxu1 %v19693_v0  ;;  %v21938_v12 = vor.u32 %v17996_v60, %v17995_v34  ;;  %v29059_v34 = vld [vmem:[#allocation56_spill] sm:$0xff] }
 0x214   :  { %v19722_v44 = vpack.c.bf16 %v2609_v24, %v2156_v11  ;;  %5394 = vmatpush1.bf16.msra.mxu1 %v19692_v22  ;;  %v2802_v19 = vpop.permute.xlu0 %2801  ;;  %v2351_v5 = vpop.permute.xlu1 %2350  ;;  %v19723_v30 = vpack.c.bf16 %v2610_v42, %v2157_v6  ;;  %v3402_v11 = vrot.slane %v21660_v48, %v20774_v43  ;;  %v21967_v48 = vor.u32 %v18020_v50, %v18019_v27 }
 0x215   :  { %v2400_v54 = vsel %vm2384_vm4, %v2351_v5, %v21879_v17  ;;  %v2401_v7 = vsel %vm2384_vm4, %v2349_v3, %v2351_v5  ;;  %v3847_v5 = vrot.slane %v21699_v9, %v20768_v55  ;;  %v344_v60 = vrot.slane %v21938_v12, %v29059_v34 }
 0x216   :  { %v2611_v31 = vmul.f32 %v2496_v51, %v2401_v7  ;;  %v2612_v45 = vmul.f32 %v2500_v41, %v2400_v54  ;;  %3270 = vrot.lane.b32.xlu0 %v29046_v35, %s20188_s17  ;;  %2819 = vrot.lane.b32.xlu1 %v29045_v40, %s20187_s16  ;;  %v3851_v7 = vrot.slane %v21699_v9, %v20771_v1 }
 0x217   :  { %5354 = vmatprep.subr.bf16.mxu0 %v19723_v30 }
 0x218   :  { %v19724_v58 = vpack.c.bf16 %v2611_v31, %v2158_v15  ;;  %5355 = vmatpush1.bf16.msra.mxu0 %v19722_v44  ;;  %v21909_v47 = vpop.permute.xlu0 %2805  ;;  %v2800_v28 = vpop.permute.xlu1 %2799  ;;  %v19725_v52 = vpack.c.bf16 %v2612_v45, %v2159_v63 }
 0x219   :  { %v2855_v53 = vsel %vm2837_vm5, %v2800_v28, %v2802_v19  ;;  %v2856_v14 = vsel %vm2837_vm5, %v21656_v33, %v2800_v28  ;;  %v2949_v33 = vrot.slane %v21658_v26, %v20774_v43  ;;  %v29058_v28 = vld [vmem:[#allocation50_spill] sm:$0xff] }
 0x21a   :  { %3274 = vrot.lane.b32.xlu0 %v29056_v62, %s20188_s17  ;;  %3268 = vrot.lane.b32.xlu1 %v29044_v61, %s20188_s17  ;;  %v3062_v0 = vmul.f32 %v2941_v8, %v2856_v14  ;;  %v3063_v39 = vmul.f32 %v2945_v25, %v2855_v53  ;;  %v29060_v8 = vld [vmem:[#allocation37_spill] sm:$0xff]  ;;  %v29061_v25 = vld [vmem:[#allocation32_spill] sm:$0xff] }
 0x21b   :  { %5395 = vmatprep.subr.bf16.mxu1 %v19725_v52  ;;  %v340_v52 = vrot.slane %v21938_v12, %v29058_v28  ;;  %v29062_v53 = vld [vmem:[#allocation69_spill] sm:$0xff] }
 0x21c   :  { %5396 = vmatpush1.bf16.msra.mxu1 %v19724_v58  ;;  %v3255_v3 = vpop.permute.xlu0 %3254  ;;  %v2804_v59 = vpop.permute.xlu1 %2803  ;;  %v29057_v58 = vld [vmem:[#allocation20_spill] sm:$0xff]  ;;  %v29063_v14 = vld [vmem:[#allocation65_spill] sm:$0xff] }
 0x21d   :  { %v2854_v26 = vsel %vm2837_vm5, %v2802_v19, %v2804_v59  ;;  %v2853_v24 = vsel %vm2837_vm5, %v2804_v59, %v21909_v47  ;;  %v793_v59 = vrot.slane %v21967_v48, %v29058_v28 }
 0x21e   :  { %3723 = vrot.lane.b32.xlu0 %v29046_v35, %s20189_s18  ;;  %3272 = vrot.lane.b32.xlu1 %v29045_v40, %s20188_s17  ;;  %v3064_v30 = vmul.f32 %v2949_v33, %v2854_v26  ;;  %v3065_v31 = vmul.f32 %v2953_v21, %v2853_v24  ;;  %v233_v26 = vsel %vm217_vm0, %v29053_v38, %v29061_v25 }
 0x220   :  { %v21950_v49 = vpop.permute.xlu0 %3258  ;;  %v3253_v22 = vpop.permute.xlu1 %3252 }
 0x221   :  { %v3308_v2 = vsel %vm3290_vm6, %v3253_v22, %v3255_v3  ;;  %v3309_v56 = vsel %vm3290_vm6, %v21693_v57, %v3253_v22  ;;  %v336_v57 = vrot.slane %v21938_v12, %v20925_v10  ;;  %v685_v22 = vsel %vm669_vm1, %v29051_v13, %v29063_v14 }
 0x222   :  { %v3515_v51 = vmul.f32 %v3394_v4, %v3309_v56  ;;  %v3516_v6 = vmul.f32 %v3398_v18, %v3308_v2  ;;  %3727 = vrot.lane.b32.xlu0 %v29056_v62, %s20189_s18  ;;  %3721 = vrot.lane.b32.xlu1 %v29044_v61, %s20189_s18  ;;  %v232_v4 = vsel %vm217_vm0, %v29061_v25, %v29060_v8  ;;  %v29064_v56 = vld [vmem:[#allocation22_spill] sm:$0xff] }
 0x223   :  { %v684_v18 = vsel %vm669_vm1, %v29063_v14, %v29062_v53  ;;  %v3859_v13 = vrot.slane %v21699_v9, %v20819_v16 }
 0x224   :  { %v19754_v42 = vpack.c.bf16 %v3515_v51, %v3062_v0  ;;  %v3708_v41 = vpop.permute.xlu0 %3707  ;;  %v3257_v44 = vpop.permute.xlu1 %3256  ;;  %v19755_v19 = vpack.c.bf16 %v3516_v6, %v3063_v39  ;;  %v3855_v0 = vrot.slane %v21699_v9, %v20774_v43  ;;  %v29066_v6 = vld [vmem:[#allocation55_spill] sm:$0xff] }
 0x225   :  { %v3306_v15 = vsel %vm3290_vm6, %v3257_v44, %v21950_v49  ;;  %v3307_v54 = vsel %vm3290_vm6, %v3255_v3, %v3257_v44  ;;  %v789_v3 = vrot.slane %v21967_v48, %v20925_v10  ;;  %v348_v24 = vrot.slane %v21938_v12, %v29066_v6 }
 0x226   :  { %v3517_v45 = vmul.f32 %v3402_v11, %v3307_v54  ;;  %v3518_v63 = vmul.f32 %v3406_v23, %v3306_v15  ;;  %655 = vrot.lane.b32.xlu0 %v29057_v58, %s20183_s30  ;;  %3725 = vrot.lane.b32.xlu1 %v29045_v40, %s20189_s18  ;;  %v446_v44 = vmul.f32 %v340_v52, %v232_v4 }
 0x227   :  { %5356 = vmatprep.subr.bf16.mxu0 %v19755_v19  ;;  %v29067_v19 = vld [vmem:[#allocation39_spill] sm:$0xff]  ;;  %v898_v54 = vmul.f32 %v789_v3, %v685_v22 }
 0x228   :  { %v19756_v27 = vpack.c.bf16 %v3517_v45, %v3064_v30  ;;  %5357 = vmatpush1.bf16.msra.mxu0 %v19754_v42  ;;  %v22003_v50 = vpop.permute.xlu0 %3711  ;;  %v3706_v33 = vpop.permute.xlu1 %3705  ;;  %v19757_v21 = vpack.c.bf16 %v3518_v63, %v3065_v31  ;;  %v899_v42 = vmul.f32 %v793_v59, %v684_v18  ;;  %v797_v45 = vrot.slane %v21967_v48, %v29059_v34  ;;  %v29068_v59 = vld [vmem:[#allocation17_spill] sm:$0xff] }
 0x229   :  { %v3761_v11 = vsel %vm3743_vm7, %v3706_v33, %v3708_v41  ;;  %v3762_v23 = vsel %vm3743_vm7, %v21746_v29, %v3706_v33  ;;  %v29065_v29 = vld [vmem:[#allocation34_spill] sm:$0xff] }
 0x22a   :  { %v3968_v39 = vmul.f32 %v3847_v5, %v3762_v23  ;;  %v3969_v2 = vmul.f32 %v3851_v7, %v3761_v11  ;;  %659 = vrot.lane.b32.xlu0 %v29064_v56, %s20183_s30  ;;  %653 = vrot.lane.b32.xlu1 %v29056_v62, %s20183_s30  ;;  %v231_v51 = vsel %vm217_vm0, %v29060_v8, %v29065_v29  ;;  %v18043_v33 = vld [vmem:[%s28625_s1 + $0x82] ss:$8 sm:$0xf] }
 0x22b   :  { %5397 = vmatprep.subr.bf16.mxu1 %v19757_v21  ;;  %v230_v9 = vsel %vm217_vm0, %v29065_v29, %v29067_v19  ;;  %v801_v8 = vrot.slane %v21967_v48, %v29066_v6  ;;  %v19663_v25 = vpack.c.bf16 %v899_v42, %v446_v44  ;;  %v447_v21 = vmul.f32 %v344_v60, %v231_v51 }
 0x22c   :  { %v19786_v5 = vpack.c.bf16 %v3968_v39, %v3968_v39  ;;  %v19787_v30 = vpack.c.bf16 %v3969_v2, %v3969_v2  ;;  %5398 = vmatpush1.bf16.msra.mxu1 %v19756_v27  ;;  %v22036_v38 = vpop.permute.xlu0 %643  ;;  %v3710_v15 = vpop.permute.xlu1 %3709  ;;  %v448_v22 = vmul.f32 %v348_v24, %v230_v9 }
 0x22d   :  { %v3759_v7 = vsel %vm3743_vm7, %v3710_v15, %v22003_v50  ;;  %v3760_v31 = vsel %vm3743_vm7, %v3708_v41, %v3710_v15  ;;  %v445_v41 = vmul.f32 %v336_v57, %v233_v26  ;;  %v18044_v57 = vld [vmem:[%s28625_s1 + $0x82] ss:$8 sm:$0xf0]  ;;  %v18091_v15 = vld [vmem:[%s28625_s1 + $0x84] ss:$8 sm:$0xf] }
 0x22e   :  { %v3970_v63 = vmul.f32 %v3855_v0, %v3760_v31  ;;  %v3971_v52 = vmul.f32 %v3859_v13, %v3759_v7  ;;  %1108 = vrot.lane.b32.xlu0 %v29057_v58, %s20184_s0  ;;  %657 = vrot.lane.b32.xlu1 %v29068_v59, %s20183_s30  ;;  %v5045_v3 = vsel %vm5007_vm8, %v19786_v5, 0  ;;  %v18067_v0 = vld [vmem:[%s28625_s1 + $0x83] ss:$8 sm:$0xf]  ;;  %v22086_v44 = vor.u32 %v18044_v57, %v18043_v33 }
 0x22f   :  { %18379 = vmatprep.subr.msk.bf16.mxu0 %vm5007_vm8, %v19787_v30  ;;  %v19662_v39 = vpack.c.bf16 %v898_v54, %v445_v41  ;;  %v18068_v13 = vld [vmem:[%s28625_s1 + $0x83] ss:$8 sm:$0xf0]  ;;  %v18092_v54 = vld [vmem:[%s28625_s1 + $0x84] ss:$8 sm:$0xf0] }
 0x230   :  { %v19788_v4 = vpack.c.bf16 %v3970_v63, %v3970_v63  ;;  %v19789_v14 = vpack.c.bf16 %v3971_v52, %v3971_v52  ;;  %5359 = vmatpush1.bf16.msra.mxu0 %v5045_v3  ;;  %v1093_v18 = vpop.permute.xlu0 %1092  ;;  %v642_v27 = vpop.permute.xlu1 %641  ;;  %v22079_v26 = vld [vmem:[%s28628_s4] sm:$0xf]  ;;  %v22088_v9 = vor.u32 %v18068_v13, %v18067_v0  ;;  %v1242_v7 = vrot.slane %v22086_v44, %v20925_v10  ;;  %v18115_v63 = vld [vmem:[%s28625_s1 + $0x85] ss:$8 sm:$0xf] }
 0x231   :  { %v682_v11 = vsel %vm669_vm1, %v642_v27, %v22036_v38  ;;  %v683_v23 = vsel %vm669_vm1, %v29062_v53, %v642_v27  ;;  %5432 = vmatprep.subr.bf16.mxu0 %v19663_v25  ;;  %v1246_v31 = vrot.slane %v22086_v44, %v29058_v28  ;;  %v18116_v52 = vld [vmem:[%s28625_s1 + $0x85] ss:$8 sm:$0xf0]  ;;  %v1250_v41 = vrot.slane %v22086_v44, %v29059_v34 }
 0x232   :  { %v900_v60 = vmul.f32 %v797_v45, %v683_v23  ;;  %v901_v2 = vmul.f32 %v801_v8, %v682_v11  ;;  %1112 = vrot.lane.b32.xlu0 %v29064_v56, %s20184_s0  ;;  %1106 = vrot.lane.b32.xlu1 %v29056_v62, %s20184_s0  ;;  %v5051_v53 = vsel %vm5007_vm8, %v19788_v4, 0  ;;  %v1695_v45 = vrot.slane %v22088_v9, %v20925_v10 }
 0x233   :  { %18380 = vmatmul.mubr.msk.bf16.vlgmr.msra.gmra.mrb[12].mxu0 %vm5003_vm9, %v22079_v26  ;;  %18381 = vmatprep.subr.msk.bf16.mxu1 %vm5007_vm8, %v19789_v14  ;;  %v1699_v25 = vrot.slane %v22088_v9, %v29058_v28  ;;  %v22129_v4 = vor.u32 %v18092_v54, %v18091_v15  ;;  %v1254_v14 = vrot.slane %v22086_v44, %v29066_v6 }
 0x234   :  { %v19664_v29 = vpack.c.bf16 %v900_v60, %v447_v21  ;;  %5400 = vmatpush1.bf16.msra.mxu1 %v5051_v53  ;;  %5433 = vmatpush1.bf16.msra.mxu0 %v19662_v39  ;;  %v22084_v51 = vpop.permute.xlu0 %1096  ;;  %v1091_v24 = vpop.permute.xlu1 %1090  ;;  %v19665_v42 = vpack.c.bf16 %v901_v2, %v448_v22  ;;  %v1703_v33 = vrot.slane %v22088_v9, %v29059_v34 }
 0x235   :  { %5464 = vmatprep.mubr.bf16.mxu0 %v29025_v46  ;;  %v1137_v3 = vsel %vm1122_vm2, %v1091_v24, %v1093_v18  ;;  %v1138_v8 = vsel %vm1122_vm2, %v21805_v36, %v1091_v24  ;;  %v1707_v21 = vrot.slane %v22088_v9, %v29066_v6  ;;  %v22139_v22 = vor.u32 %v18116_v52, %v18115_v63 }
 0x236   :  { %1561 = vrot.lane.b32.xlu0 %v29057_v58, %s20185_s14  ;;  %1110 = vrot.lane.b32.xlu1 %v29068_v59, %s20184_s0  ;;  %v1351_v11 = vmul.f32 %v1242_v7, %v1138_v8  ;;  %v1352_v23 = vmul.f32 %v1246_v31, %v1137_v3  ;;  %v2051_v13 = vrot.slane %v22129_v4, %v20925_v10  ;;  %v29069_v3 = vld [vmem:[#allocation19_spill] sm:$0xff] }
 0x237   :  { %18382 = vmatmul.mubr.msk.bf16.vlgmr.msra.gmra.mrb[12].mxu1 %vm5003_vm9, %v22079_v26  ;;  %5473 = vmatprep.subr.bf16.mxu1 %v19665_v42  ;;  %v2055_v15 = vrot.slane %v22129_v4, %v29058_v28  ;;  %v2508_v31 = vrot.slane %v22139_v22, %v29058_v28  ;;  %v2059_v8 = vrot.slane %v22129_v4, %v29059_v34 }
 0x238   :  { %5474 = vmatpush1.bf16.msra.mxu1 %v19664_v29  ;;  %v1546_v5 = vpop.permute.xlu0 %1545  ;;  %v1095_v30 = vpop.permute.xlu1 %1094  ;;  %5505 = vmatprep.mubr.bf16.mxu1 %v29025_v46 }
 0x239   :  { %v1136_v39 = vsel %vm1122_vm2, %v1093_v18, %v1095_v30  ;;  %v1135_v53 = vsel %vm1122_vm2, %v1095_v30, %v22084_v51  ;;  %v2504_v18 = vrot.slane %v22139_v22, %v20925_v10 }
 0x23a   :  { %1565 = vrot.lane.b32.xlu0 %v29064_v56, %s20185_s14  ;;  %1559 = vrot.lane.b32.xlu1 %v29056_v62, %s20185_s14  ;;  %v1353_v54 = vmul.f32 %v1250_v41, %v1136_v39 }
 0x23c   :  { %v22133_v27 = vpop.permute.xlu0 %1549  ;;  %v1544_v36 = vpop.permute.xlu1 %1543 }
 0x23d   :  { %v1590_v57 = vsel %vm1575_vm3, %v1544_v36, %v1546_v5  ;;  %v1591_v0 = vsel %vm1575_vm3, %v21839_v20, %v1544_v36 }
 0x23e   :  { %v1804_v60 = vmul.f32 %v1695_v45, %v1591_v0  ;;  %v1805_v2 = vmul.f32 %v1699_v25, %v1590_v57  ;;  %2372 = vrot.lane.b32.xlu0 %v29068_v59, %s20186_s15  ;;  %1563 = vrot.lane.b32.xlu1 %v29068_v59, %s20185_s14  ;;  %v1354_v45 = vmul.f32 %v1254_v14, %v1135_v53  ;;  %v29071_v0 = vld [vmem:[#allocation12_spill] sm:$0xff] }
 0x23f   :  { %v2512_v57 = vrot.slane %v22139_v22, %v29059_v34  ;;  %v2161_v39 = vmul.f32 %v2055_v15, %v29071_v0  ;;  %v2516_v53 = vrot.slane %v22139_v22, %v29066_v6 }
 0x240   :  { %v19694_v29 = vpack.c.bf16 %v1804_v60, %v1351_v11  ;;  %v2357_v20 = vpop.permute.xlu0 %2356  ;;  %v1548_v24 = vpop.permute.xlu1 %1547  ;;  %v19695_v42 = vpack.c.bf16 %v1805_v2, %v1352_v23 }
 0x241   :  { %v1588_v7 = vsel %vm1575_vm3, %v1548_v24, %v22133_v27  ;;  %v1589_v30 = vsel %vm1575_vm3, %v1546_v5, %v1548_v24  ;;  %v29070_v5 = vld [vmem:[#allocation9_spill] sm:$0xff] }
 0x242   :  { %v1806_v63 = vmul.f32 %v1703_v33, %v1589_v30  ;;  %v1807_v52 = vmul.f32 %v1707_v21, %v1588_v7  ;;  %2376 = vrot.lane.b32.xlu0 %v29069_v3, %s20186_s15  ;;  %2370 = vrot.lane.b32.xlu1 %v29057_v58, %s20186_s15  ;;  %v2160_v36 = vmul.f32 %v2051_v13, %v29070_v5  ;;  %v18139_v7 = vld [vmem:[%s28625_s1 + $0x86] ss:$8 sm:$0xf] }
 0x243   :  { %5434 = vmatprep.subr.bf16.mxu0 %v19695_v42  ;;  %v2063_v33 = vrot.slane %v22129_v4, %v29066_v6  ;;  %v29072_v42 = vld [vmem:[#allocation10_spill] sm:$0xff] }
 0x244   :  { %v19696_v25 = vpack.c.bf16 %v1806_v63, %v1353_v54  ;;  %5435 = vmatpush1.bf16.msra.mxu0 %v19694_v29  ;;  %v22174_v41 = vpop.permute.xlu0 %2360  ;;  %v2355_v11 = vpop.permute.xlu1 %2354  ;;  %v19697_v14 = vpack.c.bf16 %v1807_v52, %v1354_v45  ;;  %v2162_v54 = vmul.f32 %v2059_v8, %v29072_v42  ;;  %v18140_v30 = vld [vmem:[%s28625_s1 + $0x86] ss:$8 sm:$0xf0]  ;;  %v18164_v8 = vld [vmem:[%s28625_s1 + $0x87] ss:$8 sm:$0xf0] }
 0x245   :  { %v2398_v21 = vsel %vm2384_vm4, %v2355_v11, %v2357_v20  ;;  %v2399_v23 = vsel %vm2384_vm4, %v21879_v17, %v2355_v11  ;;  %v29073_v63 = vld [vmem:[#allocation14_spill] sm:$0xff] }
 0x246   :  { %v2613_v60 = vmul.f32 %v2504_v18, %v2399_v23  ;;  %v2614_v2 = vmul.f32 %v2508_v31, %v2398_v21  ;;  %2825 = vrot.lane.b32.xlu0 %v29068_v59, %s20187_s16  ;;  %2374 = vrot.lane.b32.xlu1 %v29064_v56, %s20186_s15  ;;  %v2163_v52 = vmul.f32 %v2063_v33, %v29073_v63 }
 0x247   :  { %5475 = vmatprep.subr.bf16.mxu1 %v19697_v14  ;;  %v22218_v14 = vor.u32 %v18140_v30, %v18139_v7 }
 0x248   :  { %v19726_v13 = vpack.c.bf16 %v2613_v60, %v2160_v36  ;;  %5476 = vmatpush1.bf16.msra.mxu1 %v19696_v25  ;;  %v2810_v17 = vpop.permute.xlu0 %2809  ;;  %v2359_v29 = vpop.permute.xlu1 %2358  ;;  %v19727_v24 = vpack.c.bf16 %v2614_v2, %v2161_v39  ;;  %v18187_v60 = vld [vmem:[%s28625_s1 + $0x180] ss:$8 sm:$0xf] }
 0x249   :  { %v2396_v18 = vsel %vm2384_vm4, %v2359_v29, %v22174_v41  ;;  %v2397_v15 = vsel %vm2384_vm4, %v2357_v20, %v2359_v29  ;;  %v18163_v20 = vld [vmem:[%s28625_s1 + $0x87] ss:$8 sm:$0xf]  ;;  %v2961_v0 = vrot.slane %v22218_v14, %v29058_v28  ;;  %v18188_v2 = vld [vmem:[%s28625_s1 + $0x180] ss:$8 sm:$0xf0]  ;;  %v2969_v42 = vrot.slane %v22218_v14, %v29066_v6 }
 0x24a   :  { %v2615_v31 = vmul.f32 %v2512_v57, %v2397_v15  ;;  %v2616_v45 = vmul.f32 %v2516_v53, %v2396_v18  ;;  %2829 = vrot.lane.b32.xlu0 %v29069_v3, %s20187_s16  ;;  %2823 = vrot.lane.b32.xlu1 %v29057_v58, %s20187_s16  ;;  %v22220_v21 = vor.u32 %v18164_v8, %v18163_v20 }
 0x24b   :  { %5436 = vmatprep.subr.bf16.mxu0 %v19727_v24  ;;  %v2957_v57 = vrot.slane %v22218_v14, %v20925_v10  ;;  %v2965_v24 = vrot.slane %v22218_v14, %v29059_v34  ;;  %v22259_v7 = vor.u32 %v18188_v2, %v18187_v60 }
 0x24c   :  { %v19728_v25 = vpack.c.bf16 %v2615_v31, %v2162_v54  ;;  %5437 = vmatpush1.bf16.msra.mxu0 %v19726_v13  ;;  %v22216_v5 = vpop.permute.xlu0 %2813  ;;  %v2808_v36 = vpop.permute.xlu1 %2807  ;;  %v19729_v11 = vpack.c.bf16 %v2616_v45, %v2163_v52  ;;  %v3410_v39 = vrot.slane %v22220_v21, %v20925_v10  ;;  %v3414_v29 = vrot.slane %v22220_v21, %v29058_v28 }
 0x24d   :  { %v2851_v53 = vsel %vm2837_vm5, %v2808_v36, %v2810_v17  ;;  %v2852_v13 = vsel %vm2837_vm5, %v21909_v47, %v2808_v36  ;;  %v3418_v47 = vrot.slane %v22220_v21, %v29059_v34  ;;  %v3422_v15 = vrot.slane %v22220_v21, %v29066_v6 }
 0x24e   :  { %3278 = vrot.lane.b32.xlu0 %v29068_v59, %s20188_s17  ;;  %2827 = vrot.lane.b32.xlu1 %v29064_v56, %s20187_s16  ;;  %v3066_v30 = vmul.f32 %v2957_v57, %v2852_v13  ;;  %v3067_v31 = vmul.f32 %v2961_v0, %v2851_v53  ;;  %v3867_v2 = vrot.slane %v22259_v7, %v29058_v28 }
 0x24f   :  { %5477 = vmatprep.subr.bf16.mxu1 %v19729_v11 }
 0x250   :  { %5478 = vmatpush1.bf16.msra.mxu1 %v19728_v25  ;;  %v3263_v33 = vpop.permute.xlu0 %3262  ;;  %v2812_v23 = vpop.permute.xlu1 %2811 }
 0x251   :  { %v2850_v52 = vsel %vm2837_vm5, %v2810_v17, %v2812_v23  ;;  %v2849_v25 = vsel %vm2837_vm5, %v2812_v23, %v22216_v5 }
 0x252   :  { %3282 = vrot.lane.b32.xlu0 %v29069_v3, %s20188_s17  ;;  %3276 = vrot.lane.b32.xlu1 %v29057_v58, %s20188_s17  ;;  %v3068_v17 = vmul.f32 %v2965_v24, %v2850_v52  ;;  %v3069_v53 = vmul.f32 %v2969_v42, %v2849_v25  ;;  %v352_v52 = vrot.slane %v21938_v12, %v20768_v55 }
 0x254   :  { %v22253_v54 = vpop.permute.xlu0 %3266  ;;  %v3261_v18 = vpop.permute.xlu1 %3260 }
 0x255   :  { %v3304_v45 = vsel %vm3290_vm6, %v3261_v18, %v3263_v33  ;;  %v3305_v63 = vsel %vm3290_vm6, %v21950_v49, %v3261_v18  ;;  %v3863_v49 = vrot.slane %v22259_v7, %v20925_v10 }
 0x256   :  { %v3519_v20 = vmul.f32 %v3410_v39, %v3305_v63  ;;  %v3520_v8 = vmul.f32 %v3414_v29, %v3304_v45  ;;  %3731 = vrot.lane.b32.xlu0 %v29068_v59, %s20189_s18  ;;  %3280 = vrot.lane.b32.xlu1 %v29064_v56, %s20188_s17  ;;  %v29074_v45 = vld [vmem:[#allocation23_spill] sm:$0xff]  ;;  %v3875_v63 = vrot.slane %v22259_v7, %v29066_v6 }
 0x258   :  { %v19758_v36 = vpack.c.bf16 %v3519_v20, %v3066_v30  ;;  %v3716_v11 = vpop.permute.xlu0 %3715  ;;  %v3265_v57 = vpop.permute.xlu1 %3264  ;;  %v19759_v0 = vpack.c.bf16 %v3520_v8, %v3067_v31  ;;  %v29075_v20 = vld [vmem:[#allocation36_spill] sm:$0xff]  ;;  %v356_v8 = vrot.slane %v21938_v12, %v20771_v1 }
 0x259   :  { %v3302_v39 = vsel %vm3290_vm6, %v3265_v57, %v22253_v54  ;;  %v3303_v60 = vsel %vm3290_vm6, %v3263_v33, %v3265_v57 }
 0x25a   :  { %v3521_v23 = vmul.f32 %v3418_v47, %v3303_v60  ;;  %v3522_v13 = vmul.f32 %v3422_v15, %v3302_v39  ;;  %3735 = vrot.lane.b32.xlu0 %v29069_v3, %s20189_s18  ;;  %3729 = vrot.lane.b32.xlu1 %v29057_v58, %s20189_s18  ;;  %v3871_v47 = vrot.slane %v22259_v7, %v29059_v34 }
 0x25b   :  { %5438 = vmatprep.subr.bf16.mxu0 %v19759_v0  ;;  %v805_v60 = vrot.slane %v21967_v48, %v20768_v55 }
 0x25c   :  { %v19760_v29 = vpack.c.bf16 %v3521_v23, %v3068_v17  ;;  %5439 = vmatpush1.bf16.msra.mxu0 %v19758_v36  ;;  %v22288_v24 = vpop.permute.xlu0 %3719  ;;  %v3714_v18 = vpop.permute.xlu1 %3713  ;;  %v19761_v30 = vpack.c.bf16 %v3522_v13, %v3069_v53  ;;  %v809_v13 = vrot.slane %v21967_v48, %v20771_v1 }
 0x25d   :  { %v3757_v33 = vsel %vm3743_vm7, %v3714_v18, %v3716_v11  ;;  %v3758_v42 = vsel %vm3743_vm7, %v22003_v50, %v3714_v18  ;;  %v229_v50 = vsel %vm217_vm0, %v29067_v19, %v29075_v20 }
 0x25e   :  { %v3972_v15 = vmul.f32 %v3863_v49, %v3758_v42  ;;  %v3973_v31 = vmul.f32 %v3867_v2, %v3757_v33  ;;  %663 = vrot.lane.b32.xlu0 %v29074_v45, %s20183_s30  ;;  %3733 = vrot.lane.b32.xlu1 %v29064_v56, %s20189_s18  ;;  %v29076_v49 = vld [vmem:[#allocation41_spill] sm:$0xff]  ;;  %v449_v18 = vmul.f32 %v352_v52, %v229_v50 }
 0x25f   :  { %5479 = vmatprep.subr.bf16.mxu1 %v19761_v30  ;;  %v228_v17 = vsel %vm217_vm0, %v29075_v20, %v29076_v49  ;;  %v29077_v30 = vld [vmem:[#allocation38_spill] sm:$0xff]  ;;  %v813_v52 = vrot.slane %v21967_v48, %v20774_v43 }
 0x260   :  { %v19790_v25 = vpack.c.bf16 %v3972_v15, %v3972_v15  ;;  %v19791_v36 = vpack.c.bf16 %v3973_v31, %v3973_v31  ;;  %5480 = vmatpush1.bf16.msra.mxu1 %v19760_v29  ;;  %v648_v57 = vpop.permute.xlu0 %647  ;;  %v3718_v0 = vpop.permute.xlu1 %3717  ;;  %v360_v29 = vrot.slane %v21938_v12, %v20774_v43  ;;  %v227_v33 = vsel %vm217_vm0, %v29076_v49, %v29077_v30  ;;  %v29079_v49 = vld [vmem:[#allocation43_spill] sm:$0xff] }
 0x261   :  { %v3755_v39 = vsel %vm3743_vm7, %v3718_v0, %v22288_v24  ;;  %v3756_v19 = vsel %vm3743_vm7, %v3716_v11, %v3718_v0  ;;  %v364_v11 = vrot.slane %v21938_v12, %v20819_v16  ;;  %v817_v0 = vrot.slane %v21967_v48, %v20819_v16 }
 0x262   :  { %v3974_v2 = vmul.f32 %v3871_v47, %v3756_v19  ;;  %v3975_v53 = vmul.f32 %v3875_v63, %v3755_v39  ;;  %1114 = vrot.lane.b32.xlu0 %v29069_v3, %s20184_s0  ;;  %661 = vrot.lane.b32.xlu1 %v29069_v3, %s20183_s30  ;;  %v5057_v23 = vsel %vm5007_vm8, %v19790_v25, 0  ;;  %v450_v63 = vmul.f32 %v356_v8, %v228_v17 }
 0x263   :  { %18383 = vmatprep.subr.msk.bf16.mxu0 %vm5007_vm8, %v19791_v36  ;;  %v29078_v36 = vld [vmem:[#allocation21_spill] sm:$0xff] }
 0x264   :  { %v19792_v42 = vpack.c.bf16 %v3974_v2, %v3974_v2  ;;  %v19793_v47 = vpack.c.bf16 %v3975_v53, %v3975_v53  ;;  %5441 = vmatpush1.bf16.msra.mxu0 %v5057_v23  ;;  %v22338_v15 = vpop.permute.xlu0 %651  ;;  %v646_v31 = vpop.permute.xlu1 %645  ;;  %v451_v2 = vmul.f32 %v360_v29, %v227_v33 }
 0x265   :  { %v680_v20 = vsel %vm669_vm1, %v646_v31, %v648_v57  ;;  %v681_v12 = vsel %vm669_vm1, %v22036_v38, %v646_v31  ;;  %v226_v38 = vsel %vm217_vm0, %v29077_v30, %v29079_v49  ;;  %v1262_v31 = vrot.slane %v22086_v44, %v20771_v1 }
 0x266   :  { %v902_v50 = vmul.f32 %v805_v60, %v681_v12  ;;  %v903_v25 = vmul.f32 %v809_v13, %v680_v20  ;;  %1118 = vrot.lane.b32.xlu0 %v29078_v36, %s20184_s0  ;;  %665 = vrot.lane.b32.xlu1 %v29078_v36, %s20183_s30  ;;  %v5063_v8 = vsel %vm5007_vm8, %v19792_v42, 0  ;;  %v452_v23 = vmul.f32 %v364_v11, %v226_v38 }
 0x267   :  { %18384 = vmatmul.mubr.msk.bf16.vlgmr.msra.gmra.mrb[16].mxu0 %vm5003_vm9, %v22079_v26  ;;  %18385 = vmatprep.subr.msk.bf16.mxu1 %vm5007_vm8, %v19793_v47  ;;  %v1258_v47 = vrot.slane %v22086_v44, %v20768_v55 }
 0x268   :  { %v19666_v17 = vpack.c.bf16 %v902_v50, %v449_v18  ;;  %5482 = vmatpush1.bf16.msra.mxu1 %v5063_v8  ;;  %v1101_v39 = vpop.permute.xlu0 %1100  ;;  %v650_v19 = vpop.permute.xlu1 %649  ;;  %v19667_v60 = vpack.c.bf16 %v903_v25, %v450_v63  ;;  %5546 = vmatprep.mubr.bf16.mxu0 %v29025_v46  ;;  %v1711_v63 = vrot.slane %v22088_v9, %v20768_v55 }
 0x269   :  { %v678_v48 = vsel %vm669_vm1, %v650_v19, %v22338_v15  ;;  %v679_v53 = vsel %vm669_vm1, %v648_v57, %v650_v19  ;;  %v1715_v50 = vrot.slane %v22088_v9, %v20771_v1  ;;  %v1266_v25 = vrot.slane %v22086_v44, %v20774_v43 }
 0x26a   :  { %v904_v13 = vmul.f32 %v813_v52, %v679_v53  ;;  %v905_v30 = vmul.f32 %v817_v0, %v678_v48  ;;  %1569 = vrot.lane.b32.xlu0 %v29074_v45, %s20185_s14  ;;  %1116 = vrot.lane.b32.xlu1 %v29074_v45, %s20184_s0  ;;  %v29080_v52 = vld [vmem:[#allocation24_spill] sm:$0xff]  ;;  %v1270_v8 = vrot.slane %v22086_v44, %v20819_v16 }
 0x26b   :  { %18386 = vmatmul.mubr.msk.bf16.vlgmr.msra.gmra.mrb[16].mxu1 %vm5003_vm9, %v22079_v26  ;;  %5514 = vmatprep.subr.bf16.mxu0 %v19667_v60 }
 0x26c   :  { %v19668_v29 = vpack.c.bf16 %v904_v13, %v451_v2  ;;  %5515 = vmatpush1.bf16.msra.mxu0 %v19666_v17  ;;  %v22373_v18 = vpop.permute.xlu0 %1104  ;;  %v1099_v33 = vpop.permute.xlu1 %1098  ;;  %v19669_v42 = vpack.c.bf16 %v905_v30, %v452_v23  ;;  %5587 = vmatprep.mubr.bf16.mxu1 %v29025_v46  ;;  %v1723_v17 = vrot.slane %v22088_v9, %v20819_v16 }
 0x26d   :  { %v1133_v20 = vsel %vm1122_vm2, %v1099_v33, %v1101_v39  ;;  %v1134_v12 = vsel %vm1122_vm2, %v22084_v51, %v1099_v33  ;;  %v1719_v51 = vrot.slane %v22088_v9, %v20774_v43  ;;  %v2067_v13 = vrot.slane %v22129_v4, %v20768_v55 }
 0x26e   :  { %2378 = vrot.lane.b32.xlu0 %v29074_v45, %s20186_s15  ;;  %1567 = vrot.lane.b32.xlu1 %v29069_v3, %s20185_s14  ;;  %v1355_v19 = vmul.f32 %v1258_v47, %v1134_v12  ;;  %v1356_v60 = vmul.f32 %v1262_v31, %v1133_v20 }
 0x26f   :  { %5555 = vmatprep.subr.bf16.mxu1 %v19669_v42  ;;  %v2071_v42 = vrot.slane %v22129_v4, %v20771_v1 }
 0x270   :  { %5556 = vmatpush1.bf16.msra.mxu1 %v19668_v29  ;;  %v1554_v57 = vpop.permute.xlu0 %1553  ;;  %v1103_v11 = vpop.permute.xlu1 %1102 }
 0x271   :  { %v1132_v44 = vsel %vm1122_vm2, %v1101_v39, %v1103_v11  ;;  %v1131_v9 = vsel %vm1122_vm2, %v1103_v11, %v22373_v18  ;;  %v2520_v39 = vrot.slane %v22139_v22, %v20768_v55 }
 0x272   :  { %2382 = vrot.lane.b32.xlu0 %v29080_v52, %s20186_s15  ;;  %1571 = vrot.lane.b32.xlu1 %v29078_v36, %s20185_s14  ;;  %v1357_v47 = vmul.f32 %v1266_v25, %v1132_v44  ;;  %v1358_v20 = vmul.f32 %v1270_v8, %v1131_v9  ;;  %v2075_v25 = vrot.slane %v22129_v4, %v20774_v43 }
 0x273   :  { %v2165_v44 = vmul.f32 %v2071_v42, %v29044_v61 }
 0x274   :  { %v22401_v0 = vpop.permute.xlu0 %1557  ;;  %v1552_v38 = vpop.permute.xlu1 %1551 }
 0x275   :  { %v1586_v2 = vsel %vm1575_vm3, %v1552_v38, %v1554_v57  ;;  %v1587_v48 = vsel %vm1575_vm3, %v22133_v27, %v1552_v38 }
 0x276   :  { %v1808_v53 = vmul.f32 %v1711_v63, %v1587_v48  ;;  %v1809_v23 = vmul.f32 %v1715_v50, %v1586_v2  ;;  %2833 = vrot.lane.b32.xlu0 %v29078_v36, %s20187_s16  ;;  %2380 = vrot.lane.b32.xlu1 %v29078_v36, %s20186_s15  ;;  %v2524_v63 = vrot.slane %v22139_v22, %v20771_v1 }
 0x277   :  { %v2528_v48 = vrot.slane %v22139_v22, %v20774_v43 }
 0x278   :  { %v19698_v30 = vpack.c.bf16 %v1808_v53, %v1355_v19  ;;  %v2365_v27 = vpop.permute.xlu0 %2364  ;;  %v1556_v29 = vpop.permute.xlu1 %1555  ;;  %v19699_v33 = vpack.c.bf16 %v1809_v23, %v1356_v60 }
 0x279   :  { %v1584_v31 = vsel %vm1575_vm3, %v1556_v29, %v22401_v0  ;;  %v1585_v11 = vsel %vm1575_vm3, %v1554_v57, %v1556_v29  ;;  %v2164_v57 = vmul.f32 %v2067_v13, %v29041_v32  ;;  %v22453_v53 = vpop.f32.mrb[0].mxu0 }
 0x27a   :  { %v1810_v12 = vmul.f32 %v1719_v51, %v1585_v11  ;;  %v1811_v50 = vmul.f32 %v1723_v17, %v1584_v31  ;;  %3284 = vrot.lane.b32.xlu0 %v29074_v45, %s20188_s17  ;;  %2831 = vrot.lane.b32.xlu1 %v29074_v45, %s20187_s16  ;;  %v2079_v51 = vrot.slane %v22129_v4, %v20819_v16  ;;  %v22455_v32 = vpop.f32.mrb[0].mxu1 }
 0x27b   :  { %5516 = vmatprep.subr.bf16.mxu0 %v19699_v33  ;;  %29081 = vst [vmem:[#allocation7_spill] sm:$0xff] %v22453_v53  ;;  %v2532_v4 = vrot.slane %v22139_v22, %v20819_v16  ;;  %v22471_v22 = vpop.f32.mrb[1].mxu1 }
 0x27c   :  { %v19700_v38 = vpack.c.bf16 %v1810_v12, %v1357_v47  ;;  %5517 = vmatpush1.bf16.msra.mxu0 %v19698_v30  ;;  %v22440_v19 = vpop.permute.xlu0 %2368  ;;  %v2363_v60 = vpop.permute.xlu1 %2362  ;;  %v19701_v8 = vpack.c.bf16 %v1811_v50, %v1358_v20  ;;  %v4277_v12 = vld [vmem:[%s28629_s5] sm:$0xff] }
 0x27d   :  { %v2394_v17 = vsel %vm2384_vm4, %v2363_v60, %v2365_v27  ;;  %v2395_v2 = vsel %vm2384_vm4, %v22174_v41, %v2363_v60  ;;  %v22463_v41 = vpop.f32.mrb[1].mxu0  ;;  %v5183_v20 = vpop.f32.mrb[2].mxu1 }
 0x27e   :  { %v2617_v23 = vmul.f32 %v2520_v39, %v2395_v2  ;;  %v2618_v9 = vmul.f32 %v2524_v63, %v2394_v17  ;;  %3288 = vrot.lane.b32.xlu0 %v29080_v52, %s20188_s17  ;;  %2835 = vrot.lane.b32.xlu1 %v29080_v52, %s20187_s16  ;;  %v5142_v13 = vpop.f32.mrb[2].mxu0  ;;  %v2166_v39 = vmul.f32 %v2075_v25, %v29046_v35 }
 0x27f   :  { %5557 = vmatprep.subr.bf16.mxu1 %v19701_v8  ;;  %v5143_v31 = vpop.f32.mrb[3].mxu0  ;;  %v2167_v35 = vmul.f32 %v2079_v51, %v29045_v40  ;;  %v2973_v8 = vrot.slane %v22218_v14, %v20768_v55  ;;  %v2977_v51 = vrot.slane %v22218_v14, %v20771_v1  ;;  %v3426_v17 = vrot.slane %v22220_v21, %v20768_v55 }
 0x280   :  { %v19730_v61 = vpack.c.bf16 %v2617_v23, %v2164_v57  ;;  %5558 = vmatpush1.bf16.msra.mxu1 %v19700_v38  ;;  %v2818_v30 = vpop.permute.xlu0 %2817  ;;  %v2367_v29 = vpop.permute.xlu1 %2366  ;;  %v19731_v33 = vpack.c.bf16 %v2618_v9, %v2165_v44  ;;  %v3430_v2 = vrot.slane %v22220_v21, %v20771_v1  ;;  %v2981_v23 = vrot.slane %v22218_v14, %v20774_v43 }
 0x281   :  { %v2392_v42 = vsel %vm2384_vm4, %v2367_v29, %v22440_v19  ;;  %v2393_v47 = vsel %vm2384_vm4, %v2365_v27, %v2367_v29  ;;  %v5184_v27 = vpop.f32.mrb[3].mxu1  ;;  %v2985_v9 = vrot.slane %v22218_v14, %v20819_v16 }
 0x282   :  { %v2619_v11 = vmul.f32 %v2528_v48, %v2393_v47  ;;  %v2620_v63 = vmul.f32 %v2532_v4, %v2392_v42  ;;  %3739 = vrot.lane.b32.xlu0 %v29078_v36, %s20189_s18  ;;  %3286 = vrot.lane.b32.xlu1 %v29078_v36, %s20188_s17 }
 0x283   :  { %5518 = vmatprep.subr.bf16.mxu0 %v19731_v33  ;;  %v3434_v33 = vrot.slane %v22220_v21, %v20774_v43 }
 0x284   :  { %v19732_v50 = vpack.c.bf16 %v2619_v11, %v2166_v39  ;;  %5519 = vmatpush1.bf16.msra.mxu0 %v19730_v61  ;;  %v22481_v25 = vpop.permute.xlu0 %2821  ;;  %v2816_v38 = vpop.permute.xlu1 %2815  ;;  %v19733_v57 = vpack.c.bf16 %v2620_v63, %v2167_v35  ;;  %v17998_v63 = vld [vmem:[%s28625_s1 + $0xc0] ss:$8 sm:$0xf0] }
 0x285   :  { %v2847_v48 = vsel %vm2837_vm5, %v2816_v38, %v2818_v30  ;;  %v2848_v44 = vsel %vm2837_vm5, %v22216_v5, %v2816_v38  ;;  %v3438_v5 = vrot.slane %v22220_v21, %v20819_v16  ;;  %v3883_v38 = vrot.slane %v22259_v7, %v20771_v1 }
 0x286   :  { %4280 = vperm.xlu0 %20149, %v4277_v12   ;;  %3737 = vrot.lane.b32.xlu1 %v29074_v45, %s20189_s18  ;;  %v3070_v39 = vmul.f32 %v2973_v8, %v2848_v44  ;;  %v3071_v42 = vmul.f32 %v2977_v51, %v2847_v48 }
 0x287   :  { %5559 = vmatprep.subr.bf16.mxu1 %v19733_v57 }
 0x288   :  { %5560 = vmatpush1.bf16.msra.mxu1 %v19732_v50  ;;  %v3271_v40 = vpop.permute.xlu0 %3270  ;;  %v2820_v60 = vpop.permute.xlu1 %2819 }
 0x289   :  { %v2845_v31 = vsel %vm2837_vm5, %v2820_v60, %v22481_v25  ;;  %v2846_v11 = vsel %vm2837_vm5, %v2818_v30, %v2820_v60  ;;  %v3879_v30 = vrot.slane %v22259_v7, %v20768_v55 }
 0x28a   :  { %3741 = vrot.lane.b32.xlu1 %v29080_v52, %s20189_s18  ;;  %v3072_v57 = vmul.f32 %v2981_v23, %v2846_v11  ;;  %v3073_v60 = vmul.f32 %v2985_v9, %v2845_v31 }
 0x28c   :  { %v22504_v4 = vpop.permute.xlu0 %3274  ;;  %v3269_v13 = vpop.permute.xlu1 %3268 }
 0x28d   :  { %v3300_v61 = vsel %vm3290_vm6, %v3269_v13, %v3271_v40  ;;  %v3301_v29 = vsel %vm3290_vm6, %v22253_v54, %v3269_v13  ;;  %v17997_v54 = vld [vmem:[%s28625_s1 + $0xc0] ss:$8 sm:$0xf] }
 0x28e   :  { %v3523_v47 = vmul.f32 %v3426_v17, %v3301_v29  ;;  %v3524_v14 = vmul.f32 %v3430_v2, %v3300_v61  ;;  %v18021_v17 = vld [vmem:[%s28625_s1 + $0xc1] ss:$8 sm:$0xf] }
 0x28f   :  { %v18022_v2 = vld [vmem:[%s28625_s1 + $0xc1] ss:$8 sm:$0xf0] }
 0x290   :  { %v19762_v21 = vpack.c.bf16 %v3523_v47, %v3070_v39  ;;  %v3724_v35 = vpop.permute.xlu0 %3723  ;;  %v3273_v20 = vpop.permute.xlu1 %3272  ;;  %v19763_v12 = vpack.c.bf16 %v3524_v14, %v3071_v42  ;;  %v22550_v29 = vor.u32 %v18022_v2, %v18021_v17  ;;  %v3887_v39 = vrot.slane %v22259_v7, %v20774_v43  ;;  %v29082_v14 = vld [vmem:[#allocation40_spill] sm:$0xff] }
 0x291   :  { %v3298_v27 = vsel %vm3290_vm6, %v3273_v20, %v22504_v4  ;;  %v3299_v50 = vsel %vm3290_vm6, %v3271_v40, %v3273_v20  ;;  %v22541_v40 = vor.u32 %v17998_v63, %v17997_v54  ;;  %v3891_v42 = vrot.slane %v22259_v7, %v20819_v16  ;;  %v29083_v20 = vld [vmem:[#allocation45_spill] sm:$0xff] }
 0x292   :  { %v3525_v8 = vmul.f32 %v3434_v33, %v3299_v50  ;;  %v3526_v51 = vmul.f32 %v3438_v5, %v3298_v27  ;;  %5520 = vmatprep.subr.bf16.mxu0 %v19763_v12  ;;  %v224_v7 = vsel %vm217_vm0, %v29082_v14, %v29083_v20 }
 0x293   :  { %5521 = vmatpush1.bf16.msra.mxu0 %v19762_v21  ;;  %v368_v47 = vrot.slane %v22541_v40, %v20925_v10  ;;  %v372_v31 = vrot.slane %v22541_v40, %v29058_v28 }
 0x294   :  { %v19764_v48 = vpack.c.bf16 %v3525_v8, %v3072_v57  ;;  %v22543_v44 = vpop.permute.xlu0 %3727  ;;  %v3722_v13 = vpop.permute.xlu1 %3721  ;;  %v19765_v23 = vpack.c.bf16 %v3526_v51, %v3073_v60  ;;  %v825_v57 = vrot.slane %v22550_v29, %v29058_v28  ;;  %v376_v60 = vrot.slane %v22541_v40, %v29059_v34  ;;  %v29084_v51 = vld [vmem:[#allocation42_spill] sm:$0xff] }
 0x295   :  { %v3753_v9 = vsel %vm3743_vm7, %v3722_v13, %v3724_v35  ;;  %v3754_v61 = vsel %vm3743_vm7, %v22288_v24, %v3722_v13  ;;  %v225_v24 = vsel %vm217_vm0, %v29079_v49, %v29082_v14  ;;  %v821_v49 = vrot.slane %v22550_v29, %v20925_v10 }
 0x296   :  { %v3976_v33 = vmul.f32 %v3879_v30, %v3754_v61  ;;  %v3977_v5 = vmul.f32 %v3883_v38, %v3753_v9  ;;  %5561 = vmatprep.subr.bf16.mxu1 %v19765_v23  ;;  %v380_v8 = vrot.slane %v22541_v40, %v29066_v6  ;;  %v223_v17 = vsel %vm217_vm0, %v29083_v20, %v29084_v51 }
 0x297   :  { %5562 = vmatpush1.bf16.msra.mxu1 %v19764_v48  ;;  %v454_v9 = vmul.f32 %v372_v31, %v224_v7  ;;  %v833_v14 = vrot.slane %v22550_v29, %v29066_v6  ;;  %v455_v20 = vmul.f32 %v376_v60, %v223_v17 }
 0x298   :  { %v19794_v11 = vpack.c.bf16 %v3976_v33, %v3976_v33  ;;  %v19795_v54 = vpack.c.bf16 %v3977_v5, %v3977_v5  ;;  %v656_v63 = vpop.permute.xlu0 %655  ;;  %v3726_v21 = vpop.permute.xlu1 %3725  ;;  %v829_v5 = vrot.slane %v22550_v29, %v29059_v34 }
 0x299   :  { %v3751_v12 = vsel %vm3743_vm7, %v3726_v21, %v22543_v44  ;;  %v3752_v27 = vsel %vm3743_vm7, %v3724_v35, %v3726_v21  ;;  %v453_v35 = vmul.f32 %v368_v47, %v225_v24  ;;  %v29085_v24 = vld [vmem:[#allocation47_spill] sm:$0xff] }
 0x29a   :  { %v3978_v50 = vmul.f32 %v3887_v39, %v3752_v27  ;;  %v3979_v30 = vmul.f32 %v3891_v42, %v3751_v12  ;;  %18387 = vmatprep.subr.msk.bf16.mxu0 %vm5007_vm8, %v19795_v54  ;;  %v5069_v38 = vsel %vm5007_vm8, %v19794_v11, 0 }
 0x29b   :  { %5523 = vmatpush1.bf16.msra.mxu0 %v5069_v38  ;;  %v18046_v38 = vld [vmem:[%s28625_s1 + $0xc2] ss:$8 sm:$0xf0] }
 0x29c   :  { %v19796_v2 = vpack.c.bf16 %v3978_v50, %v3978_v50  ;;  %v19797_v48 = vpack.c.bf16 %v3979_v30, %v3979_v30  ;;  %v22587_v13 = vpop.permute.xlu0 %659  ;;  %v654_v23 = vpop.permute.xlu1 %653  ;;  %v18045_v30 = vld [vmem:[%s28625_s1 + $0xc2] ss:$8 sm:$0xf] }
 0x29d   :  { %v676_v61 = vsel %vm669_vm1, %v654_v23, %v656_v63  ;;  %v677_v33 = vsel %vm669_vm1, %v22338_v15, %v654_v23  ;;  %v222_v15 = vsel %vm217_vm0, %v29084_v51, %v29085_v24  ;;  %v22629_v51 = vor.u32 %v18046_v38, %v18045_v30 }
 0x29e   :  { %v906_v39 = vmul.f32 %v821_v49, %v677_v33  ;;  %v907_v42 = vmul.f32 %v825_v57, %v676_v61  ;;  %18388 = vmatmul.mubr.msk.bf16.vlgmr.msra.gmra.mrb[20].mxu0 %vm5003_vm9, %v22079_v26  ;;  %18389 = vmatprep.subr.msk.bf16.mxu1 %vm5007_vm8, %v19797_v48  ;;  %v5075_v47 = vsel %vm5007_vm8, %v19796_v2, 0  ;;  %v456_v27 = vmul.f32 %v380_v8, %v222_v15  ;;  %v18070_v57 = vld [vmem:[%s28625_s1 + $0xc3] ss:$8 sm:$0xf0] }
 0x29f   :  { %5564 = vmatpush1.bf16.msra.mxu1 %v5075_v47  ;;  %5628 = vmatprep.mubr.bf16.mxu0 %v29025_v46  ;;  %v18093_v61 = vld [vmem:[%s28625_s1 + $0xc4] ss:$8 sm:$0xf]  ;;  %v1278_v47 = vrot.slane %v22629_v51, %v29058_v28 }
 0x2a0   :  { %v19670_v31 = vpack.c.bf16 %v906_v39, %v453_v35  ;;  %v1109_v11 = vpop.permute.xlu0 %1108  ;;  %v658_v54 = vpop.permute.xlu1 %657  ;;  %v19671_v21 = vpack.c.bf16 %v907_v42, %v454_v9  ;;  %v18094_v33 = vld [vmem:[%s28625_s1 + $0xc4] ss:$8 sm:$0xf0]  ;;  %v1274_v42 = vrot.slane %v22629_v51, %v20925_v10 }
 0x2a1   :  { %v674_v7 = vsel %vm669_vm1, %v658_v54, %v22587_v13  ;;  %v675_v12 = vsel %vm669_vm1, %v656_v63, %v658_v54  ;;  %v18069_v63 = vld [vmem:[%s28625_s1 + $0xc3] ss:$8 sm:$0xf] }
 0x2a2   :  { %v908_v49 = vmul.f32 %v829_v5, %v675_v12  ;;  %v909_v50 = vmul.f32 %v833_v14, %v674_v7  ;;  %18390 = vmatmul.mubr.msk.bf16.vlgmr.msra.gmra.mrb[20].mxu1 %vm5003_vm9, %v22079_v26  ;;  %5596 = vmatprep.subr.bf16.mxu0 %v19671_v21  ;;  %v22631_v17 = vor.u32 %v18070_v57, %v18069_v63  ;;  %v18117_v5 = vld [vmem:[%s28625_s1 + $0xc5] ss:$8 sm:$0xf] }
 0x2a3   :  { %5597 = vmatpush1.bf16.msra.mxu0 %v19670_v31  ;;  %5669 = vmatprep.mubr.bf16.mxu1 %v29025_v46  ;;  %v18118_v31 = vld [vmem:[%s28625_s1 + $0xc5] ss:$8 sm:$0xf0]  ;;  %v22674_v63 = vor.u32 %v18094_v33, %v18093_v61 }
 0x2a4   :  { %v19672_v26 = vpack.c.bf16 %v908_v49, %v455_v20  ;;  %v22627_v60 = vpop.permute.xlu0 %1112  ;;  %v1107_v8 = vpop.permute.xlu1 %1106  ;;  %v19673_v35 = vpack.c.bf16 %v909_v50, %v456_v27  ;;  %v1727_v14 = vrot.slane %v22631_v17, %v20925_v10  ;;  %v1731_v15 = vrot.slane %v22631_v17, %v29058_v28 }
 0x2a5   :  { %v1129_v20 = vsel %vm1122_vm2, %v1107_v8, %v1109_v11  ;;  %v1130_v7 = vsel %vm1122_vm2, %v22373_v18, %v1107_v8  ;;  %v1282_v27 = vrot.slane %v22629_v51, %v29059_v34  ;;  %v1286_v49 = vrot.slane %v22629_v51, %v29066_v6 }
 0x2a6   :  { %5637 = vmatprep.subr.bf16.mxu1 %v19673_v35  ;;  %v22633_v2 = vpop.f32.mrb[4].mxu0  ;;  %v1735_v38 = vrot.slane %v22631_v17, %v29059_v34  ;;  %v22683_v8 = vor.u32 %v18118_v31, %v18117_v5  ;;  %v2083_v5 = vrot.slane %v22674_v63, %v20925_v10 }
 0x2a7   :  { %29086 = vst [vmem:[#allocation29_spill] sm:$0xff] %v22633_v2  ;;  %5638 = vmatpush1.bf16.msra.mxu1 %v19672_v26  ;;  %v22635_v48 = vpop.f32.mrb[5].mxu0  ;;  %v1739_v26 = vrot.slane %v22631_v17, %v29066_v6 }
 0x2a8   :  { %29087 = vst [vmem:[#allocation25_spill] sm:$0xff] %v22635_v48  ;;  %v1562_v23 = vpop.permute.xlu0 %1561  ;;  %v1111_v9 = vpop.permute.xlu1 %1110 }
 0x2a9   :  { %v5224_v39 = vpop.f32.mrb[6].mxu0  ;;  %v1127_v61 = vsel %vm1122_vm2, %v1111_v9, %v22627_v60  ;;  %v1128_v33 = vsel %vm1122_vm2, %v1109_v11, %v1111_v9  ;;  %v2536_v11 = vrot.slane %v22683_v8, %v20925_v10 }
 0x2aa   :  { %v5225_v54 = vpop.f32.mrb[7].mxu0  ;;  %v22657_v21 = vpop.f32.mrb[4].mxu1  ;;  %v1359_v39 = vmul.f32 %v1274_v42, %v1130_v7  ;;  %v2087_v42 = vrot.slane %v22674_v63, %v29058_v28  ;;  %v1362_v9 = vmul.f32 %v1286_v49, %v1127_v61 }
 0x2ab   :  { %29088 = vst [vmem:[#allocation62_spill] sm:$0xff] %v22657_v21  ;;  %v22664_v12 = vpop.f32.mrb[5].mxu1  ;;  %v1360_v54 = vmul.f32 %v1278_v47, %v1129_v20 }
 0x2ac   :  { %29089 = vst [vmem:[#allocation58_spill] sm:$0xff] %v22664_v12  ;;  %v22670_v50 = vpop.permute.xlu0 %1565  ;;  %v1560_v30 = vpop.permute.xlu1 %1559 }
 0x2ad   :  { %v1582_v57 = vsel %vm1575_vm3, %v1560_v30, %v1562_v23  ;;  %v1583_v18 = vsel %vm1575_vm3, %v22401_v0, %v1560_v30  ;;  %v5265_v35 = vpop.f32.mrb[6].mxu1 }
 0x2ae   :  { %v1812_v53 = vmul.f32 %v1727_v14, %v1583_v18  ;;  %v1813_v48 = vmul.f32 %v1731_v15, %v1582_v57  ;;  %v5266_v21 = vpop.f32.mrb[7].mxu1  ;;  %v2095_v18 = vrot.slane %v22674_v63, %v29066_v6  ;;  %v2168_v35 = vmul.f32 %v2083_v5, %v29056_v62 }
 0x2b0   :  { %v19702_v12 = vpack.c.bf16 %v1812_v53, %v1359_v39  ;;  %v2373_v0 = vpop.permute.xlu0 %2372  ;;  %v1564_v30 = vpop.permute.xlu1 %1563  ;;  %v19703_v2 = vpack.c.bf16 %v1813_v48, %v1360_v54  ;;  %v2540_v53 = vrot.slane %v22683_v8, %v29058_v28  ;;  %v1361_v48 = vmul.f32 %v1282_v27, %v1128_v33 }
 0x2b1   :  { %v1580_v47 = vsel %vm1575_vm3, %v1564_v30, %v22670_v50  ;;  %v1581_v14 = vsel %vm1575_vm3, %v1562_v23, %v1564_v30  ;;  %v2091_v23 = vrot.slane %v22674_v63, %v29059_v34  ;;  %v2548_v39 = vrot.slane %v22683_v8, %v29066_v6 }
 0x2b2   :  { %v1814_v15 = vmul.f32 %v1735_v38, %v1581_v14  ;;  %v1815_v31 = vmul.f32 %v1739_v26, %v1580_v47  ;;  %5598 = vmatprep.subr.bf16.mxu0 %v19703_v2  ;;  %v2544_v26 = vrot.slane %v22683_v8, %v29059_v34  ;;  %v18141_v47 = vld [vmem:[%s28625_s1 + $0xc6] ss:$8 sm:$0xf] }
 0x2b3   :  { %5599 = vmatpush1.bf16.msra.mxu0 %v19702_v12  ;;  %v2169_v12 = vmul.f32 %v2087_v42, %v29057_v58  ;;  %v2170_v30 = vmul.f32 %v2091_v23, %v29068_v59  ;;  %v18142_v14 = vld [vmem:[%s28625_s1 + $0xc6] ss:$8 sm:$0xf0]  ;;  %v18166_v59 = vld [vmem:[%s28625_s1 + $0xc7] ss:$8 sm:$0xf0] }
 0x2b4   :  { %v19704_v21 = vpack.c.bf16 %v1814_v15, %v1361_v48  ;;  %v22703_v20 = vpop.permute.xlu0 %2376  ;;  %v2371_v7 = vpop.permute.xlu1 %2370  ;;  %v19705_v57 = vpack.c.bf16 %v1815_v31, %v1362_v9  ;;  %v22741_v31 = vor.u32 %v18142_v14, %v18141_v47 }
 0x2b5   :  { %v2390_v27 = vsel %vm2384_vm4, %v2371_v7, %v2373_v0  ;;  %v2391_v2 = vsel %vm2384_vm4, %v22440_v19, %v2371_v7 }
 0x2b6   :  { %v2621_v49 = vmul.f32 %v2536_v11, %v2391_v2  ;;  %v2622_v38 = vmul.f32 %v2540_v53, %v2390_v27  ;;  %5639 = vmatprep.subr.bf16.mxu1 %v19705_v57  ;;  %v2171_v11 = vmul.f32 %v2095_v18, %v29064_v56  ;;  %v2989_v57 = vrot.slane %v22741_v31, %v20925_v10  ;;  %v18189_v27 = vld [vmem:[%s28625_s1 + $0x1c0] ss:$8 sm:$0xf] }
 0x2b7   :  { %5640 = vmatpush1.bf16.msra.mxu1 %v19704_v21  ;;  %v2993_v23 = vrot.slane %v22741_v31, %v29058_v28  ;;  %v18190_v2 = vld [vmem:[%s28625_s1 + $0x1c0] ss:$8 sm:$0xf0] }
 0x2b8   :  { %v19734_v62 = vpack.c.bf16 %v2621_v49, %v2168_v35  ;;  %v2826_v54 = vpop.permute.xlu0 %2825  ;;  %v2375_v61 = vpop.permute.xlu1 %2374  ;;  %v19735_v33 = vpack.c.bf16 %v2622_v38, %v2169_v12  ;;  %v2997_v38 = vrot.slane %v22741_v31, %v29059_v34 }
 0x2b9   :  { %v2388_v19 = vsel %vm2384_vm4, %v2375_v61, %v22703_v20  ;;  %v2389_v58 = vsel %vm2384_vm4, %v2373_v0, %v2375_v61  ;;  %v18165_v0 = vld [vmem:[%s28625_s1 + $0xc7] ss:$8 sm:$0xf] }
 0x2ba   :  { %v2623_v5 = vmul.f32 %v2544_v26, %v2389_v58  ;;  %v2624_v42 = vmul.f32 %v2548_v39, %v2388_v19  ;;  %5600 = vmatprep.subr.bf16.mxu0 %v19735_v33  ;;  %v22743_v21 = vor.u32 %v18166_v59, %v18165_v0  ;;  %v3001_v26 = vrot.slane %v22741_v31, %v29066_v6 }
 0x2bb   :  { %5601 = vmatpush1.bf16.msra.mxu0 %v19734_v62  ;;  %v22779_v58 = vor.u32 %v18190_v2, %v18189_v27 }
 0x2bc   :  { %v19736_v53 = vpack.c.bf16 %v2623_v5, %v2170_v30  ;;  %v22739_v48 = vpop.permute.xlu0 %2829  ;;  %v2824_v9 = vpop.permute.xlu1 %2823  ;;  %v19737_v15 = vpack.c.bf16 %v2624_v42, %v2171_v11  ;;  %v3442_v18 = vrot.slane %v22743_v21, %v20925_v10  ;;  %v3446_v35 = vrot.slane %v22743_v21, %v29058_v28 }
 0x2bd   :  { %v2843_v12 = vsel %vm2837_vm5, %v2824_v9, %v2826_v54  ;;  %v2844_v49 = vsel %vm2837_vm5, %v22481_v25, %v2824_v9  ;;  %v3450_v61 = vrot.slane %v22743_v21, %v29059_v34  ;;  %v3454_v25 = vrot.slane %v22743_v21, %v29066_v6 }
 0x2be   :  { %5641 = vmatprep.subr.bf16.mxu1 %v19737_v15  ;;  %v3074_v30 = vmul.f32 %v2989_v57, %v2844_v49  ;;  %v3075_v5 = vmul.f32 %v2993_v23, %v2843_v12  ;;  %v3895_v57 = vrot.slane %v22779_v58, %v20925_v10  ;;  %v3899_v23 = vrot.slane %v22779_v58, %v29058_v28 }
 0x2bf   :  { %5642 = vmatpush1.bf16.msra.mxu1 %v19736_v53 }
 0x2c0   :  { %v3279_v56 = vpop.permute.xlu0 %3278  ;;  %v2828_v7 = vpop.permute.xlu1 %2827 }
 0x2c1   :  { %v2841_v14 = vsel %vm2837_vm5, %v2828_v7, %v22739_v48  ;;  %v2842_v11 = vsel %vm2837_vm5, %v2826_v54, %v2828_v7 }
 0x2c4   :  { %v22768_v39 = vpop.permute.xlu0 %3282  ;;  %v3277_v62 = vpop.permute.xlu1 %3276 }
 0x2c5   :  { %v3296_v33 = vsel %vm3290_vm6, %v3277_v62, %v3279_v56  ;;  %v3297_v19 = vsel %vm3290_vm6, %v22504_v4, %v3277_v62 }
 0x2c6   :  { %v3527_v42 = vmul.f32 %v3442_v18, %v3297_v19  ;;  %v3528_v47 = vmul.f32 %v3446_v35, %v3296_v33  ;;  %v3076_v18 = vmul.f32 %v2997_v38, %v2842_v11  ;;  %v3077_v35 = vmul.f32 %v3001_v26, %v2841_v14  ;;  %v29091_v11 = vld [vmem:[#allocation49_spill] sm:$0xff] }
 0x2c7   :  { %v3903_v38 = vrot.slane %v22779_v58, %v29059_v34  ;;  %v3907_v26 = vrot.slane %v22779_v58, %v29066_v6 }
 0x2c8   :  { %v19766_v0 = vpack.c.bf16 %v3527_v42, %v3074_v30  ;;  %v3732_v59 = vpop.permute.xlu0 %3731  ;;  %v3281_v53 = vpop.permute.xlu1 %3280  ;;  %v19767_v4 = vpack.c.bf16 %v3528_v47, %v3075_v5 }
 0x2c9   :  { %v3294_v9 = vsel %vm3290_vm6, %v3281_v53, %v22768_v39  ;;  %v3295_v15 = vsel %vm3290_vm6, %v3279_v56, %v3281_v53 }
 0x2ca   :  { %v3529_v54 = vmul.f32 %v3450_v61, %v3295_v15  ;;  %v3530_v7 = vmul.f32 %v3454_v25, %v3294_v9  ;;  %5602 = vmatprep.subr.bf16.mxu0 %v19767_v4  ;;  %v384_v61 = vrot.slane %v22541_v40, %v20768_v55  ;;  %v29090_v25 = vld [vmem:[#allocation44_spill] sm:$0xff] }
 0x2cb   :  { %5603 = vmatpush1.bf16.msra.mxu0 %v19766_v0  ;;  %v221_v30 = vsel %vm217_vm0, %v29085_v24, %v29090_v25  ;;  %v220_v0 = vsel %vm217_vm0, %v29090_v25, %v29091_v11  ;;  %v837_v24 = vrot.slane %v22550_v29, %v20768_v55 }
 0x2cc   :  { %v19768_v27 = vpack.c.bf16 %v3529_v54, %v3076_v18  ;;  %v22795_v2 = vpop.permute.xlu0 %3735  ;;  %v3730_v12 = vpop.permute.xlu1 %3729  ;;  %v19769_v49 = vpack.c.bf16 %v3530_v7, %v3077_v35  ;;  %v392_v18 = vrot.slane %v22541_v40, %v20774_v43  ;;  %v396_v35 = vrot.slane %v22541_v40, %v20819_v16  ;;  %v29092_v54 = vld [vmem:[#allocation46_spill] sm:$0xff] }
 0x2cd   :  { %v3749_v56 = vsel %vm3743_vm7, %v3730_v12, %v3732_v59  ;;  %v3750_v62 = vsel %vm3743_vm7, %v22543_v44, %v3730_v12  ;;  %v388_v44 = vrot.slane %v22541_v40, %v20771_v1  ;;  %v219_v7 = vsel %vm217_vm0, %v29091_v11, %v29092_v54 }
 0x2ce   :  { %v3980_v33 = vmul.f32 %v3895_v57, %v3750_v62  ;;  %v3981_v19 = vmul.f32 %v3899_v23, %v3749_v56  ;;  %5643 = vmatprep.subr.bf16.mxu1 %v19769_v49  ;;  %v841_v23 = vrot.slane %v22550_v29, %v20771_v1  ;;  %v845_v40 = vrot.slane %v22550_v29, %v20774_v43 }
 0x2cf   :  { %5644 = vmatpush1.bf16.msra.mxu1 %v19768_v27  ;;  %v458_v62 = vmul.f32 %v388_v44, %v220_v0  ;;  %v29093_v44 = vld [vmem:[#allocation51_spill] sm:$0xff] }
 0x2d0   :  { %v19798_v5 = vpack.c.bf16 %v3980_v33, %v3980_v33  ;;  %v19799_v42 = vpack.c.bf16 %v3981_v19, %v3981_v19  ;;  %v664_v47 = vpop.permute.xlu0 %663  ;;  %v3734_v14 = vpop.permute.xlu1 %3733 }
 0x2d1   :  { %v3747_v53 = vsel %vm3743_vm7, %v3734_v14, %v22795_v2  ;;  %v3748_v4 = vsel %vm3743_vm7, %v3732_v59, %v3734_v14  ;;  %v457_v59 = vmul.f32 %v384_v61, %v221_v30  ;;  %v22847_v61 = vld [vmem:[%s28628_s4] sm:$0xf] }
 0x2d2   :  { %v3982_v9 = vmul.f32 %v3903_v38, %v3748_v4  ;;  %v3983_v15 = vmul.f32 %v3907_v26, %v3747_v53  ;;  %18391 = vmatprep.subr.msk.bf16.mxu0 %vm5007_vm8, %v19799_v42  ;;  %v5081_v57 = vsel %vm5007_vm8, %v19798_v5, 0  ;;  %v218_v5 = vsel %vm217_vm0, %v29092_v54, %v29093_v44 }
 0x2d3   :  { %5605 = vmatpush1.bf16.msra.mxu0 %v5081_v57  ;;  %v459_v4 = vmul.f32 %v392_v18, %v219_v7  ;;  %v460_v57 = vmul.f32 %v396_v35, %v218_v5  ;;  %v1290_v35 = vrot.slane %v22629_v51, %v20768_v55  ;;  %v1298_v44 = vrot.slane %v22629_v51, %v20774_v43 }
 0x2d4   :  { %v19800_v27 = vpack.c.bf16 %v3982_v9, %v3982_v9  ;;  %v19801_v12 = vpack.c.bf16 %v3983_v15, %v3983_v15  ;;  %v1115_v49 = vpop.permute.xlu0 %1114  ;;  %v662_v56 = vpop.permute.xlu1 %661 }
 0x2d5   :  { %v672_v33 = vsel %vm669_vm1, %v662_v56, %v664_v47  ;;  %v673_v19 = vsel %vm669_vm1, %v22587_v13, %v662_v56  ;;  %v849_v13 = vrot.slane %v22550_v29, %v20819_v16 }
 0x2d6   :  { %v910_v38 = vmul.f32 %v837_v24, %v673_v19  ;;  %v911_v26 = vmul.f32 %v841_v23, %v672_v33  ;;  %18392 = vmatmul.mubr.msk.bf16.vlgmr.msra.gmra.mrb[24].mxu0 %vm5003_vm9, %v22847_v61  ;;  %18393 = vmatprep.subr.msk.bf16.mxu1 %vm5007_vm8, %v19801_v12  ;;  %v5087_v25 = vsel %vm5007_vm8, %v19800_v27, 0  ;;  %v22855_v30 = vpop.f32.mrb[8].mxu0  ;;  %v29094_v24 = vld [vmem:[#allocation67_spill] sm:$0xff]  ;;  %v1126_v33 = vsel %vm1122_vm2, %v22627_v60, %v1115_v49 }
 0x2d7   :  { %5646 = vmatpush1.bf16.msra.mxu1 %v5087_v25  ;;  %5710 = vmatprep.mubr.bf16.mxu0 %v29025_v46  ;;  %v22862_v42 = vpop.f32.mrb[9].mxu0  ;;  %v1294_v19 = vrot.slane %v22629_v51, %v20771_v1  ;;  %v1302_v25 = vrot.slane %v22629_v51, %v20819_v16  ;;  %v2107_v60 = vrot.slane %v22674_v63, %v20774_v43 }
 0x2d8   :  { %v19674_v14 = vpack.c.bf16 %v910_v38, %v457_v59  ;;  %v1119_v11 = vpop.permute.xlu0 %1118  ;;  %v666_v0 = vpop.permute.xlu1 %665  ;;  %v19675_v53 = vpack.c.bf16 %v911_v26, %v458_v62  ;;  %v1747_v38 = vrot.slane %v22631_v17, %v20771_v1 }
 0x2d9   :  { %v670_v29 = vsel %vm669_vm1, %v666_v0, %v29094_v24  ;;  %v671_v9 = vsel %vm669_vm1, %v664_v47, %v666_v0  ;;  %v5306_v15 = vpop.f32.mrb[10].mxu0  ;;  %v2564_v0 = vrot.slane %v22683_v8, %v20819_v16  ;;  %v1363_v24 = vmul.f32 %v1290_v35, %v1126_v33 }
 0x2da   :  { %v912_v23 = vmul.f32 %v845_v40, %v671_v9  ;;  %v913_v54 = vmul.f32 %v849_v13, %v670_v29  ;;  %18394 = vmatmul.mubr.msk.bf16.vlgmr.msra.gmra.mrb[24].mxu1 %vm5003_vm9, %v22847_v61  ;;  %5678 = vmatprep.subr.bf16.mxu0 %v19675_v53  ;;  %v5307_v59 = vpop.f32.mrb[11].mxu0  ;;  %v22871_v27 = vpop.f32.mrb[8].mxu1  ;;  %v1743_v40 = vrot.slane %v22631_v17, %v20768_v55 }
 0x2db   :  { %5679 = vmatpush1.bf16.msra.mxu0 %v19674_v14  ;;  %v22873_v18 = vpop.f32.mrb[9].mxu1  ;;  %5751 = vmatprep.mubr.bf16.mxu1 %v29025_v46  ;;  %v1751_v53 = vrot.slane %v22631_v17, %v20774_v43  ;;  %v2556_v59 = vrot.slane %v22683_v8, %v20771_v1 }
 0x2dc   :  { %v19676_v7 = vpack.c.bf16 %v912_v23, %v459_v4  ;;  %v1570_v12 = vpop.permute.xlu0 %1569  ;;  %v1117_v56 = vpop.permute.xlu1 %1116  ;;  %v19677_v47 = vpack.c.bf16 %v913_v54, %v460_v57  ;;  %v1755_v4 = vrot.slane %v22631_v17, %v20819_v16  ;;  %v2552_v17 = vrot.slane %v22683_v8, %v20768_v55 }
 0x2dd   :  { %v5347_v62 = vpop.f32.mrb[10].mxu1  ;;  %v1125_v13 = vsel %vm1122_vm2, %v1115_v49, %v1117_v56  ;;  %v29095_v49 = vld [vmem:[#allocation71_spill] sm:$0xff]  ;;  %v1124_v15 = vsel %vm1122_vm2, %v1117_v56, %v1119_v11  ;;  %v2560_v56 = vrot.slane %v22683_v8, %v20774_v43  ;;  %v2099_v8 = vrot.slane %v22674_v63, %v20768_v55 }
 0x2de   :  { %5719 = vmatprep.subr.bf16.mxu1 %v19677_v47  ;;  %v5348_v26 = vpop.f32.mrb[11].mxu1  ;;  %v1123_v29 = vsel %vm1122_vm2, %v1119_v11, %v29095_v49  ;;  %v1364_v57 = vmul.f32 %v1294_v19, %v1125_v13  ;;  %v2103_v47 = vrot.slane %v22674_v63, %v20771_v1  ;;  %v1365_v19 = vmul.f32 %v1298_v44, %v1124_v15 }
 0x2df   :  { %5720 = vmatpush1.bf16.msra.mxu1 %v19676_v7  ;;  %v2111_v7 = vrot.slane %v22674_v63, %v20819_v16  ;;  %v1366_v35 = vmul.f32 %v1302_v25, %v1123_v29  ;;  %v29097_v26 = vld [vmem:[#allocation70_spill] sm:$0xff] }
 0x2e0   :  { %v2379_v5 = vpop.permute.xlu0 %2378  ;;  %v1568_v14 = vpop.permute.xlu1 %1567 }
 0x2e1   :  { %v1578_v9 = vsel %vm1575_vm3, %v1568_v14, %v1570_v12  ;;  %v1579_v51 = vsel %vm1575_vm3, %v22670_v50, %v1568_v14  ;;  %v2387_v25 = vsel %vm2384_vm4, %v22703_v20, %v2379_v5 }
 0x2e2   :  { %v1816_v23 = vmul.f32 %v1743_v40, %v1579_v51  ;;  %v1817_v54 = vmul.f32 %v1747_v38, %v1578_v9  ;;  %v29096_v40 = vld [vmem:[#allocation72_spill] sm:$0xff] }
 0x2e4   :  { %v19706_v50 = vpack.c.bf16 %v1816_v23, %v1363_v24  ;;  %v2383_v62 = vpop.permute.xlu0 %2382  ;;  %v1572_v33 = vpop.permute.xlu1 %1571  ;;  %v19707_v11 = vpack.c.bf16 %v1817_v54, %v1364_v57  ;;  %v2175_v57 = vmul.f32 %v2111_v7, %v29080_v52  ;;  %v2625_v23 = vmul.f32 %v2552_v17, %v2387_v25 }
 0x2e5   :  { %v2416_v38 = vsel %vm2384_vm4, %v2383_v62, %v29096_v40  ;;  %v1576_v13 = vsel %vm1575_vm3, %v1572_v33, %v29097_v26  ;;  %v1577_v14 = vsel %vm1575_vm3, %v1570_v12, %v1572_v33  ;;  %v2174_v12 = vmul.f32 %v2107_v60, %v29078_v36 }
 0x2e6   :  { %v2628_v24 = vmul.f32 %v2564_v0, %v2416_v38  ;;  %v1818_v49 = vmul.f32 %v1751_v53, %v1577_v14  ;;  %v1819_v29 = vmul.f32 %v1755_v4, %v1576_v13  ;;  %5680 = vmatprep.subr.bf16.mxu0 %v19707_v11  ;;  %v2173_v54 = vmul.f32 %v2103_v47, %v29074_v45  ;;  %v29098_v11 = vld [vmem:[#allocation75_spill] sm:$0xff] }
 0x2e7   :  { %5681 = vmatpush1.bf16.msra.mxu0 %v19706_v50  ;;  %v2172_v50 = vmul.f32 %v2099_v8, %v29069_v3  ;;  %v3470_v7 = vrot.slane %v22743_v21, %v20819_v16  ;;  %v3458_v45 = vrot.slane %v22743_v21, %v20768_v55  ;;  %v3005_v3 = vrot.slane %v22741_v31, %v20768_v55 }
 0x2e8   :  { %v19708_v44 = vpack.c.bf16 %v1818_v49, %v1365_v19  ;;  %v2834_v9 = vpop.permute.xlu0 %2833  ;;  %v2381_v51 = vpop.permute.xlu1 %2380  ;;  %v19709_v15 = vpack.c.bf16 %v1819_v29, %v1366_v35  ;;  %v19741_v63 = vpack.c.bf16 %v2628_v24, %v2175_v57  ;;  %v29099_v19 = vld [vmem:[#allocation73_spill] sm:$0xff]  ;;  %v3462_v38 = vrot.slane %v22743_v21, %v20771_v1 }
 0x2e9   :  { %v2385_v20 = vsel %vm2384_vm4, %v2381_v51, %v2383_v62  ;;  %v2386_v0 = vsel %vm2384_vm4, %v2379_v5, %v2381_v51  ;;  %v19738_v60 = vpack.c.bf16 %v2625_v23, %v2172_v50  ;;  %v3017_v5 = vrot.slane %v22741_v31, %v20819_v16 }
 0x2ea   :  { %v2626_v53 = vmul.f32 %v2556_v59, %v2386_v0  ;;  %v2627_v4 = vmul.f32 %v2560_v56, %v2385_v20  ;;  %5721 = vmatprep.subr.bf16.mxu1 %v19709_v15  ;;  %v3009_v59 = vrot.slane %v22741_v31, %v20771_v1  ;;  %v3013_v62 = vrot.slane %v22741_v31, %v20774_v43 }
 0x2eb   :  { %5722 = vmatpush1.bf16.msra.mxu1 %v19708_v44  ;;  %v3466_v26 = vrot.slane %v22743_v21, %v20774_v43  ;;  %v3911_v21 = vrot.slane %v22779_v58, %v20768_v55 }
 0x2ec   :  { %v19740_v35 = vpack.c.bf16 %v2627_v4, %v2174_v12  ;;  %v3285_v52 = vpop.permute.xlu0 %3284  ;;  %5723 = vmatprep.subr.bf16.mxu1 %v19741_v63  ;;  %v2832_v17 = vpop.permute.xlu1 %2831  ;;  %v19739_v36 = vpack.c.bf16 %v2626_v53, %v2173_v54 }
 0x2ed   :  { %v3293_v13 = vsel %vm3290_vm6, %v22768_v39, %v3285_v52  ;;  %v2840_v31 = vsel %vm2837_vm5, %v22739_v48, %v2832_v17  ;;  %v2839_v24 = vsel %vm2837_vm5, %v2832_v17, %v2834_v9  ;;  %v3915_v39 = vrot.slane %v22779_v58, %v20771_v1 }
 0x2ee   :  { %5682 = vmatprep.subr.bf16.mxu0 %v19739_v36  ;;  %v3531_v44 = vmul.f32 %v3458_v45, %v3293_v13  ;;  %v3078_v51 = vmul.f32 %v3005_v3, %v2840_v31  ;;  %v3079_v57 = vmul.f32 %v3009_v59, %v2839_v24  ;;  %v3923_v36 = vrot.slane %v22779_v58, %v20819_v16  ;;  %v29100_v3 = vld [vmem:[#allocation74_spill] sm:$0xff] }
 0x2ef   :  { %5683 = vmatpush1.bf16.msra.mxu0 %v19738_v60  ;;  %5724 = vmatpush1.bf16.msra.mxu1 %v19740_v35  ;;  %v3919_v35 = vrot.slane %v22779_v58, %v20774_v43 }
 0x2f0   :  { %v3289_v47 = vpop.permute.xlu0 %3288  ;;  %v2836_v33 = vpop.permute.xlu1 %2835  ;;  %v19770_v63 = vpack.c.bf16 %v3531_v44, %v3078_v51  ;;  %v29107_v51 = vld [vmem:[#allocation62_spill] sm:$0xff] }
 0x2f1   :  { %v3322_v56 = vsel %vm3290_vm6, %v3289_v47, %v29098_v11  ;;  %v2869_v40 = vsel %vm2837_vm5, %v2836_v33, %v29099_v19  ;;  %v2838_v49 = vsel %vm2837_vm5, %v2834_v9, %v2836_v33 }
 0x2f2   :  { %v3534_v14 = vmul.f32 %v3470_v7, %v3322_v56  ;;  %v3081_v25 = vmul.f32 %v3017_v5, %v2869_v40  ;;  %v3080_v23 = vmul.f32 %v3013_v62, %v2838_v49 }
 0x2f4   :  { %v3287_v29 = vpop.permute.xlu1 %3286  ;;  %v19773_v8 = vpack.c.bf16 %v3534_v14, %v3081_v25  ;;  %v3740_v20 = vpop.permute.xlu0 %3739 }
 0x2f5   :  { %v3291_v48 = vsel %vm3290_vm6, %v3287_v29, %v3289_v47  ;;  %v3292_v15 = vsel %vm3290_vm6, %v3285_v52, %v3287_v29 }
 0x2f6   :  { %v3532_v12 = vmul.f32 %v3462_v38, %v3292_v15  ;;  %v3533_v9 = vmul.f32 %v3466_v26, %v3291_v48  ;;  %5725 = vmatprep.subr.bf16.mxu1 %v19773_v8 }
 0x2f8   :  { %v19772_v0 = vpack.c.bf16 %v3533_v9, %v3080_v23  ;;  %v3738_v53 = vpop.permute.xlu1 %3737  ;;  %v19771_v4 = vpack.c.bf16 %v3532_v12, %v3079_v57  ;;  %v29110_v9 = vld [vmem:[#allocation25_spill] sm:$0xff] }
 0x2f9   :  { %v3745_v54 = vsel %vm3743_vm7, %v3738_v53, %v3740_v20  ;;  %v3746_v50 = vsel %vm3743_vm7, %v22795_v2, %v3738_v53 }
 0x2fa   :  { %v3984_v52 = vmul.f32 %v3911_v21, %v3746_v50  ;;  %v3985_v17 = vmul.f32 %v3915_v39, %v3745_v54  ;;  %5684 = vmatprep.subr.bf16.mxu0 %v19771_v4  ;;  %5726 = vmatpush1.bf16.msra.mxu1 %v19772_v0  ;;  %v29106_v39 = vld [vmem:[#allocation58_spill] sm:$0xff] }
 0x2fb   :  { %5685 = vmatpush1.bf16.msra.mxu0 %v19770_v63 }
 0x2fc   :  { %v19802_v60 = vpack.c.bf16 %v3984_v52, %v3984_v52  ;;  %v19803_v7 = vpack.c.bf16 %v3985_v17, %v3985_v17  ;;  %v3742_v5 = vpop.permute.xlu1 %3741 }
 0x2fd   :  { %v3744_v45 = vsel %vm3743_vm7, %v3740_v20, %v3742_v5  ;;  %v3775_v2 = vsel %vm3743_vm7, %v3742_v5, %v29100_v3 }
 0x2fe   :  { %v3986_v59 = vmul.f32 %v3919_v35, %v3744_v45  ;;  %v3987_v47 = vmul.f32 %v3923_v36, %v3775_v2  ;;  %18395 = vmatprep.subr.msk.bf16.mxu0 %vm5007_vm8, %v19803_v7  ;;  %v5093_v62 = vsel %vm5007_vm8, %v19802_v60, 0 }
 0x2ff   :  { %5687 = vmatpush1.bf16.msra.mxu0 %v5093_v62 }
 0x300   :  { %v19804_v33 = vpack.c.bf16 %v3986_v59, %v3986_v59  ;;  %v19805_v58 = vpack.c.bf16 %v3987_v47, %v3987_v47  ;;  %v5888_v59 = vld [vmem:[%s28625_s1] ss:$8 sm:$0xf] }
 0x301   :  { %v5889_v47 = vld [vmem:[%s28625_s1] ss:$8 sm:$0xf0] }
 0x302   :  { %18396 = vmatmul.mubr.msk.bf16.vlgmr.msra.gmra.mrb[28].mxu0 %vm5003_vm9, %v22847_v61  ;;  %18397 = vmatprep.subr.msk.bf16.mxu1 %vm5007_vm8, %v19805_v58  ;;  %v5099_v11 = vsel %vm5007_vm8, %v19804_v33, 0  ;;  %v18421_v33 = vld [vmem:[%s28625_s1 + $0x1] ss:$8 sm:$0xf] }
 0x303   :  { %5728 = vmatpush1.bf16.msra.mxu1 %v5099_v11  ;;  %10730 = vmatprep.mubr.bf16.mxu0 %v29025_v46  ;;  %v18422_v58 = vld [vmem:[%s28625_s1 + $0x1] ss:$8 sm:$0xf0] }
 0x305   :  { %v23003_v56 = vpop.permute.xlu0 %4280 }
 0x306   :  { %v23005_v19 = vpop.f32.mrb[12].mxu0  ;;  %18398 = vmatmul.mubr.msk.bf16.vlgmr.msra.gmra.mrb[28].mxu1 %vm5003_vm9, %v22847_v61  ;;  %v5182_v40 = vadd.f32 %v22471_v22, %v23003_v56  ;;  %v5180_v38 = vadd.f32 %v22455_v32, %v23003_v56  ;;  %v5141_v32 = vadd.f32 %v22463_v41, %v23003_v56  ;;  %v29104_v41 = vld [vmem:[#allocation29_spill] sm:$0xff]  ;;  %v5264_v44 = vadd.f32 %v29106_v39, %v23003_v56 }
 0x307   :  { %v23013_v26 = vpop.f32.mrb[13].mxu0  ;;  %10771 = vmatprep.mubr.bf16.mxu1 %v29025_v46  ;;  %v5221_v8 = vadd.f32 %v29104_v41, %v23003_v56  ;;  %v5262_v48 = vadd.f32 %v29107_v51, %v23003_v56  ;;  %v5223_v20 = vadd.f32 %v29110_v9, %v23003_v56  ;;  %v5303_v52 = vadd.f32 %v22855_v30, %v23003_v56 }
 0x308   :  { %v23016_v13 = vmax.f32 %v5182_v40, 0.0  ;;  %v23018_v31 = vmax.f32 %v5180_v38, 0.0  ;;  %v5388_v14 = vpop.f32.mrb[14].mxu0  ;;  %v23034_v29 = vmax.f32 %v5141_v32, 0.0  ;;  %v23084_v15 = vmax.f32 %v5264_v44, 0.0 }
 0x309   :  { %v5389_v25 = vpop.f32.mrb[15].mxu0  ;;  %v23054_v21 = vmax.f32 %v5221_v8, 0.0  ;;  %v23086_v57 = vmax.f32 %v5262_v48, 0.0  ;;  %v23106_v54 = vmax.f32 %v5223_v20, 0.0  ;;  %v23126_v17 = vmax.f32 %v5303_v52, 0.0 }
 0x30a   :  { %29101 = vst [vmem:[#allocation60_spill] sm:$0xff] %v23016_v13  ;;  %29102 = vst [vmem:[#allocation27_spill] sm:$0xff] %v23018_v31  ;;  %v23020_v24 = vpop.f32.mrb[12].mxu1  ;;  %5798 = vrot.lane.b32.xlu0 %v23016_v13, %s20182_s13  ;;  %5796 = vrot.lane.b32.xlu1 %v23018_v31, %s20182_s13  ;;  %v5346_v30 = vadd.f32 %v22873_v18, %v23003_v56  ;;  %v5344_v36 = vadd.f32 %v22871_v27, %v23003_v56  ;;  %v18470_v52 = vld [vmem:[%s28625_s1 + $0x3] ss:$8 sm:$0xf0] }
 0x30b   :  { %v23026_v22 = vpop.f32.mrb[13].mxu1  ;;  %29103 = vst [vmem:[#allocation64_spill] sm:$0xff] %v23034_v29  ;;  %29105 = vst [vmem:[#allocation59_spill] sm:$0xff] %v23054_v21  ;;  %v5305_v18 = vadd.f32 %v22862_v42, %v23003_v56  ;;  %v23204_v38 = vor.u32 %v5889_v47, %v5888_v59  ;;  %v23206_v14 = vor.u32 %v18422_v58, %v18421_v33 }
 0x30c   :  { %v5429_v61 = vpop.f32.mrb[14].mxu1  ;;  %29108 = vst [vmem:[#allocation31_spill] sm:$0xff] %v23084_v15  ;;  %29109 = vst [vmem:[#allocation26_spill] sm:$0xff] %v23086_v57  ;;  %v23156_v60 = vmax.f32 %v5346_v30, 0.0  ;;  %v23158_v7 = vmax.f32 %v5344_v36, 0.0  ;;  %v5385_v25 = vadd.f32 %v23005_v19, %v23003_v56 }
 0x30d   :  { %v5430_v49 = vpop.f32.mrb[15].mxu1  ;;  %29111 = vst [vmem:[#allocation11_spill] sm:$0xff] %v23106_v54  ;;  %29112 = vst [vmem:[#allocation6_spill] sm:$0xff] %v23126_v17  ;;  %v23170_v27 = vmax.f32 %v5305_v18, 0.0  ;;  %v6367_v41 = vrot.slane %v23206_v14, %v29066_v6  ;;  %v6363_v48 = vrot.slane %v23206_v14, %v29059_v34 }
 0x30e   :  { %6246 = vrot.lane.b32.xlu0 %v23016_v13, %s20183_s30  ;;  %6244 = vrot.lane.b32.xlu1 %v23018_v31, %s20183_s30  ;;  %29113 = vst [vmem:[#allocation8_spill] sm:$0xff] %v23156_v60  ;;  %29114 = vst [vmem:[#allocation16_spill] sm:$0xff] %v23158_v7  ;;  %v5919_v49 = vrot.slane %v23204_v38, %v29066_v6  ;;  %v23223_v19 = vmax.f32 %v5385_v25, 0.0 }
 0x30f   :  { %29115 = vst [vmem:[#allocation18_spill] sm:$0xff] %v23170_v27 }
 0x310   :  { %29117 = vst [vmem:[#allocation66_spill] sm:$0xff] %v23223_v19 }
 0x312   :  { %6242 = vrot.lane.b32.xlu0 %v23034_v29, %s20183_s30  ;;  %5794 = vrot.lane.b32.xlu1 %v23034_v29, %s20182_s13 }
 0x316   :  { %6694 = vrot.lane.b32.xlu0 %v23016_v13, %s20184_s0  ;;  %6692 = vrot.lane.b32.xlu1 %v23018_v31, %s20184_s0 }
 0x31a   :  { %7142 = vrot.lane.b32.xlu0 %v23016_v13, %s20185_s14  ;;  %7140 = vrot.lane.b32.xlu1 %v23018_v31, %s20185_s14 }
 0x31e   :  { %7138 = vrot.lane.b32.xlu0 %v23034_v29, %s20185_s14  ;;  %6690 = vrot.lane.b32.xlu1 %v23034_v29, %s20184_s0 }
 0x322   :  { %7944 = vrot.lane.b32.xlu0 %v23054_v21, %s20186_s15  ;;  %7942 = vrot.lane.b32.xlu1 %v23016_v13, %s20186_s15 }
 0x326   :  { %8390 = vrot.lane.b32.xlu0 %v23016_v13, %s20187_s16  ;;  %7940 = vrot.lane.b32.xlu1 %v23018_v31, %s20186_s15 }
 0x32a   :  { %8838 = vrot.lane.b32.xlu0 %v23016_v13, %s20188_s17  ;;  %8392 = vrot.lane.b32.xlu1 %v23054_v21, %s20187_s16 }
 0x32e   :  { %8388 = vrot.lane.b32.xlu0 %v23018_v31, %s20187_s16  ;;  %8840 = vrot.lane.b32.xlu1 %v23054_v21, %s20188_s17 }
 0x332   :  { %9284 = vrot.lane.b32.xlu0 %v23018_v31, %s20189_s18  ;;  %8836 = vrot.lane.b32.xlu1 %v23018_v31, %s20188_s17 }
 0x336   :  { %9288 = vrot.lane.b32.xlu0 %v23054_v21, %s20189_s18  ;;  %9286 = vrot.lane.b32.xlu1 %v23016_v13, %s20189_s18 }
 0x33a   :  { %v23088_v23 = vpop.f32.mrb[16].mxu0  ;;  %5806 = vrot.lane.b32.xlu0 %v23084_v15, %s20182_s13  ;;  %5804 = vrot.lane.b32.xlu1 %v23086_v57, %s20182_s13 }
 0x33b   :  { %v23094_v12 = vpop.f32.mrb[17].mxu0 }
 0x33c   :  { %v5470_v0 = vpop.f32.mrb[18].mxu0 }
 0x33d   :  { %v5471_v53 = vpop.f32.mrb[19].mxu0  ;;  %v5915_v0 = vrot.slane %v23204_v38, %v29059_v34 }
 0x33e   :  { %v23098_v4 = vpop.f32.mrb[16].mxu1  ;;  %6254 = vrot.lane.b32.xlu0 %v23084_v15, %s20183_s30  ;;  %6252 = vrot.lane.b32.xlu1 %v23086_v57, %s20183_s30  ;;  %v18445_v53 = vld [vmem:[%s28625_s1 + $0x2] ss:$8 sm:$0xf] }
 0x33f   :  { %v23104_v63 = vpop.f32.mrb[17].mxu1 }
 0x340   :  { %v5511_v50 = vpop.f32.mrb[18].mxu1 }
 0x341   :  { %v5512_v35 = vpop.f32.mrb[19].mxu1  ;;  %v18446_v50 = vld [vmem:[%s28625_s1 + $0x2] ss:$8 sm:$0xf0] }
 0x342   :  { %6250 = vrot.lane.b32.xlu0 %v23106_v54, %s20183_s30  ;;  %5802 = vrot.lane.b32.xlu1 %v23106_v54, %s20182_s13  ;;  %v18469_v35 = vld [vmem:[%s28625_s1 + $0x3] ss:$8 sm:$0xf]  ;;  %v23260_v59 = vor.u32 %v18446_v50, %v18445_v53 }
 0x343   :  { %v23264_v58 = vor.u32 %v18470_v52, %v18469_v35 }
 0x345   :  { %v7259_v53 = vrot.slane %v23264_v58, %v29059_v34 }
 0x346   :  { %6702 = vrot.lane.b32.xlu0 %v23084_v15, %s20184_s0  ;;  %6700 = vrot.lane.b32.xlu1 %v23086_v57, %s20184_s0 }
 0x34a   :  { %7150 = vrot.lane.b32.xlu0 %v23084_v15, %s20185_s14  ;;  %7148 = vrot.lane.b32.xlu1 %v23086_v57, %s20185_s14 }
 0x34e   :  { %7146 = vrot.lane.b32.xlu0 %v23106_v54, %s20185_s14  ;;  %6698 = vrot.lane.b32.xlu1 %v23106_v54, %s20184_s0 }
 0x352   :  { %7952 = vrot.lane.b32.xlu0 %v23126_v17, %s20186_s15  ;;  %7950 = vrot.lane.b32.xlu1 %v23084_v15, %s20186_s15 }
 0x356   :  { %8398 = vrot.lane.b32.xlu0 %v23084_v15, %s20187_s16  ;;  %7948 = vrot.lane.b32.xlu1 %v23086_v57, %s20186_s15 }
 0x35a   :  { %8846 = vrot.lane.b32.xlu0 %v23084_v15, %s20188_s17  ;;  %8400 = vrot.lane.b32.xlu1 %v23126_v17, %s20187_s16 }
 0x35e   :  { %8396 = vrot.lane.b32.xlu0 %v23086_v57, %s20187_s16  ;;  %8848 = vrot.lane.b32.xlu1 %v23126_v17, %s20188_s17 }
 0x362   :  { %9292 = vrot.lane.b32.xlu0 %v23086_v57, %s20189_s18  ;;  %8844 = vrot.lane.b32.xlu1 %v23086_v57, %s20188_s17 }
 0x366   :  { %9296 = vrot.lane.b32.xlu0 %v23126_v17, %s20189_s18  ;;  %9294 = vrot.lane.b32.xlu1 %v23084_v15, %s20189_s18 }
 0x36a   :  { %5814 = vrot.lane.b32.xlu0 %v23156_v60, %s20182_s13  ;;  %5812 = vrot.lane.b32.xlu1 %v23158_v7, %s20182_s13 }
 0x36e   :  { %6262 = vrot.lane.b32.xlu0 %v23156_v60, %s20183_s30  ;;  %6260 = vrot.lane.b32.xlu1 %v23158_v7, %s20183_s30 }
 0x371   :  { %v23172_v5 = vpop.f32.mrb[20].mxu0 }
 0x372   :  { %v23174_v45 = vpop.f32.mrb[21].mxu0  ;;  %6258 = vrot.lane.b32.xlu0 %v23170_v27, %s20183_s30  ;;  %5810 = vrot.lane.b32.xlu1 %v23170_v27, %s20182_s13 }
 0x373   :  { %v5552_v3 = vpop.f32.mrb[22].mxu0 }
 0x374   :  { %v5553_v42 = vpop.f32.mrb[23].mxu0 }
 0x375   :  { %v23180_v2 = vpop.f32.mrb[20].mxu1 }
 0x376   :  { %v23188_v62 = vpop.f32.mrb[21].mxu1  ;;  %6710 = vrot.lane.b32.xlu0 %v23156_v60, %s20184_s0  ;;  %6708 = vrot.lane.b32.xlu1 %v23158_v7, %s20184_s0 }
 0x377   :  { %v5593_v11 = vpop.f32.mrb[22].mxu1 }
 0x378   :  { %v5594_v40 = vpop.f32.mrb[23].mxu1 }
 0x37a   :  { %7158 = vrot.lane.b32.xlu0 %v23156_v60, %s20185_s14  ;;  %7156 = vrot.lane.b32.xlu1 %v23158_v7, %s20185_s14 }
 0x37c   :  { %v23210_v32 = vpop.permute.xlu0 %5798  ;;  %v5797_v61 = vpop.permute.xlu1 %5796 }
 0x37d   :  { %29116 = vst [vmem:[#allocation13_spill] sm:$0xff] %v23210_v32  ;;  %v5884_v8 = vsel %vm217_vm0, %v5797_v61, %v23210_v32 }
 0x37e   :  { %7154 = vrot.lane.b32.xlu0 %v23170_v27, %s20185_s14  ;;  %6706 = vrot.lane.b32.xlu1 %v23170_v27, %s20184_s0  ;;  %v6067_v9 = vmul.f32 %v5919_v49, %v5884_v8  ;;  %v7263_v49 = vrot.slane %v23264_v58, %v29066_v6  ;;  %v18494_v8 = vld [vmem:[%s28625_s1 + $0x4] ss:$8 sm:$0xf0] }
 0x380   :  { %v23225_v39 = vpop.permute.xlu0 %6246  ;;  %v6245_v44 = vpop.permute.xlu1 %6244 }
 0x381   :  { %29118 = vst [vmem:[#allocation61_spill] sm:$0xff] %v23225_v39  ;;  %v6332_v51 = vsel %vm669_vm1, %v6245_v44, %v23225_v39 }
 0x382   :  { %v6515_v20 = vmul.f32 %v6367_v41, %v6332_v51  ;;  %7960 = vrot.lane.b32.xlu0 %v23223_v19, %s20186_s15  ;;  %7958 = vrot.lane.b32.xlu1 %v23156_v60, %s20186_s15  ;;  %v18493_v41 = vld [vmem:[%s28625_s1 + $0x4] ss:$8 sm:$0xf]  ;;  %v18517_v51 = vld [vmem:[%s28625_s1 + $0x5] ss:$8 sm:$0xf] }
 0x383   :  { %v23300_v50 = vor.u32 %v18494_v8, %v18493_v41 }
 0x384   :  { %v23250_v30 = vpop.permute.xlu0 %6242  ;;  %v23252_v36 = vpop.permute.xlu1 %5794  ;;  %v19809_v18 = vpack.c.bf16 %v6515_v20, %v6067_v9 }
 0x385   :  { %v6333_v3 = vsel %vm669_vm1, %v23250_v30, %v6245_v44  ;;  %v5885_v42 = vsel %vm217_vm0, %v23252_v36, %v5797_v61  ;;  %v6815_v61 = vrot.slane %v23260_v59, %v29066_v6  ;;  %29121 = vst [vmem:[#allocation68_spill] sm:$0xff] %v23300_v50 }
 0x386   :  { %v6514_v47 = vmul.f32 %v6363_v48, %v6333_v3  ;;  %v6066_v33 = vmul.f32 %v5915_v0, %v5885_v42  ;;  %10739 = vmatprep.subr.bf16.mxu1 %v19809_v18  ;;  %8406 = vrot.lane.b32.xlu0 %v23156_v60, %s20187_s16  ;;  %v18518_v48 = vld [vmem:[%s28625_s1 + $0x5] ss:$8 sm:$0xf0]  ;;  %v6811_v18 = vrot.slane %v23260_v59, %v29059_v34 }
 0x387   :  { %7956 = vrot.lane.b32.xlu1 %v23158_v7, %s20186_s15  ;;  %v23306_v3 = vor.u32 %v18518_v48, %v18517_v51  ;;  %v5428_v51 = vadd.f32 %v23026_v22, %v23003_v56 }
 0x388   :  { %v19808_v11 = vpack.c.bf16 %v6514_v47, %v6066_v33  ;;  %v23268_v40 = vpop.permute.xlu0 %6694  ;;  %v6693_v25 = vpop.permute.xlu1 %6692 }
 0x389   :  { %29119 = vst [vmem:[#allocation33_spill] sm:$0xff] %v23268_v40  ;;  %v6780_v44 = vsel %vm1122_vm2, %v6693_v25, %v23268_v40  ;;  %29122 = vst [vmem:[#allocation63_spill] sm:$0xff] %v23306_v3  ;;  %v8059_v22 = vrot.slane %v23306_v3, %v29059_v34 }
 0x38a   :  { %8854 = vrot.lane.b32.xlu0 %v23156_v60, %s20188_s17  ;;  %10740 = vmatpush1.bf16.msra.mxu1 %v19808_v11  ;;  %v6963_v35 = vmul.f32 %v6815_v61, %v6780_v44  ;;  %v8063_v44 = vrot.slane %v23306_v3, %v29066_v6 }
 0x38b   :  { %8408 = vrot.lane.b32.xlu1 %v23223_v19, %s20187_s16 }
 0x38c   :  { %v23293_v9 = vpop.permute.xlu0 %7142  ;;  %v7141_v20 = vpop.permute.xlu1 %7140 }
 0x38d   :  { %29120 = vst [vmem:[#allocation28_spill] sm:$0xff] %v23293_v9  ;;  %v7228_v0 = vsel %vm1575_vm3, %v7141_v20, %v23293_v9 }
 0x38e   :  { %v7411_v52 = vmul.f32 %v7263_v49, %v7228_v0  ;;  %8404 = vrot.lane.b32.xlu0 %v23158_v7, %s20187_s16  ;;  %v7615_v49 = vrot.slane %v23300_v50, %v29066_v6  ;;  %v5426_v0 = vadd.f32 %v23020_v24, %v23003_v56  ;;  %v18541_v24 = vld [vmem:[%s28625_s1 + $0x6] ss:$8 sm:$0xf] }
 0x38f   :  { %8856 = vrot.lane.b32.xlu1 %v23223_v19, %s20188_s17 }
 0x390   :  { %v23310_v42 = vpop.permute.xlu0 %7138  ;;  %v23312_v47 = vpop.permute.xlu1 %6690  ;;  %v19841_v33 = vpack.c.bf16 %v7411_v52, %v6963_v35  ;;  %v7611_v35 = vrot.slane %v23300_v50, %v29059_v34 }
 0x391   :  { %29123 = vst [vmem:[#allocation35_spill] sm:$0xff] %v23310_v42  ;;  %29124 = vst [vmem:[#allocation30_spill] sm:$0xff] %v23312_v47  ;;  %v7229_v11 = vsel %vm1575_vm3, %v23310_v42, %v7141_v20  ;;  %v6781_v61 = vsel %vm1122_vm2, %v23312_v47, %v6693_v25 }
 0x392   :  { %v7410_v41 = vmul.f32 %v7259_v53, %v7229_v11  ;;  %v6962_v8 = vmul.f32 %v6811_v18, %v6781_v61  ;;  %9300 = vrot.lane.b32.xlu0 %v23158_v7, %s20189_s18  ;;  %10741 = vmatprep.subr.bf16.mxu1 %v19841_v33  ;;  %v7763_v18 = vmul.f32 %v7615_v49, %v23016_v13  ;;  %v18542_v33 = vld [vmem:[%s28625_s1 + $0x6] ss:$8 sm:$0xf0]  ;;  %v18565_v11 = vld [vmem:[%s28625_s1 + $0x7] ss:$8 sm:$0xf] }
 0x393   :  { %8852 = vrot.lane.b32.xlu1 %v23158_v7, %s20188_s17  ;;  %v18566_v61 = vld [vmem:[%s28625_s1 + $0x7] ss:$8 sm:$0xf0]  ;;  %v23358_v49 = vmax.f32 %v5428_v51, 0.0  ;;  %v23370_v40 = vor.u32 %v18542_v33, %v18541_v24 }
 0x394   :  { %v19840_v48 = vpack.c.bf16 %v7410_v41, %v6962_v8  ;;  %v23330_v25 = vpop.permute.xlu0 %7944  ;;  %v7943_v20 = vpop.permute.xlu1 %7942  ;;  %v23372_v51 = vor.u32 %v18566_v61, %v18565_v11 }
 0x395   :  { %29125 = vst [vmem:[#allocation15_spill] sm:$0xff] %v23330_v25  ;;  %v8027_v53 = vsel %vm2384_vm4, %v7943_v20, %v23330_v25  ;;  %29126 = vst [vmem:[#allocation20_spill] sm:$0xff] %v23358_v49 }
 0x396   :  { %v8211_v52 = vmul.f32 %v8063_v44, %v8027_v53  ;;  %9304 = vrot.lane.b32.xlu0 %v23223_v19, %s20189_s18  ;;  %10742 = vmatpush1.bf16.msra.mxu1 %v19840_v48  ;;  %v23362_v48 = vmax.f32 %v5426_v0, 0.0  ;;  %v7762_v53 = vmul.f32 %v7611_v35, %v23018_v31  ;;  %29129 = vst [vmem:[#allocation32_spill] sm:$0xff] %v23370_v40  ;;  %29130 = vst [vmem:[#allocation69_spill] sm:$0xff] %v23372_v51 }
 0x397   :  { %9302 = vrot.lane.b32.xlu1 %v23156_v60, %s20189_s18  ;;  %v5387_v0 = vadd.f32 %v23013_v26, %v23003_v56  ;;  %v18590_v26 = vld [vmem:[%s28625_s1 + $0x100] ss:$8 sm:$0xf0] }
 0x398   :  { %v8391_v41 = vpop.permute.xlu0 %8390  ;;  %v23360_v8 = vpop.permute.xlu1 %7940  ;;  %v19873_v44 = vpack.c.bf16 %v8211_v52, %v7763_v18  ;;  %29128 = vst [vmem:[#allocation37_spill] sm:$0xff] %v23362_v48 }
 0x399   :  { %29127 = vst [vmem:[#allocation50_spill] sm:$0xff] %v23360_v8  ;;  %v8028_v13 = vsel %vm2384_vm4, %v23360_v8, %v7943_v20  ;;  %v8959_v20 = vrot.slane %v23372_v51, %v29066_v6  ;;  %v23397_v24 = vmax.f32 %v5387_v0, 0.0  ;;  %v8955_v0 = vrot.slane %v23372_v51, %v29059_v34 }
 0x39a   :  { %v8210_v25 = vmul.f32 %v8059_v22, %v8028_v13  ;;  %5822 = vrot.lane.b32.xlu0 %v23358_v49, %s20182_s13  ;;  %10743 = vmatprep.subr.bf16.mxu1 %v19873_v44  ;;  %v8511_v13 = vrot.slane %v23370_v40, %v29066_v6  ;;  %v18589_v22 = vld [vmem:[%s28625_s1 + $0x100] ss:$8 sm:$0xf] }
 0x39b   :  { %5820 = vrot.lane.b32.xlu1 %v23362_v48, %s20182_s13  ;;  %29132 = vst [vmem:[#allocation22_spill] sm:$0xff] %v23397_v24  ;;  %v23406_v44 = vor.u32 %v18590_v26, %v18589_v22 }
 0x39c   :  { %v19872_v35 = vpack.c.bf16 %v8210_v25, %v7762_v53  ;;  %v8839_v52 = vpop.permute.xlu0 %8838  ;;  %v23378_v18 = vpop.permute.xlu1 %8392 }
 0x39d   :  { %29131 = vst [vmem:[#allocation65_spill] sm:$0xff] %v23378_v18  ;;  %v8475_v25 = vsel %vm2837_vm5, %v8391_v41, %v23378_v18  ;;  %29135 = vst [vmem:[#allocation17_spill] sm:$0xff] %v23406_v44 }
 0x39e   :  { %6270 = vrot.lane.b32.xlu0 %v23358_v49, %s20183_s30  ;;  %10744 = vmatpush1.bf16.msra.mxu1 %v19872_v35  ;;  %v8659_v53 = vmul.f32 %v8511_v13, %v8475_v25  ;;  %v8507_v35 = vrot.slane %v23370_v40, %v29059_v34  ;;  %v9403_v25 = vrot.slane %v23406_v44, %v29059_v34 }
 0x39f   :  { %6268 = vrot.lane.b32.xlu1 %v23362_v48, %s20183_s30 }
 0x3a0   :  { %v23399_v33 = vpop.permute.xlu0 %8388  ;;  %v23401_v11 = vpop.permute.xlu1 %8840 }
 0x3a1   :  { %29133 = vst [vmem:[#allocation34_spill] sm:$0xff] %v23399_v33  ;;  %29134 = vst [vmem:[#allocation39_spill] sm:$0xff] %v23401_v11  ;;  %v8923_v61 = vsel %vm3290_vm6, %v8839_v52, %v23401_v11  ;;  %v8476_v18 = vsel %vm2837_vm5, %v23399_v33, %v8391_v41  ;;  %v9407_v41 = vrot.slane %v23406_v44, %v29066_v6 }
 0x3a2   :  { %v9107_v31 = vmul.f32 %v8959_v20, %v8923_v61  ;;  %6266 = vrot.lane.b32.xlu0 %v23397_v24, %s20183_s30  ;;  %v8658_v61 = vmul.f32 %v8507_v35, %v8476_v18 }
 0x3a3   :  { %5818 = vrot.lane.b32.xlu1 %v23397_v24, %s20182_s13 }
 0x3a4   :  { %v23419_v22 = vpop.permute.xlu0 %9284  ;;  %v23421_v13 = vpop.permute.xlu1 %8836  ;;  %v19905_v26 = vpack.c.bf16 %v9107_v31, %v8659_v53 }
 0x3a5   :  { %29136 = vst [vmem:[#allocation19_spill] sm:$0xff] %v23419_v22  ;;  %29137 = vst [vmem:[#allocation9_spill] sm:$0xff] %v23421_v13  ;;  %v8924_v20 = vsel %vm3290_vm6, %v23421_v13, %v8839_v52 }
 0x3a6   :  { %v9106_v11 = vmul.f32 %v8955_v0, %v8924_v20  ;;  %6718 = vrot.lane.b32.xlu0 %v23358_v49, %s20184_s0  ;;  %10745 = vmatprep.subr.bf16.mxu1 %v19905_v26 }
 0x3a7   :  { %6716 = vrot.lane.b32.xlu1 %v23362_v48, %s20184_s0 }
 0x3a8   :  { %v19904_v31 = vpack.c.bf16 %v9106_v11, %v8658_v61  ;;  %v23434_v53 = vpop.permute.xlu0 %9288  ;;  %v9287_v9 = vpop.permute.xlu1 %9286  ;;  %v5467_v61 = vadd.f32 %v23088_v23, %v23003_v56 }
 0x3a9   :  { %29138 = vst [vmem:[#allocation12_spill] sm:$0xff] %v23434_v53  ;;  %v9371_v52 = vsel %vm3743_vm7, %v9287_v9, %v23434_v53  ;;  %v9372_v18 = vsel %vm3743_vm7, %v23419_v22, %v9287_v9  ;;  %v23442_v35 = vpop.f32.mrb[24].mxu0 }
 0x3aa   :  { %v9554_v0 = vmul.f32 %v9403_v25, %v9372_v18  ;;  %v9555_v26 = vmul.f32 %v9407_v41, %v9371_v52  ;;  %v23444_v20 = vpop.f32.mrb[25].mxu0  ;;  %7166 = vrot.lane.b32.xlu0 %v23358_v49, %s20185_s14  ;;  %10746 = vmatpush1.bf16.msra.mxu1 %v19904_v31  ;;  %v5935_v52 = vrot.slane %v23204_v38, %v20819_v16 }
 0x3ab   :  { %7164 = vrot.lane.b32.xlu1 %v23362_v48, %s20185_s14  ;;  %v5634_v11 = vpop.f32.mrb[26].mxu0  ;;  %v6383_v31 = vrot.slane %v23206_v14, %v20819_v16 }
 0x3ac   :  { %v19936_v53 = vpack.c.bf16 %v9554_v0, %v9554_v0  ;;  %v19937_v32 = vpack.c.bf16 %v9555_v26, %v9555_v26  ;;  %v23452_v9 = vpop.permute.xlu0 %5806  ;;  %v5805_v39 = vpop.permute.xlu1 %5804  ;;  %v23474_v26 = vld [vmem:[%s28630_s6] sm:$0xf] }
 0x3ad   :  { %29139 = vst [vmem:[#allocation10_spill] sm:$0xff] %v23452_v9  ;;  %v23454_v25 = vpop.f32.mrb[24].mxu1  ;;  %v5635_v41 = vpop.f32.mrb[27].mxu0  ;;  %v5880_v0 = vsel %vm217_vm0, %v5805_v39, %v23452_v9  ;;  %v6379_v9 = vrot.slane %v23206_v14, %v20774_v43 }
 0x3ae   :  { %v23458_v18 = vpop.f32.mrb[25].mxu1  ;;  %7162 = vrot.lane.b32.xlu0 %v23397_v24, %s20185_s14  ;;  %18775 = vmatprep.subr.msk.bf16.mxu1 %vm5007_vm8, %v19937_v32  ;;  %v10609_v23 = vsel %vm5007_vm8, %v19936_v53, 0  ;;  %v23476_v32 = vmax.f32 %v5467_v61, 0.0  ;;  %v5931_v61 = vrot.slane %v23204_v38, %v20774_v43 }
 0x3af   :  { %6714 = vrot.lane.b32.xlu1 %v23397_v24, %s20184_s0  ;;  %10748 = vmatpush1.bf16.msra.mxu1 %v10609_v23  ;;  %v5675_v11 = vpop.f32.mrb[26].mxu1  ;;  %v6071_v23 = vmul.f32 %v5935_v52, %v5880_v0 }
 0x3b0   :  { %29140 = vst [vmem:[#allocation14_spill] sm:$0xff] %v23476_v32  ;;  %v23478_v53 = vpop.permute.xlu0 %6254  ;;  %v6253_v41 = vpop.permute.xlu1 %6252 }
 0x3b1   :  { %29141 = vst [vmem:[#allocation23_spill] sm:$0xff] %v23478_v53  ;;  %v6328_v1 = vsel %vm669_vm1, %v6253_v41, %v23478_v53  ;;  %v5676_v55 = vpop.f32.mrb[27].mxu1 }
 0x3b2   :  { %v6519_v22 = vmul.f32 %v6383_v31, %v6328_v1  ;;  %7968 = vrot.lane.b32.xlu0 %v23476_v32, %s20186_s15  ;;  %18776 = vmatmul.mubr.msk.bf16.vlgmr.msra.gmra.mrb[32].mxu1 %vm5003_vm9, %v23474_v26 }
 0x3b3   :  { %7966 = vrot.lane.b32.xlu1 %v23358_v49, %s20186_s15  ;;  %10853 = vmatprep.mubr.bf16.mxu1 %v29025_v46 }
 0x3b4   :  { %v23494_v11 = vpop.permute.xlu0 %6250  ;;  %v23496_v53 = vpop.permute.xlu1 %5802  ;;  %v19813_v55 = vpack.c.bf16 %v6519_v22, %v6071_v23 }
 0x3b5   :  { %29142 = vst [vmem:[#allocation36_spill] sm:$0xff] %v23494_v11  ;;  %29143 = vst [vmem:[#allocation41_spill] sm:$0xff] %v23496_v53  ;;  %v6329_v1 = vsel %vm669_vm1, %v23494_v11, %v6253_v41  ;;  %v5881_v52 = vsel %vm217_vm0, %v23496_v53, %v5805_v39  ;;  %v6831_v41 = vrot.slane %v23260_v59, %v20819_v16 }
 0x3b6   :  { %v6518_v31 = vmul.f32 %v6379_v9, %v6329_v1  ;;  %v6070_v0 = vmul.f32 %v5931_v61, %v5881_v52  ;;  %8414 = vrot.lane.b32.xlu0 %v23358_v49, %s20187_s16  ;;  %10821 = vmatprep.subr.bf16.mxu1 %v19813_v55  ;;  %v7279_v39 = vrot.slane %v23264_v58, %v20819_v16 }
 0x3b7   :  { %7964 = vrot.lane.b32.xlu1 %v23362_v48, %s20186_s15 }
 0x3b8   :  { %v19812_v33 = vpack.c.bf16 %v6518_v31, %v6070_v0  ;;  %v23508_v13 = vpop.permute.xlu0 %6702  ;;  %v6701_v22 = vpop.permute.xlu1 %6700  ;;  %v6827_v31 = vrot.slane %v23260_v59, %v20774_v43 }
 0x3b9   :  { %29144 = vst [vmem:[#allocation38_spill] sm:$0xff] %v23508_v13  ;;  %v6776_v9 = vsel %vm1122_vm2, %v6701_v22, %v23508_v13 }
 0x3ba   :  { %8862 = vrot.lane.b32.xlu0 %v23358_v49, %s20188_s17  ;;  %10822 = vmatpush1.bf16.msra.mxu1 %v19812_v33  ;;  %v6967_v1 = vmul.f32 %v6831_v41, %v6776_v9  ;;  %v7275_v33 = vrot.slane %v23264_v58, %v20774_v43  ;;  %v7631_v9 = vrot.slane %v23300_v50, %v20819_v16 }
 0x3bb   :  { %8416 = vrot.lane.b32.xlu1 %v23476_v32, %s20187_s16 }
 0x3bc   :  { %v23521_v23 = vpop.permute.xlu0 %7150  ;;  %v7149_v61 = vpop.permute.xlu1 %7148 }
 0x3bd   :  { %29145 = vst [vmem:[#allocation21_spill] sm:$0xff] %v23521_v23  ;;  %v7224_v55 = vsel %vm1575_vm3, %v7149_v61, %v23521_v23 }
 0x3be   :  { %v7415_v52 = vmul.f32 %v7279_v39, %v7224_v55  ;;  %8412 = vrot.lane.b32.xlu0 %v23362_v48, %s20187_s16 }
 0x3bf   :  { %8864 = vrot.lane.b32.xlu1 %v23476_v32, %s20188_s17 }
 0x3c0   :  { %v23534_v0 = vpop.permute.xlu0 %7146  ;;  %v23536_v13 = vpop.permute.xlu1 %6698  ;;  %v19845_v53 = vpack.c.bf16 %v7415_v52, %v6967_v1  ;;  %v8079_v1 = vrot.slane %v23306_v3, %v20819_v16 }
 0x3c1   :  { %29146 = vst [vmem:[#allocation43_spill] sm:$0xff] %v23534_v0  ;;  %29147 = vst [vmem:[#allocation24_spill] sm:$0xff] %v23536_v13  ;;  %v7225_v41 = vsel %vm1575_vm3, %v23534_v0, %v7149_v61  ;;  %v6777_v39 = vsel %vm1122_vm2, %v23536_v13, %v6701_v22  ;;  %v5510_v61 = vadd.f32 %v23104_v63, %v23003_v56 }
 0x3c2   :  { %v7414_v55 = vmul.f32 %v7275_v33, %v7225_v41  ;;  %v6966_v23 = vmul.f32 %v6827_v31, %v6777_v39  ;;  %9308 = vrot.lane.b32.xlu0 %v23362_v48, %s20189_s18  ;;  %10823 = vmatprep.subr.bf16.mxu1 %v19845_v53  ;;  %v5508_v33 = vadd.f32 %v23098_v4, %v23003_v56 }
 0x3c3   :  { %8860 = vrot.lane.b32.xlu1 %v23362_v48, %s20188_s17  ;;  %v7627_v31 = vrot.slane %v23300_v50, %v20774_v43  ;;  %v8075_v63 = vrot.slane %v23306_v3, %v20774_v43  ;;  %v23570_v4 = vmax.f32 %v5510_v61, 0.0 }
 0x3c4   :  { %v19844_v52 = vpack.c.bf16 %v7414_v55, %v6966_v23  ;;  %v23554_v22 = vpop.permute.xlu0 %7952  ;;  %v7951_v13 = vpop.permute.xlu1 %7950  ;;  %v7767_v23 = vmul.f32 %v7631_v9, %v23084_v15  ;;  %v23574_v0 = vmax.f32 %v5508_v33, 0.0  ;;  %v5469_v9 = vadd.f32 %v23094_v12, %v23003_v56 }
 0x3c5   :  { %29148 = vst [vmem:[#allocation40_spill] sm:$0xff] %v23554_v22  ;;  %v8023_v53 = vsel %vm2384_vm4, %v7951_v13, %v23554_v22  ;;  %29149 = vst [vmem:[#allocation45_spill] sm:$0xff] %v23570_v4 }
 0x3c6   :  { %v8215_v41 = vmul.f32 %v8079_v1, %v8023_v53  ;;  %9312 = vrot.lane.b32.xlu0 %v23476_v32, %s20189_s18  ;;  %10824 = vmatpush1.bf16.msra.mxu1 %v19844_v52  ;;  %29151 = vst [vmem:[#allocation47_spill] sm:$0xff] %v23574_v0  ;;  %v7766_v52 = vmul.f32 %v7627_v31, %v23086_v57  ;;  %v23599_v12 = vmax.f32 %v5469_v9, 0.0 }
 0x3c7   :  { %9310 = vrot.lane.b32.xlu1 %v23358_v49, %s20189_s18  ;;  %v8971_v9 = vrot.slane %v23372_v51, %v20774_v43 }
 0x3c8   :  { %v8399_v39 = vpop.permute.xlu0 %8398  ;;  %v23572_v55 = vpop.permute.xlu1 %7948  ;;  %v19877_v22 = vpack.c.bf16 %v8215_v41, %v7767_v23  ;;  %29153 = vst [vmem:[#allocation49_spill] sm:$0xff] %v23599_v12 }
 0x3c9   :  { %29150 = vst [vmem:[#allocation42_spill] sm:$0xff] %v23572_v55  ;;  %v8024_v1 = vsel %vm2384_vm4, %v23572_v55, %v7951_v13  ;;  %v8527_v13 = vrot.slane %v23370_v40, %v20819_v16 }
 0x3ca   :  { %v8214_v53 = vmul.f32 %v8075_v63, %v8024_v1  ;;  %5830 = vrot.lane.b32.xlu0 %v23570_v4, %s20182_s13  ;;  %10825 = vmatprep.subr.bf16.mxu1 %v19877_v22  ;;  %v8975_v22 = vrot.slane %v23372_v51, %v20819_v16 }
 0x3cb   :  { %5828 = vrot.lane.b32.xlu1 %v23574_v0, %s20182_s13 }
 0x3cc   :  { %v19876_v61 = vpack.c.bf16 %v8214_v53, %v7766_v52  ;;  %v8847_v33 = vpop.permute.xlu0 %8846  ;;  %v23586_v41 = vpop.permute.xlu1 %8400  ;;  %v8523_v53 = vrot.slane %v23370_v40, %v20774_v43 }
 0x3cd   :  { %29152 = vst [vmem:[#allocation44_spill] sm:$0xff] %v23586_v41  ;;  %v8471_v31 = vsel %vm2837_vm5, %v8399_v39, %v23586_v41 }
 0x3ce   :  { %6278 = vrot.lane.b32.xlu0 %v23570_v4, %s20183_s30  ;;  %10826 = vmatpush1.bf16.msra.mxu1 %v19876_v61  ;;  %v8663_v52 = vmul.f32 %v8527_v13, %v8471_v31 }
 0x3cf   :  { %6276 = vrot.lane.b32.xlu1 %v23574_v0, %s20183_s30 }
 0x3d0   :  { %v23601_v63 = vpop.permute.xlu0 %8396  ;;  %v23603_v23 = vpop.permute.xlu1 %8848 }
 0x3d1   :  { %29154 = vst [vmem:[#allocation46_spill] sm:$0xff] %v23601_v63  ;;  %29155 = vst [vmem:[#allocation51_spill] sm:$0xff] %v23603_v23  ;;  %v8919_v1 = vsel %vm3290_vm6, %v8847_v33, %v23603_v23  ;;  %v8472_v15 = vsel %vm2837_vm5, %v23601_v63, %v8399_v39  ;;  %v9419_v39 = vrot.slane %v23406_v44, %v20774_v43  ;;  %v18400_v23 = vld [vmem:[%s28625_s1 + $0x40] ss:$8 sm:$0xf0] }
 0x3d2   :  { %v9111_v61 = vmul.f32 %v8975_v22, %v8919_v1  ;;  %6274 = vrot.lane.b32.xlu0 %v23599_v12, %s20183_s30  ;;  %v18399_v22 = vld [vmem:[%s28625_s1 + $0x40] ss:$8 sm:$0xf]  ;;  %v8662_v63 = vmul.f32 %v8523_v53, %v8472_v15  ;;  %v18424_v15 = vld [vmem:[%s28625_s1 + $0x41] ss:$8 sm:$0xf0] }
 0x3d3   :  { %5826 = vrot.lane.b32.xlu1 %v23599_v12, %s20182_s13  ;;  %v23660_v40 = vor.u32 %v18400_v23, %v18399_v22 }
 0x3d4   :  { %v23619_v57 = vpop.permute.xlu0 %9292  ;;  %v23621_v13 = vpop.permute.xlu1 %8844  ;;  %v19909_v31 = vpack.c.bf16 %v9111_v61, %v8663_v52  ;;  %v18423_v61 = vld [vmem:[%s28625_s1 + $0x41] ss:$8 sm:$0xf] }
 0x3d5   :  { %29156 = vst [vmem:[#allocation67_spill] sm:$0xff] %v23619_v57  ;;  %29157 = vst [vmem:[#allocation71_spill] sm:$0xff] %v23621_v13  ;;  %v8920_v1 = vsel %vm3290_vm6, %v23621_v13, %v8847_v33  ;;  %v23629_v41 = vpop.f32.mrb[28].mxu0  ;;  %v9423_v33 = vrot.slane %v23406_v44, %v20819_v16 }
 0x3d6   :  { %v9110_v55 = vmul.f32 %v8971_v9, %v8920_v1  ;;  %v23636_v52 = vpop.f32.mrb[29].mxu0  ;;  %6726 = vrot.lane.b32.xlu0 %v23570_v4, %s20184_s0  ;;  %10827 = vmatprep.subr.bf16.mxu1 %v19909_v31  ;;  %29159 = vst [vmem:[#allocation70_spill] sm:$0xff] %v23660_v40 }
 0x3d7   :  { %6724 = vrot.lane.b32.xlu1 %v23574_v0, %s20184_s0  ;;  %v5716_v53 = vpop.f32.mrb[30].mxu0 }
 0x3d8   :  { %v19908_v9 = vpack.c.bf16 %v9110_v55, %v8662_v63  ;;  %v23650_v1 = vpop.permute.xlu0 %9296  ;;  %v9295_v13 = vpop.permute.xlu1 %9294  ;;  %v23666_v55 = vor.u32 %v18424_v15, %v18423_v61 }
 0x3d9   :  { %29158 = vst [vmem:[#allocation72_spill] sm:$0xff] %v23650_v1  ;;  %v9367_v31 = vsel %vm3743_vm7, %v9295_v13, %v23650_v1  ;;  %v9368_v11 = vsel %vm3743_vm7, %v23619_v57, %v9295_v13  ;;  %v23658_v44 = vpop.f32.mrb[28].mxu1  ;;  %v5717_v51 = vpop.f32.mrb[31].mxu0  ;;  %v5549_v13 = vadd.f32 %v23172_v5, %v23003_v56 }
 0x3da   :  { %v9558_v8 = vmul.f32 %v9419_v39, %v9368_v11  ;;  %v9559_v3 = vmul.f32 %v9423_v33, %v9367_v31  ;;  %v23662_v53 = vpop.f32.mrb[29].mxu1  ;;  %7174 = vrot.lane.b32.xlu0 %v23570_v4, %s20185_s14  ;;  %10828 = vmatpush1.bf16.msra.mxu1 %v19908_v9  ;;  %v5951_v33 = vrot.slane %v23660_v40, %v29066_v6 }
 0x3db   :  { %7172 = vrot.lane.b32.xlu1 %v23574_v0, %s20185_s14  ;;  %v5757_v63 = vpop.f32.mrb[30].mxu1  ;;  %v6399_v15 = vrot.slane %v23666_v55, %v29066_v6 }
 0x3dc   :  { %v19940_v23 = vpack.c.bf16 %v9558_v8, %v9558_v8  ;;  %v19941_v22 = vpack.c.bf16 %v9559_v3, %v9559_v3  ;;  %v23672_v51 = vpop.permute.xlu0 %5814  ;;  %v5813_v11 = vpop.permute.xlu1 %5812  ;;  %v23687_v3 = vmax.f32 %v5549_v13, 0.0  ;;  %v6395_v63 = vrot.slane %v23666_v55, %v29059_v34  ;;  %v18447_v13 = vld [vmem:[%s28625_s1 + $0x42] ss:$8 sm:$0xf] }
 0x3dd   :  { %29160 = vst [vmem:[#allocation75_spill] sm:$0xff] %v23672_v51  ;;  %v5758_v39 = vpop.f32.mrb[31].mxu1  ;;  %v5876_v5 = vsel %vm217_vm0, %v5813_v11, %v23672_v51 }
 0x3de   :  { %7170 = vrot.lane.b32.xlu0 %v23599_v12, %s20185_s14  ;;  %18779 = vmatprep.subr.msk.bf16.mxu1 %vm5007_vm8, %v19941_v22  ;;  %v10621_v61 = vsel %vm5007_vm8, %v19940_v23, 0  ;;  %29161 = vst [vmem:[#allocation73_spill] sm:$0xff] %v23687_v3  ;;  %v6075_v23 = vmul.f32 %v5951_v33, %v5876_v5  ;;  %v5947_v39 = vrot.slane %v23660_v40, %v29059_v34  ;;  %v18471_v33 = vld [vmem:[%s28625_s1 + $0x43] ss:$8 sm:$0xf] }
 0x3df   :  { %6722 = vrot.lane.b32.xlu1 %v23599_v12, %s20184_s0  ;;  %10830 = vmatpush1.bf16.msra.mxu1 %v10621_v61  ;;  %v18448_v61 = vld [vmem:[%s28625_s1 + $0x42] ss:$8 sm:$0xf0] }
 0x3e0   :  { %v23689_v8 = vpop.permute.xlu0 %6262  ;;  %v6261_v9 = vpop.permute.xlu1 %6260  ;;  %v23727_v57 = vor.u32 %v18448_v61, %v18447_v13 }
 0x3e1   :  { %29162 = vst [vmem:[#allocation74_spill] sm:$0xff] %v23689_v8  ;;  %v6324_v31 = vsel %vm669_vm1, %v6261_v9, %v23689_v8 }
 0x3e2   :  { %v6523_v22 = vmul.f32 %v6399_v15, %v6324_v31  ;;  %7976 = vrot.lane.b32.xlu0 %v23687_v3, %s20186_s15  ;;  %18780 = vmatmul.mubr.msk.bf16.vlgmr.msra.gmra.mrb[36].mxu1 %vm5003_vm9, %v23474_v26  ;;  %v18472_v15 = vld [vmem:[%s28625_s1 + $0x43] ss:$8 sm:$0xf0]  ;;  %29165 = vst [vmem:[#allocation62_spill] sm:$0xff] %v23727_v57 }
 0x3e3   :  { %7974 = vrot.lane.b32.xlu1 %v23570_v4, %s20186_s15  ;;  %10935 = vmatprep.mubr.bf16.mxu1 %v29025_v46  ;;  %v23731_v32 = vor.u32 %v18472_v15, %v18471_v33 }
 0x3e4   :  { %v23717_v5 = vpop.permute.xlu0 %6258  ;;  %v23719_v31 = vpop.permute.xlu1 %5810  ;;  %v19817_v51 = vpack.c.bf16 %v6523_v22, %v6075_v23 }
 0x3e5   :  { %29163 = vst [vmem:[#allocation29_spill] sm:$0xff] %v23717_v5  ;;  %29164 = vst [vmem:[#allocation58_spill] sm:$0xff] %v23719_v31  ;;  %v6325_v8 = vsel %vm669_vm1, %v23717_v5, %v6261_v9  ;;  %v5877_v1 = vsel %vm217_vm0, %v23719_v31, %v5813_v11  ;;  %v6847_v11 = vrot.slane %v23727_v57, %v29066_v6 }
 0x3e6   :  { %v6522_v12 = vmul.f32 %v6395_v63, %v6325_v8  ;;  %v6074_v50 = vmul.f32 %v5947_v39, %v5877_v1  ;;  %8422 = vrot.lane.b32.xlu0 %v23570_v4, %s20187_s16  ;;  %10903 = vmatprep.subr.bf16.mxu1 %v19817_v51  ;;  %29166 = vst [vmem:[#allocation25_spill] sm:$0xff] %v23731_v32  ;;  %v18495_v51 = vld [vmem:[%s28625_s1 + $0x44] ss:$8 sm:$0xf] }
 0x3e7   :  { %7972 = vrot.lane.b32.xlu1 %v23574_v0, %s20186_s15  ;;  %v7295_v1 = vrot.slane %v23731_v32, %v29066_v6  ;;  %v18519_v8 = vld [vmem:[%s28625_s1 + $0x45] ss:$8 sm:$0xf]  ;;  %v7291_v33 = vrot.slane %v23731_v32, %v29059_v34  ;;  %v6843_v31 = vrot.slane %v23727_v57, %v29059_v34 }
 0x3e8   :  { %v19816_v23 = vpack.c.bf16 %v6522_v12, %v6074_v50  ;;  %v23735_v22 = vpop.permute.xlu0 %6710  ;;  %v6709_v9 = vpop.permute.xlu1 %6708  ;;  %v18496_v50 = vld [vmem:[%s28625_s1 + $0x44] ss:$8 sm:$0xf0]  ;;  %v18520_v63 = vld [vmem:[%s28625_s1 + $0x45] ss:$8 sm:$0xf0] }
 0x3e9   :  { %29167 = vst [vmem:[#allocation76_spill] sm:$0xff] %v23735_v22  ;;  %v6772_v12 = vsel %vm1122_vm2, %v6709_v9, %v23735_v22  ;;  %v23767_v15 = vor.u32 %v18496_v50, %v18495_v51  ;;  %v23773_v5 = vor.u32 %v18520_v63, %v18519_v8 }
 0x3ea   :  { %8870 = vrot.lane.b32.xlu0 %v23570_v4, %s20188_s17  ;;  %10904 = vmatpush1.bf16.msra.mxu1 %v19816_v23  ;;  %v6971_v23 = vmul.f32 %v6847_v11, %v6772_v12  ;;  %v5592_v11 = vadd.f32 %v23188_v62, %v23003_v56 }
 0x3eb   :  { %8424 = vrot.lane.b32.xlu1 %v23687_v3, %s20187_s16  ;;  %29169 = vst [vmem:[#allocation78_spill] sm:$0xff] %v23767_v15  ;;  %29170 = vst [vmem:[#allocation79_spill] sm:$0xff] %v23773_v5  ;;  %v7647_v50 = vrot.slane %v23767_v15, %v29066_v6  ;;  %v8095_v62 = vrot.slane %v23773_v5, %v29066_v6 }
 0x3ec   :  { %v23760_v39 = vpop.permute.xlu0 %7158  ;;  %v7157_v13 = vpop.permute.xlu1 %7156 }
 0x3ed   :  { %29168 = vst [vmem:[#allocation77_spill] sm:$0xff] %v23760_v39  ;;  %v7220_v61 = vsel %vm1575_vm3, %v7157_v13, %v23760_v39 }
 0x3ee   :  { %v7419_v22 = vmul.f32 %v7295_v1, %v7220_v61  ;;  %8420 = vrot.lane.b32.xlu0 %v23574_v0, %s20187_s16  ;;  %v23804_v61 = vmax.f32 %v5592_v11, 0.0  ;;  %v18543_v11 = vld [vmem:[%s28625_s1 + $0x46] ss:$8 sm:$0xf] }
 0x3ef   :  { %8872 = vrot.lane.b32.xlu1 %v23687_v3, %s20188_s17 }
 0x3f0   :  { %v23777_v42 = vpop.permute.xlu0 %7154  ;;  %v23779_v39 = vpop.permute.xlu1 %6706  ;;  %v19849_v47 = vpack.c.bf16 %v7419_v22, %v6971_v23  ;;  %29174 = vst [vmem:[#allocation83_spill] sm:$0xff] %v23804_v61  ;;  %v7643_v23 = vrot.slane %v23767_v15, %v29059_v34 }
 0x3f1   :  { %29171 = vst [vmem:[#allocation80_spill] sm:$0xff] %v23777_v42  ;;  %29172 = vst [vmem:[#allocation81_spill] sm:$0xff] %v23779_v39  ;;  %v7221_v1 = vsel %vm1575_vm3, %v23777_v42, %v7157_v13  ;;  %v6773_v51 = vsel %vm1122_vm2, %v23779_v39, %v6709_v9  ;;  %v5590_v9 = vadd.f32 %v23180_v2, %v23003_v56 }
 0x3f2   :  { %v7418_v12 = vmul.f32 %v7291_v33, %v7221_v1  ;;  %v6970_v8 = vmul.f32 %v6843_v31, %v6773_v51  ;;  %9316 = vrot.lane.b32.xlu0 %v23574_v0, %s20189_s18  ;;  %10905 = vmatprep.subr.bf16.mxu1 %v19849_v47  ;;  %v7771_v33 = vmul.f32 %v7647_v50, %v23156_v60  ;;  %v18544_v1 = vld [vmem:[%s28625_s1 + $0x46] ss:$8 sm:$0xf0]  ;;  %v18567_v50 = vld [vmem:[%s28625_s1 + $0x47] ss:$8 sm:$0xf] }
 0x3f3   :  { %8868 = vrot.lane.b32.xlu1 %v23574_v0, %s20188_s17  ;;  %v8091_v2 = vrot.slane %v23773_v5, %v29059_v34  ;;  %v23839_v60 = vor.u32 %v18544_v1, %v18543_v11  ;;  %v18592_v11 = vld [vmem:[%s28625_s1 + $0x140] ss:$8 sm:$0xf0] }
 0x3f4   :  { %v19848_v22 = vpack.c.bf16 %v7418_v12, %v6970_v8  ;;  %v23797_v63 = vpop.permute.xlu0 %7960  ;;  %v7959_v13 = vpop.permute.xlu1 %7958  ;;  %v18568_v8 = vld [vmem:[%s28625_s1 + $0x47] ss:$8 sm:$0xf0] }
 0x3f5   :  { %29173 = vst [vmem:[#allocation82_spill] sm:$0xff] %v23797_v63  ;;  %v8019_v31 = vsel %vm2384_vm4, %v7959_v13, %v23797_v63  ;;  %29177 = vst [vmem:[#allocation86_spill] sm:$0xff] %v23839_v60  ;;  %v5551_v63 = vadd.f32 %v23174_v45, %v23003_v56  ;;  %v18591_v45 = vld [vmem:[%s28625_s1 + $0x140] ss:$8 sm:$0xf] }
 0x3f6   :  { %v8219_v47 = vmul.f32 %v8095_v62, %v8019_v31  ;;  %9320 = vrot.lane.b32.xlu0 %v23687_v3, %s20189_s18  ;;  %10906 = vmatpush1.bf16.msra.mxu1 %v19848_v22  ;;  %v23827_v62 = vmax.f32 %v5590_v9, 0.0  ;;  %v23841_v9 = vor.u32 %v18568_v8, %v18567_v50 }
 0x3f7   :  { %9318 = vrot.lane.b32.xlu1 %v23570_v4, %s20189_s18  ;;  %v23861_v1 = vmax.f32 %v5551_v63, 0.0  ;;  %v8539_v63 = vrot.slane %v23839_v60, %v29059_v34 }
 0x3f8   :  { %v8407_v51 = vpop.permute.xlu0 %8406  ;;  %v19881_v12 = vpack.c.bf16 %v8219_v47, %v7771_v33  ;;  %29175 = vst [vmem:[#allocation84_spill] sm:$0xff] %v23827_v62  ;;  %v7770_v47 = vmul.f32 %v7643_v23, %v23158_v7  ;;  %29178 = vst [vmem:[#allocation87_spill] sm:$0xff] %v23841_v9  ;;  %v8543_v23 = vrot.slane %v23839_v60, %v29066_v6 }
 0x3f9   :  { %v23829_v22 = vpop.permute.xlu1 %7956  ;;  %29180 = vst [vmem:[#allocation89_spill] sm:$0xff] %v23861_v1  ;;  %v8987_v7 = vrot.slane %v23841_v9, %v29059_v34 }
 0x3fa   :  { %29176 = vst [vmem:[#allocation85_spill] sm:$0xff] %v23829_v22  ;;  %v8020_v31 = vsel %vm2384_vm4, %v23829_v22, %v7959_v13  ;;  %5838 = vrot.lane.b32.xlu0 %v23804_v61, %s20182_s13  ;;  %10907 = vmatprep.subr.bf16.mxu1 %v19881_v12 }
 0x3fb   :  { %v8218_v33 = vmul.f32 %v8091_v2, %v8020_v31  ;;  %5836 = vrot.lane.b32.xlu1 %v23827_v62, %s20182_s13  ;;  %v8991_v2 = vrot.slane %v23841_v9, %v29066_v6  ;;  %v23875_v31 = vor.u32 %v18592_v11, %v18591_v45 }
 0x3fc   :  { %v8855_v39 = vpop.permute.xlu0 %8854 }
 0x3fd   :  { %v19880_v42 = vpack.c.bf16 %v8218_v33, %v7770_v47  ;;  %v23845_v13 = vpop.permute.xlu1 %8408  ;;  %29183 = vst [vmem:[#allocation92_spill] sm:$0xff] %v23875_v31 }
 0x3fe   :  { %29179 = vst [vmem:[#allocation88_spill] sm:$0xff] %v23845_v13  ;;  %6286 = vrot.lane.b32.xlu0 %v23804_v61, %s20183_s30  ;;  %v8467_v12 = vsel %vm2837_vm5, %v8407_v51, %v23845_v13 }
 0x3ff   :  { %6284 = vrot.lane.b32.xlu1 %v23827_v62, %s20183_s30  ;;  %10908 = vmatpush1.bf16.msra.mxu1 %v19880_v42  ;;  %v8667_v47 = vmul.f32 %v8543_v23, %v8467_v12 }
 0x400   :  { %v23866_v50 = vpop.permute.xlu0 %8404 }
 0x401   :  { %29181 = vst [vmem:[#allocation90_spill] sm:$0xff] %v23866_v50  ;;  %v23868_v42 = vpop.permute.xlu1 %8856  ;;  %v8468_v13 = vsel %vm2837_vm5, %v23866_v50, %v8407_v51  ;;  %v9439_v51 = vrot.slane %v23875_v31, %v29066_v6 }
 0x402   :  { %29182 = vst [vmem:[#allocation91_spill] sm:$0xff] %v23868_v42  ;;  %v8915_v8 = vsel %vm3290_vm6, %v8855_v39, %v23868_v42  ;;  %6282 = vrot.lane.b32.xlu0 %v23861_v1, %s20183_s30  ;;  %v8666_v11 = vmul.f32 %v8539_v63, %v8468_v13 }
 0x403   :  { %v9115_v33 = vmul.f32 %v8991_v2, %v8915_v8  ;;  %5834 = vrot.lane.b32.xlu1 %v23861_v1, %s20182_s13  ;;  %v9435_v2 = vrot.slane %v23875_v31, %v29059_v34 }
 0x404   :  { %v23886_v42 = vpop.permute.xlu0 %9300 }
 0x405   :  { %29184 = vst [vmem:[#allocation93_spill] sm:$0xff] %v23886_v42  ;;  %v23888_v22 = vpop.permute.xlu1 %8852  ;;  %v19913_v45 = vpack.c.bf16 %v9115_v33, %v8667_v47 }
 0x406   :  { %29185 = vst [vmem:[#allocation94_spill] sm:$0xff] %v23888_v22  ;;  %v8916_v23 = vsel %vm3290_vm6, %v23888_v22, %v8855_v39  ;;  %6734 = vrot.lane.b32.xlu0 %v23804_v61, %s20184_s0 }
 0x407   :  { %v9114_v12 = vmul.f32 %v8987_v7, %v8916_v23  ;;  %6732 = vrot.lane.b32.xlu1 %v23827_v62, %s20184_s0  ;;  %10909 = vmatprep.subr.bf16.mxu1 %v19913_v45  ;;  %v5631_v45 = vadd.f32 %v23442_v35, %v23003_v56  ;;  %v6415_v35 = vrot.slane %v23666_v55, %v20819_v16 }
 0x408   :  { %v23901_v8 = vpop.permute.xlu0 %9304 }
 0x409   :  { %29186 = vst [vmem:[#allocation95_spill] sm:$0xff] %v23901_v8  ;;  %v19912_v47 = vpack.c.bf16 %v9114_v12, %v8666_v11  ;;  %v9303_v33 = vpop.permute.xlu1 %9302 }
 0x40a   :  { %v9363_v39 = vsel %vm3743_vm7, %v9303_v33, %v23901_v8  ;;  %v9364_v13 = vsel %vm3743_vm7, %v23886_v42, %v9303_v33  ;;  %7182 = vrot.lane.b32.xlu0 %v23804_v61, %s20185_s14  ;;  %v5967_v33 = vrot.slane %v23660_v40, %v20819_v16 }
 0x40b   :  { %v9562_v7 = vmul.f32 %v9435_v2, %v9364_v13  ;;  %v9563_v63 = vmul.f32 %v9439_v51, %v9363_v39  ;;  %7180 = vrot.lane.b32.xlu1 %v23827_v62, %s20185_s14  ;;  %10910 = vmatpush1.bf16.msra.mxu1 %v19912_v47  ;;  %v23927_v51 = vmax.f32 %v5631_v45, 0.0 }
 0x40c   :  { %v23915_v23 = vpop.permute.xlu0 %5822 }
 0x40d   :  { %29187 = vst [vmem:[#allocation96_spill] sm:$0xff] %v23915_v23  ;;  %v19944_v11 = vpack.c.bf16 %v9562_v7, %v9562_v7  ;;  %v19945_v12 = vpack.c.bf16 %v9563_v63, %v9563_v63  ;;  %v5821_v8 = vpop.permute.xlu1 %5820  ;;  %29188 = vst [vmem:[#allocation97_spill] sm:$0xff] %v23927_v51  ;;  %v6411_v63 = vrot.slane %v23666_v55, %v20774_v43 }
 0x40e   :  { %7178 = vrot.lane.b32.xlu0 %v23861_v1, %s20185_s14  ;;  %v5872_v47 = vsel %vm217_vm0, %v5821_v8, %v23915_v23 }
 0x40f   :  { %6730 = vrot.lane.b32.xlu1 %v23861_v1, %s20184_s0  ;;  %18783 = vmatprep.subr.msk.bf16.mxu1 %vm5007_vm8, %v19945_v12  ;;  %v10633_v2 = vsel %vm5007_vm8, %v19944_v11, 0  ;;  %v6079_v45 = vmul.f32 %v5967_v33, %v5872_v47  ;;  %v5963_v12 = vrot.slane %v23660_v40, %v20774_v43 }
 0x410   :  { %10912 = vmatpush1.bf16.msra.mxu1 %v10633_v2  ;;  %v23932_v39 = vpop.permute.xlu0 %6270 }
 0x411   :  { %29189 = vst [vmem:[#allocation98_spill] sm:$0xff] %v23932_v39  ;;  %v6269_v13 = vpop.permute.xlu1 %6268 }
 0x412   :  { %v6320_v7 = vsel %vm669_vm1, %v6269_v13, %v23932_v39  ;;  %7984 = vrot.lane.b32.xlu0 %v23927_v51, %s20186_s15 }
 0x413   :  { %v6527_v11 = vmul.f32 %v6415_v35, %v6320_v7  ;;  %7982 = vrot.lane.b32.xlu1 %v23804_v61, %s20186_s15  ;;  %18784 = vmatmul.mubr.msk.bf16.vlgmr.msra.gmra.mrb[40].mxu1 %vm5003_vm9, %v23474_v26 }
 0x414   :  { %v23947_v2 = vpop.permute.xlu0 %6266  ;;  %11017 = vmatprep.mubr.bf16.mxu1 %v29025_v46 }
 0x415   :  { %29190 = vst [vmem:[#allocation99_spill] sm:$0xff] %v23947_v2  ;;  %v6321_v23 = vsel %vm669_vm1, %v23947_v2, %v6269_v13  ;;  %v23953_v39 = vpop.permute.xlu1 %5818  ;;  %v19821_v33 = vpack.c.bf16 %v6527_v11, %v6079_v45 }
 0x416   :  { %29191 = vst [vmem:[#allocation100_spill] sm:$0xff] %v23953_v39  ;;  %v6526_v35 = vmul.f32 %v6411_v63, %v6321_v23  ;;  %v5873_v47 = vsel %vm217_vm0, %v23953_v39, %v5821_v8  ;;  %8430 = vrot.lane.b32.xlu0 %v23804_v61, %s20187_s16  ;;  %v6863_v23 = vrot.slane %v23727_v57, %v20819_v16 }
 0x417   :  { %v6078_v7 = vmul.f32 %v5963_v12, %v5873_v47  ;;  %7980 = vrot.lane.b32.xlu1 %v23827_v62, %s20186_s15  ;;  %10985 = vmatprep.subr.bf16.mxu1 %v19821_v33  ;;  %v7311_v8 = vrot.slane %v23731_v32, %v20819_v16  ;;  %v6859_v47 = vrot.slane %v23727_v57, %v20774_v43 }
 0x418   :  { %v23962_v22 = vpop.permute.xlu0 %6718 }
 0x419   :  { %29192 = vst [vmem:[#allocation101_spill] sm:$0xff] %v23962_v22  ;;  %v19820_v42 = vpack.c.bf16 %v6526_v35, %v6078_v7  ;;  %v6717_v13 = vpop.permute.xlu1 %6716 }
 0x41a   :  { %8878 = vrot.lane.b32.xlu0 %v23804_v61, %s20188_s17  ;;  %v6768_v63 = vsel %vm1122_vm2, %v6717_v13, %v23962_v22 }
 0x41b   :  { %8432 = vrot.lane.b32.xlu1 %v23927_v51, %s20187_s16  ;;  %10986 = vmatpush1.bf16.msra.mxu1 %v19820_v42  ;;  %v7307_v42 = vrot.slane %v23731_v32, %v20774_v43  ;;  %v6975_v33 = vmul.f32 %v6863_v23, %v6768_v63  ;;  %v8111_v63 = vrot.slane %v23773_v5, %v20819_v16 }
 0x41c   :  { %v23975_v45 = vpop.permute.xlu0 %7166 }
 0x41d   :  { %29193 = vst [vmem:[#allocation102_spill] sm:$0xff] %v23975_v45  ;;  %v7165_v11 = vpop.permute.xlu1 %7164 }
 0x41e   :  { %v7216_v12 = vsel %vm1575_vm3, %v7165_v11, %v23975_v45  ;;  %8428 = vrot.lane.b32.xlu0 %v23827_v62, %s20187_s16 }
 0x41f   :  { %v7423_v35 = vmul.f32 %v7311_v8, %v7216_v12  ;;  %8880 = vrot.lane.b32.xlu1 %v23927_v51, %s20188_s17 }
 0x420   :  { %v23988_v7 = vpop.permute.xlu0 %7162 }
 0x421   :  { %29194 = vst [vmem:[#allocation103_spill] sm:$0xff] %v23988_v7  ;;  %v7217_v22 = vsel %vm1575_vm3, %v23988_v7, %v7165_v11  ;;  %v23993_v45 = vpop.permute.xlu1 %6714  ;;  %v19853_v39 = vpack.c.bf16 %v7423_v35, %v6975_v33  ;;  %v7663_v11 = vrot.slane %v23767_v15, %v20819_v16  ;;  %v7659_v35 = vrot.slane %v23767_v15, %v20774_v43 }
 0x422   :  { %29195 = vst [vmem:[#allocation104_spill] sm:$0xff] %v23993_v45  ;;  %v7422_v2 = vmul.f32 %v7307_v42, %v7217_v22  ;;  %v6769_v23 = vsel %vm1122_vm2, %v23993_v45, %v6717_v13  ;;  %9324 = vrot.lane.b32.xlu0 %v23827_v62, %s20189_s18  ;;  %v5674_v22 = vadd.f32 %v23458_v18, %v23003_v56 }
 0x423   :  { %v6974_v8 = vmul.f32 %v6859_v47, %v6769_v23  ;;  %8876 = vrot.lane.b32.xlu1 %v23827_v62, %s20188_s17  ;;  %10987 = vmatprep.subr.bf16.mxu1 %v19853_v39  ;;  %v5672_v13 = vadd.f32 %v23454_v25, %v23003_v56  ;;  %v8107_v25 = vrot.slane %v23773_v5, %v20774_v43 }
 0x424   :  { %v24008_v12 = vpop.permute.xlu0 %7968  ;;  %v7775_v18 = vmul.f32 %v7663_v11, %v23358_v49  ;;  %v5633_v11 = vadd.f32 %v23444_v20, %v23003_v56 }
 0x425   :  { %29196 = vst [vmem:[#allocation105_spill] sm:$0xff] %v24008_v12  ;;  %v19852_v42 = vpack.c.bf16 %v7422_v2, %v6974_v8  ;;  %v7967_v33 = vpop.permute.xlu1 %7966  ;;  %v24024_v2 = vmax.f32 %v5674_v22, 0.0  ;;  %v24026_v8 = vmax.f32 %v5672_v13, 0.0 }
 0x426   :  { %v8015_v39 = vsel %vm2384_vm4, %v7967_v33, %v24008_v12  ;;  %9328 = vrot.lane.b32.xlu0 %v23927_v51, %s20189_s18 }
 0x427   :  { %v8223_v47 = vmul.f32 %v8111_v63, %v8015_v39  ;;  %9326 = vrot.lane.b32.xlu1 %v23804_v61, %s20189_s18  ;;  %10988 = vmatpush1.bf16.msra.mxu1 %v19852_v42  ;;  %29197 = vst [vmem:[#allocation106_spill] sm:$0xff] %v24024_v2  ;;  %29198 = vst [vmem:[#allocation107_spill] sm:$0xff] %v24026_v8  ;;  %v7774_v42 = vmul.f32 %v7659_v35, %v23362_v48  ;;  %v24050_v35 = vmax.f32 %v5633_v11, 0.0 }
 0x428   :  { %v8415_v23 = vpop.permute.xlu0 %8414 }
 0x429   :  { %v24028_v12 = vpop.permute.xlu1 %7964  ;;  %v19885_v45 = vpack.c.bf16 %v8223_v47, %v7775_v18  ;;  %29201 = vst [vmem:[#allocation110_spill] sm:$0xff] %v24050_v35 }
 0x42a   :  { %29199 = vst [vmem:[#allocation108_spill] sm:$0xff] %v24028_v12  ;;  %v8016_v63 = vsel %vm2384_vm4, %v24028_v12, %v7967_v33  ;;  %5846 = vrot.lane.b32.xlu0 %v24024_v2, %s20182_s13  ;;  %v8559_v33 = vrot.slane %v23839_v60, %v20819_v16 }
 0x42b   :  { %v8222_v39 = vmul.f32 %v8107_v25, %v8016_v63  ;;  %5844 = vrot.lane.b32.xlu1 %v24026_v8, %s20182_s13  ;;  %10989 = vmatprep.subr.bf16.mxu1 %v19885_v45  ;;  %v9007_v45 = vrot.slane %v23841_v9, %v20819_v16 }
 0x42c   :  { %v8863_v22 = vpop.permute.xlu0 %8862 }
 0x42d   :  { %v19884_v13 = vpack.c.bf16 %v8222_v39, %v7774_v42  ;;  %v24040_v47 = vpop.permute.xlu1 %8416  ;;  %v8555_v39 = vrot.slane %v23839_v60, %v20774_v43 }
 0x42e   :  { %29200 = vst [vmem:[#allocation109_spill] sm:$0xff] %v24040_v47  ;;  %6294 = vrot.lane.b32.xlu0 %v24024_v2, %s20183_s30  ;;  %v8463_v20 = vsel %vm2837_vm5, %v8415_v23, %v24040_v47 }
 0x42f   :  { %6292 = vrot.lane.b32.xlu1 %v24026_v8, %s20183_s30  ;;  %10990 = vmatpush1.bf16.msra.mxu1 %v19884_v13  ;;  %v8671_v42 = vmul.f32 %v8559_v33, %v8463_v20  ;;  %v9003_v13 = vrot.slane %v23841_v9, %v20774_v43 }
 0x430   :  { %v24055_v25 = vpop.permute.xlu0 %8412 }
 0x431   :  { %29202 = vst [vmem:[#allocation111_spill] sm:$0xff] %v24055_v25  ;;  %v24057_v18 = vpop.permute.xlu1 %8864  ;;  %v8464_v48 = vsel %vm2837_vm5, %v24055_v25, %v8415_v23  ;;  %v9455_v23 = vrot.slane %v23875_v31, %v20819_v16 }
 0x432   :  { %29203 = vst [vmem:[#allocation112_spill] sm:$0xff] %v24057_v18  ;;  %v8911_v63 = vsel %vm3290_vm6, %v8863_v22, %v24057_v18  ;;  %6290 = vrot.lane.b32.xlu0 %v24050_v35, %s20183_s30  ;;  %v8670_v20 = vmul.f32 %v8555_v39, %v8464_v48  ;;  %v18425_v48 = vld [vmem:[%s28625_s1 + $0x81] ss:$8 sm:$0xf] }
 0x433   :  { %v9119_v11 = vmul.f32 %v9007_v45, %v8911_v63  ;;  %5842 = vrot.lane.b32.xlu1 %v24050_v35, %s20182_s13  ;;  %v9451_v45 = vrot.slane %v23875_v31, %v20774_v43 }
 0x434   :  { %v24073_v49 = vpop.permute.xlu0 %9308 }
 0x435   :  { %29204 = vst [vmem:[#allocation113_spill] sm:$0xff] %v24073_v49  ;;  %v24075_v47 = vpop.permute.xlu1 %8860  ;;  %v19917_v18 = vpack.c.bf16 %v9119_v11, %v8671_v42  ;;  %v18401_v42 = vld [vmem:[%s28625_s1 + $0x80] ss:$8 sm:$0xf] }
 0x436   :  { %29205 = vst [vmem:[#allocation114_spill] sm:$0xff] %v24075_v47  ;;  %v8912_v33 = vsel %vm3290_vm6, %v24075_v47, %v8863_v22  ;;  %6742 = vrot.lane.b32.xlu0 %v24024_v2, %s20184_s0  ;;  %v18402_v22 = vld [vmem:[%s28625_s1 + $0x80] ss:$8 sm:$0xf0] }
 0x437   :  { %v9118_v63 = vmul.f32 %v9003_v13, %v8912_v33  ;;  %6740 = vrot.lane.b32.xlu1 %v24026_v8, %s20184_s0  ;;  %10991 = vmatprep.subr.bf16.mxu1 %v19917_v18  ;;  %v18426_v18 = vld [vmem:[%s28625_s1 + $0x81] ss:$8 sm:$0xf0]  ;;  %v24110_v47 = vor.u32 %v18402_v22, %v18401_v42 }
 0x438   :  { %v24094_v11 = vpop.permute.xlu0 %9312 }
 0x439   :  { %29206 = vst [vmem:[#allocation115_spill] sm:$0xff] %v24094_v11  ;;  %v19916_v39 = vpack.c.bf16 %v9118_v63, %v8670_v20  ;;  %v9311_v13 = vpop.permute.xlu1 %9310  ;;  %29207 = vst [vmem:[#allocation116_spill] sm:$0xff] %v24110_v47  ;;  %v24114_v20 = vor.u32 %v18426_v18, %v18425_v48  ;;  %v18449_v48 = vld [vmem:[%s28625_s1 + $0x82] ss:$8 sm:$0xf] }
 0x43a   :  { %v9359_v33 = vsel %vm3743_vm7, %v9311_v13, %v24094_v11  ;;  %v9360_v25 = vsel %vm3743_vm7, %v24073_v49, %v9311_v13  ;;  %7190 = vrot.lane.b32.xlu0 %v24024_v2, %s20185_s14  ;;  %v29210_v11 = vld [vmem:[#allocation7_spill] sm:$0xff] }
 0x43b   :  { %v9566_v12 = vmul.f32 %v9451_v45, %v9360_v25  ;;  %v9567_v7 = vmul.f32 %v9455_v23, %v9359_v33  ;;  %7188 = vrot.lane.b32.xlu1 %v24026_v8, %s20185_s14  ;;  %10992 = vmatpush1.bf16.msra.mxu1 %v19916_v39  ;;  %29208 = vst [vmem:[#allocation117_spill] sm:$0xff] %v24114_v20  ;;  %v18450_v33 = vld [vmem:[%s28625_s1 + $0x82] ss:$8 sm:$0xf0] }
 0x43c   :  { %v24116_v63 = vpop.permute.xlu0 %5830  ;;  %v5139_v50 = vadd.f32 %v29210_v11, %v23003_v56  ;;  %v5983_v25 = vrot.slane %v24110_v47, %v29066_v6  ;;  %v6431_v23 = vrot.slane %v24114_v20, %v29066_v6  ;;  %v24183_v60 = vor.u32 %v18450_v33, %v18449_v48  ;;  %v18522_v33 = vld [vmem:[%s28625_s1 + $0x85] ss:$8 sm:$0xf0] }
 0x43d   :  { %29209 = vst [vmem:[#allocation118_spill] sm:$0xff] %v24116_v63  ;;  %v19948_v31 = vpack.c.bf16 %v9566_v12, %v9566_v12  ;;  %v19949_v13 = vpack.c.bf16 %v9567_v7, %v9567_v7  ;;  %v5829_v49 = vpop.permute.xlu1 %5828  ;;  %v5713_v7 = vadd.f32 %v23629_v41, %v23003_v56  ;;  %v6427_v41 = vrot.slane %v24114_v20, %v29059_v34 }
 0x43e   :  { %7186 = vrot.lane.b32.xlu0 %v24050_v35, %s20185_s14  ;;  %v5868_v12 = vsel %vm217_vm0, %v5829_v49, %v24116_v63  ;;  %v24137_v22 = vmax.f32 %v5139_v50, 0.0  ;;  %v5979_v50 = vrot.slane %v24110_v47, %v29059_v34  ;;  %29216 = vst [vmem:[#allocation123_spill] sm:$0xff] %v24183_v60 }
 0x43f   :  { %6738 = vrot.lane.b32.xlu1 %v24050_v35, %s20184_s0  ;;  %18787 = vmatprep.subr.msk.bf16.mxu1 %vm5007_vm8, %v19949_v13  ;;  %v10645_v45 = vsel %vm5007_vm8, %v19948_v31, 0  ;;  %v6083_v18 = vmul.f32 %v5983_v25, %v5868_v12  ;;  %v18473_v13 = vld [vmem:[%s28625_s1 + $0x83] ss:$8 sm:$0xf]  ;;  %v5756_v25 = vadd.f32 %v23662_v53, %v23003_v56 }
 0x440   :  { %10994 = vmatpush1.bf16.msra.mxu1 %v10645_v45  ;;  %v24135_v42 = vpop.permute.xlu0 %6278  ;;  %29212 = vst [vmem:[#allocation119_spill] sm:$0xff] %v24137_v22  ;;  %v24161_v45 = vmax.f32 %v5713_v7, 0.0  ;;  %v18474_v12 = vld [vmem:[%s28625_s1 + $0x83] ss:$8 sm:$0xf0] }
 0x441   :  { %29211 = vst [vmem:[#allocation7_spill] sm:$0xff] %v24135_v42  ;;  %v6277_v11 = vpop.permute.xlu1 %6276  ;;  %v24185_v9 = vor.u32 %v18474_v12, %v18473_v13 }
 0x442   :  { %v6316_v31 = vsel %vm669_vm1, %v6277_v11, %v24135_v42  ;;  %6240 = vrot.lane.b32.xlu0 %v24137_v22, %s20183_s30  ;;  %29213 = vst [vmem:[#allocation120_spill] sm:$0xff] %v24161_v45 }
 0x443   :  { %v6531_v39 = vmul.f32 %v6431_v23, %v6316_v31  ;;  %5792 = vrot.lane.b32.xlu1 %v24137_v22, %s20182_s13  ;;  %18788 = vmatmul.mubr.msk.bf16.vlgmr.msra.gmra.mrb[44].mxu1 %vm5003_vm9, %v23474_v26  ;;  %29217 = vst [vmem:[#allocation124_spill] sm:$0xff] %v24185_v9  ;;  %v7323_v12 = vrot.slane %v24185_v9, %v29059_v34 }
 0x444   :  { %v24165_v23 = vpop.permute.xlu0 %6274  ;;  %11099 = vmatprep.mubr.bf16.mxu1 %v29025_v46 }
 0x445   :  { %29214 = vst [vmem:[#allocation121_spill] sm:$0xff] %v24165_v23  ;;  %v6317_v26 = vsel %vm669_vm1, %v24165_v23, %v6277_v11  ;;  %v24174_v31 = vpop.permute.xlu1 %5826  ;;  %v19825_v63 = vpack.c.bf16 %v6531_v39, %v6083_v18  ;;  %v24187_v11 = vmax.f32 %v5756_v25, 0.0 }
 0x446   :  { %29215 = vst [vmem:[#allocation122_spill] sm:$0xff] %v24174_v31  ;;  %v6530_v7 = vmul.f32 %v6427_v41, %v6317_v26  ;;  %v5869_v53 = vsel %vm217_vm0, %v24174_v31, %v5829_v49  ;;  %7992 = vrot.lane.b32.xlu0 %v24161_v45, %s20186_s15  ;;  %v6879_v49 = vrot.slane %v24183_v60, %v29066_v6  ;;  %v18497_v26 = vld [vmem:[%s28625_s1 + $0x84] ss:$8 sm:$0xf] }
 0x447   :  { %v6082_v42 = vmul.f32 %v5979_v50, %v5869_v53  ;;  %11067 = vmatprep.subr.bf16.mxu1 %v19825_v63  ;;  %7990 = vrot.lane.b32.xlu1 %v24024_v2, %s20186_s15  ;;  %29218 = vst [vmem:[#allocation125_spill] sm:$0xff] %v24187_v11  ;;  %v7327_v63 = vrot.slane %v24185_v9, %v29066_v6 }
 0x448   :  { %v24189_v18 = vpop.permute.xlu0 %6726 }
 0x449   :  { %29219 = vst [vmem:[#allocation126_spill] sm:$0xff] %v24189_v18  ;;  %v19824_v41 = vpack.c.bf16 %v6530_v7, %v6082_v42  ;;  %v6725_v39 = vpop.permute.xlu1 %6724  ;;  %v18521_v42 = vld [vmem:[%s28625_s1 + $0x85] ss:$8 sm:$0xf] }
 0x44a   :  { %6302 = vrot.lane.b32.xlu0 %v24187_v11, %s20183_s30  ;;  %v6764_v48 = vsel %vm1122_vm2, %v6725_v39, %v24189_v18  ;;  %v18498_v7 = vld [vmem:[%s28625_s1 + $0x84] ss:$8 sm:$0xf0]  ;;  %v6875_v18 = vrot.slane %v24183_v60, %v29059_v34 }
 0x44b   :  { %11068 = vmatpush1.bf16.msra.mxu1 %v19824_v41  ;;  %5854 = vrot.lane.b32.xlu1 %v24187_v11, %s20182_s13  ;;  %v6979_v53 = vmul.f32 %v6879_v49, %v6764_v48  ;;  %v24236_v57 = vor.u32 %v18498_v7, %v18497_v26  ;;  %v18545_v7 = vld [vmem:[%s28625_s1 + $0x86] ss:$8 sm:$0xf] }
 0x44c   :  { %v24202_v50 = vpop.permute.xlu0 %7174 }
 0x44d   :  { %29220 = vst [vmem:[#allocation127_spill] sm:$0xff] %v24202_v50  ;;  %v7173_v13 = vpop.permute.xlu1 %7172  ;;  %29224 = vst [vmem:[#allocation131_spill] sm:$0xff] %v24236_v57 }
 0x44e   :  { %v7212_v25 = vsel %vm1575_vm3, %v7173_v13, %v24202_v50  ;;  %6688 = vrot.lane.b32.xlu0 %v24137_v22, %s20184_s0  ;;  %v24227_v50 = vor.u32 %v18522_v33, %v18521_v42  ;;  %v7679_v33 = vrot.slane %v24236_v57, %v29066_v6 }
 0x44f   :  { %v7427_v41 = vmul.f32 %v7327_v63, %v7212_v25  ;;  %7988 = vrot.lane.b32.xlu1 %v24026_v8, %s20186_s15 }
 0x450   :  { %29221 = vst [vmem:[#allocation128_spill] sm:$0xff] %v24227_v50  ;;  %v24229_v31 = vpop.permute.xlu0 %7170  ;;  %v8127_v42 = vrot.slane %v24227_v50, %v29066_v6  ;;  %v7779_v26 = vmul.f32 %v7679_v33, %v23570_v4 }
 0x451   :  { %29222 = vst [vmem:[#allocation129_spill] sm:$0xff] %v24229_v31  ;;  %v7213_v23 = vsel %vm1575_vm3, %v24229_v31, %v7173_v13  ;;  %v24234_v15 = vpop.permute.xlu1 %6722  ;;  %v19857_v5 = vpack.c.bf16 %v7427_v41, %v6979_v53  ;;  %v18546_v53 = vld [vmem:[%s28625_s1 + $0x86] ss:$8 sm:$0xf0] }
 0x452   :  { %29223 = vst [vmem:[#allocation130_spill] sm:$0xff] %v24234_v15  ;;  %v7426_v49 = vmul.f32 %v7323_v12, %v7213_v23  ;;  %v6765_v63 = vsel %vm1122_vm2, %v24234_v15, %v6725_v39  ;;  %8438 = vrot.lane.b32.xlu0 %v24024_v2, %s20187_s16  ;;  %v8123_v12 = vrot.slane %v24227_v50, %v29059_v34 }
 0x453   :  { %v6978_v48 = vmul.f32 %v6875_v18, %v6765_v63  ;;  %11069 = vmatprep.subr.bf16.mxu1 %v19857_v5  ;;  %7136 = vrot.lane.b32.xlu1 %v24137_v22, %s20185_s14  ;;  %v7675_v5 = vrot.slane %v24236_v57, %v29059_v34  ;;  %v18570_v63 = vld [vmem:[%s28625_s1 + $0x87] ss:$8 sm:$0xf0]  ;;  %v24285_v4 = vor.u32 %v18546_v53, %v18545_v7  ;;  %v18594_v7 = vld [vmem:[%s28625_s1 + $0x180] ss:$8 sm:$0xf0] }
 0x454   :  { %v24249_v13 = vpop.permute.xlu0 %7976 }
 0x455   :  { %29225 = vst [vmem:[#allocation132_spill] sm:$0xff] %v24249_v13  ;;  %v19856_v23 = vpack.c.bf16 %v7426_v49, %v6978_v48  ;;  %v7975_v25 = vpop.permute.xlu1 %7974  ;;  %v18569_v49 = vld [vmem:[%s28625_s1 + $0x87] ss:$8 sm:$0xf]  ;;  %v7778_v33 = vmul.f32 %v7675_v5, %v23574_v0  ;;  %29227 = vst [vmem:[#allocation134_spill] sm:$0xff] %v24285_v4 }
 0x456   :  { %v8011_v39 = vsel %vm2384_vm4, %v7975_v25, %v24249_v13  ;;  %8886 = vrot.lane.b32.xlu0 %v24024_v2, %s20188_s17  ;;  %v24287_v13 = vor.u32 %v18570_v63, %v18569_v49 }
 0x457   :  { %v8227_v18 = vmul.f32 %v8127_v42, %v8011_v39  ;;  %11070 = vmatpush1.bf16.msra.mxu1 %v19856_v23  ;;  %8440 = vrot.lane.b32.xlu1 %v24161_v45, %s20187_s16 }
 0x458   :  { %v8423_v41 = vpop.permute.xlu0 %8422  ;;  %29228 = vst [vmem:[#allocation135_spill] sm:$0xff] %v24287_v13  ;;  %v9023_v5 = vrot.slane %v24287_v13, %v29066_v6  ;;  %v9019_v0 = vrot.slane %v24287_v13, %v29059_v34 }
 0x459   :  { %v24275_v48 = vpop.permute.xlu1 %7972  ;;  %v19889_v42 = vpack.c.bf16 %v8227_v18, %v7779_v26 }
 0x45a   :  { %29226 = vst [vmem:[#allocation133_spill] sm:$0xff] %v24275_v48  ;;  %v8012_v23 = vsel %vm2384_vm4, %v24275_v48, %v7975_v25  ;;  %6750 = vrot.lane.b32.xlu0 %v24187_v11, %s20184_s0  ;;  %v8575_v25 = vrot.slane %v24285_v4, %v29066_v6 }
 0x45b   :  { %v8226_v39 = vmul.f32 %v8123_v12, %v8012_v23  ;;  %11071 = vmatprep.subr.bf16.mxu1 %v19889_v42  ;;  %8888 = vrot.lane.b32.xlu1 %v24161_v45, %s20188_s17  ;;  %v18593_v12 = vld [vmem:[%s28625_s1 + $0x180] ss:$8 sm:$0xf] }
 0x45c   :  { %v8871_v15 = vpop.permute.xlu0 %8870 }
 0x45d   :  { %v19888_v18 = vpack.c.bf16 %v8226_v39, %v7778_v33  ;;  %v24289_v26 = vpop.permute.xlu1 %8424  ;;  %v24317_v33 = vor.u32 %v18594_v7, %v18593_v12  ;;  %v8571_v39 = vrot.slane %v24285_v4, %v29059_v34 }
 0x45e   :  { %29229 = vst [vmem:[#allocation136_spill] sm:$0xff] %v24289_v26  ;;  %8436 = vrot.lane.b32.xlu0 %v24026_v8, %s20187_s16  ;;  %v8459_v53 = vsel %vm2837_vm5, %v8423_v41, %v24289_v26 }
 0x45f   :  { %11072 = vmatpush1.bf16.msra.mxu1 %v19888_v18  ;;  %7198 = vrot.lane.b32.xlu1 %v24187_v11, %s20185_s14  ;;  %29232 = vst [vmem:[#allocation139_spill] sm:$0xff] %v24317_v33  ;;  %v8675_v23 = vmul.f32 %v8575_v25, %v8459_v53 }
 0x460   :  { %v24308_v49 = vpop.permute.xlu0 %8420 }
 0x461   :  { %29230 = vst [vmem:[#allocation137_spill] sm:$0xff] %v24308_v49  ;;  %v24310_v63 = vpop.permute.xlu1 %8872  ;;  %v8460_v26 = vsel %vm2837_vm5, %v24308_v49, %v8423_v41  ;;  %v9471_v41 = vrot.slane %v24317_v33, %v29066_v6 }
 0x462   :  { %29231 = vst [vmem:[#allocation138_spill] sm:$0xff] %v24310_v63  ;;  %v8907_v42 = vsel %vm3290_vm6, %v8871_v15, %v24310_v63  ;;  %7938 = vrot.lane.b32.xlu0 %v23034_v29, %s20186_s15  ;;  %v8674_v7 = vmul.f32 %v8571_v39, %v8460_v26 }
 0x463   :  { %v9123_v18 = vmul.f32 %v9023_v5, %v8907_v42  ;;  %8884 = vrot.lane.b32.xlu1 %v24026_v8, %s20188_s17  ;;  %v9467_v5 = vrot.slane %v24317_v33, %v29059_v34  ;;  %v5754_v42 = vadd.f32 %v23658_v44, %v23003_v56 }
 0x464   :  { %v24328_v63 = vpop.permute.xlu0 %9316 }
 0x465   :  { %29233 = vst [vmem:[#allocation140_spill] sm:$0xff] %v24328_v63  ;;  %v24330_v48 = vpop.permute.xlu1 %8868  ;;  %v19921_v12 = vpack.c.bf16 %v9123_v18, %v8675_v23  ;;  %v24357_v44 = vmax.f32 %v5754_v42, 0.0 }
 0x466   :  { %29234 = vst [vmem:[#allocation141_spill] sm:$0xff] %v24330_v48  ;;  %v8908_v25 = vsel %vm3290_vm6, %v24330_v48, %v8871_v15  ;;  %9334 = vrot.lane.b32.xlu0 %v24024_v2, %s20189_s18 }
 0x467   :  { %v9122_v53 = vmul.f32 %v9019_v0, %v8908_v25  ;;  %11073 = vmatprep.subr.bf16.mxu1 %v19921_v12  ;;  %9332 = vrot.lane.b32.xlu1 %v24026_v8, %s20189_s18  ;;  %29236 = vst [vmem:[#allocation143_spill] sm:$0xff] %v24357_v44 }
 0x468   :  { %v24345_v23 = vpop.permute.xlu0 %9320 }
 0x469   :  { %29235 = vst [vmem:[#allocation142_spill] sm:$0xff] %v24345_v23  ;;  %v19920_v15 = vpack.c.bf16 %v9122_v53, %v8674_v7  ;;  %v9319_v18 = vpop.permute.xlu1 %9318 }
 0x46a   :  { %v9355_v49 = vsel %vm3743_vm7, %v9319_v18, %v24345_v23  ;;  %v9356_v0 = vsel %vm3743_vm7, %v24328_v63, %v9319_v18  ;;  %7936 = vrot.lane.b32.xlu0 %v24137_v22, %s20186_s15  ;;  %v5999_v18 = vrot.slane %v24110_v47, %v20819_v16 }
 0x46b   :  { %v9570_v26 = vmul.f32 %v9467_v5, %v9356_v0  ;;  %v9571_v39 = vmul.f32 %v9471_v41, %v9355_v49  ;;  %11074 = vmatpush1.bf16.msra.mxu1 %v19920_v15  ;;  %9336 = vrot.lane.b32.xlu1 %v24161_v45, %s20189_s18  ;;  %v6447_v5 = vrot.slane %v24114_v20, %v20819_v16 }
 0x46c   :  { %v24359_v12 = vpop.permute.xlu0 %5838  ;;  %v5715_v41 = vadd.f32 %v23636_v52, %v23003_v56  ;;  %v5995_v52 = vrot.slane %v24110_v47, %v20774_v43 }
 0x46d   :  { %29237 = vst [vmem:[#allocation144_spill] sm:$0xff] %v24359_v12  ;;  %v19952_v25 = vpack.c.bf16 %v9570_v26, %v9570_v26  ;;  %v19953_v7 = vpack.c.bf16 %v9571_v39, %v9571_v39  ;;  %v5837_v53 = vpop.permute.xlu1 %5836  ;;  %v6443_v39 = vrot.slane %v24114_v20, %v20774_v43 }
 0x46e   :  { %6300 = vrot.lane.b32.xlu0 %v24357_v44, %s20183_s30  ;;  %v5864_v42 = vsel %vm217_vm0, %v5837_v53, %v24359_v12 }
 0x46f   :  { %18791 = vmatprep.subr.msk.bf16.mxu1 %vm5007_vm8, %v19953_v7  ;;  %5852 = vrot.lane.b32.xlu1 %v24357_v44, %s20182_s13  ;;  %v10657_v49 = vsel %vm5007_vm8, %v19952_v25, 0  ;;  %v6087_v25 = vmul.f32 %v5999_v18, %v5864_v42  ;;  %v24392_v7 = vld [vmem:[%s28630_s6] sm:$0xf] }
 0x470   :  { %11076 = vmatpush1.bf16.msra.mxu1 %v10657_v49  ;;  %v24376_v15 = vpop.permute.xlu0 %6286  ;;  %v24396_v49 = vmax.f32 %v5715_v41, 0.0 }
 0x471   :  { %29238 = vst [vmem:[#allocation145_spill] sm:$0xff] %v24376_v15  ;;  %v6285_v0 = vpop.permute.xlu1 %6284 }
 0x472   :  { %v6312_v26 = vsel %vm669_vm1, %v6285_v0, %v24376_v15  ;;  %8834 = vrot.lane.b32.xlu0 %v23034_v29, %s20188_s17  ;;  %29239 = vst [vmem:[#allocation146_spill] sm:$0xff] %v24396_v49 }
 0x473   :  { %v6535_v56 = vmul.f32 %v6447_v5, %v6312_v26  ;;  %8386 = vrot.lane.b32.xlu1 %v23034_v29, %s20187_s16  ;;  %18792 = vmatmul.mubr.msk.bf16.vlgmr.msra.gmra.mrb[48].mxu1 %vm5003_vm9, %v24392_v7 }
 0x474   :  { %v24398_v12 = vpop.permute.xlu0 %6282  ;;  %11181 = vmatprep.mubr.bf16.mxu1 %v29025_v46 }
 0x475   :  { %29240 = vst [vmem:[#allocation147_spill] sm:$0xff] %v24398_v12  ;;  %v6313_v18 = vsel %vm669_vm1, %v24398_v12, %v6285_v0  ;;  %v24404_v5 = vpop.permute.xlu1 %5834  ;;  %v19829_v42 = vpack.c.bf16 %v6535_v56, %v6087_v25 }
 0x476   :  { %29241 = vst [vmem:[#allocation148_spill] sm:$0xff] %v24404_v5  ;;  %v6534_v26 = vmul.f32 %v6443_v39, %v6313_v18  ;;  %v5865_v15 = vsel %vm217_vm0, %v24404_v5, %v5837_v53  ;;  %6298 = vrot.lane.b32.xlu0 %v24396_v49, %s20183_s30  ;;  %v6895_v39 = vrot.slane %v24183_v60, %v20819_v16 }
 0x477   :  { %v6086_v41 = vmul.f32 %v5995_v52, %v5865_v15  ;;  %11149 = vmatprep.subr.bf16.mxu1 %v19829_v42  ;;  %5850 = vrot.lane.b32.xlu1 %v24396_v49, %s20182_s13  ;;  %v7343_v53 = vrot.slane %v24185_v9, %v20819_v16 }
 0x478   :  { %v24413_v23 = vpop.permute.xlu0 %6734 }
 0x479   :  { %29242 = vst [vmem:[#allocation149_spill] sm:$0xff] %v24413_v23  ;;  %v19828_v63 = vpack.c.bf16 %v6534_v26, %v6086_v41  ;;  %v6733_v0 = vpop.permute.xlu1 %6732  ;;  %v6891_v26 = vrot.slane %v24183_v60, %v20774_v43  ;;  %v29267_v60 = vld [vmem:[#allocation14_spill] sm:$0xff] }
 0x47a   :  { %8832 = vrot.lane.b32.xlu0 %v24137_v22, %s20188_s17  ;;  %v6760_v15 = vsel %vm1122_vm2, %v6733_v0, %v24413_v23 }
 0x47b   :  { %11150 = vmatpush1.bf16.msra.mxu1 %v19828_v63  ;;  %8384 = vrot.lane.b32.xlu1 %v24137_v22, %s20187_s16  ;;  %v7339_v63 = vrot.slane %v24185_v9, %v20774_v43  ;;  %v6983_v18 = vmul.f32 %v6895_v39, %v6760_v15  ;;  %v8143_v15 = vrot.slane %v24227_v50, %v20819_v16  ;;  %v29271_v9 = vld [vmem:[#allocation63_spill] sm:$0xff] }
 0x47c   :  { %v24426_v25 = vpop.permute.xlu0 %7182  ;;  %v8055_v47 = vrot.slane %v29271_v9, %v29058_v28 }
 0x47d   :  { %29243 = vst [vmem:[#allocation150_spill] sm:$0xff] %v24426_v25  ;;  %v7181_v56 = vpop.permute.xlu1 %7180 }
 0x47e   :  { %v7208_v52 = vsel %vm1575_vm3, %v7181_v56, %v24426_v25  ;;  %7196 = vrot.lane.b32.xlu0 %v24357_v44, %s20185_s14 }
 0x47f   :  { %v7431_v42 = vmul.f32 %v7343_v53, %v7208_v52  ;;  %6748 = vrot.lane.b32.xlu1 %v24357_v44, %s20184_s0 }
 0x480   :  { %v24439_v41 = vpop.permute.xlu0 %7178 }
 0x481   :  { %29244 = vst [vmem:[#allocation151_spill] sm:$0xff] %v24439_v41  ;;  %v7209_v23 = vsel %vm1575_vm3, %v24439_v41, %v7181_v56  ;;  %v24444_v25 = vpop.permute.xlu1 %6730  ;;  %v19861_v5 = vpack.c.bf16 %v7431_v42, %v6983_v18  ;;  %v7695_v56 = vrot.slane %v24236_v57, %v20819_v16  ;;  %v8139_v42 = vrot.slane %v24227_v50, %v20774_v43 }
 0x482   :  { %29245 = vst [vmem:[#allocation152_spill] sm:$0xff] %v24444_v25  ;;  %v7430_v12 = vmul.f32 %v7339_v63, %v7209_v23  ;;  %v6761_v39 = vsel %vm1122_vm2, %v24444_v25, %v6733_v0  ;;  %9282 = vrot.lane.b32.xlu0 %v23034_v29, %s20189_s18 }
 0x483   :  { %v6982_v53 = vmul.f32 %v6891_v26, %v6761_v39  ;;  %11151 = vmatprep.subr.bf16.mxu1 %v19861_v5  ;;  %9280 = vrot.lane.b32.xlu1 %v24137_v22, %s20189_s18  ;;  %v7691_v5 = vrot.slane %v24236_v57, %v20774_v43 }
 0x484   :  { %v24457_v52 = vpop.permute.xlu0 %7984 }
 0x485   :  { %29246 = vst [vmem:[#allocation153_spill] sm:$0xff] %v24457_v52  ;;  %v19860_v23 = vpack.c.bf16 %v7430_v12, %v6982_v53  ;;  %v7983_v63 = vpop.permute.xlu1 %7982  ;;  %v7783_v12 = vmul.f32 %v7695_v56, %v23804_v61 }
 0x486   :  { %v8007_v0 = vsel %vm2384_vm4, %v7983_v63, %v24457_v52  ;;  %7194 = vrot.lane.b32.xlu0 %v24396_v49, %s20185_s14 }
 0x487   :  { %v8231_v18 = vmul.f32 %v8143_v15, %v8007_v0  ;;  %11152 = vmatpush1.bf16.msra.mxu1 %v19860_v23  ;;  %6746 = vrot.lane.b32.xlu1 %v24396_v49, %s20184_s0  ;;  %v7782_v15 = vmul.f32 %v7691_v5, %v23827_v62 }
 0x488   :  { %v8431_v26 = vpop.permute.xlu0 %8430 }
 0x489   :  { %v24471_v39 = vpop.permute.xlu1 %7980  ;;  %v19893_v53 = vpack.c.bf16 %v8231_v18, %v7783_v12 }
 0x48a   :  { %29247 = vst [vmem:[#allocation154_spill] sm:$0xff] %v24471_v39  ;;  %v8008_v52 = vsel %vm2384_vm4, %v24471_v39, %v7983_v63  ;;  %6248 = vrot.lane.b32.xlu0 %v23054_v21, %s20183_s30  ;;  %v8591_v63 = vrot.slane %v24285_v4, %v20819_v16 }
 0x48b   :  { %v8230_v23 = vmul.f32 %v8139_v42, %v8008_v52  ;;  %11153 = vmatprep.subr.bf16.mxu1 %v19893_v53  ;;  %5800 = vrot.lane.b32.xlu1 %v23054_v21, %s20182_s13  ;;  %v9039_v52 = vrot.slane %v24287_v13, %v20819_v16 }
 0x48c   :  { %v8879_v0 = vpop.permute.xlu0 %8878 }
 0x48d   :  { %v19892_v56 = vpack.c.bf16 %v8230_v23, %v7782_v15  ;;  %v24481_v61 = vpop.permute.xlu1 %8432  ;;  %v8587_v15 = vrot.slane %v24285_v4, %v20774_v43 }
 0x48e   :  { %29248 = vst [vmem:[#allocation155_spill] sm:$0xff] %v24481_v61  ;;  %7996 = vrot.lane.b32.xlu0 %v24357_v44, %s20186_s15  ;;  %v8455_v5 = vsel %vm2837_vm5, %v8431_v26, %v24481_v61 }
 0x48f   :  { %11154 = vmatpush1.bf16.msra.mxu1 %v19892_v56  ;;  %7998 = vrot.lane.b32.xlu1 %v24187_v11, %s20186_s15  ;;  %v8679_v53 = vmul.f32 %v8591_v63, %v8455_v5  ;;  %v9035_v56 = vrot.slane %v24287_v13, %v20774_v43 }
 0x490   :  { %v24494_v18 = vpop.permute.xlu0 %8428 }
 0x491   :  { %29249 = vst [vmem:[#allocation156_spill] sm:$0xff] %v24494_v18  ;;  %v24496_v42 = vpop.permute.xlu1 %8880  ;;  %v8456_v62 = vsel %vm2837_vm5, %v24494_v18, %v8431_v26  ;;  %v9487_v26 = vrot.slane %v24317_v33, %v20819_v16 }
 0x492   :  { %29250 = vst [vmem:[#allocation157_spill] sm:$0xff] %v24496_v42  ;;  %v8903_v12 = vsel %vm3290_vm6, %v8879_v0, %v24496_v42  ;;  %7144 = vrot.lane.b32.xlu0 %v23054_v21, %s20185_s14  ;;  %v8678_v5 = vmul.f32 %v8587_v15, %v8456_v62  ;;  %v18427_v62 = vld [vmem:[%s28625_s1 + $0xc1] ss:$8 sm:$0xf] }
 0x493   :  { %v9127_v23 = vmul.f32 %v9039_v52, %v8903_v12  ;;  %6696 = vrot.lane.b32.xlu1 %v23054_v21, %s20184_s0  ;;  %v9483_v52 = vrot.slane %v24317_v33, %v20774_v43 }
 0x494   :  { %v24512_v61 = vpop.permute.xlu0 %9324 }
 0x495   :  { %29251 = vst [vmem:[#allocation158_spill] sm:$0xff] %v24512_v61  ;;  %v24514_v42 = vpop.permute.xlu1 %8876  ;;  %v19925_v39 = vpack.c.bf16 %v9127_v23, %v8679_v53  ;;  %v18403_v53 = vld [vmem:[%s28625_s1 + $0xc0] ss:$8 sm:$0xf] }
 0x496   :  { %29252 = vst [vmem:[#allocation159_spill] sm:$0xff] %v24514_v42  ;;  %v8904_v63 = vsel %vm3290_vm6, %v24514_v42, %v8879_v0  ;;  %8894 = vrot.lane.b32.xlu0 %v24187_v11, %s20188_s17  ;;  %v18404_v0 = vld [vmem:[%s28625_s1 + $0xc0] ss:$8 sm:$0xf0] }
 0x497   :  { %v9126_v12 = vmul.f32 %v9035_v56, %v8904_v63  ;;  %11155 = vmatprep.subr.bf16.mxu1 %v19925_v39  ;;  %8446 = vrot.lane.b32.xlu1 %v24187_v11, %s20187_s16  ;;  %v18428_v39 = vld [vmem:[%s28625_s1 + $0xc1] ss:$8 sm:$0xf0]  ;;  %v24549_v42 = vor.u32 %v18404_v0, %v18403_v53 }
 0x498   :  { %v24533_v23 = vpop.permute.xlu0 %9328 }
 0x499   :  { %29253 = vst [vmem:[#allocation160_spill] sm:$0xff] %v24533_v23  ;;  %v19924_v15 = vpack.c.bf16 %v9126_v12, %v8678_v5  ;;  %v9327_v56 = vpop.permute.xlu1 %9326  ;;  %v24553_v5 = vor.u32 %v18428_v39, %v18427_v62  ;;  %v6015_v53 = vrot.slane %v24549_v42, %v29066_v6  ;;  %v6011_v39 = vrot.slane %v24549_v42, %v29059_v34 }
 0x49a   :  { %v9351_v63 = vsel %vm3743_vm7, %v9327_v56, %v24533_v23  ;;  %v9352_v18 = vsel %vm3743_vm7, %v24512_v61, %v9327_v56  ;;  %8892 = vrot.lane.b32.xlu0 %v24357_v44, %s20188_s17  ;;  %v18452_v56 = vld [vmem:[%s28625_s1 + $0xc2] ss:$8 sm:$0xf0] }
 0x49b   :  { %v9574_v25 = vmul.f32 %v9483_v52, %v9352_v18  ;;  %v9575_v41 = vmul.f32 %v9487_v26, %v9351_v63  ;;  %11156 = vmatpush1.bf16.msra.mxu1 %v19924_v15  ;;  %8444 = vrot.lane.b32.xlu1 %v24357_v44, %s20187_s16  ;;  %v6463_v52 = vrot.slane %v24553_v5, %v29066_v6  ;;  %v18451_v15 = vld [vmem:[%s28625_s1 + $0xc2] ss:$8 sm:$0xf] }
 0x49c   :  { %v24555_v12 = vpop.permute.xlu0 %5846  ;;  %v6459_v0 = vrot.slane %v24553_v5, %v29059_v34  ;;  %v24612_v48 = vor.u32 %v18452_v56, %v18451_v15 }
 0x49d   :  { %29254 = vst [vmem:[#allocation161_spill] sm:$0xff] %v24555_v12  ;;  %v19956_v23 = vpack.c.bf16 %v9574_v25, %v9574_v25  ;;  %v19957_v33 = vpack.c.bf16 %v9575_v41, %v9575_v41  ;;  %v5845_v4 = vpop.permute.xlu1 %5844 }
 0x49e   :  { %9340 = vrot.lane.b32.xlu0 %v24357_v44, %s20189_s18  ;;  %v5860_v25 = vsel %vm217_vm0, %v5845_v4, %v24555_v12 }
 0x49f   :  { %18795 = vmatprep.subr.msk.bf16.mxu1 %vm5007_vm8, %v19957_v33  ;;  %7946 = vrot.lane.b32.xlu1 %v23106_v54, %s20186_s15  ;;  %v10669_v18 = vsel %vm5007_vm8, %v19956_v23, 0  ;;  %v6091_v23 = vmul.f32 %v6015_v53, %v5860_v25  ;;  %v18475_v53 = vld [vmem:[%s28625_s1 + $0xc3] ss:$8 sm:$0xf] }
 0x4a0   :  { %11158 = vmatpush1.bf16.msra.mxu1 %v10669_v18  ;;  %v24570_v41 = vpop.permute.xlu0 %6294  ;;  %v18476_v18 = vld [vmem:[%s28625_s1 + $0xc3] ss:$8 sm:$0xf0] }
 0x4a1   :  { %29255 = vst [vmem:[#allocation162_spill] sm:$0xff] %v24570_v41  ;;  %v6293_v26 = vpop.permute.xlu1 %6292  ;;  %v24614_v13 = vor.u32 %v18476_v18, %v18475_v53  ;;  %v6907_v18 = vrot.slane %v24612_v48, %v29059_v34 }
 0x4a2   :  { %v6308_v33 = vsel %vm669_vm1, %v6293_v26, %v24570_v41  ;;  %8394 = vrot.lane.b32.xlu0 %v23106_v54, %s20187_s16 }
 0x4a3   :  { %v6539_v62 = vmul.f32 %v6463_v52, %v6308_v33  ;;  %9342 = vrot.lane.b32.xlu1 %v24187_v11, %s20189_s18  ;;  %18796 = vmatmul.mubr.msk.bf16.vlgmr.msra.gmra.mrb[52].mxu1 %vm5003_vm9, %v24392_v7  ;;  %v7355_v15 = vrot.slane %v24614_v13, %v29059_v34 }
 0x4a4   :  { %v24591_v63 = vpop.permute.xlu0 %6290  ;;  %11263 = vmatprep.mubr.bf16.mxu1 %v29025_v46 }
 0x4a5   :  { %29256 = vst [vmem:[#allocation163_spill] sm:$0xff] %v24591_v63  ;;  %v6309_v52 = vsel %vm669_vm1, %v24591_v63, %v6293_v26  ;;  %v24603_v25 = vpop.permute.xlu1 %5842  ;;  %v19833_v33 = vpack.c.bf16 %v6539_v62, %v6091_v23 }
 0x4a6   :  { %29257 = vst [vmem:[#allocation164_spill] sm:$0xff] %v24603_v25  ;;  %v6538_v12 = vmul.f32 %v6459_v0, %v6309_v52  ;;  %v5861_v41 = vsel %vm217_vm0, %v24603_v25, %v5845_v4  ;;  %9290 = vrot.lane.b32.xlu0 %v23106_v54, %s20189_s18  ;;  %v6911_v4 = vrot.slane %v24612_v48, %v29066_v6  ;;  %v18499_v25 = vld [vmem:[%s28625_s1 + $0xc4] ss:$8 sm:$0xf] }
 0x4a7   :  { %v6090_v61 = vmul.f32 %v6011_v39, %v5861_v41  ;;  %11231 = vmatprep.subr.bf16.mxu1 %v19833_v33  ;;  %8842 = vrot.lane.b32.xlu1 %v23106_v54, %s20188_s17  ;;  %v7359_v41 = vrot.slane %v24614_v13, %v29066_v6  ;;  %v18523_v33 = vld [vmem:[%s28625_s1 + $0xc5] ss:$8 sm:$0xf] }
 0x4a8   :  { %v24616_v26 = vpop.permute.xlu0 %6742 }
 0x4a9   :  { %29258 = vst [vmem:[#allocation165_spill] sm:$0xff] %v24616_v26  ;;  %v19832_v23 = vpack.c.bf16 %v6538_v12, %v6090_v61  ;;  %v6741_v0 = vpop.permute.xlu1 %6740 }
 0x4aa   :  { %6256 = vrot.lane.b32.xlu0 %v23126_v17, %s20183_s30  ;;  %v6756_v62 = vsel %vm1122_vm2, %v6741_v0, %v24616_v26 }
 0x4ab   :  { %11232 = vmatpush1.bf16.msra.mxu1 %v19832_v23  ;;  %5808 = vrot.lane.b32.xlu1 %v23126_v17, %s20182_s13  ;;  %v6987_v56 = vmul.f32 %v6911_v4, %v6756_v62  ;;  %v18524_v23 = vld [vmem:[%s28625_s1 + $0xc5] ss:$8 sm:$0xf0] }
 0x4ac   :  { %v24629_v39 = vpop.permute.xlu0 %7190 }
 0x4ad   :  { %29259 = vst [vmem:[#allocation166_spill] sm:$0xff] %v24629_v39  ;;  %v7189_v61 = vpop.permute.xlu1 %7188 }
 0x4ae   :  { %v7204_v12 = vsel %vm1575_vm3, %v7189_v61, %v24629_v39  ;;  %7152 = vrot.lane.b32.xlu0 %v23126_v17, %s20185_s14  ;;  %v6359_v39 = vrot.slane %v23206_v14, %v29058_v28 }
 0x4af   :  { %v7435_v53 = vmul.f32 %v7359_v41, %v7204_v12  ;;  %6704 = vrot.lane.b32.xlu1 %v23126_v17, %s20184_s0 }
 0x4b0   :  { %v24642_v52 = vpop.permute.xlu0 %7186 }
 0x4b1   :  { %29260 = vst [vmem:[#allocation167_spill] sm:$0xff] %v24642_v52  ;;  %v7205_v4 = vsel %vm1575_vm3, %v24642_v52, %v7189_v61  ;;  %v24653_v41 = vpop.permute.xlu1 %6738  ;;  %v19865_v62 = vpack.c.bf16 %v7435_v53, %v6987_v56  ;;  %v18500_v61 = vld [vmem:[%s28625_s1 + $0xc4] ss:$8 sm:$0xf0] }
 0x4b2   :  { %29261 = vst [vmem:[#allocation168_spill] sm:$0xff] %v24653_v41  ;;  %v7434_v12 = vmul.f32 %v7355_v15, %v7205_v4  ;;  %v6757_v26 = vsel %vm1122_vm2, %v24653_v41, %v6741_v0  ;;  %8402 = vrot.lane.b32.xlu0 %v23170_v27, %s20187_s16  ;;  %v5911_v0 = vrot.slane %v23204_v38, %v29058_v28 }
 0x4b3   :  { %v6986_v56 = vmul.f32 %v6907_v18, %v6757_v26  ;;  %11233 = vmatprep.subr.bf16.mxu1 %v19865_v62  ;;  %7954 = vrot.lane.b32.xlu1 %v23170_v27, %s20186_s15  ;;  %v24672_v15 = vor.u32 %v18524_v23, %v18523_v33  ;;  %v24677_v63 = vor.u32 %v18500_v61, %v18499_v25 }
 0x4b4   :  { %v6241_v53 = vpop.permute.xlu0 %6240 }
 0x4b5   :  { %v19864_v4 = vpack.c.bf16 %v7434_v12, %v6986_v56  ;;  %v6334_v41 = vsel %vm669_vm1, %v6241_v53, %v23250_v30  ;;  %v5793_v52 = vpop.permute.xlu1 %5792  ;;  %v8159_v33 = vrot.slane %v24672_v15, %v29066_v6  ;;  %v7711_v30 = vrot.slane %v24677_v63, %v29066_v6 }
 0x4b6   :  { %v6513_v57 = vmul.f32 %v6359_v39, %v6334_v41  ;;  %v5886_v26 = vsel %vm217_vm0, %v5793_v52, %v23252_v36  ;;  %9298 = vrot.lane.b32.xlu0 %v23170_v27, %s20189_s18  ;;  %v6355_v41 = vrot.slane %v23206_v14, %v20925_v10  ;;  %v5907_v12 = vrot.slane %v23204_v38, %v20925_v10 }
 0x4b7   :  { %v6065_v18 = vmul.f32 %v5911_v0, %v5886_v26  ;;  %11234 = vmatpush1.bf16.msra.mxu1 %v19864_v4  ;;  %8850 = vrot.lane.b32.xlu1 %v23170_v27, %s20188_s17  ;;  %v29272_v27 = vld [vmem:[#allocation50_spill] sm:$0xff] }
 0x4b8   :  { %v24690_v25 = vpop.permute.xlu0 %7992 }
 0x4b9   :  { %29262 = vst [vmem:[#allocation169_spill] sm:$0xff] %v24690_v25  ;;  %v7991_v39 = vpop.permute.xlu1 %7990  ;;  %v19807_v23 = vpack.c.bf16 %v6513_v57, %v6065_v18  ;;  %v7787_v57 = vmul.f32 %v7711_v30, %v24024_v2  ;;  %v29265_v2 = vld [vmem:[#allocation35_spill] sm:$0xff] }
 0x4ba   :  { %v8003_v36 = vsel %vm2384_vm4, %v7991_v39, %v24690_v25  ;;  %6264 = vrot.lane.b32.xlu0 %v23223_v19, %s20183_s30 }
 0x4bb   :  { %v8235_v62 = vmul.f32 %v8159_v33, %v8003_v36  ;;  %5816 = vrot.lane.b32.xlu1 %v23223_v19, %s20182_s13  ;;  %10698 = vmatprep.subr.bf16.mxu0 %v19807_v23  ;;  %v7707_v33 = vrot.slane %v24677_v63, %v29059_v34 }
 0x4bc   :  { %v24704_v61 = vpop.permute.xlu0 %6302 }
 0x4bd   :  { %v6335_v56 = vsel %vm669_vm1, %v24704_v61, %v6241_v53  ;;  %v24709_v0 = vpop.permute.xlu1 %5854  ;;  %v19897_v4 = vpack.c.bf16 %v8235_v62, %v7787_v57  ;;  %v8155_v53 = vrot.slane %v24672_v15, %v29059_v34 }
 0x4be   :  { %v6512_v26 = vmul.f32 %v6355_v41, %v6335_v56  ;;  %v5887_v18 = vsel %vm217_vm0, %v24709_v0, %v5793_v52  ;;  %7160 = vrot.lane.b32.xlu0 %v23223_v19, %s20185_s14  ;;  %v7786_v52 = vmul.f32 %v7707_v33, %v24026_v8  ;;  %v7255_v56 = vrot.slane %v23264_v58, %v29058_v28 }
 0x4bf   :  { %v6064_v30 = vmul.f32 %v5907_v12, %v5887_v18  ;;  %6712 = vrot.lane.b32.xlu1 %v23223_v19, %s20184_s0  ;;  %11235 = vmatprep.subr.bf16.mxu1 %v19897_v4  ;;  %v6807_v12 = vrot.slane %v23260_v59, %v29058_v28  ;;  %v18547_v4 = vld [vmem:[%s28625_s1 + $0xc6] ss:$8 sm:$0xf] }
 0x4c0   :  { %v6689_v23 = vpop.permute.xlu0 %6688 }
 0x4c1   :  { %v19806_v36 = vpack.c.bf16 %v6512_v26, %v6064_v30  ;;  %v24722_v41 = vpop.permute.xlu1 %7988  ;;  %v29264_v26 = vld [vmem:[#allocation30_spill] sm:$0xff] }
 0x4c2   :  { %29263 = vst [vmem:[#allocation170_spill] sm:$0xff] %v24722_v41  ;;  %v8004_v62 = vsel %vm2384_vm4, %v24722_v41, %v7991_v39  ;;  %8410 = vrot.lane.b32.xlu0 %v23397_v24, %s20187_s16  ;;  %v18548_v39 = vld [vmem:[%s28625_s1 + $0xc6] ss:$8 sm:$0xf0]  ;;  %v6782_v18 = vsel %vm1122_vm2, %v6689_v23, %v29264_v26 }
 0x4c3   :  { %v8234_v57 = vmul.f32 %v8155_v53, %v8004_v62  ;;  %7962 = vrot.lane.b32.xlu1 %v23397_v24, %s20186_s15  ;;  %10699 = vmatpush1.bf16.msra.mxu0 %v19806_v36  ;;  %v18571_v30 = vld [vmem:[%s28625_s1 + $0xc7] ss:$8 sm:$0xf]  ;;  %v24756_v25 = vor.u32 %v18548_v39, %v18547_v4  ;;  %v6961_v26 = vmul.f32 %v6807_v12, %v6782_v18 }
 0x4c4   :  { %v8439_v33 = vpop.permute.xlu0 %8438  ;;  %v18572_v53 = vld [vmem:[%s28625_s1 + $0xc7] ss:$8 sm:$0xf0]  ;;  %v6803_v18 = vrot.slane %v23260_v59, %v20925_v10 }
 0x4c5   :  { %v19896_v36 = vpack.c.bf16 %v8234_v57, %v7786_v52  ;;  %v7137_v62 = vpop.permute.xlu1 %7136  ;;  %v24760_v50 = vor.u32 %v18572_v53, %v18571_v30  ;;  %v7251_v53 = vrot.slane %v23264_v58, %v20925_v10 }
 0x4c6   :  { %v7230_v8 = vsel %vm1575_vm3, %v7137_v62, %v29265_v2  ;;  %9306 = vrot.lane.b32.xlu0 %v23397_v24, %s20189_s18  ;;  %v8607_v2 = vrot.slane %v24756_v25, %v29066_v6 }
 0x4c7   :  { %v7409_v41 = vmul.f32 %v7255_v56, %v7230_v8  ;;  %8858 = vrot.lane.b32.xlu1 %v23397_v24, %s20188_s17  ;;  %11236 = vmatpush1.bf16.msra.mxu1 %v19896_v36  ;;  %v9055_v8 = vrot.slane %v24760_v50, %v29066_v6  ;;  %v9051_v20 = vrot.slane %v24760_v50, %v29059_v34 }
 0x4c8   :  { %v8887_v31 = vpop.permute.xlu0 %8886 }
 0x4c9   :  { %v24762_v52 = vpop.permute.xlu1 %8440  ;;  %v19839_v57 = vpack.c.bf16 %v7409_v41, %v6961_v26 }
 0x4ca   :  { %29266 = vst [vmem:[#allocation30_spill] sm:$0xff] %v24762_v52  ;;  %6272 = vrot.lane.b32.xlu0 %v29267_v60, %s20183_s30  ;;  %v8451_v12 = vsel %vm2837_vm5, %v8439_v33, %v24762_v52 }
 0x4cb   :  { %5824 = vrot.lane.b32.xlu1 %v29267_v60, %s20182_s13  ;;  %10700 = vmatprep.subr.bf16.mxu0 %v19839_v57  ;;  %v8683_v39 = vmul.f32 %v8607_v2, %v8451_v12  ;;  %v18595_v57 = vld [vmem:[%s28625_s1 + $0x1c0] ss:$8 sm:$0xf] }
 0x4cc   :  { %v24775_v56 = vpop.permute.xlu0 %6750  ;;  %v18596_v2 = vld [vmem:[%s28625_s1 + $0x1c0] ss:$8 sm:$0xf0] }
 0x4cd   :  { %v24777_v41 = vpop.permute.xlu1 %8888  ;;  %v6783_v36 = vsel %vm1122_vm2, %v24775_v56, %v6689_v23  ;;  %v24818_v19 = vor.u32 %v18596_v2, %v18595_v57 }
 0x4ce   :  { %29268 = vst [vmem:[#allocation35_spill] sm:$0xff] %v24777_v41  ;;  %v8899_v4 = vsel %vm3290_vm6, %v8887_v31, %v24777_v41  ;;  %7168 = vrot.lane.b32.xlu0 %v29267_v60, %s20185_s14  ;;  %v8603_v41 = vrot.slane %v24756_v25, %v29059_v34 }
 0x4cf   :  { %v9131_v30 = vmul.f32 %v9055_v8, %v8899_v4  ;;  %6720 = vrot.lane.b32.xlu1 %v29267_v60, %s20184_s0  ;;  %v29269_v4 = vld [vmem:[#allocation68_spill] sm:$0xff]  ;;  %v29270_v60 = vld [vmem:[#allocation49_spill] sm:$0xff] }
 0x4d0   :  { %v24793_v26 = vpop.permute.xlu0 %8436  ;;  %v7607_v52 = vrot.slane %v29269_v4, %v29058_v28 }
 0x4d1   :  { %v24801_v8 = vpop.permute.xlu1 %7198  ;;  %v19929_v12 = vpack.c.bf16 %v9131_v30, %v8683_v39  ;;  %v6960_v39 = vmul.f32 %v6803_v18, %v6783_v36 }
 0x4d2   :  { %v7231_v23 = vsel %vm1575_vm3, %v24801_v8, %v7137_v62  ;;  %8418 = vrot.lane.b32.xlu0 %v29270_v60, %s20187_s16  ;;  %v8452_v62 = vsel %vm2837_vm5, %v24793_v26, %v8439_v33  ;;  %v7761_v36 = vmul.f32 %v7607_v52, %v23034_v29 }
 0x4d3   :  { %v7408_v30 = vmul.f32 %v7251_v53, %v7231_v23  ;;  %7970 = vrot.lane.b32.xlu1 %v29270_v60, %s20186_s15  ;;  %11237 = vmatprep.subr.bf16.mxu1 %v19929_v12  ;;  %v8682_v57 = vmul.f32 %v8603_v41, %v8452_v62  ;;  %v9503_v41 = vrot.slane %v24818_v19, %v29066_v6  ;;  %v29287_v6 = vld [vmem:[#allocation52_spill] sm:$0xff] }
 0x4d4   :  { %v7939_v24 = vpop.permute.xlu0 %7938 }
 0x4d5   :  { %v19838_v17 = vpack.c.bf16 %v7408_v30, %v6960_v39  ;;  %v8029_v32 = vsel %vm2384_vm4, %v7939_v24, %v29272_v27  ;;  %v24826_v40 = vpop.permute.xlu1 %8884  ;;  %v9499_v27 = vrot.slane %v24818_v19, %v29059_v34 }
 0x4d6   :  { %v8209_v18 = vmul.f32 %v8055_v47, %v8029_v32  ;;  %v8900_v53 = vsel %vm3290_vm6, %v24826_v40, %v8887_v31  ;;  %9314 = vrot.lane.b32.xlu0 %v29270_v60, %s20189_s18 }
 0x4d7   :  { %v9130_v33 = vmul.f32 %v9051_v20, %v8900_v53  ;;  %8866 = vrot.lane.b32.xlu1 %v29270_v60, %s20188_s17  ;;  %10701 = vmatpush1.bf16.msra.mxu0 %v19838_v17  ;;  %v7603_v20 = vrot.slane %v29269_v4, %v20925_v10  ;;  %v8051_v17 = vrot.slane %v29271_v9, %v20925_v10 }
 0x4d8   :  { %v9335_v2 = vpop.permute.xlu0 %9334  ;;  %v19871_v32 = vpack.c.bf16 %v8209_v18, %v7761_v36  ;;  %v6479_v36 = vrot.slane %v24553_v5, %v20819_v16 }
 0x4d9   :  { %v19928_v47 = vpack.c.bf16 %v9130_v33, %v8682_v57  ;;  %v24838_v12 = vpop.permute.xlu1 %9332  ;;  %v7760_v62 = vmul.f32 %v7603_v20, %v24137_v22 }
 0x4da   :  { %29273 = vst [vmem:[#allocation68_spill] sm:$0xff] %v24838_v12  ;;  %v9348_v31 = vsel %vm3743_vm7, %v24838_v12, %v9335_v2  ;;  %6280 = vrot.lane.b32.xlu0 %v23687_v3, %s20183_s30  ;;  %10702 = vmatprep.subr.bf16.mxu0 %v19871_v32 }
 0x4db   :  { %v9578_v52 = vmul.f32 %v9499_v27, %v9348_v31  ;;  %5832 = vrot.lane.b32.xlu1 %v23687_v3, %s20182_s13  ;;  %11238 = vmatpush1.bf16.msra.mxu1 %v19928_v47 }
 0x4dc   :  { %v24853_v23 = vpop.permute.xlu0 %7936 }
 0x4dd   :  { %v8030_v39 = vsel %vm2384_vm4, %v24853_v23, %v7939_v24  ;;  %v24858_v30 = vpop.permute.xlu1 %9336  ;;  %v19960_v57 = vpack.c.bf16 %v9578_v52, %v9578_v52  ;;  %v6031_v24 = vrot.slane %v24549_v42, %v20819_v16  ;;  %v29275_v52 = vld [vmem:[#allocation69_spill] sm:$0xff] }
 0x4de   :  { %29274 = vst [vmem:[#allocation63_spill] sm:$0xff] %v24858_v30  ;;  %v8208_v18 = vmul.f32 %v8051_v17, %v8030_v39  ;;  %v9347_v53 = vsel %vm3743_vm7, %v9335_v2, %v24858_v30  ;;  %7176 = vrot.lane.b32.xlu0 %v23687_v3, %s20185_s14  ;;  %v29291_v30 = vld [vmem:[#allocation36_spill] sm:$0xff] }
 0x4df   :  { %v9579_v33 = vmul.f32 %v9503_v41, %v9347_v53  ;;  %6728 = vrot.lane.b32.xlu1 %v23687_v3, %s20184_s0  ;;  %v8951_v41 = vrot.slane %v29275_v52, %v29058_v28  ;;  %v29277_v53 = vld [vmem:[#allocation9_spill] sm:$0xff] }
 0x4e0   :  { %v19870_v27 = vpack.c.bf16 %v8208_v18, %v7760_v62  ;;  %v6301_v32 = vpop.permute.xlu0 %6300  ;;  %v29276_v62 = vld [vmem:[#allocation32_spill] sm:$0xff] }
 0x4e1   :  { %v19961_v47 = vpack.c.bf16 %v9579_v33, %v9579_v33  ;;  %v6304_v2 = vsel %vm669_vm1, %v6301_v32, %v24704_v61  ;;  %v5853_v31 = vpop.permute.xlu1 %5852  ;;  %v10681_v61 = vsel %vm5007_vm8, %v19960_v57, 0  ;;  %v8503_v18 = vrot.slane %v29276_v62, %v29058_v28 }
 0x4e2   :  { %v6543_v20 = vmul.f32 %v6479_v36, %v6304_v2  ;;  %v5856_v17 = vsel %vm217_vm0, %v5853_v31, %v24709_v0  ;;  %8426 = vrot.lane.b32.xlu0 %v23861_v1, %s20187_s16  ;;  %10703 = vmatpush1.bf16.msra.mxu0 %v19870_v27  ;;  %v24891_v2 = vpop.f32.mrb[32].mxu1  ;;  %v6475_v57 = vrot.slane %v24553_v5, %v20774_v43 }
 0x4e3   :  { %v6095_v39 = vmul.f32 %v6031_v24, %v5856_v17  ;;  %7978 = vrot.lane.b32.xlu1 %v23861_v1, %s20186_s15  ;;  %18799 = vmatprep.subr.msk.bf16.mxu1 %vm5007_vm8, %v19961_v47  ;;  %29278 = vst [vmem:[#allocation50_spill] sm:$0xff] %v24891_v2  ;;  %v29279_v17 = vld [vmem:[#allocation34_spill] sm:$0xff] }
 0x4e4   :  { %11240 = vmatpush1.bf16.msra.mxu1 %v10681_v61  ;;  %v8835_v0 = vpop.permute.xlu0 %8834  ;;  %v24900_v61 = vpop.f32.mrb[33].mxu1 }
 0x4e5   :  { %v8925_v36 = vsel %vm3290_vm6, %v8835_v0, %v29277_v53  ;;  %v8387_v33 = vpop.permute.xlu1 %8386  ;;  %v19837_v27 = vpack.c.bf16 %v6543_v20, %v6095_v39  ;;  %29280 = vst [vmem:[#allocation69_spill] sm:$0xff] %v24900_v61  ;;  %v6027_v20 = vrot.slane %v24549_v42, %v20774_v43 }
 0x4e6   :  { %v9105_v24 = vmul.f32 %v8951_v41, %v8925_v36  ;;  %v8477_v47 = vsel %vm2837_vm5, %v8387_v33, %v29279_v17  ;;  %9322 = vrot.lane.b32.xlu0 %v23861_v1, %s20189_s18  ;;  %v10777_v41 = vpop.f32.mrb[34].mxu1 }
 0x4e7   :  { %v8657_v29 = vmul.f32 %v8503_v18, %v8477_v47  ;;  %8874 = vrot.lane.b32.xlu1 %v23861_v1, %s20188_s17  ;;  %11313 = vmatprep.subr.bf16.mxu1 %v19837_v27  ;;  %v10778_v53 = vpop.f32.mrb[35].mxu1  ;;  %v8947_v41 = vrot.slane %v29275_v52, %v20925_v10 }
 0x4e8   :  { %v24906_v39 = vpop.permute.xlu0 %6298  ;;  %18800 = vmatmul.mubr.msk.bf16.vlgmr.msra.gmra.mrb[56].mxu1 %vm5003_vm9, %v24392_v7 }
 0x4e9   :  { %29281 = vst [vmem:[#allocation32_spill] sm:$0xff] %v24906_v39  ;;  %v6305_v36 = vsel %vm669_vm1, %v24906_v39, %v6301_v32  ;;  %v24913_v17 = vpop.permute.xlu1 %5850  ;;  %v19903_v18 = vpack.c.bf16 %v9105_v24, %v8657_v29  ;;  %11345 = vmatprep.mubr.bf16.mxu1 %v29025_v46  ;;  %v8499_v29 = vrot.slane %v29276_v62, %v20925_v10  ;;  %v29293_v39 = vld [vmem:[#allocation41_spill] sm:$0xff] }
 0x4ea   :  { %29282 = vst [vmem:[#allocation9_spill] sm:$0xff] %v24913_v17  ;;  %v6542_v27 = vmul.f32 %v6475_v57, %v6305_v36  ;;  %v5857_v47 = vsel %vm217_vm0, %v24913_v17, %v5853_v31  ;;  %6288 = vrot.lane.b32.xlu0 %v23927_v51, %s20183_s30 }
 0x4eb   :  { %v6094_v53 = vmul.f32 %v6027_v20, %v5857_v47  ;;  %5840 = vrot.lane.b32.xlu1 %v23927_v51, %s20182_s13  ;;  %10704 = vmatprep.subr.bf16.mxu0 %v19903_v18  ;;  %v7375_v18 = vrot.slane %v24614_v13, %v20819_v16 }
 0x4ec   :  { %v24927_v32 = vpop.permute.xlu0 %8832 }
 0x4ed   :  { %v19836_v24 = vpack.c.bf16 %v6542_v27, %v6094_v53  ;;  %v8926_v31 = vsel %vm3290_vm6, %v24927_v32, %v8835_v0  ;;  %v24932_v57 = vpop.permute.xlu1 %8384  ;;  %v6927_v0 = vrot.slane %v24612_v48, %v20819_v16 }
 0x4ee   :  { %v9104_v36 = vmul.f32 %v8947_v41, %v8926_v31  ;;  %v8478_v20 = vsel %vm2837_vm5, %v24932_v57, %v8387_v33  ;;  %7184 = vrot.lane.b32.xlu0 %v23927_v51, %s20185_s14 }
 0x4ef   :  { %v8656_v47 = vmul.f32 %v8499_v29, %v8478_v20  ;;  %6736 = vrot.lane.b32.xlu1 %v23927_v51, %s20184_s0  ;;  %11314 = vmatpush1.bf16.msra.mxu1 %v19836_v24  ;;  %v29283_v29 = vld [vmem:[#allocation17_spill] sm:$0xff] }
 0x4f0   :  { %v7197_v27 = vpop.permute.xlu0 %7196  ;;  %v9399_v24 = vrot.slane %v29283_v29, %v29058_v28 }
 0x4f1   :  { %v19902_v41 = vpack.c.bf16 %v9104_v36, %v8656_v47  ;;  %v7200_v33 = vsel %vm1575_vm3, %v7197_v27, %v24801_v8  ;;  %v6749_v53 = vpop.permute.xlu1 %6748  ;;  %v9395_v8 = vrot.slane %v29283_v29, %v20925_v10 }
 0x4f2   :  { %v7439_v31 = vmul.f32 %v7375_v18, %v7200_v33  ;;  %v6752_v22 = vsel %vm1122_vm2, %v6749_v53, %v24775_v56  ;;  %8434 = vrot.lane.b32.xlu0 %v24050_v35, %s20187_s16  ;;  %v29284_v18 = vld [vmem:[#allocation19_spill] sm:$0xff] }
 0x4f3   :  { %v6991_v20 = vmul.f32 %v6927_v0, %v6752_v22  ;;  %7986 = vrot.lane.b32.xlu1 %v24050_v35, %s20186_s15  ;;  %10705 = vmatpush1.bf16.msra.mxu0 %v19902_v41  ;;  %v7371_v0 = vrot.slane %v24614_v13, %v20774_v43 }
 0x4f4   :  { %v9283_v36 = vpop.permute.xlu0 %9282 }
 0x4f5   :  { %v9373_v47 = vsel %vm3743_vm7, %v9283_v36, %v29284_v18  ;;  %v24962_v56 = vpop.permute.xlu1 %9280  ;;  %v19869_v33 = vpack.c.bf16 %v7439_v31, %v6991_v20  ;;  %v6923_v18 = vrot.slane %v24612_v48, %v20774_v43 }
 0x4f6   :  { %v9553_v34 = vmul.f32 %v9399_v24, %v9373_v47  ;;  %v9374_v22 = vsel %vm3743_vm7, %v24962_v56, %v9283_v36  ;;  %9330 = vrot.lane.b32.xlu0 %v24050_v35, %s20189_s18 }
 0x4f7   :  { %v9552_v41 = vmul.f32 %v9395_v8, %v9374_v22  ;;  %8882 = vrot.lane.b32.xlu1 %v24050_v35, %s20188_s17  ;;  %11315 = vmatprep.subr.bf16.mxu1 %v19869_v33  ;;  %v6371_v8 = vrot.slane %v23206_v14, %v29287_v6  ;;  %v24984_v22 = vpop.f32.mrb[36].mxu1 }
 0x4f8   :  { %v19935_v31 = vpack.c.bf16 %v9553_v34, %v9553_v34  ;;  %v24975_v24 = vpop.permute.xlu0 %7194  ;;  %29288 = vst [vmem:[#allocation19_spill] sm:$0xff] %v24984_v22  ;;  %v29289_v34 = vld [vmem:[#allocation53_spill] sm:$0xff] }
 0x4f9   :  { %29285 = vst [vmem:[#allocation34_spill] sm:$0xff] %v24975_v24  ;;  %v19934_v20 = vpack.c.bf16 %v9552_v41, %v9552_v41  ;;  %v7201_v36 = vsel %vm1575_vm3, %v24975_v24, %v7197_v27  ;;  %v24980_v47 = vpop.permute.xlu1 %6746  ;;  %v6375_v27 = vrot.slane %v23206_v14, %v29289_v34  ;;  %v24994_v41 = vpop.f32.mrb[37].mxu1  ;;  %v7723_v14 = vrot.slane %v24677_v63, %v20774_v43 }
 0x4fa   :  { %29286 = vst [vmem:[#allocation17_spill] sm:$0xff] %v24980_v47  ;;  %v7438_v61 = vmul.f32 %v7371_v0, %v7201_v36  ;;  %v6753_v33 = vsel %vm1122_vm2, %v24980_v47, %v6749_v53  ;;  %6296 = vrot.lane.b32.xlu0 %v24161_v45, %s20183_s30  ;;  %18773 = vmatprep.subr.msk.bf16.mxu0 %vm5007_vm8, %v19935_v31  ;;  %29290 = vst [vmem:[#allocation52_spill] sm:$0xff] %v24994_v41  ;;  %v10859_v22 = vpop.f32.mrb[38].mxu1  ;;  %v29292_v47 = vld [vmem:[#allocation61_spill] sm:$0xff] }
 0x4fb   :  { %v6990_v2 = vmul.f32 %v6923_v18, %v6753_v33  ;;  %5848 = vrot.lane.b32.xlu1 %v24161_v45, %s20182_s13  ;;  %v10603_v0 = vsel %vm5007_vm8, %v19934_v20, 0  ;;  %v5923_v36 = vrot.slane %v23204_v38, %v29287_v6  ;;  %v5927_v53 = vrot.slane %v23204_v38, %v29289_v34  ;;  %v10860_v33 = vpop.f32.mrb[39].mxu1 }
 0x4fc   :  { %10707 = vmatpush1.bf16.msra.mxu0 %v10603_v0  ;;  %v6249_v31 = vpop.permute.xlu0 %6248  ;;  %v7727_v18 = vrot.slane %v24677_v63, %v20819_v16  ;;  %v8171_v22 = vrot.slane %v24672_v15, %v20774_v43  ;;  %v29294_v33 = vld [vmem:[#allocation13_spill] sm:$0xff] }
 0x4fd   :  { %v19868_v41 = vpack.c.bf16 %v7438_v61, %v6990_v2  ;;  %v6330_v20 = vsel %vm669_vm1, %v6249_v31, %v29291_v30  ;;  %v6331_v24 = vsel %vm669_vm1, %v29292_v47, %v6249_v31  ;;  %v5801_v38 = vpop.permute.xlu1 %5800  ;;  %v7790_v47 = vmul.f32 %v7723_v14, %v24357_v44 }
 0x4fe   :  { %v6516_v0 = vmul.f32 %v6371_v8, %v6331_v24  ;;  %v6517_v17 = vmul.f32 %v6375_v27, %v6330_v20  ;;  %v5882_v51 = vsel %vm217_vm0, %v5801_v38, %v29293_v39  ;;  %v5883_v2 = vsel %vm217_vm0, %v29294_v33, %v5801_v38  ;;  %7192 = vrot.lane.b32.xlu0 %v24161_v45, %s20185_s14  ;;  %v29296_v33 = vld [vmem:[#allocation43_spill] sm:$0xff] }
 0x4ff   :  { %v6068_v30 = vmul.f32 %v5923_v36, %v5883_v2  ;;  %v6069_v61 = vmul.f32 %v5927_v53, %v5882_v51  ;;  %6744 = vrot.lane.b32.xlu1 %v24161_v45, %s20184_s0  ;;  %18774 = vmatmul.mubr.msk.bf16.vlgmr.msra.gmra.mrb[32].mxu0 %vm5003_vm9, %v24392_v7  ;;  %v8175_v24 = vrot.slane %v24672_v15, %v20819_v16  ;;  %v29297_v2 = vld [vmem:[#allocation28_spill] sm:$0xff] }
 0x500   :  { %11316 = vmatpush1.bf16.msra.mxu1 %v19868_v41  ;;  %v25029_v39 = vpop.permute.xlu0 %7996  ;;  %10812 = vmatprep.mubr.bf16.mxu0 %v29025_v46  ;;  %v7267_v51 = vrot.slane %v23264_v58, %v29287_v6  ;;  %v7791_v53 = vmul.f32 %v7727_v18, %v24187_v11  ;;  %v7271_v31 = vrot.slane %v23264_v58, %v29289_v34  ;;  %v29340_v45 = vld [vmem:[#allocation44_spill] sm:$0xff] }
 0x501   :  { %29295 = vst [vmem:[#allocation53_spill] sm:$0xff] %v25029_v39  ;;  %v19810_v8 = vpack.c.bf16 %v6516_v0, %v6068_v30  ;;  %v7999_v27 = vpop.permute.xlu1 %7998  ;;  %v19811_v36 = vpack.c.bf16 %v6517_v17, %v6069_v61  ;;  %v6819_v17 = vrot.slane %v23260_v59, %v29287_v6  ;;  %v6823_v18 = vrot.slane %v23260_v59, %v29289_v34 }
 0x502   :  { %v8000_v7 = vsel %vm2384_vm4, %v25029_v39, %v7999_v27  ;;  %v8031_v41 = vsel %vm2384_vm4, %v7999_v27, %v24853_v23  ;;  %8442 = vrot.lane.b32.xlu0 %v24396_v49, %s20187_s16  ;;  %v9071_v38 = vrot.slane %v24760_v50, %v20819_v16 }
 0x503   :  { %v8238_v14 = vmul.f32 %v8171_v22, %v8000_v7  ;;  %v8239_v20 = vmul.f32 %v8175_v24, %v8031_v41  ;;  %7994 = vrot.lane.b32.xlu1 %v24396_v49, %s20186_s15  ;;  %10780 = vmatprep.subr.bf16.mxu0 %v19811_v36  ;;  %v29298_v36 = vld [vmem:[#allocation24_spill] sm:$0xff] }
 0x504   :  { %10781 = vmatpush1.bf16.msra.mxu0 %v19810_v8  ;;  %v7145_v23 = vpop.permute.xlu0 %7144  ;;  %v29299_v8 = vld [vmem:[#allocation33_spill] sm:$0xff] }
 0x505   :  { %v19900_v0 = vpack.c.bf16 %v8238_v14, %v7790_v47  ;;  %v7226_v58 = vsel %vm1575_vm3, %v7145_v23, %v29296_v33  ;;  %v7227_v22 = vsel %vm1575_vm3, %v29297_v2, %v7145_v23  ;;  %v6697_v30 = vpop.permute.xlu1 %6696  ;;  %v19901_v61 = vpack.c.bf16 %v8239_v20, %v7791_v53 }
 0x506   :  { %v7412_v24 = vmul.f32 %v7267_v51, %v7227_v22  ;;  %v7413_v27 = vmul.f32 %v7271_v31, %v7226_v58  ;;  %v6778_v59 = vsel %vm1122_vm2, %v6697_v30, %v29298_v36  ;;  %v6779_v47 = vsel %vm1122_vm2, %v29299_v8, %v6697_v30  ;;  %9338 = vrot.lane.b32.xlu0 %v24396_v49, %s20189_s18  ;;  %v9873_v31 = vld [vmem:[%s28631_s7] sm:$0xff]  ;;  %v25085_v22 = vpop.f32.mrb[40].mxu1 }
 0x507   :  { %v6964_v7 = vmul.f32 %v6819_v17, %v6779_v47  ;;  %v6965_v41 = vmul.f32 %v6823_v18, %v6778_v59  ;;  %8890 = vrot.lane.b32.xlu1 %v24396_v49, %s20188_s17  ;;  %11317 = vmatprep.subr.bf16.mxu1 %v19901_v61  ;;  %v8623_v51 = vrot.slane %v24756_v25, %v20819_v16  ;;  %v25094_v61 = vpop.f32.mrb[41].mxu1 }
 0x508   :  { %11318 = vmatpush1.bf16.msra.mxu1 %v19900_v0  ;;  %v8895_v53 = vpop.permute.xlu0 %8894  ;;  %v9067_v0 = vrot.slane %v24760_v50, %v20774_v43  ;;  %v8619_v2 = vrot.slane %v24756_v25, %v20774_v43  ;;  %29300 = vst [vmem:[#allocation36_spill] sm:$0xff] %v25085_v22  ;;  %29303 = vst [vmem:[#allocation13_spill] sm:$0xff] %v25094_v61  ;;  %v7619_v36 = vrot.slane %v29269_v4, %v29287_v6  ;;  %v10941_v8 = vpop.f32.mrb[42].mxu1 }
 0x509   :  { %v19842_v14 = vpack.c.bf16 %v7412_v24, %v6964_v7  ;;  %v8927_v20 = vsel %vm3290_vm6, %v8895_v53, %v24927_v32  ;;  %v8447_v17 = vpop.permute.xlu1 %8446  ;;  %v19843_v18 = vpack.c.bf16 %v7413_v27, %v6965_v41  ;;  %v7623_v59 = vrot.slane %v29269_v4, %v29289_v34 }
 0x50a   :  { %v9135_v23 = vmul.f32 %v9071_v38, %v8927_v20  ;;  %v8479_v33 = vsel %vm2837_vm5, %v8447_v17, %v24932_v57  ;;  %v8067_v7 = vrot.slane %v29271_v9, %v29287_v6  ;;  %v8071_v41 = vrot.slane %v29271_v9, %v29289_v34 }
 0x50b   :  { %v8687_v58 = vmul.f32 %v8623_v51, %v8479_v33  ;;  %9876 = vperm.xlu1 %20150, %v9873_v31   ;;  %10782 = vmatprep.subr.bf16.mxu0 %v19843_v18  ;;  %v10942_v51 = vpop.f32.mrb[43].mxu1  ;;  %v7764_v20 = vmul.f32 %v7619_v36, %v23054_v21  ;;  %v29306_v18 = vld [vmem:[#allocation15_spill] sm:$0xff]  ;;  %v7765_v33 = vmul.f32 %v7623_v59, %v23106_v54  ;;  %v29307_v36 = vld [vmem:[#allocation65_spill] sm:$0xff] }
 0x50c   :  { %10783 = vmatpush1.bf16.msra.mxu0 %v19842_v14  ;;  %v25087_v32 = vpop.permute.xlu0 %8892  ;;  %v9515_v9 = vrot.slane %v24818_v19, %v20774_v43  ;;  %v9411_v51 = vrot.slane %v29283_v29, %v29287_v6 }
 0x50d   :  { %29301 = vst [vmem:[#allocation61_spill] sm:$0xff] %v25087_v32  ;;  %v8896_v38 = vsel %vm3290_vm6, %v25087_v32, %v8895_v53  ;;  %v25092_v30 = vpop.permute.xlu1 %8444  ;;  %v19933_v57 = vpack.c.bf16 %v9135_v23, %v8687_v58 }
 0x50e   :  { %29302 = vst [vmem:[#allocation41_spill] sm:$0xff] %v25092_v30  ;;  %v9134_v24 = vmul.f32 %v9067_v0, %v8896_v38  ;;  %v8448_v27 = vsel %vm2837_vm5, %v25092_v30, %v8447_v17  ;;  %v29305_v17 = vld [vmem:[#allocation42_spill] sm:$0xff]  ;;  %v8515_v38 = vrot.slane %v29276_v62, %v29287_v6 }
 0x50f   :  { %v8686_v47 = vmul.f32 %v8619_v2, %v8448_v27  ;;  %11319 = vmatprep.subr.bf16.mxu1 %v19933_v57  ;;  %v9519_v2 = vrot.slane %v24818_v19, %v20819_v16  ;;  %v8519_v27 = vrot.slane %v29276_v62, %v29289_v34  ;;  %v9415_v62 = vrot.slane %v29283_v29, %v29289_v34  ;;  %v29309_v29 = vld [vmem:[#allocation70_spill] sm:$0xff] }
 0x510   :  { %v25107_v53 = vpop.permute.xlu0 %9340 }
 0x511   :  { %29304 = vst [vmem:[#allocation43_spill] sm:$0xff] %v25107_v53  ;;  %v19932_v31 = vpack.c.bf16 %v9134_v24, %v8686_v47  ;;  %v7947_v14 = vpop.permute.xlu1 %7946 }
 0x512   :  { %v8025_v4 = vsel %vm2384_vm4, %v7947_v14, %v29305_v17  ;;  %v8026_v23 = vsel %vm2384_vm4, %v29306_v18, %v7947_v14  ;;  %v8967_v17 = vrot.slane %v29275_v52, %v29289_v34 }
 0x513   :  { %v8212_v0 = vmul.f32 %v8067_v7, %v8026_v23  ;;  %v8213_v58 = vmul.f32 %v8071_v41, %v8025_v4  ;;  %11320 = vmatpush1.bf16.msra.mxu1 %v19932_v31  ;;  %v29308_v4 = vld [vmem:[#allocation46_spill] sm:$0xff] }
 0x514   :  { %v8395_v57 = vpop.permute.xlu0 %8394 }
 0x515   :  { %v19874_v24 = vpack.c.bf16 %v8212_v0, %v7764_v20  ;;  %v8474_v59 = vsel %vm2837_vm5, %v29307_v36, %v8395_v57  ;;  %v9343_v8 = vpop.permute.xlu1 %9342  ;;  %v19875_v47 = vpack.c.bf16 %v8213_v58, %v7765_v33  ;;  %v8963_v20 = vrot.slane %v29275_v52, %v29287_v6  ;;  %v29311_v52 = vld [vmem:[#allocation12_spill] sm:$0xff] }
 0x516   :  { %v9344_v7 = vsel %vm3743_vm7, %v25107_v53, %v9343_v8  ;;  %v9375_v41 = vsel %vm3743_vm7, %v9343_v8, %v24962_v56  ;;  %v8473_v18 = vsel %vm2837_vm5, %v8395_v57, %v29308_v4  ;;  %v8660_v56 = vmul.f32 %v8515_v38, %v8474_v59  ;;  %v29312_v59 = vld [vmem:[#allocation71_spill] sm:$0xff] }
 0x517   :  { %v9582_v31 = vmul.f32 %v9515_v9, %v9344_v7  ;;  %v9583_v14 = vmul.f32 %v9519_v2, %v9375_v41  ;;  %10784 = vmatprep.subr.bf16.mxu0 %v19875_v47  ;;  %v6391_v33 = vrot.slane %v23666_v55, %v29058_v28  ;;  %v5943_v0 = vrot.slane %v29309_v29, %v29058_v28  ;;  %v29310_v2 = vld [vmem:[#allocation67_spill] sm:$0xff] }
 0x518   :  { %10785 = vmatpush1.bf16.msra.mxu0 %v19874_v24  ;;  %v9291_v23 = vpop.permute.xlu0 %9290  ;;  %v29313_v7 = vld [vmem:[#allocation39_spill] sm:$0xff] }
 0x519   :  { %v19964_v58 = vpack.c.bf16 %v9582_v31, %v9582_v31  ;;  %v19965_v9 = vpack.c.bf16 %v9583_v14, %v9583_v14  ;;  %v9369_v36 = vsel %vm3743_vm7, %v9291_v23, %v29310_v2  ;;  %v9370_v8 = vsel %vm3743_vm7, %v29311_v52, %v9291_v23  ;;  %v8843_v57 = vpop.permute.xlu1 %8842 }
 0x51a   :  { %v9556_v38 = vmul.f32 %v9411_v51, %v9370_v8  ;;  %v9557_v24 = vmul.f32 %v9415_v62, %v9369_v36  ;;  %v8921_v47 = vsel %vm3290_vm6, %v8843_v57, %v29312_v59  ;;  %v8922_v41 = vsel %vm3290_vm6, %v29313_v7, %v8843_v57  ;;  %v29314_v36 = vld [vmem:[#allocation25_spill] sm:$0xff] }
 0x51b   :  { %v8661_v31 = vmul.f32 %v8519_v27, %v8473_v18  ;;  %v9108_v14 = vmul.f32 %v8963_v20, %v8922_v41  ;;  %v9109_v4 = vmul.f32 %v8967_v17, %v8921_v47  ;;  %18803 = vmatprep.subr.msk.bf16.mxu1 %vm5007_vm8, %v19965_v9  ;;  %v10693_v2 = vsel %vm5007_vm8, %v19964_v58, 0  ;;  %v29315_v57 = vld [vmem:[#allocation29_spill] sm:$0xff]  ;;  %v29316_v18 = vld [vmem:[#allocation62_spill] sm:$0xff]  ;;  %v29317_v47 = vld [vmem:[#allocation23_spill] sm:$0xff] }
 0x51c   :  { %11322 = vmatpush1.bf16.msra.mxu1 %v10693_v2  ;;  %v6387_v51 = vrot.slane %v23666_v55, %v20925_v10  ;;  %v6257_v62 = vpop.permute.xlu0 %6256  ;;  %v5939_v23 = vrot.slane %v29309_v29, %v20925_v10  ;;  %v7287_v52 = vrot.slane %v29314_v36, %v29058_v28  ;;  %v6839_v58 = vrot.slane %v29316_v18, %v29058_v28  ;;  %v29318_v41 = vld [vmem:[#allocation58_spill] sm:$0xff] }
 0x51d   :  { %v19906_v8 = vpack.c.bf16 %v9108_v14, %v8660_v56  ;;  %v6326_v27 = vsel %vm669_vm1, %v6257_v62, %v29315_v57  ;;  %v5809_v20 = vpop.permute.xlu1 %5808  ;;  %v19907_v17 = vpack.c.bf16 %v9109_v4, %v8661_v31  ;;  %v19938_v9 = vpack.c.bf16 %v9556_v38, %v9556_v38  ;;  %v29319_v14 = vld [vmem:[#allocation10_spill] sm:$0xff] }
 0x51e   :  { %v19939_v59 = vpack.c.bf16 %v9557_v24, %v9557_v24  ;;  %v6327_v7 = vsel %vm669_vm1, %v29317_v47, %v6257_v62  ;;  %v5878_v2 = vsel %vm217_vm0, %v5809_v20, %v29318_v41  ;;  %v6521_v56 = vmul.f32 %v6391_v33, %v6326_v27  ;;  %v25186_v38 = vld [vmem:[%s28630_s6] sm:$0xf]  ;;  %v25190_v24 = vpop.f32.mrb[44].mxu1  ;;  %v29322_v62 = vld [vmem:[#allocation80_spill] sm:$0xff] }
 0x51f   :  { %v5879_v57 = vsel %vm217_vm0, %v29319_v14, %v5809_v20  ;;  %v6073_v11 = vmul.f32 %v5943_v0, %v5878_v2  ;;  %10786 = vmatprep.subr.bf16.mxu0 %v19907_v17  ;;  %18804 = vmatmul.mubr.msk.bf16.vlgmr.msra.gmra.mrb[60].mxu1 %vm5003_vm9, %v25186_v38  ;;  %29320 = vst [vmem:[#allocation28_spill] sm:$0xff] %v25190_v24  ;;  %v25194_v4 = vpop.f32.mrb[45].mxu1  ;;  %v29324_v14 = vld [vmem:[#allocation21_spill] sm:$0xff]  ;;  %v10615_v16 = vsel %vm5007_vm8, %v19938_v9, 0 }
 0x520   :  { %10787 = vmatpush1.bf16.msra.mxu0 %v19906_v8  ;;  %v7283_v33 = vrot.slane %v29314_v36, %v20925_v10  ;;  %v7153_v31 = vpop.permute.xlu0 %7152  ;;  %29321 = vst [vmem:[#allocation24_spill] sm:$0xff] %v25194_v4  ;;  %16365 = vmatprep.mubr.bf16.mxu1 %v29025_v46  ;;  %v6520_v0 = vmul.f32 %v6387_v51, %v6327_v7  ;;  %v29323_v8 = vld [vmem:[#allocation79_spill] sm:$0xff]  ;;  %v11023_v41 = vpop.f32.mrb[46].mxu1  ;;  %v29325_v51 = vld [vmem:[#allocation81_spill] sm:$0xff] }
 0x521   :  { %v7222_v27 = vsel %vm1575_vm3, %v7153_v31, %v29322_v62  ;;  %v6835_v20 = vrot.slane %v29316_v18, %v20925_v10  ;;  %v6705_v17 = vpop.permute.xlu1 %6704  ;;  %18777 = vmatprep.subr.msk.bf16.mxu0 %vm5007_vm8, %v19939_v59  ;;  %v8087_v47 = vrot.slane %v29323_v8, %v29058_v28  ;;  %v6072_v2 = vmul.f32 %v5939_v23, %v5879_v57  ;;  %v29326_v62 = vld [vmem:[#allocation38_spill] sm:$0xff]  ;;  %v11024_v21 = vpop.f32.mrb[47].mxu1 }
 0x522   :  { %v7223_v44 = vsel %vm1575_vm3, %v29324_v14, %v7153_v31  ;;  %v6774_v7 = vsel %vm1122_vm2, %v6705_v17, %v29325_v51  ;;  %v6775_v54 = vsel %vm1122_vm2, %v29326_v62, %v6705_v17  ;;  %v7417_v4 = vmul.f32 %v7287_v52, %v7222_v27  ;;  %v29327_v57 = vld [vmem:[#allocation78_spill] sm:$0xff]  ;;  %v29328_v17 = vld [vmem:[#allocation85_spill] sm:$0xff]  ;;  %v29329_v52 = vld [vmem:[#allocation40_spill] sm:$0xff] }
 0x523   :  { %v6969_v59 = vmul.f32 %v6839_v58, %v6774_v7  ;;  %v19815_v43 = vpack.c.bf16 %v6521_v56, %v6073_v11  ;;  %v7639_v41 = vrot.slane %v29327_v57, %v29058_v28  ;;  %v7416_v31 = vmul.f32 %v7283_v33, %v7223_v44  ;;  %v29331_v58 = vld [vmem:[#allocation86_spill] sm:$0xff] }
 0x524   :  { %10789 = vmatpush1.bf16.msra.mxu0 %v10615_v16  ;;  %v8403_v23 = vpop.permute.xlu0 %8402  ;;  %v6968_v14 = vmul.f32 %v6835_v20, %v6775_v54  ;;  %v19814_v51 = vpack.c.bf16 %v6520_v0, %v6072_v2  ;;  %v8083_v61 = vrot.slane %v29323_v8, %v20925_v10  ;;  %v29330_v54 = vld [vmem:[#allocation87_spill] sm:$0xff]  ;;  %v8535_v9 = vrot.slane %v29331_v58, %v29058_v28  ;;  %v29332_v0 = vld [vmem:[#allocation18_spill] sm:$0xff]  ;;  %v29333_v20 = vld [vmem:[#allocation92_spill] sm:$0xff] }
 0x525   :  { %v7955_v24 = vpop.permute.xlu1 %7954  ;;  %10862 = vmatprep.subr.bf16.mxu0 %v19815_v43  ;;  %v8983_v44 = vrot.slane %v29330_v54, %v29058_v28  ;;  %v19847_v43 = vpack.c.bf16 %v7417_v4, %v6969_v59  ;;  %v7635_v56 = vrot.slane %v29327_v57, %v20925_v10  ;;  %v7769_v27 = vmul.f32 %v7639_v41, %v29332_v0  ;;  %v29334_v62 = vld [vmem:[#allocation90_spill] sm:$0xff]  ;;  %v29335_v41 = vld [vmem:[#allocation93_spill] sm:$0xff]  ;;  %v29338_v0 = vld [vmem:[#allocation51_spill] sm:$0xff] }
 0x526   :  { %v8021_v21 = vsel %vm2384_vm4, %v7955_v24, %v29328_v17  ;;  %v8022_v16 = vsel %vm2384_vm4, %v29329_v52, %v7955_v24  ;;  %v19846_v24 = vpack.c.bf16 %v7416_v31, %v6968_v14  ;;  %v9431_v2 = vrot.slane %v29333_v20, %v29058_v28  ;;  %v29336_v14 = vld [vmem:[#allocation94_spill] sm:$0xff] }
 0x527   :  { %v8217_v11 = vmul.f32 %v8087_v47, %v8021_v21  ;;  %18778 = vmatmul.mubr.msk.bf16.vlgmr.msra.gmra.mrb[36].mxu0 %vm5003_vm9, %v25186_v38  ;;  %v9427_v47 = vrot.slane %v29333_v20, %v20925_v10  ;;  %v8979_v4 = vrot.slane %v29330_v54, %v20925_v10  ;;  %v8469_v59 = vsel %vm2837_vm5, %v8403_v23, %v29334_v62  ;;  %v29337_v21 = vld [vmem:[#allocation72_spill] sm:$0xff] }
 0x528   :  { %10863 = vmatpush1.bf16.msra.mxu0 %v19814_v51  ;;  %v9299_v33 = vpop.permute.xlu0 %9298  ;;  %10894 = vmatprep.mubr.bf16.mxu0 %v29025_v46  ;;  %v8216_v51 = vmul.f32 %v8083_v61, %v8022_v16  ;;  %v8531_v61 = vrot.slane %v29331_v58, %v20925_v10  ;;  %v29339_v16 = vld [vmem:[#allocation6_spill] sm:$0xff]  ;;  %v8665_v30 = vmul.f32 %v8535_v9, %v8469_v59 }
 0x529   :  { %v8851_v7 = vpop.permute.xlu1 %8850  ;;  %10864 = vmatprep.subr.bf16.mxu0 %v19847_v43  ;;  %v9365_v31 = vsel %vm3743_vm7, %v9299_v33, %v29335_v41  ;;  %v9366_v52 = vsel %vm3743_vm7, %v29337_v21, %v9299_v33  ;;  %v19879_v53 = vpack.c.bf16 %v8217_v11, %v7769_v27  ;;  %v7768_v62 = vmul.f32 %v7635_v56, %v29339_v16 }
 0x52a   :  { %v8917_v17 = vsel %vm3290_vm6, %v8851_v7, %v29336_v14  ;;  %v8918_v43 = vsel %vm3290_vm6, %v29338_v0, %v8851_v7  ;;  %v8470_v14 = vsel %vm2837_vm5, %v29340_v45, %v8403_v23  ;;  %v9560_v21 = vmul.f32 %v9427_v47, %v9366_v52  ;;  %v29342_v45 = vld [vmem:[#allocation100_spill] sm:$0xff] }
 0x52b   :  { %v9113_v22 = vmul.f32 %v8983_v44, %v8917_v17  ;;  %v19878_v33 = vpack.c.bf16 %v8216_v51, %v7768_v62  ;;  %v9561_v32 = vmul.f32 %v9431_v2, %v9365_v31  ;;  %v9112_v0 = vmul.f32 %v8979_v4, %v8918_v43  ;;  %v29343_v31 = vld [vmem:[#allocation74_spill] sm:$0xff] }
 0x52c   :  { %10865 = vmatpush1.bf16.msra.mxu0 %v19846_v24  ;;  %v6265_v41 = vpop.permute.xlu0 %6264  ;;  %v6407_v11 = vrot.slane %v23666_v55, %v29289_v34  ;;  %v5959_v44 = vrot.slane %v29309_v29, %v29289_v34  ;;  %v8664_v27 = vmul.f32 %v8531_v61, %v8470_v14  ;;  %v29341_v24 = vld [vmem:[#allocation99_spill] sm:$0xff]  ;;  %v6403_v9 = vrot.slane %v23666_v55, %v29287_v6  ;;  %v29346_v14 = vld [vmem:[#allocation104_spill] sm:$0xff] }
 0x52d   :  { %v5817_v49 = vpop.permute.xlu1 %5816  ;;  %10866 = vmatprep.subr.bf16.mxu0 %v19879_v53  ;;  %v19911_v56 = vpack.c.bf16 %v9113_v22, %v8665_v30  ;;  %v6322_v7 = vsel %vm669_vm1, %v6265_v41, %v29341_v24  ;;  %v5955_v47 = vrot.slane %v29309_v29, %v29287_v6  ;;  %v7303_v22 = vrot.slane %v29314_v36, %v29289_v34  ;;  %v29344_v55 = vld [vmem:[#allocation75_spill] sm:$0xff] }
 0x52e   :  { %v5874_v53 = vsel %vm217_vm0, %v5817_v49, %v29342_v45  ;;  %v19942_v2 = vpack.c.bf16 %v9560_v21, %v9560_v21  ;;  %v19943_v4 = vpack.c.bf16 %v9561_v32, %v9561_v32  ;;  %v19910_v59 = vpack.c.bf16 %v9112_v0, %v8664_v27  ;;  %v29345_v61 = vld [vmem:[#allocation103_spill] sm:$0xff]  ;;  %v29348_v45 = vld [vmem:[#allocation76_spill] sm:$0xff] }
 0x52f   :  { %v6855_v51 = vrot.slane %v29316_v18, %v29289_v34  ;;  %v6323_v17 = vsel %vm669_vm1, %v29343_v31, %v6265_v41  ;;  %v6525_v52 = vmul.f32 %v6407_v11, %v6322_v7  ;;  %v5875_v29 = vsel %vm217_vm0, %v29344_v55, %v5817_v49 }
 0x530   :  { %10867 = vmatpush1.bf16.msra.mxu0 %v19878_v33  ;;  %v7161_v23 = vpop.permute.xlu0 %7160  ;;  %v6077_v43 = vmul.f32 %v5959_v44, %v5874_v53  ;;  %v7299_v21 = vrot.slane %v29314_v36, %v29287_v6  ;;  %v6851_v41 = vrot.slane %v29316_v18, %v29287_v6  ;;  %v8103_v49 = vrot.slane %v29323_v8, %v29289_v34 }
 0x531   :  { %v6713_v30 = vpop.permute.xlu1 %6712  ;;  %10868 = vmatprep.subr.bf16.mxu0 %v19911_v56  ;;  %v7218_v62 = vsel %vm1575_vm3, %v7161_v23, %v29345_v61  ;;  %v6524_v11 = vmul.f32 %v6403_v9, %v6323_v17  ;;  %v6076_v44 = vmul.f32 %v5955_v47, %v5875_v29  ;;  %v29347_v56 = vld [vmem:[#allocation77_spill] sm:$0xff]  ;;  %v10627_v24 = vsel %vm5007_vm8, %v19942_v2, 0  ;;  %v29351_v61 = vld [vmem:[#allocation114_spill] sm:$0xff] }
 0x532   :  { %v6770_v32 = vsel %vm1122_vm2, %v6713_v30, %v29346_v14  ;;  %v7219_v27 = vsel %vm1575_vm3, %v29347_v56, %v7161_v23  ;;  %v7421_v7 = vmul.f32 %v7303_v22, %v7218_v62  ;;  %v6771_v36 = vsel %vm1122_vm2, %v29348_v45, %v6713_v30  ;;  %v29350_v30 = vld [vmem:[#allocation82_spill] sm:$0xff]  ;;  %v29355_v45 = vld [vmem:[#allocation95_spill] sm:$0xff] }
 0x533   :  { %v6973_v18 = vmul.f32 %v6855_v51, %v6770_v32  ;;  %v19819_v53 = vpack.c.bf16 %v6525_v52, %v6077_v43  ;;  %v7655_v47 = vrot.slane %v29327_v57, %v29289_v34  ;;  %v19818_v23 = vpack.c.bf16 %v6524_v11, %v6076_v44  ;;  %v29352_v14 = vld [vmem:[#allocation22_spill] sm:$0xff]  ;;  %v29353_v44 = vld [vmem:[#allocation111_spill] sm:$0xff] }
 0x534   :  { %10869 = vmatpush1.bf16.msra.mxu0 %v19910_v59  ;;  %v8411_v33 = vpop.permute.xlu0 %8410  ;;  %v29349_v59 = vld [vmem:[#allocation108_spill] sm:$0xff]  ;;  %v7420_v2 = vmul.f32 %v7299_v21, %v7219_v27  ;;  %v6972_v22 = vmul.f32 %v6851_v41, %v6771_v36  ;;  %v8099_v17 = vrot.slane %v29323_v8, %v29287_v6  ;;  %v8999_v55 = vrot.slane %v29330_v54, %v29289_v34 }
 0x535   :  { %v7963_v0 = vpop.permute.xlu1 %7962  ;;  %18781 = vmatprep.subr.msk.bf16.mxu0 %vm5007_vm8, %v19943_v4  ;;  %v19851_v29 = vpack.c.bf16 %v7421_v7, %v6973_v18  ;;  %v7651_v43 = vrot.slane %v29327_v57, %v29287_v6  ;;  %v7773_v32 = vmul.f32 %v7655_v47, %v29352_v14  ;;  %v8551_v21 = vrot.slane %v29331_v58, %v29289_v34  ;;  %v29374_v14 = vld [vmem:[#allocation133_spill] sm:$0xff] }
 0x536   :  { %v8017_v31 = vsel %vm2384_vm4, %v7963_v0, %v29349_v59  ;;  %v8018_v51 = vsel %vm2384_vm4, %v29350_v30, %v7963_v0  ;;  %v9443_v41 = vrot.slane %v29333_v20, %v29287_v6  ;;  %v8995_v57 = vrot.slane %v29330_v54, %v29287_v6 }
 0x537   :  { %v8221_v52 = vmul.f32 %v8103_v49, %v8017_v31  ;;  %v9447_v49 = vrot.slane %v29333_v20, %v29289_v34  ;;  %v19850_v11 = vpack.c.bf16 %v7420_v2, %v6972_v22  ;;  %v8465_v56 = vsel %vm2837_vm5, %v8411_v33, %v29353_v44  ;;  %v29356_v20 = vld [vmem:[#allocation91_spill] sm:$0xff]  ;;  %v29357_v31 = vld [vmem:[#allocation66_spill] sm:$0xff]  ;;  %v29358_v2 = vld [vmem:[#allocation88_spill] sm:$0xff] }
 0x538   :  { %10871 = vmatpush1.bf16.msra.mxu0 %v10627_v24  ;;  %v9307_v9 = vpop.permute.xlu0 %9306  ;;  %v8220_v27 = vmul.f32 %v8099_v17, %v8018_v51  ;;  %v29354_v24 = vld [vmem:[#allocation113_spill] sm:$0xff]  ;;  %v8547_v59 = vrot.slane %v29331_v58, %v29287_v6  ;;  %v7772_v47 = vmul.f32 %v7651_v43, %v29357_v31  ;;  %v8466_v22 = vsel %vm2837_vm5, %v29358_v2, %v8411_v33  ;;  %v29360_v58 = vld [vmem:[#allocation116_spill] sm:$0xff]  ;;  %v29362_v33 = vld [vmem:[#allocation122_spill] sm:$0xff] }
 0x539   :  { %v8859_v4 = vpop.permute.xlu1 %8858  ;;  %10944 = vmatprep.subr.bf16.mxu0 %v19819_v53  ;;  %v9361_v7 = vsel %vm3743_vm7, %v9307_v9, %v29354_v24  ;;  %v9362_v36 = vsel %vm3743_vm7, %v29355_v45, %v9307_v9  ;;  %v19883_v53 = vpack.c.bf16 %v8221_v52, %v7773_v32  ;;  %v8669_v17 = vmul.f32 %v8551_v21, %v8465_v56  ;;  %v29359_v52 = vld [vmem:[#allocation117_spill] sm:$0xff]  ;;  %v29363_v44 = vld [vmem:[#allocation124_spill] sm:$0xff] }
 0x53a   :  { %v8913_v62 = vsel %vm3290_vm6, %v8859_v4, %v29351_v61  ;;  %v8914_v54 = vsel %vm3290_vm6, %v29356_v20, %v8859_v4  ;;  %v19882_v9 = vpack.c.bf16 %v8220_v27, %v7772_v47  ;;  %v9564_v51 = vmul.f32 %v9443_v41, %v9362_v36  ;;  %v29361_v32 = vld [vmem:[#allocation121_spill] sm:$0xff]  ;;  %v29364_v36 = vld [vmem:[#allocation123_spill] sm:$0xff]  ;;  %v29367_v47 = vld [vmem:[#allocation96_spill] sm:$0xff] }
 0x53b   :  { %18782 = vmatmul.mubr.msk.bf16.vlgmr.msra.gmra.mrb[40].mxu0 %vm5003_vm9, %v25186_v38  ;;  %v9117_v18 = vmul.f32 %v8999_v55, %v8913_v62  ;;  %v9116_v4 = vmul.f32 %v8995_v57, %v8914_v54  ;;  %v6423_v55 = vrot.slane %v29359_v52, %v29058_v28  ;;  %v5975_v61 = vrot.slane %v29360_v58, %v29058_v28 }
 0x53c   :  { %10945 = vmatpush1.bf16.msra.mxu0 %v19818_v23  ;;  %v6273_v8 = vpop.permute.xlu0 %6272  ;;  %10976 = vmatprep.mubr.bf16.mxu0 %v29025_v46  ;;  %v8668_v62 = vmul.f32 %v8547_v59, %v8466_v22  ;;  %v5971_v57 = vrot.slane %v29360_v58, %v20925_v10  ;;  %v7319_v56 = vrot.slane %v29363_v44, %v29058_v28 }
 0x53d   :  { %v5825_v0 = vpop.permute.xlu1 %5824  ;;  %10946 = vmatprep.subr.bf16.mxu0 %v19851_v29  ;;  %v9565_v29 = vmul.f32 %v9447_v49, %v9361_v7  ;;  %v19915_v43 = vpack.c.bf16 %v9117_v18, %v8669_v17  ;;  %v6419_v49 = vrot.slane %v29359_v52, %v20925_v10  ;;  %v19946_v24 = vpack.c.bf16 %v9564_v51, %v9564_v51  ;;  %v29366_v18 = vld [vmem:[#allocation98_spill] sm:$0xff] }
 0x53e   :  { %v5870_v21 = vsel %vm217_vm0, %v5825_v0, %v29362_v33  ;;  %v19914_v45 = vpack.c.bf16 %v9116_v4, %v8668_v62  ;;  %v6871_v20 = vrot.slane %v29364_v36, %v29058_v28  ;;  %v5871_v2 = vsel %vm217_vm0, %v29367_v47, %v5825_v0 }
 0x53f   :  { %v19947_v7 = vpack.c.bf16 %v9565_v29, %v9565_v29  ;;  %v6081_v22 = vmul.f32 %v5975_v61, %v5870_v21  ;;  %v29370_v29 = vld [vmem:[#allocation130_spill] sm:$0xff]  ;;  %v6867_v0 = vrot.slane %v29364_v36, %v20925_v10  ;;  %v6080_v21 = vmul.f32 %v5971_v57, %v5871_v2  ;;  %v29375_v57 = vld [vmem:[#allocation131_spill] sm:$0xff] }
 0x540   :  { %10947 = vmatpush1.bf16.msra.mxu0 %v19850_v11  ;;  %v7169_v23 = vpop.permute.xlu0 %7168  ;;  %v6318_v11 = vsel %vm669_vm1, %v6273_v8, %v29361_v32  ;;  %v10639_v47 = vsel %vm5007_vm8, %v19946_v24, 0 }
 0x541   :  { %v6721_v30 = vpop.permute.xlu1 %6720  ;;  %10948 = vmatprep.subr.bf16.mxu0 %v19883_v53  ;;  %v6319_v53 = vsel %vm669_vm1, %v29366_v18, %v6273_v8  ;;  %v6529_v59 = vmul.f32 %v6423_v55, %v6318_v11  ;;  %v7315_v8 = vrot.slane %v29363_v44, %v20925_v10  ;;  %v29371_v55 = vld [vmem:[#allocation128_spill] sm:$0xff]  ;;  %v29372_v18 = vld [vmem:[#allocation102_spill] sm:$0xff] }
 0x542   :  { %v6766_v4 = vsel %vm1122_vm2, %v6721_v30, %v29370_v29  ;;  %v8119_v61 = vrot.slane %v29371_v55, %v29058_v28  ;;  %v6528_v33 = vmul.f32 %v6419_v49, %v6319_v53  ;;  %v29373_v29 = vld [vmem:[#allocation101_spill] sm:$0xff]  ;;  %v7671_v53 = vrot.slane %v29375_v57, %v29058_v28 }
 0x543   :  { %v6977_v31 = vmul.f32 %v6871_v20, %v6766_v4  ;;  %v19823_v16 = vpack.c.bf16 %v6529_v59, %v6081_v22 }
 0x544   :  { %10949 = vmatpush1.bf16.msra.mxu0 %v19882_v9  ;;  %v25363_v41 = vpop.permute.xlu0 %8418  ;;  %v29369_v9 = vld [vmem:[#allocation129_spill] sm:$0xff] }
 0x545   :  { %v7971_v27 = vpop.permute.xlu1 %7970  ;;  %10950 = vmatprep.subr.bf16.mxu0 %v19915_v43  ;;  %v7214_v51 = vsel %vm1575_vm3, %v7169_v23, %v29369_v9 }
 0x546   :  { %v25373_v54 = vpop.f32.mrb[48].mxu1  ;;  %v7425_v9 = vmul.f32 %v7319_v56, %v7214_v51  ;;  %v8115_v51 = vrot.slane %v29371_v55, %v20925_v10 }
 0x547   :  { %29365 = vst [vmem:[#allocation33_spill] sm:$0xff] %v25373_v54  ;;  %v25381_v17 = vpop.f32.mrb[49].mxu1  ;;  %v29385_v54 = vld [vmem:[#allocation14_spill] sm:$0xff] }
 0x548   :  { %29368 = vst [vmem:[#allocation42_spill] sm:$0xff] %v25381_v17  ;;  %10951 = vmatpush1.bf16.msra.mxu0 %v19914_v45  ;;  %v9315_v43 = vpop.permute.xlu0 %9314  ;;  %v11105_v62 = vpop.f32.mrb[50].mxu1  ;;  %v7215_v45 = vsel %vm1575_vm3, %v29372_v18, %v7169_v23  ;;  %v19822_v23 = vpack.c.bf16 %v6528_v33, %v6080_v21  ;;  %v19855_v4 = vpack.c.bf16 %v7425_v9, %v6977_v31  ;;  %v29380_v33 = vld [vmem:[#allocation139_spill] sm:$0xff] }
 0x549   :  { %v8867_v32 = vpop.permute.xlu1 %8866  ;;  %18785 = vmatprep.subr.msk.bf16.mxu0 %vm5007_vm8, %v19947_v7  ;;  %v11106_v11 = vpop.f32.mrb[51].mxu1  ;;  %v6767_v62 = vsel %vm1122_vm2, %v29373_v29, %v6721_v30  ;;  %v8013_v7 = vsel %vm2384_vm4, %v7971_v27, %v29374_v14  ;;  %v7424_v24 = vmul.f32 %v7315_v8, %v7215_v45  ;;  %v29376_v30 = vld [vmem:[#allocation105_spill] sm:$0xff]  ;;  %v29377_v14 = vld [vmem:[#allocation135_spill] sm:$0xff]  ;;  %v9459_v21 = vrot.slane %v29380_v33, %v20925_v10 }
 0x54a   :  { %v6976_v56 = vmul.f32 %v6867_v0, %v6767_v62  ;;  %v8014_v20 = vsel %vm2384_vm4, %v29376_v30, %v7971_v27  ;;  %v8225_v59 = vmul.f32 %v8119_v61, %v8013_v7  ;;  %v9015_v22 = vrot.slane %v29377_v14, %v29058_v28  ;;  %v29378_v8 = vld [vmem:[#allocation141_spill] sm:$0xff]  ;;  %v29379_v27 = vld [vmem:[#allocation134_spill] sm:$0xff]  ;;  %v29383_v30 = vld [vmem:[#allocation115_spill] sm:$0xff] }
 0x54b   :  { %v8909_v0 = vsel %vm3290_vm6, %v8867_v32, %v29378_v8  ;;  %v7777_v11 = vmul.f32 %v7671_v53, %v29270_v60  ;;  %v8567_v61 = vrot.slane %v29379_v27, %v29058_v28  ;;  %v9463_v31 = vrot.slane %v29380_v33, %v29058_v28  ;;  %v29381_v29 = vld [vmem:[#allocation137_spill] sm:$0xff]  ;;  %v29382_v53 = vld [vmem:[#allocation140_spill] sm:$0xff] }
 0x54c   :  { %10953 = vmatpush1.bf16.msra.mxu0 %v10639_v47  ;;  %v6281_v49 = vpop.permute.xlu0 %6280  ;;  %v9011_v18 = vrot.slane %v29377_v14, %v20925_v10  ;;  %v19854_v9 = vpack.c.bf16 %v7424_v24, %v6976_v56  ;;  %v8461_v62 = vsel %vm2837_vm5, %v25363_v41, %v29381_v29  ;;  %v8224_v7 = vmul.f32 %v8115_v51, %v8014_v20  ;;  %v29384_v60 = vld [vmem:[#allocation112_spill] sm:$0xff]  ;;  %v29386_v51 = vld [vmem:[#allocation109_spill] sm:$0xff] }
 0x54d   :  { %v5833_v2 = vpop.permute.xlu1 %5832  ;;  %11026 = vmatprep.subr.bf16.mxu0 %v19823_v16  ;;  %v7667_v16 = vrot.slane %v29375_v57, %v20925_v10  ;;  %v9358_v8 = vsel %vm3743_vm7, %v29383_v30, %v9315_v43  ;;  %v8910_v17 = vsel %vm3290_vm6, %v29384_v60, %v8867_v32  ;;  %v19887_v24 = vpack.c.bf16 %v8225_v59, %v7777_v11  ;;  %v29387_v11 = vld [vmem:[#allocation147_spill] sm:$0xff] }
 0x54e   :  { %v8563_v56 = vrot.slane %v29379_v27, %v20925_v10  ;;  %v8462_v20 = vsel %vm2837_vm5, %v29386_v51, %v25363_v41  ;;  %v9568_v30 = vmul.f32 %v9459_v21, %v9358_v8  ;;  %v9120_v60 = vmul.f32 %v9011_v18, %v8910_v17  ;;  %v29391_v51 = vld [vmem:[#allocation151_spill] sm:$0xff] }
 0x54f   :  { %18786 = vmatmul.mubr.msk.bf16.vlgmr.msra.gmra.mrb[44].mxu0 %vm5003_vm9, %v25186_v38  ;;  %v7776_v29 = vmul.f32 %v7667_v16, %v29385_v54  ;;  %v6439_v32 = vrot.slane %v29359_v52, %v29289_v34  ;;  %v5991_v59 = vrot.slane %v29360_v58, %v29289_v34  ;;  %v6314_v41 = vsel %vm669_vm1, %v6281_v49, %v29387_v11 }
 0x550   :  { %11027 = vmatpush1.bf16.msra.mxu0 %v19822_v23  ;;  %11058 = vmatprep.mubr.bf16.mxu0 %v29025_v46  ;;  %v7177_v45 = vpop.permute.xlu0 %7176  ;;  %v9357_v23 = vsel %vm3743_vm7, %v9315_v43, %v29382_v53  ;;  %v8673_v53 = vmul.f32 %v8567_v61, %v8461_v62  ;;  %v29388_v61 = vld [vmem:[#allocation148_spill] sm:$0xff]  ;;  %v6435_v17 = vrot.slane %v29359_v52, %v29287_v6  ;;  %v29390_v52 = vld [vmem:[#allocation118_spill] sm:$0xff] }
 0x551   :  { %v6729_v47 = vpop.permute.xlu1 %6728  ;;  %11028 = vmatprep.subr.bf16.mxu0 %v19855_v4  ;;  %v9121_v4 = vmul.f32 %v9015_v22, %v8909_v0  ;;  %v19886_v43 = vpack.c.bf16 %v8224_v7, %v7776_v29  ;;  %v9569_v12 = vmul.f32 %v9463_v31, %v9357_v23  ;;  %v8672_v0 = vmul.f32 %v8563_v56, %v8462_v20 }
 0x552   :  { %v5866_v21 = vsel %vm217_vm0, %v5833_v2, %v29388_v61  ;;  %v5987_v31 = vrot.slane %v29360_v58, %v29287_v6  ;;  %v7335_v18 = vrot.slane %v29363_v44, %v29289_v34  ;;  %v19950_v62 = vpack.c.bf16 %v9568_v30, %v9568_v30 }
 0x553   :  { %v19919_v16 = vpack.c.bf16 %v9121_v4, %v8673_v53  ;;  %v19951_v7 = vpack.c.bf16 %v9569_v12, %v9569_v12  ;;  %v19918_v23 = vpack.c.bf16 %v9120_v60, %v8672_v0  ;;  %v6887_v8 = vrot.slane %v29364_v36, %v29289_v34  ;;  %v29389_v4 = vld [vmem:[#allocation7_spill] sm:$0xff]  ;;  %v29392_v53 = vld [vmem:[#allocation152_spill] sm:$0xff] }
 0x554   :  { %11029 = vmatpush1.bf16.msra.mxu0 %v19854_v9  ;;  %v25456_v22 = vpop.permute.xlu0 %8426  ;;  %v6533_v56 = vmul.f32 %v6439_v32, %v6314_v41  ;;  %v5867_v58 = vsel %vm217_vm0, %v29390_v52, %v5833_v2  ;;  %v6085_v29 = vmul.f32 %v5991_v59, %v5866_v21  ;;  %v7210_v20 = vsel %vm1575_vm3, %v7177_v45, %v29391_v51  ;;  %v29393_v59 = vld [vmem:[#allocation127_spill] sm:$0xff]  ;;  %v29394_v41 = vld [vmem:[#allocation126_spill] sm:$0xff] }
 0x555   :  { %v7979_v39 = vpop.permute.xlu1 %7978  ;;  %11030 = vmatprep.subr.bf16.mxu0 %v19887_v24  ;;  %v6315_v24 = vsel %vm669_vm1, %v29389_v4, %v6281_v49  ;;  %v6762_v12 = vsel %vm1122_vm2, %v6729_v47, %v29392_v53  ;;  %v6883_v49 = vrot.slane %v29364_v36, %v29287_v6  ;;  %v8135_v30 = vrot.slane %v29371_v55, %v29289_v34 }
 0x556   :  { %v6532_v60 = vmul.f32 %v6435_v17, %v6315_v24  ;;  %v6084_v32 = vmul.f32 %v5987_v31, %v5867_v58  ;;  %v10651_v0 = vsel %vm5007_vm8, %v19950_v62, 0  ;;  %v7429_v11 = vmul.f32 %v7335_v18, %v7210_v20 }
 0x557   :  { %v6981_v36 = vmul.f32 %v6887_v8, %v6762_v12  ;;  %v19827_v21 = vpack.c.bf16 %v6533_v56, %v6085_v29  ;;  %v7687_v31 = vrot.slane %v29375_v57, %v29289_v34  ;;  %v9031_v24 = vrot.slane %v29377_v14, %v29289_v34  ;;  %v29397_v29 = vld [vmem:[#allocation159_spill] sm:$0xff] }
 0x558   :  { %11031 = vmatpush1.bf16.msra.mxu0 %v19886_v43  ;;  %v7331_v43 = vrot.slane %v29363_v44, %v29287_v6  ;;  %v9323_v2 = vpop.permute.xlu0 %9322  ;;  %v6763_v44 = vsel %vm1122_vm2, %v29394_v41, %v6729_v47  ;;  %v29396_v47 = vld [vmem:[#allocation132_spill] sm:$0xff]  ;;  %v7683_v58 = vrot.slane %v29375_v57, %v29287_v6  ;;  %v9475_v20 = vrot.slane %v29380_v33, %v29287_v6 }
 0x559   :  { %v8875_v9 = vpop.permute.xlu1 %8874  ;;  %11032 = vmatprep.subr.bf16.mxu0 %v19919_v16  ;;  %v7211_v16 = vsel %vm1575_vm3, %v29393_v59, %v7177_v45  ;;  %v19826_v45 = vpack.c.bf16 %v6532_v60, %v6084_v32  ;;  %v6980_v18 = vmul.f32 %v6883_v49, %v6763_v44  ;;  %v8010_v8 = vsel %vm2384_vm4, %v29396_v47, %v7979_v39  ;;  %v29398_v49 = vld [vmem:[#allocation156_spill] sm:$0xff]  ;;  %v29399_v32 = vld [vmem:[#allocation158_spill] sm:$0xff] }
 0x55a   :  { %v7428_v62 = vmul.f32 %v7331_v43, %v7211_v16  ;;  %v19859_v52 = vpack.c.bf16 %v7429_v11, %v6981_v36  ;;  %v7781_v51 = vmul.f32 %v7687_v31, %v23861_v1  ;;  %v9479_v53 = vrot.slane %v29380_v33, %v29289_v34  ;;  %v29400_v16 = vld [vmem:[#allocation142_spill] sm:$0xff] }
 0x55b   :  { %v9027_v57 = vrot.slane %v29377_v14, %v29287_v6  ;;  %v9353_v59 = vsel %vm3743_vm7, %v9323_v2, %v29399_v32  ;;  %v9354_v33 = vsel %vm3743_vm7, %v29400_v16, %v9323_v2  ;;  %v8579_v44 = vrot.slane %v29379_v27, %v29287_v6  ;;  %v29407_v16 = vld [vmem:[#allocation167_spill] sm:$0xff] }
 0x55c   :  { %11033 = vmatpush1.bf16.msra.mxu0 %v19918_v23  ;;  %v29395_v23 = vld [vmem:[#allocation154_spill] sm:$0xff]  ;;  %v6289_v56 = vpop.permute.xlu0 %6288  ;;  %v19858_v43 = vpack.c.bf16 %v7428_v62, %v6980_v18  ;;  %v7780_v36 = vmul.f32 %v7683_v58, %v23687_v3  ;;  %v9573_v62 = vmul.f32 %v9479_v53, %v9353_v59  ;;  %v6455_v18 = vrot.slane %v24553_v5, %v29058_v28 }
 0x55d   :  { %18789 = vmatprep.subr.msk.bf16.mxu0 %vm5007_vm8, %v19951_v7  ;;  %v25498_v61 = vpop.permute.xlu1 %5840  ;;  %v8009_v17 = vsel %vm2384_vm4, %v7979_v39, %v29395_v23  ;;  %v8131_v7 = vrot.slane %v29371_v55, %v29287_v6  ;;  %v8905_v55 = vsel %vm3290_vm6, %v8875_v9, %v29397_v29  ;;  %v8583_v39 = vrot.slane %v29379_v27, %v29289_v34  ;;  %v18923_v1 = vld [vmem:[%s28625_s1 + $0x5] ss:$8 sm:$0xf] }
 0x55e   :  { %v8229_v4 = vmul.f32 %v8135_v30, %v8009_v17  ;;  %v8457_v30 = vsel %vm2837_vm5, %v25456_v22, %v29398_v49  ;;  %v9125_v11 = vmul.f32 %v9031_v24, %v8905_v55  ;;  %v6007_v27 = vrot.slane %v24549_v42, %v29058_v28  ;;  %v29404_v24 = vld [vmem:[#allocation164_spill] sm:$0xff] }
 0x55f   :  { %v8228_v60 = vmul.f32 %v8131_v7, %v8010_v8  ;;  %v8677_v17 = vmul.f32 %v8583_v39, %v8457_v30  ;;  %v6451_v58 = vrot.slane %v24553_v5, %v20925_v10  ;;  %v6003_v29 = vrot.slane %v24549_v42, %v20925_v10  ;;  %v29406_v30 = vld [vmem:[#allocation144_spill] sm:$0xff] }
 0x560   :  { %11035 = vmatpush1.bf16.msra.mxu0 %v10651_v0  ;;  %v29401_v0 = vld [vmem:[#allocation138_spill] sm:$0xff]  ;;  %v19891_v41 = vpack.c.bf16 %v8229_v4, %v7781_v51  ;;  %v7185_v31 = vpop.permute.xlu0 %7184  ;;  %v29403_v4 = vld [vmem:[#allocation163_spill] sm:$0xff]  ;;  %v7351_v55 = vrot.slane %v24614_v13, %v29058_v28  ;;  %v19955_v39 = vpack.c.bf16 %v9573_v62, %v9573_v62  ;;  %v6903_v53 = vrot.slane %v24612_v48, %v29058_v28 }
 0x561   :  { %11108 = vmatprep.subr.bf16.mxu0 %v19827_v21  ;;  %v6737_v12 = vpop.permute.xlu1 %6736  ;;  %v8906_v14 = vsel %vm3290_vm6, %v29401_v0, %v8875_v9  ;;  %v29402_v21 = vld [vmem:[#allocation136_spill] sm:$0xff]  ;;  %v19890_v2 = vpack.c.bf16 %v8228_v60, %v7780_v36  ;;  %v19923_v47 = vpack.c.bf16 %v9125_v11, %v8677_v17  ;;  %v5863_v60 = vsel %vm217_vm0, %v29406_v30, %v25498_v61 }
 0x562   :  { %v8458_v23 = vsel %vm2837_vm5, %v29402_v21, %v25456_v22  ;;  %v9124_v9 = vmul.f32 %v9027_v57, %v8906_v14  ;;  %v6310_v22 = vsel %vm669_vm1, %v6289_v56, %v29403_v4  ;;  %v29405_v57 = vld [vmem:[#allocation145_spill] sm:$0xff]  ;;  %v29408_v0 = vld [vmem:[#allocation168_spill] sm:$0xff]  ;;  %v6899_v11 = vrot.slane %v24612_v48, %v20925_v10  ;;  %v29409_v21 = vld [vmem:[#allocation150_spill] sm:$0xff] }
 0x563   :  { %18790 = vmatmul.mubr.msk.bf16.vlgmr.msra.gmra.mrb[48].mxu0 %vm5003_vm9, %v25186_v38  ;;  %v8676_v8 = vmul.f32 %v8579_v44, %v8458_v23  ;;  %v6537_v49 = vmul.f32 %v6455_v18, %v6310_v22  ;;  %v6758_v14 = vsel %vm1122_vm2, %v6737_v12, %v29408_v0  ;;  %v6088_v36 = vmul.f32 %v6003_v29, %v5863_v60  ;;  %v18924_v3 = vld [vmem:[%s28625_s1 + $0x5] ss:$8 sm:$0xf0] }
 0x564   :  { %11109 = vmatpush1.bf16.msra.mxu0 %v19826_v45  ;;  %11140 = vmatprep.mubr.bf16.mxu0 %v29025_v46  ;;  %v9572_v45 = vmul.f32 %v9475_v20, %v9354_v33  ;;  %v8435_v59 = vpop.permute.xlu0 %8434  ;;  %v7206_v33 = vsel %vm1575_vm3, %v7185_v31, %v29407_v16  ;;  %v7207_v23 = vsel %vm1575_vm3, %v29409_v21, %v7185_v31 }
 0x565   :  { %11110 = vmatprep.subr.bf16.mxu0 %v19859_v52  ;;  %v7987_v7 = vpop.permute.xlu1 %7986  ;;  %v5862_v52 = vsel %vm217_vm0, %v25498_v61, %v29404_v24  ;;  %v19922_v20 = vpack.c.bf16 %v9124_v9, %v8676_v8  ;;  %v8151_v61 = vrot.slane %v24672_v15, %v29058_v28  ;;  %v6985_v9 = vmul.f32 %v6903_v53, %v6758_v14 }
 0x566   :  { %v19954_v51 = vpack.c.bf16 %v9572_v45, %v9572_v45  ;;  %v6089_v32 = vmul.f32 %v6007_v27, %v5862_v52  ;;  %v29410_v45 = vld [vmem:[#allocation149_spill] sm:$0xff]  ;;  %v29411_v27 = vld [vmem:[#allocation170_spill] sm:$0xff]  ;;  %v7703_v8 = vrot.slane %v24677_v63, %v29058_v28  ;;  %v8147_v52 = vrot.slane %v24672_v15, %v20925_v10 }
 0x567   :  { %v6759_v62 = vsel %vm1122_vm2, %v29410_v45, %v6737_v12  ;;  %v29413_v12 = vld [vmem:[#allocation153_spill] sm:$0xff]  ;;  %v8599_v30 = vrot.slane %v24756_v25, %v29058_v28  ;;  %v9491_v60 = vrot.slane %v24818_v19, %v20925_v10  ;;  %v9043_v16 = vrot.slane %v24760_v50, %v20925_v10 }
 0x568   :  { %11111 = vmatpush1.bf16.msra.mxu0 %v19858_v43  ;;  %v6311_v43 = vsel %vm669_vm1, %v29405_v57, %v6289_v56  ;;  %v7347_v56 = vrot.slane %v24614_v13, %v20925_v10  ;;  %v10663_v17 = vsel %vm5007_vm8, %v19954_v51, 0  ;;  %v19831_v18 = vpack.c.bf16 %v6537_v49, %v6089_v32  ;;  %v9331_v4 = vpop.permute.xlu0 %9330 }
 0x569   :  { %11112 = vmatprep.subr.bf16.mxu0 %v19891_v41  ;;  %v8883_v41 = vpop.permute.xlu1 %8882  ;;  %v6536_v44 = vmul.f32 %v6451_v58, %v6311_v43  ;;  %v6984_v24 = vmul.f32 %v6899_v11, %v6759_v62  ;;  %v8006_v29 = vsel %vm2384_vm4, %v29413_v12, %v7987_v7  ;;  %v9047_v51 = vrot.slane %v24760_v50, %v29058_v28 }
 0x56a   :  { %v7432_v22 = vmul.f32 %v7347_v56, %v7207_v23  ;;  %v7699_v57 = vrot.slane %v24677_v63, %v20925_v10  ;;  %v8901_v43 = vsel %vm3290_vm6, %v8883_v41, %v24826_v40  ;;  %v9495_v32 = vrot.slane %v24818_v19, %v29058_v28  ;;  %v29415_v56 = vld [vmem:[#allocation68_spill] sm:$0xff] }
 0x56b   :  { %v19830_v31 = vpack.c.bf16 %v6536_v44, %v6088_v36  ;;  %v8453_v0 = vsel %vm2837_vm5, %v8435_v59, %v24793_v26  ;;  %v8232_v14 = vmul.f32 %v8147_v52, %v8006_v29  ;;  %v9349_v11 = vsel %vm3743_vm7, %v9331_v4, %v29415_v56  ;;  %v29417_v36 = vld [vmem:[#allocation157_spill] sm:$0xff]  ;;  %v29420_v29 = vld [vmem:[#allocation32_spill] sm:$0xff]  ;;  %v29424_v56 = vld [vmem:[#allocation34_spill] sm:$0xff] }
 0x56c   :  { %11113 = vmatpush1.bf16.msra.mxu0 %v19890_v2  ;;  %v7433_v2 = vmul.f32 %v7351_v55, %v7206_v33  ;;  %v19862_v33 = vpack.c.bf16 %v7432_v22, %v6984_v24  ;;  %v8902_v21 = vsel %vm3290_vm6, %v29417_v36, %v8883_v41  ;;  %v9129_v23 = vmul.f32 %v9047_v51, %v8901_v43  ;;  %v29418_v26 = vld [vmem:[#allocation97_spill] sm:$0xff] }
 0x56d   :  { %11114 = vmatprep.subr.bf16.mxu0 %v19923_v47  ;;  %v8005_v47 = vsel %vm2384_vm4, %v7987_v7, %v29411_v27  ;;  %v7785_v7 = vmul.f32 %v7703_v8, %v24050_v35  ;;  %v8595_v45 = vrot.slane %v24756_v25, %v20925_v10  ;;  %v7784_v62 = vmul.f32 %v7699_v57, %v29418_v26 }
 0x56e   :  { %v8233_v55 = vmul.f32 %v8151_v61, %v8005_v47  ;;  %v29416_v61 = vld [vmem:[#allocation160_spill] sm:$0xff]  ;;  %v8681_v27 = vmul.f32 %v8599_v30, %v8453_v0  ;;  %v9128_v41 = vmul.f32 %v9043_v16, %v8902_v21  ;;  %v6471_v22 = vrot.slane %v24553_v5, %v29289_v34  ;;  %v29422_v16 = vld [vmem:[#allocation162_spill] sm:$0xff] }
 0x56f   :  { %v9350_v44 = vsel %vm3743_vm7, %v29416_v61, %v9331_v4  ;;  %v19894_v8 = vpack.c.bf16 %v8232_v14, %v7784_v62  ;;  %v6023_v24 = vrot.slane %v24549_v42, %v29289_v34  ;;  %v6019_v57 = vrot.slane %v24549_v42, %v29287_v6  ;;  %v29425_v61 = vld [vmem:[#allocation17_spill] sm:$0xff] }
 0x570   :  { %11115 = vmatpush1.bf16.msra.mxu0 %v19922_v20  ;;  %v19863_v20 = vpack.c.bf16 %v7433_v2, %v6985_v9  ;;  %v19895_v2 = vpack.c.bf16 %v8233_v55, %v7785_v7  ;;  %v29419_v9 = vld [vmem:[#allocation155_spill] sm:$0xff]  ;;  %v9576_v4 = vmul.f32 %v9491_v60, %v9350_v44  ;;  %v19927_v52 = vpack.c.bf16 %v9129_v23, %v8681_v27 }
 0x571   :  { %18793 = vmatprep.subr.msk.bf16.mxu0 %vm5007_vm8, %v19955_v39  ;;  %v5849_v39 = vpop.permute.xlu1 %5848  ;;  %v7367_v43 = vrot.slane %v24614_v13, %v29289_v34  ;;  %v7363_v36 = vrot.slane %v24614_v13, %v29287_v6  ;;  %v6915_v21 = vrot.slane %v24612_v48, %v29287_v6 }
 0x574   :  { %11117 = vmatpush1.bf16.msra.mxu0 %v10663_v17  ;;  %v6297_v17 = vpop.permute.xlu0 %6296 }
 0x575   :  { %11190 = vmatprep.subr.bf16.mxu0 %v19831_v18  ;;  %v8454_v18 = vsel %vm2837_vm5, %v29419_v9, %v8435_v59  ;;  %v6745_v47 = vpop.permute.xlu1 %6744  ;;  %v6306_v55 = vsel %vm669_vm1, %v6297_v17, %v29420_v29  ;;  %v29421_v59 = vld [vmem:[#allocation9_spill] sm:$0xff]  ;;  %v8163_v29 = vrot.slane %v24672_v15, %v29287_v6 }
 0x576   :  { %v25602_v58 = vpop.f32.mrb[52].mxu1  ;;  %v8680_v12 = vmul.f32 %v8595_v45, %v8454_v18  ;;  %v5858_v51 = vsel %vm217_vm0, %v5849_v39, %v29421_v59  ;;  %v6754_v44 = vsel %vm1122_vm2, %v6745_v47, %v29425_v61  ;;  %v29427_v18 = vld [vmem:[#allocation165_spill] sm:$0xff]  ;;  %v8611_v61 = vrot.slane %v24756_v25, %v29287_v6 }
 0x577   :  { %29412 = vst [vmem:[#allocation15_spill] sm:$0xff] %v25602_v58  ;;  %18794 = vmatmul.mubr.msk.bf16.vlgmr.msra.gmra.mrb[52].mxu0 %vm5003_vm9, %v25186_v38  ;;  %v25611_v53 = vpop.f32.mrb[53].mxu1  ;;  %v6093_v0 = vmul.f32 %v6023_v24, %v5858_v51  ;;  %v6755_v13 = vsel %vm1122_vm2, %v29427_v18, %v6745_v47  ;;  %v29429_v47 = vld [vmem:[#allocation169_spill] sm:$0xff]  ;;  %v9063_v51 = vrot.slane %v24760_v50, %v29289_v34  ;;  %v29469_v58 = vld [vmem:[#allocation24_spill] sm:$0xff] }
 0x578   :  { %29414 = vst [vmem:[#allocation65_spill] sm:$0xff] %v25611_v53  ;;  %11191 = vmatpush1.bf16.msra.mxu0 %v19830_v31  ;;  %11222 = vmatprep.mubr.bf16.mxu0 %v29025_v46  ;;  %v11187_v49 = vpop.f32.mrb[54].mxu1  ;;  %v9577_v31 = vmul.f32 %v9495_v32, %v9349_v11  ;;  %v7193_v7 = vpop.permute.xlu0 %7192  ;;  %v19926_v60 = vpack.c.bf16 %v9128_v41, %v8680_v12 }
 0x579   :  { %11192 = vmatprep.subr.bf16.mxu0 %v19863_v20  ;;  %v11188_v40 = vpop.f32.mrb[55].mxu1  ;;  %v6467_v20 = vrot.slane %v24553_v5, %v29287_v6  ;;  %v19958_v49 = vpack.c.bf16 %v9576_v4, %v9576_v4  ;;  %v6919_v32 = vrot.slane %v24612_v48, %v29289_v34  ;;  %v29423_v5 = vld [vmem:[#allocation161_spill] sm:$0xff]  ;;  %v7995_v14 = vpop.permute.xlu1 %7994  ;;  %v7202_v11 = vsel %vm1575_vm3, %v7193_v7, %v29424_v56 }
 0x57a   :  { %v19959_v30 = vpack.c.bf16 %v9577_v31, %v9577_v31  ;;  %v6307_v40 = vsel %vm669_vm1, %v29422_v16, %v6297_v17  ;;  %v5859_v42 = vsel %vm217_vm0, %v29423_v5, %v5849_v39  ;;  %v8167_v39 = vrot.slane %v24672_v15, %v29289_v34  ;;  %v29428_v4 = vld [vmem:[#allocation53_spill] sm:$0xff] }
 0x57b   :  { %v6540_v23 = vmul.f32 %v6467_v20, %v6307_v40  ;;  %v6092_v17 = vmul.f32 %v6019_v57, %v5859_v42  ;;  %v10675_v62 = vsel %vm5007_vm8, %v19958_v49, 0  ;;  %v7437_v9 = vmul.f32 %v7367_v43, %v7202_v11  ;;  %v29430_v43 = vld [vmem:[#allocation61_spill] sm:$0xff] }
 0x57c   :  { %11193 = vmatpush1.bf16.msra.mxu0 %v19862_v33  ;;  %v6541_v33 = vmul.f32 %v6471_v22, %v6306_v55  ;;  %v6989_v27 = vmul.f32 %v6919_v32, %v6754_v44  ;;  %v8443_v48 = vpop.permute.xlu0 %8442  ;;  %v8001_v31 = vsel %vm2384_vm4, %v7995_v14, %v29428_v4  ;;  %v7719_v22 = vrot.slane %v24677_v63, %v29289_v34  ;;  %v29432_v40 = vld [vmem:[#allocation41_spill] sm:$0xff]  ;;  %v29434_v44 = vld [vmem:[#allocation120_spill] sm:$0xff] }
 0x57d   :  { %11194 = vmatprep.subr.bf16.mxu0 %v19895_v2  ;;  %v29426_v2 = vld [vmem:[#allocation166_spill] sm:$0xff]  ;;  %v8891_v41 = vpop.permute.xlu1 %8890  ;;  %v19834_v24 = vpack.c.bf16 %v6540_v23, %v6092_v17  ;;  %v6988_v12 = vmul.f32 %v6915_v21, %v6755_v13  ;;  %v8002_v55 = vsel %vm2384_vm4, %v29429_v47, %v7995_v14  ;;  %v8237_v59 = vmul.f32 %v8167_v39, %v8001_v31  ;;  %v29435_v21 = vld [vmem:[#allocation43_spill] sm:$0xff] }
 0x57e   :  { %v7203_v45 = vsel %vm1575_vm3, %v29426_v2, %v7193_v7  ;;  %v19867_v20 = vpack.c.bf16 %v7437_v9, %v6989_v27  ;;  %v7715_v57 = vrot.slane %v24677_v63, %v29287_v6  ;;  %v8897_v7 = vsel %vm3290_vm6, %v8891_v41, %v29430_v43  ;;  %v29436_v23 = vld [vmem:[#allocation63_spill] sm:$0xff] }
 0x57f   :  { %v8615_v15 = vrot.slane %v24756_v25, %v29289_v34  ;;  %v9507_v49 = vrot.slane %v24818_v19, %v29287_v6  ;;  %v8449_v63 = vsel %vm2837_vm5, %v8443_v48, %v29432_v40  ;;  %v9059_v5 = vrot.slane %v24760_v50, %v29287_v6 }
 0x580   :  { %11195 = vmatpush1.bf16.msra.mxu0 %v19894_v8  ;;  %v19835_v8 = vpack.c.bf16 %v6541_v33, %v6093_v0  ;;  %v8236_v33 = vmul.f32 %v8163_v29, %v8002_v55  ;;  %v9511_v42 = vrot.slane %v24818_v19, %v29289_v34  ;;  %v29433_v0 = vld [vmem:[#allocation35_spill] sm:$0xff]  ;;  %v9133_v56 = vmul.f32 %v9063_v51, %v8897_v7  ;;  %v29437_v19 = vld [vmem:[#allocation30_spill] sm:$0xff]  ;;  %v29441_v7 = vld [vmem:[#allocation69_spill] sm:$0xff] }
 0x581   :  { %11196 = vmatprep.subr.bf16.mxu0 %v19927_v52  ;;  %v7436_v52 = vmul.f32 %v7363_v36, %v7203_v45  ;;  %v8898_v14 = vsel %vm3290_vm6, %v29433_v0, %v8891_v41  ;;  %v7788_v36 = vmul.f32 %v7715_v57, %v29434_v44  ;;  %v8450_v17 = vsel %vm2837_vm5, %v29437_v19, %v8443_v48 }
 0x582   :  { %v8685_v2 = vmul.f32 %v8615_v15, %v8449_v63  ;;  %v8684_v13 = vmul.f32 %v8611_v61, %v8450_v17 }
 0x583   :  { %v19866_v16 = vpack.c.bf16 %v7436_v52, %v6988_v12  ;;  %v19898_v45 = vpack.c.bf16 %v8236_v33, %v7788_v36 }
 0x584   :  { %11197 = vmatpush1.bf16.msra.mxu0 %v19926_v60  ;;  %v29431_v60 = vld [vmem:[#allocation146_spill] sm:$0xff]  ;;  %v19931_v18 = vpack.c.bf16 %v9133_v56, %v8685_v2 }
 0x585   :  { %18797 = vmatprep.subr.msk.bf16.mxu0 %vm5007_vm8, %v19959_v30  ;;  %v9339_v30 = vpop.permute.xlu0 %9338  ;;  %v7789_v32 = vmul.f32 %v7719_v22, %v29431_v60 }
 0x586   :  { %v9345_v39 = vsel %vm3743_vm7, %v9339_v30, %v29435_v21  ;;  %v9346_v50 = vsel %vm3743_vm7, %v29436_v23, %v9339_v30 }
 0x587   :  { %v19899_v11 = vpack.c.bf16 %v8237_v59, %v7789_v32  ;;  %v9580_v25 = vmul.f32 %v9507_v49, %v9346_v50  ;;  %v9581_v9 = vmul.f32 %v9511_v42, %v9345_v39 }
 0x588   :  { %11199 = vmatpush1.bf16.msra.mxu0 %v10675_v62  ;;  %v9132_v62 = vmul.f32 %v9059_v5, %v8898_v14 }
 0x589   :  { %11272 = vmatprep.subr.bf16.mxu0 %v19835_v8  ;;  %v19962_v8 = vpack.c.bf16 %v9580_v25, %v9580_v25  ;;  %v19963_v4 = vpack.c.bf16 %v9581_v9, %v9581_v9  ;;  %v29444_v9 = vld [vmem:[#allocation52_spill] sm:$0xff] }
 0x58a   :  { %v19930_v27 = vpack.c.bf16 %v9132_v62, %v8684_v13  ;;  %v25746_v52 = vpop.permute.xlu1 %9876  ;;  %v29445_v13 = vld [vmem:[#allocation19_spill] sm:$0xff] }
 0x58b   :  { %18798 = vmatmul.mubr.msk.bf16.vlgmr.msra.gmra.mrb[56].mxu0 %vm5003_vm9, %v25186_v38  ;;  %v10687_v31 = vsel %vm5007_vm8, %v19962_v8, 0  ;;  %v10776_v15 = vadd.f32 %v29441_v7, %v25746_v52 }
 0x58c   :  { %11273 = vmatpush1.bf16.msra.mxu0 %v19834_v24  ;;  %11304 = vmatprep.mubr.bf16.mxu0 %v29025_v46 }
 0x58d   :  { %11274 = vmatprep.subr.bf16.mxu0 %v19867_v20  ;;  %v25764_v30 = vmax.f32 %v10776_v15, 0.0 }
 0x590   :  { %11275 = vmatpush1.bf16.msra.mxu0 %v19866_v16 }
 0x591   :  { %11276 = vmatprep.subr.bf16.mxu0 %v19899_v11 }
 0x594   :  { %11277 = vmatpush1.bf16.msra.mxu0 %v19898_v45 }
 0x595   :  { %11278 = vmatprep.subr.bf16.mxu0 %v19931_v18  ;;  %v10858_v18 = vadd.f32 %v29444_v9, %v25746_v52  ;;  %v29449_v9 = vld [vmem:[#allocation56_spill] sm:$0xff] }
 0x598   :  { %11279 = vmatpush1.bf16.msra.mxu0 %v19930_v27  ;;  %v10856_v27 = vadd.f32 %v29445_v13, %v25746_v52 }
 0x599   :  { %18801 = vmatprep.subr.msk.bf16.mxu0 %vm5007_vm8, %v19963_v4 }
 0x59c   :  { %11281 = vmatpush1.bf16.msra.mxu0 %v10687_v31 }
 0x59f   :  { %18802 = vmatmul.mubr.msk.bf16.vlgmr.msra.gmra.mrb[60].mxu0 %vm5003_vm9, %v25186_v38  ;;  %v29440_v38 = vld [vmem:[#allocation50_spill] sm:$0xff] }
 0x5a0   :  { %16324 = vmatprep.mubr.bf16.mxu0 %v29025_v46  ;;  %v10774_v20 = vadd.f32 %v29440_v38, %v25746_v52  ;;  %v18827_v38 = vld [vmem:[%s28625_s1 + $0x1] ss:$8 sm:$0xf] }
 0x5a2   :  { %v25762_v49 = vmax.f32 %v10774_v20, 0.0 }
 0x5bb   :  { %v25742_v48 = vpop.f32.mrb[56].mxu1 }
 0x5bc   :  { %29438 = vst [vmem:[#allocation46_spill] sm:$0xff] %v25742_v48  ;;  %v25744_v41 = vpop.f32.mrb[57].mxu1 }
 0x5bd   :  { %29439 = vst [vmem:[#allocation70_spill] sm:$0xff] %v25744_v41  ;;  %v11269_v22 = vpop.f32.mrb[58].mxu1 }
 0x5be   :  { %v11270_v24 = vpop.f32.mrb[59].mxu1  ;;  %v25873_v22 = vmax.f32 %v10858_v18, 0.0 }
 0x5bf   :  { %v25875_v24 = vmax.f32 %v10856_v27, 0.0 }
 0x5d2   :  { %v10732_v12 = vpop.f32.mrb[32].mxu0 }
 0x5d3   :  { %v10733_v29 = vadd.f32 %v10732_v12, %v25746_v52  ;;  %v10734_v47 = vpop.f32.mrb[33].mxu0 }
 0x5d4   :  { %v10735_v55 = vadd.f32 %v10734_v47, %v25746_v52  ;;  %v10736_v59 = vpop.f32.mrb[34].mxu0  ;;  %v11483_v47 = vld [vmem:[%s28625_s1] ss:$8 sm:$0xf0] }
 0x5d5   :  { %v25750_v51 = vmax.f32 %v10733_v29, 0.0  ;;  %v10737_v57 = vpop.f32.mrb[35].mxu0  ;;  %v11482_v29 = vld [vmem:[%s28625_s1] ss:$8 sm:$0xf] }
 0x5d6   :  { %v25754_v43 = vmax.f32 %v10735_v55, 0.0  ;;  %v18828_v57 = vld [vmem:[%s28625_s1 + $0x1] ss:$8 sm:$0xf0]  ;;  %v25911_v7 = vor.u32 %v11483_v47, %v11482_v29 }
 0x5d7   :  { %11386 = vrot.lane.b32.xlu0 %v25750_v51, %s20182_s13 }
 0x5d8   :  { %11388 = vrot.lane.b32.xlu1 %v25754_v43, %s20182_s13  ;;  %v11509_v29 = vrot.slane %v25911_v7, %v29449_v9 }
 0x5db   :  { %11390 = vrot.lane.b32.xlu0 %v25762_v49, %s20182_s13 }
 0x5dc   :  { %11392 = vrot.lane.b32.xlu1 %v25764_v30, %s20182_s13 }
 0x5df   :  { %11834 = vrot.lane.b32.xlu0 %v25750_v51, %s20183_s30 }
 0x5e0   :  { %11836 = vrot.lane.b32.xlu1 %v25754_v43, %s20183_s30 }
 0x5e3   :  { %11838 = vrot.lane.b32.xlu0 %v25762_v49, %s20183_s30 }
 0x5e4   :  { %11840 = vrot.lane.b32.xlu1 %v25764_v30, %s20183_s30 }
 0x5f2   :  { %v25778_v32 = vpop.f32.mrb[60].mxu1 }
 0x5f3   :  { %29442 = vst [vmem:[#allocation67_spill] sm:$0xff] %v25778_v32  ;;  %v11349_v16 = vpop.f32.mrb[61].mxu1 }
 0x5f4   :  { %v11350_v40 = vadd.f32 %v11349_v16, %v25746_v52  ;;  %v11351_v63 = vpop.f32.mrb[62].mxu1 }
 0x5f5   :  { %v11352_v33 = vpop.f32.mrb[63].mxu1  ;;  %v11505_v63 = vrot.slane %v25911_v7, %v29058_v28 }
 0x5f6   :  { %v25781_v5 = vmax.f32 %v11350_v40, 0.0 }
 0x5f8   :  { %29443 = vst [vmem:[#allocation12_spill] sm:$0xff] %v25781_v5  ;;  %11896 = vrot.lane.b32.xlu1 %v25781_v5, %s20183_s30  ;;  %11448 = vrot.lane.b32.xlu0 %v25781_v5, %s20182_s13 }
 0x5fa   :  { %v10814_v42 = vpop.f32.mrb[36].mxu0 }
 0x5fb   :  { %v10816_v0 = vpop.f32.mrb[37].mxu0  ;;  %v10815_v11 = vadd.f32 %v10814_v42, %v25746_v52  ;;  %v25921_v42 = vor.u32 %v18828_v57, %v18827_v38 }
 0x5fc   :  { %12284 = vrot.lane.b32.xlu1 %v25754_v43, %s20184_s0  ;;  %12282 = vrot.lane.b32.xlu0 %v25750_v51, %s20184_s0  ;;  %v10818_v14 = vpop.f32.mrb[38].mxu0  ;;  %v10817_v45 = vadd.f32 %v10816_v0, %v25746_v52 }
 0x5fd   :  { %v10819_v56 = vpop.f32.mrb[39].mxu0  ;;  %v25816_v23 = vmax.f32 %v10815_v11, 0.0  ;;  %v11953_v14 = vrot.slane %v25921_v42, %v29058_v28  ;;  %v11957_v18 = vrot.slane %v25921_v42, %v29449_v9 }
 0x5fe   :  { %v25859_v62 = vmax.f32 %v10817_v45, 0.0 }
 0x600   :  { %12288 = vrot.lane.b32.xlu1 %v25764_v30, %s20184_s0  ;;  %12286 = vrot.lane.b32.xlu0 %v25762_v49, %s20184_s0 }
 0x604   :  { %12732 = vrot.lane.b32.xlu1 %v25754_v43, %s20185_s14  ;;  %12730 = vrot.lane.b32.xlu0 %v25750_v51, %s20185_s14 }
 0x608   :  { %12736 = vrot.lane.b32.xlu1 %v25764_v30, %s20185_s14  ;;  %12734 = vrot.lane.b32.xlu0 %v25762_v49, %s20185_s14 }
 0x60c   :  { %12792 = vrot.lane.b32.xlu1 %v25781_v5, %s20185_s14  ;;  %12344 = vrot.lane.b32.xlu0 %v25781_v5, %s20184_s0 }
 0x60e   :  { %v25808_v61 = vpop.f32.mrb[40].mxu0 }
 0x60f   :  { %v25810_v36 = vpop.f32.mrb[41].mxu0 }
 0x610   :  { %13534 = vrot.lane.b32.xlu1 %v25762_v49, %s20186_s15  ;;  %13532 = vrot.lane.b32.xlu0 %v25754_v43, %s20186_s15  ;;  %v10900_v21 = vpop.f32.mrb[42].mxu0 }
 0x611   :  { %v10901_v39 = vpop.f32.mrb[43].mxu0 }
 0x612   :  { %v29448_v39 = vld [vmem:[#allocation55_spill] sm:$0xff] }
 0x613   :  { %v11961_v13 = vrot.slane %v25921_v42, %v29448_v39 }
 0x614   :  { %13538 = vrot.lane.b32.xlu1 %v25816_v23, %s20186_s15  ;;  %13536 = vrot.lane.b32.xlu0 %v25764_v30, %s20186_s15 }
 0x618   :  { %13980 = vrot.lane.b32.xlu1 %v25754_v43, %s20187_s16  ;;  %13530 = vrot.lane.b32.xlu0 %v25750_v51, %s20186_s15 }
 0x61c   :  { %13984 = vrot.lane.b32.xlu1 %v25764_v30, %s20187_s16  ;;  %13982 = vrot.lane.b32.xlu0 %v25762_v49, %s20187_s16 }
 0x620   :  { %14428 = vrot.lane.b32.xlu1 %v25754_v43, %s20188_s17  ;;  %13986 = vrot.lane.b32.xlu0 %v25816_v23, %s20187_s16 }
 0x622   :  { %v25834_v50 = vpop.f32.mrb[44].mxu0 }
 0x623   :  { %v25836_v19 = vpop.f32.mrb[45].mxu0 }
 0x624   :  { %14432 = vrot.lane.b32.xlu1 %v25764_v30, %s20188_s17  ;;  %14430 = vrot.lane.b32.xlu0 %v25762_v49, %s20188_s17  ;;  %v10982_v17 = vpop.f32.mrb[46].mxu0 }
 0x625   :  { %v10983_v2 = vpop.f32.mrb[47].mxu0  ;;  %v11513_v17 = vrot.slane %v25911_v7, %v29448_v39 }
 0x628   :  { %13978 = vrot.lane.b32.xlu1 %v25750_v51, %s20187_s16  ;;  %14434 = vrot.lane.b32.xlu0 %v25816_v23, %s20188_s17 }
 0x62c   :  { %14874 = vrot.lane.b32.xlu1 %v25750_v51, %s20189_s18  ;;  %14426 = vrot.lane.b32.xlu0 %v25750_v51, %s20188_s17 }
 0x630   :  { %14878 = vrot.lane.b32.xlu1 %v25762_v49, %s20189_s18  ;;  %14876 = vrot.lane.b32.xlu0 %v25754_v43, %s20189_s18 }
 0x634   :  { %14882 = vrot.lane.b32.xlu1 %v25816_v23, %s20189_s18  ;;  %14880 = vrot.lane.b32.xlu0 %v25764_v30, %s20189_s18 }
 0x636   :  { %v25861_v25 = vpop.f32.mrb[48].mxu0 }
 0x637   :  { %v25867_v8 = vpop.f32.mrb[49].mxu0 }
 0x638   :  { %11396 = vrot.lane.b32.xlu1 %v25859_v62, %s20182_s13  ;;  %11394 = vrot.lane.b32.xlu0 %v25816_v23, %s20182_s13  ;;  %v11064_v4 = vpop.f32.mrb[50].mxu0 }
 0x639   :  { %v11065_v31 = vpop.f32.mrb[51].mxu0 }
 0x63a   :  { %v10897_v31 = vadd.f32 %v25808_v61, %v25746_v52 }
 0x63c   :  { %11400 = vrot.lane.b32.xlu1 %v25873_v22, %s20182_s13  ;;  %11398 = vrot.lane.b32.xlu0 %v25875_v24, %s20182_s13  ;;  %v25964_v61 = vmax.f32 %v10897_v31, 0.0 }
 0x640   :  { %11844 = vrot.lane.b32.xlu1 %v25859_v62, %s20183_s30  ;;  %11842 = vrot.lane.b32.xlu0 %v25816_v23, %s20183_s30 }
 0x644   :  { %11848 = vrot.lane.b32.xlu1 %v25873_v22, %s20183_s30  ;;  %11846 = vrot.lane.b32.xlu0 %v25875_v24, %s20183_s30 }
 0x648   :  { %12292 = vrot.lane.b32.xlu1 %v25859_v62, %s20184_s0  ;;  %12290 = vrot.lane.b32.xlu0 %v25816_v23, %s20184_s0 }
 0x649   :  { %v25893_v12 = vpop.permute.xlu0 %11386 }
 0x64a   :  { %v25901_v55 = vpop.f32.mrb[52].mxu0  ;;  %v11389_v59 = vpop.permute.xlu1 %11388 }
 0x64b   :  { %29446 = vst [vmem:[#allocation71_spill] sm:$0xff] %v25901_v55  ;;  %v25906_v20 = vpop.f32.mrb[53].mxu0  ;;  %v11480_v0 = vsel %vm217_vm0, %v25893_v12, %v11389_v59 }
 0x64c   :  { %29447 = vst [vmem:[#allocation39_spill] sm:$0xff] %v25906_v20  ;;  %12296 = vrot.lane.b32.xlu1 %v25873_v22, %s20184_s0  ;;  %12294 = vrot.lane.b32.xlu0 %v25875_v24, %s20184_s0  ;;  %v11146_v15 = vpop.f32.mrb[54].mxu0  ;;  %v11659_v11 = vmul.f32 %v11505_v63, %v11480_v0  ;;  %v11022_v20 = vadd.f32 %v29469_v58, %v25746_v52 }
 0x64d   :  { %v11391_v16 = vpop.permute.xlu0 %11390  ;;  %v11147_v40 = vpop.f32.mrb[55].mxu0 }
 0x64e   :  { %v25919_v33 = vpop.permute.xlu1 %11392  ;;  %v11479_v15 = vsel %vm217_vm0, %v11389_v59, %v11391_v16 }
 0x64f   :  { %v11478_v27 = vsel %vm217_vm0, %v11391_v16, %v25919_v33 }
 0x650   :  { %12740 = vrot.lane.b32.xlu1 %v25859_v62, %s20185_s14  ;;  %12738 = vrot.lane.b32.xlu0 %v25816_v23, %s20185_s14  ;;  %v11661_v63 = vmul.f32 %v11513_v17, %v11478_v27 }
 0x651   :  { %v11835_v56 = vpop.permute.xlu0 %11834 }
 0x652   :  { %v11837_v21 = vpop.permute.xlu1 %11836 }
 0x653   :  { %v11928_v2 = vsel %vm669_vm1, %v11835_v56, %v11837_v21 }
 0x654   :  { %v12107_v45 = vmul.f32 %v11953_v14, %v11928_v2  ;;  %12744 = vrot.lane.b32.xlu1 %v25873_v22, %s20185_s14  ;;  %12742 = vrot.lane.b32.xlu0 %v25875_v24, %s20185_s14 }
 0x655   :  { %v11839_v4 = vpop.permute.xlu0 %11838 }
 0x656   :  { %v11927_v47 = vsel %vm669_vm1, %v11837_v21, %v11839_v4  ;;  %v25953_v38 = vpop.permute.xlu1 %11840  ;;  %v19967_v57 = vpack.c.bf16 %v12107_v45, %v11659_v11  ;;  %v11660_v11 = vmul.f32 %v11509_v29, %v11479_v15  ;;  %v18851_v15 = vld [vmem:[%s28625_s1 + $0x2] ss:$8 sm:$0xf] }
 0x657   :  { %v11926_v40 = vsel %vm669_vm1, %v11839_v4, %v25953_v38  ;;  %v12108_v0 = vmul.f32 %v11957_v18, %v11927_v47  ;;  %v11949_v18 = vrot.slane %v25921_v42, %v20925_v10 }
 0x658   :  { %v12109_v14 = vmul.f32 %v11961_v13, %v11926_v40  ;;  %13542 = vrot.lane.b32.xlu1 %v25875_v24, %s20186_s15  ;;  %13540 = vrot.lane.b32.xlu0 %v25859_v62, %s20186_s15  ;;  %v11501_v13 = vrot.slane %v25911_v7, %v20925_v10 }
 0x659   :  { %16292 = vmatprep.subr.bf16.mxu0 %v19967_v57  ;;  %v19968_v2 = vpack.c.bf16 %v12108_v0, %v11660_v11 }
 0x65a   :  { %v19969_v21 = vpack.c.bf16 %v12109_v14, %v11661_v63  ;;  %v18876_v14 = vld [vmem:[%s28625_s1 + $0x3] ss:$8 sm:$0xf0] }
 0x65c   :  { %13546 = vrot.lane.b32.xlu1 %v25964_v61, %s20186_s15  ;;  %13544 = vrot.lane.b32.xlu0 %v25873_v22, %s20186_s15 }
 0x65d   :  { %16333 = vmatprep.subr.bf16.mxu1 %v19969_v21 }
 0x65e   :  { %16334 = vmatpush1.bf16.msra.mxu1 %v19968_v2  ;;  %v25970_v59 = vpop.f32.mrb[56].mxu0  ;;  %v10899_v2 = vadd.f32 %v25810_v36, %v25746_v52 }
 0x65f   :  { %29450 = vst [vmem:[#allocation25_spill] sm:$0xff] %v25970_v59  ;;  %v25972_v16 = vpop.f32.mrb[57].mxu0 }
 0x660   :  { %29451 = vst [vmem:[#allocation29_spill] sm:$0xff] %v25972_v16  ;;  %13990 = vrot.lane.b32.xlu1 %v25875_v24, %s20187_s16  ;;  %13988 = vrot.lane.b32.xlu0 %v25859_v62, %s20187_s16  ;;  %v11228_v17 = vpop.f32.mrb[58].mxu0 }
 0x661   :  { %v11229_v45 = vpop.f32.mrb[59].mxu0 }
 0x664   :  { %13994 = vrot.lane.b32.xlu1 %v25964_v61, %s20187_s16  ;;  %13992 = vrot.lane.b32.xlu0 %v25873_v22, %s20187_s16 }
 0x668   :  { %14438 = vrot.lane.b32.xlu1 %v25875_v24, %s20188_s17  ;;  %14436 = vrot.lane.b32.xlu0 %v25859_v62, %s20188_s17 }
 0x66a   :  { %v25990_v27 = vpop.permute.xlu1 %11896  ;;  %v25992_v4 = vpop.permute.xlu0 %11448 }
 0x66b   :  { %29452 = vst [vmem:[#allocation62_spill] sm:$0xff] %v25990_v27  ;;  %29453 = vst [vmem:[#allocation23_spill] sm:$0xff] %v25992_v4  ;;  %v11929_v31 = vsel %vm669_vm1, %v25990_v27, %v11835_v56  ;;  %v11481_v29 = vsel %vm217_vm0, %v25992_v4, %v25893_v12  ;;  %v18852_v56 = vld [vmem:[%s28625_s1 + $0x2] ss:$8 sm:$0xf0] }
 0x66c   :  { %v12106_v47 = vmul.f32 %v11949_v18, %v11929_v31  ;;  %v11658_v57 = vmul.f32 %v11501_v13, %v11481_v29  ;;  %14442 = vrot.lane.b32.xlu1 %v25964_v61, %s20188_s17  ;;  %14440 = vrot.lane.b32.xlu0 %v25873_v22, %s20188_s17  ;;  %v18875_v12 = vld [vmem:[%s28625_s1 + $0x3] ss:$8 sm:$0xf]  ;;  %v26023_v11 = vor.u32 %v18852_v56, %v18851_v15 }
 0x66d   :  { %v26025_v21 = vor.u32 %v18876_v14, %v18875_v12  ;;  %v29457_v56 = vld [vmem:[#allocation13_spill] sm:$0xff]  ;;  %v26047_v12 = vmax.f32 %v10899_v2, 0.0 }
 0x66e   :  { %v19966_v40 = vpack.c.bf16 %v12106_v47, %v11658_v57  ;;  %v12285_v63 = vpop.permute.xlu1 %12284  ;;  %v26011_v0 = vpop.permute.xlu0 %12282  ;;  %v12401_v29 = vrot.slane %v26023_v11, %v29058_v28  ;;  %v29456_v57 = vld [vmem:[#allocation36_spill] sm:$0xff]  ;;  %v12405_v44 = vrot.slane %v26023_v11, %v29449_v9 }
 0x66f   :  { %v12849_v36 = vrot.slane %v26025_v21, %v29058_v28  ;;  %v10938_v15 = vadd.f32 %v29456_v57, %v25746_v52  ;;  %v12376_v14 = vsel %vm1122_vm2, %v26011_v0, %v12285_v63  ;;  %v12853_v35 = vrot.slane %v26025_v21, %v29449_v9 }
 0x670   :  { %14886 = vrot.lane.b32.xlu1 %v25875_v24, %s20189_s18  ;;  %14884 = vrot.lane.b32.xlu0 %v25859_v62, %s20189_s18  ;;  %v12555_v2 = vmul.f32 %v12401_v29, %v12376_v14  ;;  %v12857_v26 = vrot.slane %v26025_v21, %v29448_v39  ;;  %v12845_v5 = vrot.slane %v26025_v21, %v20925_v10 }
 0x671   :  { %16293 = vmatpush1.bf16.msra.mxu0 %v19966_v40  ;;  %v10940_v40 = vadd.f32 %v29457_v56, %v25746_v52  ;;  %v26072_v54 = vmax.f32 %v10938_v15, 0.0  ;;  %v12397_v15 = vrot.slane %v26023_v11, %v20925_v10 }
 0x672   :  { %v26029_v17 = vpop.f32.mrb[60].mxu0  ;;  %v26031_v45 = vpop.permute.xlu1 %12288 }
 0x673   :  { %29454 = vst [vmem:[#allocation58_spill] sm:$0xff] %v26029_v17  ;;  %v12287_v18 = vpop.permute.xlu0 %12286  ;;  %v26033_v13 = vpop.f32.mrb[61].mxu0  ;;  %29458 = vst [vmem:[#allocation80_spill] sm:$0xff] %v26072_v54  ;;  %v26074_v27 = vmax.f32 %v10940_v40, 0.0 }
 0x674   :  { %29455 = vst [vmem:[#allocation10_spill] sm:$0xff] %v26033_v13  ;;  %14890 = vrot.lane.b32.xlu1 %v25964_v61, %s20189_s18  ;;  %14888 = vrot.lane.b32.xlu0 %v25873_v22, %s20189_s18  ;;  %v11310_v31 = vpop.f32.mrb[62].mxu0  ;;  %v12374_v29 = vsel %vm1122_vm2, %v12287_v18, %v26031_v45 }
 0x675   :  { %v11311_v47 = vpop.f32.mrb[63].mxu0  ;;  %29459 = vst [vmem:[#allocation79_spill] sm:$0xff] %v26074_v27 }
 0x676   :  { %v12733_v31 = vpop.permute.xlu1 %12732  ;;  %v12409_v47 = vrot.slane %v26023_v11, %v29448_v39 }
 0x677   :  { %v12731_v60 = vpop.permute.xlu0 %12730 }
 0x678   :  { %v12824_v57 = vsel %vm1575_vm3, %v12731_v60, %v12733_v31  ;;  %11404 = vrot.lane.b32.xlu1 %v26047_v12, %s20182_s13  ;;  %11402 = vrot.lane.b32.xlu0 %v25964_v61, %s20182_s13  ;;  %v12557_v13 = vmul.f32 %v12409_v47, %v12374_v29 }
 0x679   :  { %v13003_v56 = vmul.f32 %v12849_v36, %v12824_v57  ;;  %v12375_v36 = vsel %vm1122_vm2, %v12285_v63, %v12287_v18  ;;  %v26096_v63 = vor.u32 %v18924_v3, %v18923_v1  ;;  %v18899_v18 = vld [vmem:[%s28625_s1 + $0x4] ss:$8 sm:$0xf] }
 0x67a   :  { %v26081_v14 = vpop.permute.xlu1 %12736 }
 0x67b   :  { %v12735_v57 = vpop.permute.xlu0 %12734  ;;  %v19999_v4 = vpack.c.bf16 %v13003_v56, %v12555_v2  ;;  %v18900_v2 = vld [vmem:[%s28625_s1 + $0x4] ss:$8 sm:$0xf0]  ;;  %v12556_v56 = vmul.f32 %v12405_v44, %v12375_v36 }
 0x67c   :  { %v12822_v40 = vsel %vm1575_vm3, %v12735_v57, %v26081_v14  ;;  %v12823_v32 = vsel %vm1575_vm3, %v12733_v31, %v12735_v57  ;;  %11408 = vrot.lane.b32.xlu1 %v26074_v27, %s20182_s13  ;;  %11406 = vrot.lane.b32.xlu0 %v26072_v54, %s20182_s13  ;;  %v26111_v48 = vor.u32 %v18900_v2, %v18899_v18 }
 0x67d   :  { %v13004_v17 = vmul.f32 %v12853_v35, %v12823_v32  ;;  %v13005_v31 = vmul.f32 %v12857_v26, %v12822_v40  ;;  %16294 = vmatprep.subr.bf16.mxu0 %v19999_v4 }
 0x67e   :  { %v26104_v57 = vpop.permute.xlu1 %12792  ;;  %v13201_v44 = vrot.slane %v26111_v48, %v29058_v28  ;;  %v13197_v40 = vrot.slane %v26111_v48, %v20925_v10 }
 0x67f   :  { %29460 = vst [vmem:[#allocation21_spill] sm:$0xff] %v26104_v57  ;;  %v20000_v41 = vpack.c.bf16 %v13004_v17, %v12556_v56  ;;  %v12825_v3 = vsel %vm1575_vm3, %v26104_v57, %v12731_v60  ;;  %v26109_v1 = vpop.permute.xlu0 %12344  ;;  %v20001_v16 = vpack.c.bf16 %v13005_v31, %v12557_v13  ;;  %v13649_v60 = vrot.slane %v26096_v63, %v29058_v28 }
 0x680   :  { %29461 = vst [vmem:[#allocation81_spill] sm:$0xff] %v26109_v1  ;;  %v13002_v59 = vmul.f32 %v12845_v5, %v12825_v3  ;;  %v12377_v35 = vsel %vm1122_vm2, %v26109_v1, %v26011_v0  ;;  %11852 = vrot.lane.b32.xlu1 %v26047_v12, %s20183_s30  ;;  %11850 = vrot.lane.b32.xlu0 %v25964_v61, %s20183_s30 }
 0x681   :  { %v12554_v26 = vmul.f32 %v12397_v15, %v12377_v35  ;;  %16335 = vmatprep.subr.bf16.mxu1 %v20001_v16  ;;  %v13205_v16 = vrot.slane %v26111_v48, %v29449_v9  ;;  %v13209_v17 = vrot.slane %v26111_v48, %v29448_v39  ;;  %v13355_v47 = vmul.f32 %v13201_v44, %v25754_v43 }
 0x682   :  { %16336 = vmatpush1.bf16.msra.mxu1 %v20000_v41  ;;  %v13535_v32 = vpop.permute.xlu1 %13534  ;;  %v13653_v41 = vrot.slane %v26096_v63, %v29449_v9  ;;  %v13645_v3 = vrot.slane %v26096_v63, %v20925_v10 }
 0x683   :  { %v19998_v5 = vpack.c.bf16 %v13002_v59, %v12554_v26  ;;  %v13533_v4 = vpop.permute.xlu0 %13532  ;;  %v13657_v59 = vrot.slane %v26096_v63, %v29448_v39  ;;  %v13356_v18 = vmul.f32 %v13205_v16, %v25762_v49  ;;  %v13357_v49 = vmul.f32 %v13209_v17, %v25764_v30  ;;  %v18947_v30 = vld [vmem:[%s28625_s1 + $0x6] ss:$8 sm:$0xf]  ;;  %v18971_v17 = vld [vmem:[%s28625_s1 + $0x7] ss:$8 sm:$0xf] }
 0x684   :  { %v13623_v0 = vsel %vm2384_vm4, %v13533_v4, %v13535_v32  ;;  %11856 = vrot.lane.b32.xlu1 %v26074_v27, %s20183_s30  ;;  %11854 = vrot.lane.b32.xlu0 %v26072_v54, %s20183_s30  ;;  %v18948_v16 = vld [vmem:[%s28625_s1 + $0x6] ss:$8 sm:$0xf0] }
 0x685   :  { %v13803_v13 = vmul.f32 %v13649_v60, %v13623_v0  ;;  %16295 = vmatpush1.bf16.msra.mxu0 %v19998_v5  ;;  %v13354_v5 = vmul.f32 %v13197_v40, %v25750_v51  ;;  %v18972_v51 = vld [vmem:[%s28625_s1 + $0x7] ss:$8 sm:$0xf0] }
 0x686   :  { %v26140_v29 = vpop.permute.xlu1 %13538 }
 0x687   :  { %v13537_v36 = vpop.permute.xlu0 %13536  ;;  %v20031_v15 = vpack.c.bf16 %v13803_v13, %v13355_v47  ;;  %v26187_v47 = vor.u32 %v18972_v51, %v18971_v17 }
 0x688   :  { %v13621_v2 = vsel %vm2384_vm4, %v13537_v36, %v26140_v29  ;;  %v13622_v56 = vsel %vm2384_vm4, %v13535_v32, %v13537_v36  ;;  %12300 = vrot.lane.b32.xlu1 %v26047_v12, %s20184_s0  ;;  %12298 = vrot.lane.b32.xlu0 %v25964_v61, %s20184_s0 }
 0x689   :  { %v13804_v43 = vmul.f32 %v13653_v41, %v13622_v56  ;;  %v13805_v31 = vmul.f32 %v13657_v59, %v13621_v2  ;;  %16296 = vmatprep.subr.bf16.mxu0 %v20031_v15  ;;  %v26185_v59 = vor.u32 %v18948_v16, %v18947_v30  ;;  %v10979_v2 = vadd.f32 %v25834_v50, %v25746_v52 }
 0x68a   :  { %v26157_v35 = vpop.permute.xlu1 %13980 }
 0x68b   :  { %v20032_v26 = vpack.c.bf16 %v13804_v43, %v13356_v18  ;;  %v26159_v60 = vpop.permute.xlu0 %13530  ;;  %v20033_v44 = vpack.c.bf16 %v13805_v31, %v13357_v49  ;;  %v14097_v40 = vrot.slane %v26185_v59, %v29058_v28  ;;  %v14545_v18 = vrot.slane %v26187_v47, %v29058_v28 }
 0x68c   :  { %29462 = vst [vmem:[#allocation38_spill] sm:$0xff] %v26159_v60  ;;  %v13624_v32 = vsel %vm2384_vm4, %v26159_v60, %v13533_v4  ;;  %12304 = vrot.lane.b32.xlu1 %v26074_v27, %s20184_s0  ;;  %12302 = vrot.lane.b32.xlu0 %v26072_v54, %s20184_s0  ;;  %v14549_v49 = vrot.slane %v26187_v47, %v29449_v9  ;;  %v26221_v30 = vmax.f32 %v10979_v2, 0.0 }
 0x68d   :  { %v13802_v0 = vmul.f32 %v13645_v3, %v13624_v32  ;;  %16337 = vmatprep.subr.bf16.mxu1 %v20033_v44  ;;  %v14105_v3 = vrot.slane %v26185_v59, %v29448_v39  ;;  %v14101_v16 = vrot.slane %v26185_v59, %v29449_v9 }
 0x68e   :  { %16338 = vmatpush1.bf16.msra.mxu1 %v20032_v26  ;;  %v13985_v4 = vpop.permute.xlu1 %13984 }
 0x68f   :  { %v20030_v13 = vpack.c.bf16 %v13802_v0, %v13354_v5  ;;  %v13983_v41 = vpop.permute.xlu0 %13982  ;;  %v14553_v5 = vrot.slane %v26187_v47, %v29448_v39  ;;  %v18995_v0 = vld [vmem:[%s28625_s1 + $0x100] ss:$8 sm:$0xf] }
 0x690   :  { %12748 = vrot.lane.b32.xlu1 %v26047_v12, %s20185_s14  ;;  %12746 = vrot.lane.b32.xlu0 %v25964_v61, %s20185_s14  ;;  %v14071_v56 = vsel %vm2837_vm5, %v26157_v35, %v13983_v41 }
 0x691   :  { %16297 = vmatpush1.bf16.msra.mxu0 %v20030_v13  ;;  %v14251_v50 = vmul.f32 %v14097_v40, %v14071_v56  ;;  %v18996_v13 = vld [vmem:[%s28625_s1 + $0x100] ss:$8 sm:$0xf0]  ;;  %v14070_v40 = vsel %vm2837_vm5, %v13983_v41, %v13985_v4 }
 0x692   :  { %v14429_v36 = vpop.permute.xlu1 %14428  ;;  %v26248_v41 = vor.u32 %v18996_v13, %v18995_v0 }
 0x693   :  { %v26189_v15 = vpop.permute.xlu0 %13986 }
 0x694   :  { %12752 = vrot.lane.b32.xlu1 %v26074_v27, %s20185_s14  ;;  %12750 = vrot.lane.b32.xlu0 %v26072_v54, %s20185_s14  ;;  %v14069_v17 = vsel %vm2837_vm5, %v13985_v4, %v26189_v15  ;;  %v14541_v4 = vrot.slane %v26187_v47, %v20925_v10 }
 0x695   :  { %v14253_v60 = vmul.f32 %v14105_v3, %v14069_v17 }
 0x696   :  { %v14433_v43 = vpop.permute.xlu1 %14432 }
 0x697   :  { %v14431_v31 = vpop.permute.xlu0 %14430 }
 0x698   :  { %v14519_v26 = vsel %vm3290_vm6, %v14429_v36, %v14431_v31  ;;  %13550 = vrot.lane.b32.xlu1 %v26072_v54, %s20186_s15  ;;  %13548 = vrot.lane.b32.xlu0 %v26047_v12, %s20186_s15  ;;  %v14518_v44 = vsel %vm3290_vm6, %v14431_v31, %v14433_v43  ;;  %v14093_v31 = vrot.slane %v26185_v59, %v20925_v10 }
 0x699   :  { %v14699_v32 = vmul.f32 %v14545_v18, %v14519_v26  ;;  %v14700_v56 = vmul.f32 %v14549_v49, %v14518_v44  ;;  %v14252_v49 = vmul.f32 %v14101_v16, %v14070_v40 }
 0x69a   :  { %v26228_v51 = vpop.permute.xlu1 %13978 }
 0x69b   :  { %29463 = vst [vmem:[#allocation78_spill] sm:$0xff] %v26228_v51  ;;  %v26235_v18 = vpop.permute.xlu0 %14434  ;;  %v20063_v2 = vpack.c.bf16 %v14699_v32, %v14251_v50  ;;  %v20064_v1 = vpack.c.bf16 %v14700_v56, %v14252_v49  ;;  %v15001_v56 = vrot.slane %v26248_v41, %v29448_v39 }
 0x69c   :  { %v14517_v26 = vsel %vm3290_vm6, %v14433_v43, %v26235_v18  ;;  %13554 = vrot.lane.b32.xlu1 %v26221_v30, %s20186_s15  ;;  %13552 = vrot.lane.b32.xlu0 %v26074_v27, %s20186_s15  ;;  %v14072_v43 = vsel %vm2837_vm5, %v26228_v51, %v26157_v35  ;;  %v14989_v35 = vrot.slane %v26248_v41, %v20925_v10 }
 0x69d   :  { %v14701_v57 = vmul.f32 %v14553_v5, %v14517_v26  ;;  %16298 = vmatprep.subr.bf16.mxu0 %v20063_v2  ;;  %v14250_v5 = vmul.f32 %v14093_v31, %v14072_v43 }
 0x69e   :  { %v26254_v50 = vpop.permute.xlu1 %14874 }
 0x69f   :  { %29464 = vst [vmem:[#allocation85_spill] sm:$0xff] %v26254_v50  ;;  %v26256_v44 = vpop.permute.xlu0 %14426  ;;  %v20065_v32 = vpack.c.bf16 %v14701_v57, %v14253_v60  ;;  %v14993_v57 = vrot.slane %v26248_v41, %v29058_v28 }
 0x6a0   :  { %29465 = vst [vmem:[#allocation40_spill] sm:$0xff] %v26256_v44  ;;  %v14520_v3 = vsel %vm3290_vm6, %v26256_v44, %v14429_v36  ;;  %13998 = vrot.lane.b32.xlu1 %v26072_v54, %s20187_s16  ;;  %13996 = vrot.lane.b32.xlu0 %v26047_v12, %s20187_s16 }
 0x6a1   :  { %v14698_v0 = vmul.f32 %v14541_v4, %v14520_v3  ;;  %16339 = vmatprep.subr.bf16.mxu1 %v20065_v32 }
 0x6a2   :  { %16340 = vmatpush1.bf16.msra.mxu1 %v20064_v1  ;;  %v14879_v60 = vpop.permute.xlu1 %14878  ;;  %v14997_v1 = vrot.slane %v26248_v41, %v29449_v9 }
 0x6a3   :  { %v20062_v16 = vpack.c.bf16 %v14698_v0, %v14250_v5  ;;  %v14877_v17 = vpop.permute.xlu0 %14876 }
 0x6a4   :  { %v14967_v36 = vsel %vm3743_vm7, %v14877_v17, %v14879_v60  ;;  %v14968_v13 = vsel %vm3743_vm7, %v26254_v50, %v14877_v17  ;;  %14002 = vrot.lane.b32.xlu1 %v26221_v30, %s20187_s16  ;;  %14000 = vrot.lane.b32.xlu0 %v26074_v27, %s20187_s16 }
 0x6a5   :  { %v15146_v40 = vmul.f32 %v14989_v35, %v14968_v13  ;;  %v15147_v2 = vmul.f32 %v14993_v57, %v14967_v36  ;;  %16299 = vmatpush1.bf16.msra.mxu0 %v20062_v16  ;;  %v26298_v57 = vld [vmem:[%s28632_s8] sm:$0xf] }
 0x6a6   :  { %v26282_v31 = vpop.permute.xlu1 %14882 }
 0x6a7   :  { %v20094_v26 = vpack.c.bf16 %v15146_v40, %v15146_v40  ;;  %v20095_v4 = vpack.c.bf16 %v15147_v2, %v15147_v2  ;;  %v14881_v49 = vpop.permute.xlu0 %14880  ;;  %v11517_v2 = vrot.slane %v25911_v7, %v29287_v6 }
 0x6a8   :  { %v14965_v43 = vsel %vm3743_vm7, %v14881_v49, %v26282_v31  ;;  %v14966_v32 = vsel %vm3743_vm7, %v14879_v60, %v14881_v49  ;;  %14446 = vrot.lane.b32.xlu1 %v26072_v54, %s20188_s17  ;;  %14444 = vrot.lane.b32.xlu0 %v26047_v12, %s20188_s17 }
 0x6a9   :  { %v15148_v3 = vmul.f32 %v14997_v1, %v14966_v32  ;;  %v15149_v5 = vmul.f32 %v15001_v56, %v14965_v43  ;;  %19179 = vmatprep.subr.msk.bf16.mxu0 %vm5007_vm8, %v20095_v4  ;;  %v16197_v0 = vsel %vm5007_vm8, %v20094_v26, 0  ;;  %v11521_v1 = vrot.slane %v25911_v7, %v29289_v34 }
 0x6aa   :  { %16301 = vmatpush1.bf16.msra.mxu0 %v16197_v0  ;;  %v11397_v35 = vpop.permute.xlu1 %11396  ;;  %v11965_v56 = vrot.slane %v25921_v42, %v29287_v6  ;;  %v11969_v26 = vrot.slane %v25921_v42, %v29289_v34  ;;  %v10981_v4 = vadd.f32 %v25836_v19, %v25746_v52  ;;  %v29467_v0 = vld [vmem:[#allocation54_spill] sm:$0xff] }
 0x6ab   :  { %v20096_v60 = vpack.c.bf16 %v15148_v3, %v15148_v3  ;;  %v20097_v16 = vpack.c.bf16 %v15149_v5, %v15149_v5  ;;  %v11395_v17 = vpop.permute.xlu0 %11394  ;;  %v29466_v3 = vld [vmem:[#allocation28_spill] sm:$0xff]  ;;  %v11973_v50 = vrot.slane %v25921_v42, %v29467_v0 }
 0x6ac   :  { %14450 = vrot.lane.b32.xlu1 %v26221_v30, %s20188_s17  ;;  %14448 = vrot.lane.b32.xlu0 %v26074_v27, %s20188_s17  ;;  %v11476_v49 = vsel %vm217_vm0, %v11395_v17, %v11397_v35  ;;  %v11477_v43 = vsel %vm217_vm0, %v25919_v33, %v11395_v17  ;;  %v11020_v5 = vadd.f32 %v29466_v3, %v25746_v52  ;;  %v26354_v55 = vmax.f32 %v10981_v4, 0.0 }
 0x6ad   :  { %19181 = vmatprep.subr.msk.bf16.mxu1 %vm5007_vm8, %v20097_v16  ;;  %v16203_v36 = vsel %vm5007_vm8, %v20096_v60, 0  ;;  %19180 = vmatmul.mubr.msk.bf16.vlgmr.msra.gmra.mrb[64].mxu0 %vm5003_vm9, %v26298_v57  ;;  %v11525_v60 = vrot.slane %v25911_v7, %v29467_v0  ;;  %v29468_v16 = vld [vmem:[#allocation57_spill] sm:$0xff]  ;;  %v11662_v17 = vmul.f32 %v11517_v2, %v11477_v43  ;;  %v11663_v3 = vmul.f32 %v11521_v1, %v11476_v49 }
 0x6ae   :  { %16342 = vmatpush1.bf16.msra.mxu1 %v16203_v36  ;;  %v26308_v13 = vpop.permute.xlu1 %11400  ;;  %16406 = vmatprep.mubr.bf16.mxu0 %v29025_v46  ;;  %v11529_v36 = vrot.slane %v25911_v7, %v29468_v16  ;;  %v11977_v7 = vrot.slane %v25921_v42, %v29468_v16 }
 0x6af   :  { %v11399_v40 = vpop.permute.xlu0 %11398 }
 0x6b0   :  { %14894 = vrot.lane.b32.xlu1 %v26072_v54, %s20189_s18  ;;  %14892 = vrot.lane.b32.xlu0 %v26047_v12, %s20189_s18 }
 0x6b1   :  { %19182 = vmatmul.mubr.msk.bf16.vlgmr.msra.gmra.mrb[64].mxu1 %vm5003_vm9, %v26298_v57 }
 0x6b2   :  { %v11845_v32 = vpop.permute.xlu1 %11844  ;;  %16447 = vmatprep.mubr.bf16.mxu1 %v29025_v46 }
 0x6b3   :  { %v11843_v19 = vpop.permute.xlu0 %11842 }
 0x6b4   :  { %v11924_v44 = vsel %vm669_vm1, %v11843_v19, %v11845_v32  ;;  %v11925_v33 = vsel %vm669_vm1, %v25953_v38, %v11843_v19  ;;  %14898 = vrot.lane.b32.xlu1 %v26221_v30, %s20189_s18  ;;  %14896 = vrot.lane.b32.xlu0 %v26074_v27, %s20189_s18  ;;  %v11474_v38 = vsel %vm217_vm0, %v11399_v40, %v26308_v13 }
 0x6b5   :  { %v12110_v51 = vmul.f32 %v11965_v56, %v11925_v33  ;;  %v12111_v53 = vmul.f32 %v11969_v26, %v11924_v44  ;;  %v11475_v19 = vsel %vm217_vm0, %v11397_v35, %v11399_v40  ;;  %v11665_v35 = vmul.f32 %v11529_v36, %v11474_v38 }
 0x6b6   :  { %v26361_v27 = vpop.permute.xlu1 %11848  ;;  %v11664_v1 = vmul.f32 %v11525_v60, %v11475_v19  ;;  %v12865_v60 = vrot.slane %v26025_v21, %v29289_v34  ;;  %v12869_v19 = vrot.slane %v26025_v21, %v29467_v0 }
 0x6b7   :  { %v19970_v54 = vpack.c.bf16 %v12110_v51, %v11662_v17  ;;  %v11847_v42 = vpop.permute.xlu0 %11846  ;;  %v19971_v2 = vpack.c.bf16 %v12111_v53, %v11663_v3  ;;  %v26372_v51 = vmax.f32 %v11020_v5, 0.0  ;;  %v26374_v53 = vmax.f32 %v11022_v20, 0.0 }
 0x6b8   :  { %v11922_v44 = vsel %vm669_vm1, %v11847_v42, %v26361_v27  ;;  %v11923_v58 = vsel %vm669_vm1, %v11845_v32, %v11847_v42  ;;  %11412 = vrot.lane.b32.xlu1 %v26354_v55, %s20182_s13  ;;  %11410 = vrot.lane.b32.xlu0 %v26221_v30, %s20182_s13  ;;  %v12417_v20 = vrot.slane %v26023_v11, %v29289_v34 }
 0x6b9   :  { %v12112_v40 = vmul.f32 %v11973_v50, %v11923_v58  ;;  %v12113_v56 = vmul.f32 %v11977_v7, %v11922_v44  ;;  %16374 = vmatprep.subr.bf16.mxu0 %v19971_v2  ;;  %v12861_v5 = vrot.slane %v26025_v21, %v29287_v6  ;;  %v12421_v17 = vrot.slane %v26023_v11, %v29467_v0 }
 0x6ba   :  { %16375 = vmatpush1.bf16.msra.mxu0 %v19970_v54  ;;  %v12293_v26 = vpop.permute.xlu1 %12292  ;;  %v12413_v54 = vrot.slane %v26023_v11, %v29287_v6  ;;  %v12425_v3 = vrot.slane %v26023_v11, %v29468_v16  ;;  %v12873_v11 = vrot.slane %v26025_v21, %v29468_v16  ;;  %v13661_v21 = vrot.slane %v26096_v63, %v29287_v6 }
 0x6bb   :  { %v19972_v4 = vpack.c.bf16 %v12112_v40, %v11664_v1  ;;  %v12291_v49 = vpop.permute.xlu0 %12290  ;;  %v19973_v43 = vpack.c.bf16 %v12113_v56, %v11665_v35  ;;  %v13213_v56 = vrot.slane %v26111_v48, %v29287_v6 }
 0x6bc   :  { %11416 = vrot.lane.b32.xlu1 %v26374_v53, %s20182_s13  ;;  %11414 = vrot.lane.b32.xlu0 %v26372_v51, %s20182_s13  ;;  %v12372_v36 = vsel %vm1122_vm2, %v12291_v49, %v12293_v26  ;;  %v12373_v33 = vsel %vm1122_vm2, %v26031_v45, %v12291_v49 }
 0x6bd   :  { %16415 = vmatprep.subr.bf16.mxu1 %v19973_v43  ;;  %v12558_v45 = vmul.f32 %v12413_v54, %v12373_v33  ;;  %v12559_v44 = vmul.f32 %v12417_v20, %v12372_v36  ;;  %v13217_v54 = vrot.slane %v26111_v48, %v29289_v34 }
 0x6be   :  { %16416 = vmatpush1.bf16.msra.mxu1 %v19972_v4  ;;  %v26380_v50 = vpop.permute.xlu1 %12296 }
 0x6bf   :  { %v12295_v32 = vpop.permute.xlu0 %12294 }
 0x6c0   :  { %11860 = vrot.lane.b32.xlu1 %v26354_v55, %s20183_s30  ;;  %11858 = vrot.lane.b32.xlu0 %v26221_v30, %s20183_s30  ;;  %v12370_v35 = vsel %vm1122_vm2, %v12295_v32, %v26380_v50 }
 0x6c2   :  { %v12741_v7 = vpop.permute.xlu1 %12740 }
 0x6c3   :  { %v12739_v38 = vpop.permute.xlu0 %12738 }
 0x6c4   :  { %v12820_v42 = vsel %vm1575_vm3, %v12739_v38, %v12741_v7  ;;  %v12821_v2 = vsel %vm1575_vm3, %v26081_v14, %v12739_v38  ;;  %11864 = vrot.lane.b32.xlu1 %v26374_v53, %s20183_s30  ;;  %11862 = vrot.lane.b32.xlu0 %v26372_v51, %s20183_s30  ;;  %v12371_v14 = vsel %vm1122_vm2, %v12293_v26, %v12295_v32 }
 0x6c5   :  { %v13006_v58 = vmul.f32 %v12861_v5, %v12821_v2  ;;  %v13007_v1 = vmul.f32 %v12865_v60, %v12820_v42  ;;  %v13665_v32 = vrot.slane %v26096_v63, %v29289_v34  ;;  %v12560_v5 = vmul.f32 %v12421_v17, %v12371_v14 }
 0x6c6   :  { %v26421_v40 = vpop.permute.xlu1 %12744  ;;  %v12561_v60 = vmul.f32 %v12425_v3, %v12370_v35  ;;  %v13221_v42 = vrot.slane %v26111_v48, %v29467_v0  ;;  %v13358_v2 = vmul.f32 %v13213_v56, %v25816_v23  ;;  %v13359_v23 = vmul.f32 %v13217_v54, %v25859_v62 }
 0x6c7   :  { %v20002_v4 = vpack.c.bf16 %v13006_v58, %v12558_v45  ;;  %v12743_v49 = vpop.permute.xlu0 %12742  ;;  %v20003_v43 = vpack.c.bf16 %v13007_v1, %v12559_v44  ;;  %v13225_v58 = vrot.slane %v26111_v48, %v29468_v16  ;;  %v13669_v48 = vrot.slane %v26096_v63, %v29467_v0 }
 0x6c8   :  { %v12818_v20 = vsel %vm1575_vm3, %v12743_v49, %v26421_v40  ;;  %v12819_v26 = vsel %vm1575_vm3, %v12741_v7, %v12743_v49  ;;  %12308 = vrot.lane.b32.xlu1 %v26354_v55, %s20184_s0  ;;  %12306 = vrot.lane.b32.xlu0 %v26221_v30, %s20184_s0  ;;  %v13673_v1 = vrot.slane %v26096_v63, %v29468_v16 }
 0x6c9   :  { %v13008_v36 = vmul.f32 %v12869_v19, %v12819_v26  ;;  %v13009_v33 = vmul.f32 %v12873_v11, %v12818_v20  ;;  %16376 = vmatprep.subr.bf16.mxu0 %v20003_v43  ;;  %v13360_v63 = vmul.f32 %v13221_v42, %v25875_v24  ;;  %v11061_v24 = vadd.f32 %v25861_v25, %v25746_v52 }
 0x6ca   :  { %16377 = vmatpush1.bf16.msra.mxu0 %v20002_v4  ;;  %v13543_v38 = vpop.permute.xlu1 %13542  ;;  %v14561_v25 = vrot.slane %v26187_v47, %v29289_v34 }
 0x6cb   :  { %v20004_v7 = vpack.c.bf16 %v13008_v36, %v12560_v5  ;;  %v13541_v45 = vpop.permute.xlu0 %13540  ;;  %v20005_v44 = vpack.c.bf16 %v13009_v33, %v12561_v60  ;;  %v14113_v36 = vrot.slane %v26185_v59, %v29289_v34  ;;  %v14557_v33 = vrot.slane %v26187_v47, %v29287_v6 }
 0x6cc   :  { %v13619_v17 = vsel %vm2384_vm4, %v13541_v45, %v13543_v38  ;;  %v13620_v3 = vsel %vm2384_vm4, %v26140_v29, %v13541_v45  ;;  %12312 = vrot.lane.b32.xlu1 %v26374_v53, %s20184_s0  ;;  %12310 = vrot.lane.b32.xlu0 %v26372_v51, %s20184_s0  ;;  %v14117_v45 = vrot.slane %v26185_v59, %v29467_v0 }
 0x6cd   :  { %v13806_v19 = vmul.f32 %v13661_v21, %v13620_v3  ;;  %v13807_v11 = vmul.f32 %v13665_v32, %v13619_v17  ;;  %16417 = vmatprep.subr.bf16.mxu1 %v20005_v44  ;;  %v13361_v21 = vmul.f32 %v13225_v58, %v25873_v22  ;;  %v14109_v22 = vrot.slane %v26185_v59, %v29287_v6 }
 0x6ce   :  { %16418 = vmatpush1.bf16.msra.mxu1 %v20004_v7  ;;  %v26459_v35 = vpop.permute.xlu1 %13546  ;;  %v14121_v44 = vrot.slane %v26185_v59, %v29468_v16  ;;  %v14565_v17 = vrot.slane %v26187_v47, %v29467_v0  ;;  %v14569_v59 = vrot.slane %v26187_v47, %v29468_v16 }
 0x6cf   :  { %v20034_v29 = vpack.c.bf16 %v13806_v19, %v13358_v2  ;;  %v13545_v14 = vpop.permute.xlu0 %13544  ;;  %v20035_v56 = vpack.c.bf16 %v13807_v11, %v13359_v23 }
 0x6d0   :  { %v13617_v4 = vsel %vm2384_vm4, %v13545_v14, %v26459_v35  ;;  %v13618_v62 = vsel %vm2384_vm4, %v13543_v38, %v13545_v14  ;;  %12756 = vrot.lane.b32.xlu1 %v26354_v55, %s20185_s14  ;;  %12754 = vrot.lane.b32.xlu0 %v26221_v30, %s20185_s14  ;;  %v26492_v38 = vmax.f32 %v11061_v24, 0.0 }
 0x6d1   :  { %v13808_v49 = vmul.f32 %v13669_v48, %v13618_v62  ;;  %v13809_v43 = vmul.f32 %v13673_v1, %v13617_v4  ;;  %16378 = vmatprep.subr.bf16.mxu0 %v20035_v56  ;;  %v15005_v62 = vrot.slane %v26248_v41, %v29287_v6 }
 0x6d2   :  { %16379 = vmatpush1.bf16.msra.mxu0 %v20034_v29  ;;  %v13991_v54 = vpop.permute.xlu1 %13990 }
 0x6d3   :  { %v20036_v20 = vpack.c.bf16 %v13808_v49, %v13360_v63  ;;  %v13989_v26 = vpop.permute.xlu0 %13988  ;;  %v20037_v32 = vpack.c.bf16 %v13809_v43, %v13361_v21  ;;  %v15009_v49 = vrot.slane %v26248_v41, %v29289_v34 }
 0x6d4   :  { %12760 = vrot.lane.b32.xlu1 %v26374_v53, %s20185_s14  ;;  %12758 = vrot.lane.b32.xlu0 %v26372_v51, %s20185_s14  ;;  %v14067_v42 = vsel %vm2837_vm5, %v13989_v26, %v13991_v54  ;;  %v14068_v7 = vsel %vm2837_vm5, %v26189_v15, %v13989_v26 }
 0x6d5   :  { %16419 = vmatprep.subr.bf16.mxu1 %v20037_v32  ;;  %v14254_v15 = vmul.f32 %v14109_v22, %v14068_v7  ;;  %v14255_v19 = vmul.f32 %v14113_v36, %v14067_v42  ;;  %v15013_v42 = vrot.slane %v26248_v41, %v29467_v0  ;;  %v15017_v7 = vrot.slane %v26248_v41, %v29468_v16  ;;  %v18805_v41 = vld [vmem:[%s28625_s1 + $0x40] ss:$8 sm:$0xf] }
 0x6d6   :  { %16420 = vmatpush1.bf16.msra.mxu1 %v20036_v20  ;;  %v26478_v5 = vpop.permute.xlu1 %13994 }
 0x6d7   :  { %v13993_v60 = vpop.permute.xlu0 %13992 }
 0x6d8   :  { %13558 = vrot.lane.b32.xlu1 %v26372_v51, %s20186_s15  ;;  %13556 = vrot.lane.b32.xlu0 %v26354_v55, %s20186_s15  ;;  %v14065_v1 = vsel %vm2837_vm5, %v13993_v60, %v26478_v5 }
 0x6d9   :  { %v14257_v21 = vmul.f32 %v14121_v44, %v14065_v1 }
 0x6da   :  { %v14439_v2 = vpop.permute.xlu1 %14438 }
 0x6db   :  { %v14437_v58 = vpop.permute.xlu0 %14436 }
 0x6dc   :  { %v14515_v3 = vsel %vm3290_vm6, %v14437_v58, %v14439_v2  ;;  %v14516_v23 = vsel %vm3290_vm6, %v26235_v18, %v14437_v58  ;;  %13562 = vrot.lane.b32.xlu1 %v26492_v38, %s20186_s15  ;;  %13560 = vrot.lane.b32.xlu0 %v26374_v53, %s20186_s15  ;;  %v14066_v18 = vsel %vm2837_vm5, %v13991_v54, %v13993_v60 }
 0x6dd   :  { %v14702_v11 = vmul.f32 %v14557_v33, %v14516_v23  ;;  %v14703_v48 = vmul.f32 %v14561_v25, %v14515_v3  ;;  %v14256_v43 = vmul.f32 %v14117_v45, %v14066_v18 }
 0x6de   :  { %v26521_v29 = vpop.permute.xlu1 %14442 }
 0x6df   :  { %v20066_v14 = vpack.c.bf16 %v14702_v11, %v14254_v15  ;;  %v14441_v56 = vpop.permute.xlu0 %14440  ;;  %v20067_v4 = vpack.c.bf16 %v14703_v48, %v14255_v19  ;;  %v18806_v15 = vld [vmem:[%s28625_s1 + $0x40] ss:$8 sm:$0xf0]  ;;  %v18829_v11 = vld [vmem:[%s28625_s1 + $0x41] ss:$8 sm:$0xf] }
 0x6e0   :  { %v14513_v47 = vsel %vm3290_vm6, %v14441_v56, %v26521_v29  ;;  %v14514_v63 = vsel %vm3290_vm6, %v14439_v2, %v14441_v56  ;;  %14006 = vrot.lane.b32.xlu1 %v26372_v51, %s20187_s16  ;;  %14004 = vrot.lane.b32.xlu0 %v26354_v55, %s20187_s16  ;;  %v18830_v48 = vld [vmem:[%s28625_s1 + $0x41] ss:$8 sm:$0xf0]  ;;  %v26578_v56 = vor.u32 %v18806_v15, %v18805_v41 }
 0x6e1   :  { %v14704_v54 = vmul.f32 %v14565_v17, %v14514_v63  ;;  %v14705_v20 = vmul.f32 %v14569_v59, %v14513_v47  ;;  %16380 = vmatprep.subr.bf16.mxu0 %v20067_v4 }
 0x6e2   :  { %16381 = vmatpush1.bf16.msra.mxu0 %v20066_v14  ;;  %v14887_v26 = vpop.permute.xlu1 %14886 }
 0x6e3   :  { %v20068_v32 = vpack.c.bf16 %v14704_v54, %v14256_v43  ;;  %v14885_v24 = vpop.permute.xlu0 %14884  ;;  %v20069_v60 = vpack.c.bf16 %v14705_v20, %v14257_v21  ;;  %v11537_v43 = vrot.slane %v26578_v56, %v29058_v28  ;;  %v29470_v20 = vld [vmem:[#allocation33_spill] sm:$0xff] }
 0x6e4   :  { %v14963_v22 = vsel %vm3743_vm7, %v14885_v24, %v14887_v26  ;;  %v14964_v36 = vsel %vm3743_vm7, %v26282_v31, %v14885_v24  ;;  %14010 = vrot.lane.b32.xlu1 %v26492_v38, %s20187_s16  ;;  %14008 = vrot.lane.b32.xlu0 %v26374_v53, %s20187_s16 }
 0x6e5   :  { %v15150_v33 = vmul.f32 %v15005_v62, %v14964_v36  ;;  %v15151_v25 = vmul.f32 %v15009_v49, %v14963_v22  ;;  %16421 = vmatprep.subr.bf16.mxu1 %v20069_v60  ;;  %v26582_v62 = vor.u32 %v18830_v48, %v18829_v11  ;;  %v11533_v49 = vrot.slane %v26578_v56, %v20925_v10  ;;  %v29471_v36 = vld [vmem:[#allocation42_spill] sm:$0xff] }
 0x6e6   :  { %16422 = vmatpush1.bf16.msra.mxu1 %v20068_v32  ;;  %v26549_v2 = vpop.permute.xlu1 %14890  ;;  %v11063_v32 = vadd.f32 %v25867_v8, %v25746_v52 }
 0x6e7   :  { %v20098_v45 = vpack.c.bf16 %v15150_v33, %v15150_v33  ;;  %v20099_v31 = vpack.c.bf16 %v15151_v25, %v15151_v25  ;;  %v14889_v44 = vpop.permute.xlu0 %14888  ;;  %v11981_v21 = vrot.slane %v26582_v62, %v20925_v10  ;;  %v11985_v54 = vrot.slane %v26582_v62, %v29058_v28 }
 0x6e8   :  { %v14961_v58 = vsel %vm3743_vm7, %v14889_v44, %v26549_v2  ;;  %v14962_v17 = vsel %vm3743_vm7, %v14887_v26, %v14889_v44  ;;  %14454 = vrot.lane.b32.xlu1 %v26372_v51, %s20188_s17  ;;  %14452 = vrot.lane.b32.xlu0 %v26354_v55, %s20188_s17  ;;  %v11102_v26 = vadd.f32 %v29470_v20, %v25746_v52 }
 0x6e9   :  { %v15152_v3 = vmul.f32 %v15013_v42, %v14962_v17  ;;  %v15153_v23 = vmul.f32 %v15017_v7, %v14961_v58  ;;  %19183 = vmatprep.subr.msk.bf16.mxu0 %vm5007_vm8, %v20099_v31  ;;  %v16209_v59 = vsel %vm5007_vm8, %v20098_v45, 0  ;;  %v11104_v33 = vadd.f32 %v29471_v36, %v25746_v52 }
 0x6ea   :  { %16383 = vmatpush1.bf16.msra.mxu0 %v16209_v59  ;;  %v11405_v19 = vpop.permute.xlu1 %11404  ;;  %v11541_v25 = vrot.slane %v26578_v56, %v29449_v9  ;;  %v11545_v42 = vrot.slane %v26578_v56, %v29448_v39  ;;  %v11989_v7 = vrot.slane %v26582_v62, %v29449_v9  ;;  %v11993_v31 = vrot.slane %v26582_v62, %v29448_v39 }
 0x6eb   :  { %v20100_v1 = vpack.c.bf16 %v15152_v3, %v15152_v3  ;;  %v20101_v18 = vpack.c.bf16 %v15153_v23, %v15153_v23  ;;  %v11403_v14 = vpop.permute.xlu0 %11402  ;;  %v26632_v3 = vmax.f32 %v11063_v32, 0.0  ;;  %v18878_v32 = vld [vmem:[%s28625_s1 + $0x43] ss:$8 sm:$0xf0] }
 0x6ec   :  { %14458 = vrot.lane.b32.xlu1 %v26492_v38, %s20188_s17  ;;  %14456 = vrot.lane.b32.xlu0 %v26374_v53, %s20188_s17  ;;  %v11472_v24 = vsel %vm217_vm0, %v11403_v14, %v11405_v19  ;;  %v11473_v60 = vsel %vm217_vm0, %v26308_v13, %v11403_v14 }
 0x6ed   :  { %19185 = vmatprep.subr.msk.bf16.mxu1 %vm5007_vm8, %v20101_v18  ;;  %v16215_v4 = vsel %vm5007_vm8, %v20100_v1, 0  ;;  %19184 = vmatmul.mubr.msk.bf16.vlgmr.msra.gmra.mrb[68].mxu0 %vm5003_vm9, %v26298_v57  ;;  %v11666_v44 = vmul.f32 %v11533_v49, %v11473_v60  ;;  %v11667_v58 = vmul.f32 %v11537_v43, %v11472_v24  ;;  %v26641_v1 = vmax.f32 %v11102_v26, 0.0  ;;  %v18877_v26 = vld [vmem:[%s28625_s1 + $0x43] ss:$8 sm:$0xf] }
 0x6ee   :  { %16424 = vmatpush1.bf16.msra.mxu1 %v16215_v4  ;;  %v26586_v47 = vpop.permute.xlu1 %11408  ;;  %16488 = vmatprep.mubr.bf16.mxu0 %v29025_v46  ;;  %v26643_v18 = vmax.f32 %v11104_v33, 0.0  ;;  %v26672_v33 = vor.u32 %v18878_v32, %v18877_v26 }
 0x6ef   :  { %v11407_v63 = vpop.permute.xlu0 %11406 }
 0x6f0   :  { %14902 = vrot.lane.b32.xlu1 %v26372_v51, %s20189_s18  ;;  %14900 = vrot.lane.b32.xlu0 %v26354_v55, %s20189_s18  ;;  %v11470_v23 = vsel %vm217_vm0, %v11407_v63, %v26586_v47 }
 0x6f1   :  { %19186 = vmatmul.mubr.msk.bf16.vlgmr.msra.gmra.mrb[68].mxu1 %vm5003_vm9, %v26298_v57 }
 0x6f2   :  { %v11853_v22 = vpop.permute.xlu1 %11852  ;;  %16529 = vmatprep.mubr.bf16.mxu1 %v29025_v46 }
 0x6f3   :  { %v11851_v8 = vpop.permute.xlu0 %11850 }
 0x6f4   :  { %v11920_v45 = vsel %vm669_vm1, %v11851_v8, %v11853_v22  ;;  %v11921_v13 = vsel %vm669_vm1, %v26361_v27, %v11851_v8  ;;  %14906 = vrot.lane.b32.xlu1 %v26492_v38, %s20189_s18  ;;  %14904 = vrot.lane.b32.xlu0 %v26374_v53, %s20189_s18  ;;  %v11471_v27 = vsel %vm217_vm0, %v11405_v19, %v11407_v63  ;;  %v18901_v8 = vld [vmem:[%s28625_s1 + $0x44] ss:$8 sm:$0xf] }
 0x6f5   :  { %v12114_v17 = vmul.f32 %v11981_v21, %v11921_v13  ;;  %v12115_v41 = vmul.f32 %v11985_v54, %v11920_v45  ;;  %v11668_v19 = vmul.f32 %v11541_v25, %v11471_v27  ;;  %v11669_v63 = vmul.f32 %v11545_v42, %v11470_v23  ;;  %v18853_v21 = vld [vmem:[%s28625_s1 + $0x42] ss:$8 sm:$0xf]  ;;  %v18925_v45 = vld [vmem:[%s28625_s1 + $0x45] ss:$8 sm:$0xf] }
 0x6f6   :  { %v26639_v59 = vpop.permute.xlu1 %11856  ;;  %v18854_v54 = vld [vmem:[%s28625_s1 + $0x42] ss:$8 sm:$0xf0]  ;;  %v18926_v13 = vld [vmem:[%s28625_s1 + $0x45] ss:$8 sm:$0xf0] }
 0x6f7   :  { %v19974_v15 = vpack.c.bf16 %v12114_v17, %v11666_v44  ;;  %v11855_v11 = vpop.permute.xlu0 %11854  ;;  %v19975_v48 = vpack.c.bf16 %v12115_v41, %v11667_v58  ;;  %v26670_v36 = vor.u32 %v18854_v54, %v18853_v21  ;;  %v12877_v58 = vrot.slane %v26672_v33, %v20925_v10 }
 0x6f8   :  { %v11918_v14 = vsel %vm669_vm1, %v11855_v11, %v26639_v59  ;;  %v11919_v4 = vsel %vm669_vm1, %v11853_v22, %v11855_v11  ;;  %11420 = vrot.lane.b32.xlu1 %v26632_v3, %s20182_s13  ;;  %11418 = vrot.lane.b32.xlu0 %v26492_v38, %s20182_s13  ;;  %v12881_v17 = vrot.slane %v26672_v33, %v29058_v28 }
 0x6f9   :  { %v12116_v49 = vmul.f32 %v11989_v7, %v11919_v4  ;;  %v12117_v43 = vmul.f32 %v11993_v31, %v11918_v14  ;;  %16456 = vmatprep.subr.bf16.mxu0 %v19975_v48  ;;  %v18902_v7 = vld [vmem:[%s28625_s1 + $0x44] ss:$8 sm:$0xf0]  ;;  %v12429_v31 = vrot.slane %v26670_v36, %v20925_v10  ;;  %v12433_v44 = vrot.slane %v26670_v36, %v29058_v28 }
 0x6fa   :  { %16457 = vmatpush1.bf16.msra.mxu0 %v19974_v15  ;;  %v12301_v20 = vpop.permute.xlu1 %12300  ;;  %v26705_v15 = vor.u32 %v18902_v7, %v18901_v8  ;;  %v12437_v11 = vrot.slane %v26670_v36, %v29449_v9  ;;  %v12441_v48 = vrot.slane %v26670_v36, %v29448_v39  ;;  %v12885_v4 = vrot.slane %v26672_v33, %v29449_v9 }
 0x6fb   :  { %v19976_v24 = vpack.c.bf16 %v12116_v49, %v11668_v19  ;;  %v12299_v60 = vpop.permute.xlu0 %12298  ;;  %v19977_v22 = vpack.c.bf16 %v12117_v43, %v11669_v63  ;;  %v26713_v19 = vor.u32 %v18926_v13, %v18925_v45  ;;  %v12889_v49 = vrot.slane %v26672_v33, %v29448_v39 }
 0x6fc   :  { %11424 = vrot.lane.b32.xlu1 %v26643_v18, %s20182_s13  ;;  %11422 = vrot.lane.b32.xlu0 %v26641_v1, %s20182_s13  ;;  %v12368_v41 = vsel %vm1122_vm2, %v12299_v60, %v12301_v20  ;;  %v12369_v23 = vsel %vm1122_vm2, %v26380_v50, %v12299_v60  ;;  %v13229_v60 = vrot.slane %v26705_v15, %v20925_v10 }
 0x6fd   :  { %16497 = vmatprep.subr.bf16.mxu1 %v19977_v22  ;;  %v12562_v43 = vmul.f32 %v12429_v31, %v12369_v23  ;;  %v12563_v21 = vmul.f32 %v12433_v44, %v12368_v41  ;;  %v13677_v45 = vrot.slane %v26713_v19, %v20925_v10  ;;  %v13233_v13 = vrot.slane %v26705_v15, %v29058_v28 }
 0x6fe   :  { %16498 = vmatpush1.bf16.msra.mxu1 %v19976_v24  ;;  %v26674_v25 = vpop.permute.xlu1 %12304 }
 0x6ff   :  { %v12303_v42 = vpop.permute.xlu0 %12302 }
 0x700   :  { %11868 = vrot.lane.b32.xlu1 %v26632_v3, %s20183_s30  ;;  %11866 = vrot.lane.b32.xlu0 %v26492_v38, %s20183_s30  ;;  %v12366_v32 = vsel %vm1122_vm2, %v12303_v42, %v26674_v25 }
 0x702   :  { %v12749_v27 = vpop.permute.xlu1 %12748 }
 0x703   :  { %v12747_v14 = vpop.permute.xlu0 %12746 }
 0x704   :  { %v12816_v63 = vsel %vm1575_vm3, %v12747_v14, %v12749_v27  ;;  %v12817_v50 = vsel %vm1575_vm3, %v26421_v40, %v12747_v14  ;;  %11872 = vrot.lane.b32.xlu1 %v26643_v18, %s20183_s30  ;;  %11870 = vrot.lane.b32.xlu0 %v26641_v1, %s20183_s30  ;;  %v12367_v40 = vsel %vm1122_vm2, %v12301_v20, %v12303_v42 }
 0x705   :  { %v13010_v54 = vmul.f32 %v12877_v58, %v12817_v50  ;;  %v13011_v26 = vmul.f32 %v12881_v17, %v12816_v63  ;;  %v13681_v42 = vrot.slane %v26713_v19, %v29058_v28  ;;  %v12564_v44 = vmul.f32 %v12437_v11, %v12367_v40 }
 0x706   :  { %v26731_v24 = vpop.permute.xlu1 %12752  ;;  %v12565_v58 = vmul.f32 %v12441_v48, %v12366_v32  ;;  %v13237_v14 = vrot.slane %v26705_v15, %v29449_v9  ;;  %v13362_v63 = vmul.f32 %v13229_v60, %v25964_v61  ;;  %v13363_v61 = vmul.f32 %v13233_v13, %v26047_v12 }
 0x707   :  { %v20006_v22 = vpack.c.bf16 %v13010_v54, %v12562_v43  ;;  %v12751_v8 = vpop.permute.xlu0 %12750  ;;  %v20007_v7 = vpack.c.bf16 %v13011_v26, %v12563_v21  ;;  %v13241_v21 = vrot.slane %v26705_v15, %v29448_v39  ;;  %v13685_v54 = vrot.slane %v26713_v19, %v29449_v9 }
 0x708   :  { %v12814_v31 = vsel %vm1575_vm3, %v12751_v8, %v26731_v24  ;;  %v12815_v20 = vsel %vm1575_vm3, %v12749_v27, %v12751_v8  ;;  %12316 = vrot.lane.b32.xlu1 %v26632_v3, %s20184_s0  ;;  %12314 = vrot.lane.b32.xlu0 %v26492_v38, %s20184_s0  ;;  %v13689_v26 = vrot.slane %v26713_v19, %v29448_v39  ;;  %v29472_v8 = vld [vmem:[#allocation80_spill] sm:$0xff] }
 0x709   :  { %v13012_v17 = vmul.f32 %v12885_v4, %v12815_v20  ;;  %v13013_v41 = vmul.f32 %v12889_v49, %v12814_v31  ;;  %16458 = vmatprep.subr.bf16.mxu0 %v20007_v7  ;;  %v13364_v7 = vmul.f32 %v13237_v14, %v29472_v8  ;;  %v18949_v31 = vld [vmem:[%s28625_s1 + $0x46] ss:$8 sm:$0xf] }
 0x70a   :  { %16459 = vmatpush1.bf16.msra.mxu0 %v20006_v22  ;;  %v13551_v23 = vpop.permute.xlu1 %13550  ;;  %v18950_v20 = vld [vmem:[%s28625_s1 + $0x46] ss:$8 sm:$0xf0] }
 0x70b   :  { %v20008_v27 = vpack.c.bf16 %v13012_v17, %v12564_v44  ;;  %v13549_v50 = vpop.permute.xlu0 %13548  ;;  %v20009_v43 = vpack.c.bf16 %v13013_v41, %v12565_v58  ;;  %v18973_v17 = vld [vmem:[%s28625_s1 + $0x47] ss:$8 sm:$0xf] }
 0x70c   :  { %v13615_v11 = vsel %vm2384_vm4, %v13549_v50, %v13551_v23  ;;  %v13616_v48 = vsel %vm2384_vm4, %v26459_v35, %v13549_v50  ;;  %12320 = vrot.lane.b32.xlu1 %v26643_v18, %s20184_s0  ;;  %12318 = vrot.lane.b32.xlu0 %v26641_v1, %s20184_s0  ;;  %v18974_v41 = vld [vmem:[%s28625_s1 + $0x47] ss:$8 sm:$0xf0] }
 0x70d   :  { %v13810_v4 = vmul.f32 %v13677_v45, %v13616_v48  ;;  %v13811_v49 = vmul.f32 %v13681_v42, %v13615_v11  ;;  %16499 = vmatprep.subr.bf16.mxu1 %v20009_v43  ;;  %v29473_v42 = vld [vmem:[#allocation79_spill] sm:$0xff]  ;;  %v26800_v50 = vor.u32 %v18974_v41, %v18973_v17 }
 0x70e   :  { %16500 = vmatpush1.bf16.msra.mxu1 %v20008_v27  ;;  %v26769_v32 = vpop.permute.xlu1 %13554  ;;  %v13365_v44 = vmul.f32 %v13241_v21, %v29473_v42  ;;  %v29474_v43 = vld [vmem:[#allocation71_spill] sm:$0xff] }
 0x70f   :  { %v20038_v35 = vpack.c.bf16 %v13810_v4, %v13362_v63  ;;  %v13553_v40 = vpop.permute.xlu0 %13552  ;;  %v20039_v60 = vpack.c.bf16 %v13811_v49, %v13363_v61  ;;  %v26798_v63 = vor.u32 %v18950_v20, %v18949_v31  ;;  %v11143_v21 = vadd.f32 %v29474_v43, %v25746_v52  ;;  %v18997_v61 = vld [vmem:[%s28625_s1 + $0x140] ss:$8 sm:$0xf] }
 0x710   :  { %v13613_v22 = vsel %vm2384_vm4, %v13553_v40, %v26769_v32  ;;  %v13614_v12 = vsel %vm2384_vm4, %v13551_v23, %v13553_v40  ;;  %12764 = vrot.lane.b32.xlu1 %v26632_v3, %s20185_s14  ;;  %12762 = vrot.lane.b32.xlu0 %v26492_v38, %s20185_s14  ;;  %v18998_v4 = vld [vmem:[%s28625_s1 + $0x140] ss:$8 sm:$0xf0]  ;;  %v14585_v42 = vrot.slane %v26800_v50, %v29448_v39 }
 0x711   :  { %v13812_v45 = vmul.f32 %v13685_v54, %v13614_v12  ;;  %v13813_v13 = vmul.f32 %v13689_v26, %v13613_v22  ;;  %16460 = vmatprep.subr.bf16.mxu0 %v20039_v60  ;;  %v14125_v49 = vrot.slane %v26798_v63, %v20925_v10  ;;  %v14129_v54 = vrot.slane %v26798_v63, %v29058_v28 }
 0x712   :  { %16461 = vmatpush1.bf16.msra.mxu0 %v20038_v35  ;;  %v13999_v58 = vpop.permute.xlu1 %13998  ;;  %v14573_v26 = vrot.slane %v26800_v50, %v20925_v10  ;;  %v14577_v35 = vrot.slane %v26800_v50, %v29058_v28  ;;  %v26824_v40 = vmax.f32 %v11143_v21, 0.0  ;;  %v14133_v8 = vrot.slane %v26798_v63, %v29449_v9 }
 0x713   :  { %v20040_v23 = vpack.c.bf16 %v13812_v45, %v13364_v7  ;;  %v13997_v14 = vpop.permute.xlu0 %13996  ;;  %v20041_v27 = vpack.c.bf16 %v13813_v13, %v13365_v44  ;;  %v14137_v7 = vrot.slane %v26798_v63, %v29448_v39  ;;  %v14581_v13 = vrot.slane %v26800_v50, %v29449_v9 }
 0x714   :  { %12768 = vrot.lane.b32.xlu1 %v26643_v18, %s20185_s14  ;;  %12766 = vrot.lane.b32.xlu0 %v26641_v1, %s20185_s14  ;;  %v14063_v60 = vsel %vm2837_vm5, %v13997_v14, %v13999_v58  ;;  %v14064_v22 = vsel %vm2837_vm5, %v26478_v5, %v13997_v14  ;;  %v26837_v31 = vor.u32 %v18998_v4, %v18997_v61 }
 0x715   :  { %16501 = vmatprep.subr.bf16.mxu1 %v20041_v27  ;;  %v14258_v44 = vmul.f32 %v14125_v49, %v14064_v22  ;;  %v14259_v17 = vmul.f32 %v14129_v54, %v14063_v60 }
 0x716   :  { %16502 = vmatpush1.bf16.msra.mxu1 %v20040_v23  ;;  %v26804_v11 = vpop.permute.xlu1 %14002  ;;  %v15021_v4 = vrot.slane %v26837_v31, %v20925_v10 }
 0x717   :  { %v14001_v48 = vpop.permute.xlu0 %14000 }
 0x718   :  { %13566 = vrot.lane.b32.xlu1 %v26641_v1, %s20186_s15  ;;  %13564 = vrot.lane.b32.xlu0 %v26632_v3, %s20186_s15  ;;  %v14061_v14 = vsel %vm2837_vm5, %v14001_v48, %v26804_v11 }
 0x71a   :  { %v14447_v12 = vpop.permute.xlu1 %14446 }
 0x71b   :  { %v14445_v45 = vpop.permute.xlu0 %14444 }
 0x71c   :  { %v14511_v20 = vsel %vm3290_vm6, %v14445_v45, %v14447_v12  ;;  %v14512_v5 = vsel %vm3290_vm6, %v26521_v29, %v14445_v45  ;;  %13570 = vrot.lane.b32.xlu1 %v26824_v40, %s20186_s15  ;;  %13568 = vrot.lane.b32.xlu0 %v26643_v18, %s20186_s15  ;;  %v14062_v29 = vsel %vm2837_vm5, %v13999_v58, %v14001_v48 }
 0x71d   :  { %v14706_v41 = vmul.f32 %v14573_v26, %v14512_v5  ;;  %v14707_v23 = vmul.f32 %v14577_v35, %v14511_v20  ;;  %v15025_v58 = vrot.slane %v26837_v31, %v29058_v28  ;;  %v14260_v48 = vmul.f32 %v14133_v8, %v14062_v29 }
 0x71e   :  { %v26855_v27 = vpop.permute.xlu1 %14450  ;;  %v14261_v26 = vmul.f32 %v14137_v7, %v14061_v14 }
 0x71f   :  { %v20070_v43 = vpack.c.bf16 %v14706_v41, %v14258_v44  ;;  %v14449_v21 = vpop.permute.xlu0 %14448  ;;  %v20071_v61 = vpack.c.bf16 %v14707_v23, %v14259_v17 }
 0x720   :  { %v14509_v49 = vsel %vm3290_vm6, %v14449_v21, %v26855_v27  ;;  %v14510_v54 = vsel %vm3290_vm6, %v14447_v12, %v14449_v21  ;;  %14014 = vrot.lane.b32.xlu1 %v26641_v1, %s20187_s16  ;;  %14012 = vrot.lane.b32.xlu0 %v26632_v3, %s20187_s16 }
 0x721   :  { %v14708_v35 = vmul.f32 %v14581_v13, %v14510_v54  ;;  %v14709_v60 = vmul.f32 %v14585_v42, %v14509_v49  ;;  %16462 = vmatprep.subr.bf16.mxu0 %v20071_v61  ;;  %v15029_v13 = vrot.slane %v26837_v31, %v29449_v9  ;;  %v15033_v42 = vrot.slane %v26837_v31, %v29448_v39 }
 0x722   :  { %16463 = vmatpush1.bf16.msra.mxu0 %v20070_v43  ;;  %v14895_v22 = vpop.permute.xlu1 %14894 }
 0x723   :  { %v20072_v45 = vpack.c.bf16 %v14708_v35, %v14260_v48  ;;  %v14893_v20 = vpop.permute.xlu0 %14892  ;;  %v20073_v5 = vpack.c.bf16 %v14709_v60, %v14261_v26  ;;  %v11549_v60 = vrot.slane %v26578_v56, %v29287_v6 }
 0x724   :  { %v14959_v12 = vsel %vm3743_vm7, %v14893_v20, %v14895_v22  ;;  %v14960_v44 = vsel %vm3743_vm7, %v26549_v2, %v14893_v20  ;;  %14018 = vrot.lane.b32.xlu1 %v26824_v40, %s20187_s16  ;;  %14016 = vrot.lane.b32.xlu0 %v26643_v18, %s20187_s16  ;;  %v12001_v20 = vrot.slane %v26582_v62, %v29289_v34 }
 0x725   :  { %v15154_v8 = vmul.f32 %v15021_v4, %v14960_v44  ;;  %v15155_v7 = vmul.f32 %v15025_v58, %v14959_v12  ;;  %16503 = vmatprep.subr.bf16.mxu1 %v20073_v5  ;;  %v29475_v5 = vld [vmem:[#allocation39_spill] sm:$0xff] }
 0x726   :  { %16504 = vmatpush1.bf16.msra.mxu1 %v20072_v45  ;;  %v26883_v17 = vpop.permute.xlu1 %14898  ;;  %v11997_v45 = vrot.slane %v26582_v62, %v29287_v6  ;;  %v11145_v12 = vadd.f32 %v29475_v5, %v25746_v52 }
 0x727   :  { %v20102_v41 = vpack.c.bf16 %v15154_v8, %v15154_v8  ;;  %v20103_v2 = vpack.c.bf16 %v15155_v7, %v15155_v7  ;;  %v14897_v23 = vpop.permute.xlu0 %14896 }
 0x728   :  { %v14957_v14 = vsel %vm3743_vm7, %v14897_v23, %v26883_v17  ;;  %v14958_v29 = vsel %vm3743_vm7, %v14895_v22, %v14897_v23  ;;  %14462 = vrot.lane.b32.xlu1 %v26641_v1, %s20188_s17  ;;  %14460 = vrot.lane.b32.xlu0 %v26632_v3, %s20188_s17  ;;  %v11553_v22 = vrot.slane %v26578_v56, %v29289_v34 }
 0x729   :  { %v15156_v43 = vmul.f32 %v15029_v13, %v14958_v29  ;;  %v15157_v21 = vmul.f32 %v15033_v42, %v14957_v14  ;;  %19187 = vmatprep.subr.msk.bf16.mxu0 %vm5007_vm8, %v20103_v2  ;;  %v16221_v61 = vsel %vm5007_vm8, %v20102_v41, 0  ;;  %v29476_v13 = vld [vmem:[#allocation15_spill] sm:$0xff]  ;;  %v11557_v41 = vrot.slane %v26578_v56, %v29467_v0 }
 0x72a   :  { %16465 = vmatpush1.bf16.msra.mxu0 %v16221_v61  ;;  %v11413_v4 = vpop.permute.xlu1 %11412  ;;  %v11184_v42 = vadd.f32 %v29476_v13, %v25746_v52  ;;  %v12005_v23 = vrot.slane %v26582_v62, %v29467_v0 }
 0x72b   :  { %v20104_v49 = vpack.c.bf16 %v15156_v43, %v15156_v43  ;;  %v20105_v54 = vpack.c.bf16 %v15157_v21, %v15157_v21  ;;  %v11411_v58 = vpop.permute.xlu0 %11410 }
 0x72c   :  { %14466 = vrot.lane.b32.xlu1 %v26824_v40, %s20188_s17  ;;  %14464 = vrot.lane.b32.xlu0 %v26643_v18, %s20188_s17  ;;  %v11468_v44 = vsel %vm217_vm0, %v11411_v58, %v11413_v4  ;;  %v11469_v8 = vsel %vm217_vm0, %v26586_v47, %v11411_v58  ;;  %v26950_v58 = vmax.f32 %v11145_v12, 0.0 }
 0x72d   :  { %19189 = vmatprep.subr.msk.bf16.mxu1 %vm5007_vm8, %v20105_v54  ;;  %v16227_v48 = vsel %vm5007_vm8, %v20104_v49, 0  ;;  %19188 = vmatmul.mubr.msk.bf16.vlgmr.msra.gmra.mrb[72].mxu0 %vm5003_vm9, %v26298_v57  ;;  %v11670_v29 = vmul.f32 %v11549_v60, %v11469_v8  ;;  %v11671_v43 = vmul.f32 %v11553_v22, %v11468_v44  ;;  %v29477_v49 = vld [vmem:[#allocation65_spill] sm:$0xff]  ;;  %v26968_v44 = vmax.f32 %v11184_v42, 0.0 }
 0x72e   :  { %16506 = vmatpush1.bf16.msra.mxu1 %v16227_v48  ;;  %v26904_v26 = vpop.permute.xlu1 %11416  ;;  %16570 = vmatprep.mubr.bf16.mxu0 %v29025_v46  ;;  %v11186_v54 = vadd.f32 %v29477_v49, %v25746_v52  ;;  %v12445_v42 = vrot.slane %v26670_v36, %v29287_v6  ;;  %v12453_v49 = vrot.slane %v26670_v36, %v29467_v0 }
 0x72f   :  { %v11415_v35 = vpop.permute.xlu0 %11414 }
 0x730   :  { %14910 = vrot.lane.b32.xlu1 %v26641_v1, %s20189_s18  ;;  %14908 = vrot.lane.b32.xlu0 %v26632_v3, %s20189_s18  ;;  %v11467_v48 = vsel %vm217_vm0, %v11413_v4, %v11415_v35  ;;  %v26970_v8 = vmax.f32 %v11186_v54, 0.0  ;;  %v12457_v54 = vrot.slane %v26670_v36, %v29468_v16 }
 0x731   :  { %19190 = vmatmul.mubr.msk.bf16.vlgmr.msra.gmra.mrb[72].mxu1 %vm5003_vm9, %v26298_v57  ;;  %v11561_v57 = vrot.slane %v26578_v56, %v29468_v16  ;;  %v12009_v56 = vrot.slane %v26582_v62, %v29468_v16 }
 0x732   :  { %v11861_v7 = vpop.permute.xlu1 %11860  ;;  %16611 = vmatprep.mubr.bf16.mxu1 %v29025_v46 }
 0x733   :  { %v11859_v2 = vpop.permute.xlu0 %11858 }
 0x734   :  { %v11916_v14 = vsel %vm669_vm1, %v11859_v2, %v11861_v7  ;;  %v11917_v47 = vsel %vm669_vm1, %v26639_v59, %v11859_v2  ;;  %14914 = vrot.lane.b32.xlu1 %v26824_v40, %s20189_s18  ;;  %14912 = vrot.lane.b32.xlu0 %v26643_v18, %s20189_s18  ;;  %v11466_v59 = vsel %vm217_vm0, %v11415_v35, %v26904_v26 }
 0x735   :  { %v12118_v21 = vmul.f32 %v11997_v45, %v11917_v47  ;;  %v12119_v61 = vmul.f32 %v12001_v20, %v11916_v14  ;;  %v11672_v20 = vmul.f32 %v11557_v41, %v11467_v48  ;;  %v11673_v4 = vmul.f32 %v11561_v57, %v11466_v59 }
 0x736   :  { %v26957_v5 = vpop.permute.xlu1 %11864  ;;  %v12901_v48 = vrot.slane %v26672_v33, %v29467_v0 }
 0x737   :  { %v19978_v13 = vpack.c.bf16 %v12118_v21, %v11670_v29  ;;  %v11863_v62 = vpop.permute.xlu0 %11862  ;;  %v19979_v60 = vpack.c.bf16 %v12119_v61, %v11671_v43  ;;  %v12897_v29 = vrot.slane %v26672_v33, %v29289_v34 }
 0x738   :  { %v11914_v22 = vsel %vm669_vm1, %v11863_v62, %v26957_v5  ;;  %v11915_v45 = vsel %vm669_vm1, %v11861_v7, %v11863_v62  ;;  %11428 = vrot.lane.b32.xlu1 %v26950_v58, %s20182_s13  ;;  %11426 = vrot.lane.b32.xlu0 %v26824_v40, %s20182_s13 }
 0x739   :  { %v12120_v35 = vmul.f32 %v12005_v23, %v11915_v45  ;;  %v12121_v12 = vmul.f32 %v12009_v56, %v11914_v22  ;;  %16538 = vmatprep.subr.bf16.mxu0 %v19979_v60  ;;  %v12449_v23 = vrot.slane %v26670_v36, %v29289_v34  ;;  %v12893_v56 = vrot.slane %v26672_v33, %v29287_v6 }
 0x73a   :  { %16539 = vmatpush1.bf16.msra.mxu0 %v19978_v13  ;;  %v12309_v2 = vpop.permute.xlu1 %12308  ;;  %v12905_v36 = vrot.slane %v26672_v33, %v29468_v16  ;;  %v13693_v33 = vrot.slane %v26713_v19, %v29287_v6 }
 0x73b   :  { %v19980_v14 = vpack.c.bf16 %v12120_v35, %v11672_v20  ;;  %v12307_v47 = vpop.permute.xlu0 %12306  ;;  %v19981_v7 = vpack.c.bf16 %v12121_v12, %v11673_v4  ;;  %v13245_v35 = vrot.slane %v26705_v15, %v29287_v6 }
 0x73c   :  { %11432 = vrot.lane.b32.xlu1 %v26970_v8, %s20182_s13  ;;  %11430 = vrot.lane.b32.xlu0 %v26968_v44, %s20182_s13  ;;  %v12364_v43 = vsel %vm1122_vm2, %v12307_v47, %v12309_v2  ;;  %v12365_v21 = vsel %vm1122_vm2, %v26674_v25, %v12307_v47 }
 0x73d   :  { %16579 = vmatprep.subr.bf16.mxu1 %v19981_v7  ;;  %v12566_v25 = vmul.f32 %v12445_v42, %v12365_v21  ;;  %v12567_v60 = vmul.f32 %v12449_v23, %v12364_v43  ;;  %v13249_v7 = vrot.slane %v26705_v15, %v29289_v34 }
 0x73e   :  { %16580 = vmatpush1.bf16.msra.mxu1 %v19980_v14  ;;  %v26976_v41 = vpop.permute.xlu1 %12312 }
 0x73f   :  { %v12311_v57 = vpop.permute.xlu0 %12310 }
 0x740   :  { %11876 = vrot.lane.b32.xlu1 %v26950_v58, %s20183_s30  ;;  %11874 = vrot.lane.b32.xlu0 %v26824_v40, %s20183_s30  ;;  %v12362_v20 = vsel %vm1122_vm2, %v12311_v57, %v26976_v41 }
 0x742   :  { %v12757_v61 = vpop.permute.xlu1 %12756 }
 0x743   :  { %v12755_v59 = vpop.permute.xlu0 %12754 }
 0x744   :  { %v12812_v13 = vsel %vm1575_vm3, %v12755_v59, %v12757_v61  ;;  %v12813_v62 = vsel %vm1575_vm3, %v26731_v24, %v12755_v59  ;;  %11880 = vrot.lane.b32.xlu1 %v26970_v8, %s20183_s30  ;;  %11878 = vrot.lane.b32.xlu0 %v26968_v44, %s20183_s30  ;;  %v12363_v24 = vsel %vm1122_vm2, %v12309_v2, %v12311_v57 }
 0x745   :  { %v13014_v22 = vmul.f32 %v12893_v56, %v12813_v62  ;;  %v13015_v45 = vmul.f32 %v12897_v29, %v12812_v13  ;;  %v13697_v57 = vrot.slane %v26713_v19, %v29289_v34  ;;  %v12568_v23 = vmul.f32 %v12453_v49, %v12363_v24 }
 0x746   :  { %v27017_v4 = vpop.permute.xlu1 %12760  ;;  %v12569_v56 = vmul.f32 %v12457_v54, %v12362_v20  ;;  %v13253_v59 = vrot.slane %v26705_v15, %v29467_v0  ;;  %v13366_v13 = vmul.f32 %v13245_v35, %v26221_v30  ;;  %v13367_v30 = vmul.f32 %v13249_v7, %v26354_v55 }
 0x747   :  { %v20010_v12 = vpack.c.bf16 %v13014_v22, %v12566_v25  ;;  %v12759_v14 = vpop.permute.xlu0 %12758  ;;  %v20011_v47 = vpack.c.bf16 %v13015_v45, %v12567_v60  ;;  %v13257_v60 = vrot.slane %v26705_v15, %v29468_v16  ;;  %v13701_v15 = vrot.slane %v26713_v19, %v29467_v0 }
 0x748   :  { %v12810_v42 = vsel %vm1575_vm3, %v12759_v14, %v27017_v4  ;;  %v12811_v2 = vsel %vm1575_vm3, %v12757_v61, %v12759_v14  ;;  %12324 = vrot.lane.b32.xlu1 %v26950_v58, %s20184_s0  ;;  %12322 = vrot.lane.b32.xlu0 %v26824_v40, %s20184_s0  ;;  %v13705_v22 = vrot.slane %v26713_v19, %v29468_v16 }
 0x749   :  { %v13016_v29 = vmul.f32 %v12901_v48, %v12811_v2  ;;  %v13017_v43 = vmul.f32 %v12905_v36, %v12810_v42  ;;  %16540 = vmatprep.subr.bf16.mxu0 %v20011_v47  ;;  %v13368_v19 = vmul.f32 %v13253_v59, %v26372_v51  ;;  %v13369_v47 = vmul.f32 %v13257_v60, %v26374_v53 }
 0x74a   :  { %16541 = vmatpush1.bf16.msra.mxu0 %v20010_v12  ;;  %v13559_v21 = vpop.permute.xlu1 %13558  ;;  %v14141_v53 = vrot.slane %v26798_v63, %v29287_v6  ;;  %v14153_v60 = vrot.slane %v26798_v63, %v29468_v16 }
 0x74b   :  { %v20012_v61 = vpack.c.bf16 %v13016_v29, %v12568_v23  ;;  %v13557_v62 = vpop.permute.xlu0 %13556  ;;  %v20013_v25 = vpack.c.bf16 %v13017_v43, %v12569_v56  ;;  %v14145_v29 = vrot.slane %v26798_v63, %v29289_v34  ;;  %v14589_v43 = vrot.slane %v26800_v50, %v29287_v6 }
 0x74c   :  { %v13611_v49 = vsel %vm2384_vm4, %v13557_v62, %v13559_v21  ;;  %v13612_v54 = vsel %vm2384_vm4, %v26769_v32, %v13557_v62  ;;  %12328 = vrot.lane.b32.xlu1 %v26970_v8, %s20184_s0  ;;  %12326 = vrot.lane.b32.xlu0 %v26968_v44, %s20184_s0 }
 0x74d   :  { %v13814_v48 = vmul.f32 %v13693_v33, %v13612_v54  ;;  %v13815_v36 = vmul.f32 %v13697_v57, %v13611_v49  ;;  %16581 = vmatprep.subr.bf16.mxu1 %v20013_v25  ;;  %v29478_v57 = vld [vmem:[#allocation25_spill] sm:$0xff]  ;;  %v14149_v25 = vrot.slane %v26798_v63, %v29467_v0  ;;  %v14597_v54 = vrot.slane %v26800_v50, %v29467_v0 }
 0x74e   :  { %16582 = vmatpush1.bf16.msra.mxu1 %v20012_v61  ;;  %v27055_v45 = vpop.permute.xlu1 %13562  ;;  %v11225_v51 = vadd.f32 %v29478_v57, %v25746_v52  ;;  %v14601_v63 = vrot.slane %v26800_v50, %v29468_v16 }
 0x74f   :  { %v20042_v32 = vpack.c.bf16 %v13814_v48, %v13366_v13  ;;  %v13561_v20 = vpop.permute.xlu0 %13560  ;;  %v20043_v24 = vpack.c.bf16 %v13815_v36, %v13367_v30 }
 0x750   :  { %v13609_v35 = vsel %vm2384_vm4, %v13561_v20, %v27055_v45  ;;  %v13610_v55 = vsel %vm2384_vm4, %v13559_v21, %v13561_v20  ;;  %12772 = vrot.lane.b32.xlu1 %v26950_v58, %s20185_s14  ;;  %12770 = vrot.lane.b32.xlu0 %v26824_v40, %s20185_s14  ;;  %v14593_v21 = vrot.slane %v26800_v50, %v29289_v34  ;;  %v27088_v59 = vmax.f32 %v11225_v51, 0.0 }
 0x751   :  { %v13816_v12 = vmul.f32 %v13701_v15, %v13610_v55  ;;  %v13817_v14 = vmul.f32 %v13705_v22, %v13609_v35  ;;  %16542 = vmatprep.subr.bf16.mxu0 %v20043_v24 }
 0x752   :  { %16543 = vmatpush1.bf16.msra.mxu0 %v20042_v32  ;;  %v14007_v33 = vpop.permute.xlu1 %14006 }
 0x753   :  { %v20044_v7 = vpack.c.bf16 %v13816_v12, %v13368_v19  ;;  %v14005_v42 = vpop.permute.xlu0 %14004  ;;  %v20045_v2 = vpack.c.bf16 %v13817_v14, %v13369_v47  ;;  %v15037_v19 = vrot.slane %v26837_v31, %v29287_v6  ;;  %v15041_v14 = vrot.slane %v26837_v31, %v29289_v34 }
 0x754   :  { %12776 = vrot.lane.b32.xlu1 %v26970_v8, %s20185_s14  ;;  %12774 = vrot.lane.b32.xlu0 %v26968_v44, %s20185_s14  ;;  %v14059_v61 = vsel %vm2837_vm5, %v14005_v42, %v14007_v33  ;;  %v14060_v13 = vsel %vm2837_vm5, %v26804_v11, %v14005_v42 }
 0x755   :  { %16583 = vmatprep.subr.bf16.mxu1 %v20045_v2  ;;  %v14262_v11 = vmul.f32 %v14141_v53, %v14060_v13  ;;  %v14263_v36 = vmul.f32 %v14145_v29, %v14059_v61  ;;  %v15045_v61 = vrot.slane %v26837_v31, %v29467_v0  ;;  %v15049_v13 = vrot.slane %v26837_v31, %v29468_v16  ;;  %v18807_v31 = vld [vmem:[%s28625_s1 + $0x80] ss:$8 sm:$0xf] }
 0x756   :  { %16584 = vmatpush1.bf16.msra.mxu1 %v20044_v7  ;;  %v27074_v23 = vpop.permute.xlu1 %14010 }
 0x757   :  { %v14009_v56 = vpop.permute.xlu0 %14008 }
 0x758   :  { %13574 = vrot.lane.b32.xlu1 %v26968_v44, %s20186_s15  ;;  %13572 = vrot.lane.b32.xlu0 %v26950_v58, %s20186_s15  ;;  %v14057_v32 = vsel %vm2837_vm5, %v14009_v56, %v27074_v23 }
 0x75a   :  { %v14455_v62 = vpop.permute.xlu1 %14454 }
 0x75b   :  { %v14453_v49 = vpop.permute.xlu0 %14452 }
 0x75c   :  { %v14507_v30 = vsel %vm3290_vm6, %v14453_v49, %v14455_v62  ;;  %v14508_v48 = vsel %vm3290_vm6, %v26855_v27, %v14453_v49  ;;  %13578 = vrot.lane.b32.xlu1 %v27088_v59, %s20186_s15  ;;  %13576 = vrot.lane.b32.xlu0 %v26970_v8, %s20186_s15  ;;  %v14058_v27 = vsel %vm2837_vm5, %v14007_v33, %v14009_v56 }
 0x75d   :  { %v14710_v15 = vmul.f32 %v14589_v43, %v14508_v48  ;;  %v14711_v22 = vmul.f32 %v14593_v21, %v14507_v30  ;;  %v14264_v47 = vmul.f32 %v14149_v25, %v14058_v27  ;;  %v14265_v33 = vmul.f32 %v14153_v60, %v14057_v32 }
 0x75e   :  { %v27117_v20 = vpop.permute.xlu1 %14458 }
 0x75f   :  { %v20074_v24 = vpack.c.bf16 %v14710_v15, %v14262_v11  ;;  %v14457_v35 = vpop.permute.xlu0 %14456  ;;  %v20075_v55 = vpack.c.bf16 %v14711_v22, %v14263_v36  ;;  %v18808_v11 = vld [vmem:[%s28625_s1 + $0x80] ss:$8 sm:$0xf0]  ;;  %v18831_v15 = vld [vmem:[%s28625_s1 + $0x81] ss:$8 sm:$0xf] }
 0x760   :  { %v14505_v50 = vsel %vm3290_vm6, %v14457_v35, %v27117_v20  ;;  %v14506_v12 = vsel %vm3290_vm6, %v14455_v62, %v14457_v35  ;;  %14022 = vrot.lane.b32.xlu1 %v26968_v44, %s20187_s16  ;;  %14020 = vrot.lane.b32.xlu0 %v26950_v58, %s20187_s16  ;;  %v18832_v22 = vld [vmem:[%s28625_s1 + $0x81] ss:$8 sm:$0xf0]  ;;  %v27174_v35 = vor.u32 %v18808_v11, %v18807_v31 }
 0x761   :  { %v14712_v7 = vmul.f32 %v14597_v54, %v14506_v12  ;;  %v14713_v42 = vmul.f32 %v14601_v63, %v14505_v50  ;;  %16544 = vmatprep.subr.bf16.mxu0 %v20075_v55  ;;  %v27183_v50 = vld [vmem:[%s28632_s8] sm:$0xf] }
 0x762   :  { %16545 = vmatpush1.bf16.msra.mxu0 %v20074_v24  ;;  %v14903_v2 = vpop.permute.xlu1 %14902 }
 0x763   :  { %v20076_v57 = vpack.c.bf16 %v14712_v7, %v14264_v47  ;;  %v14901_v51 = vpop.permute.xlu0 %14900  ;;  %v20077_v56 = vpack.c.bf16 %v14713_v42, %v14265_v33  ;;  %v11565_v47 = vrot.slane %v27174_v35, %v20925_v10  ;;  %v11569_v33 = vrot.slane %v27174_v35, %v29058_v28 }
 0x764   :  { %v14955_v53 = vsel %vm3743_vm7, %v14901_v51, %v14903_v2  ;;  %v14956_v29 = vsel %vm3743_vm7, %v26883_v17, %v14901_v51  ;;  %14026 = vrot.lane.b32.xlu1 %v27088_v59, %s20187_s16  ;;  %14024 = vrot.lane.b32.xlu0 %v26970_v8, %s20187_s16  ;;  %v29480_v51 = vld [vmem:[#allocation29_spill] sm:$0xff] }
 0x765   :  { %v15158_v43 = vmul.f32 %v15037_v19, %v14956_v29  ;;  %v15159_v21 = vmul.f32 %v15041_v14, %v14955_v53  ;;  %16585 = vmatprep.subr.bf16.mxu1 %v20077_v56  ;;  %v27178_v19 = vor.u32 %v18832_v22, %v18831_v15  ;;  %v11227_v56 = vadd.f32 %v29480_v51, %v25746_v52  ;;  %v18856_v51 = vld [vmem:[%s28625_s1 + $0x82] ss:$8 sm:$0xf0] }
 0x766   :  { %16586 = vmatpush1.bf16.msra.mxu1 %v20076_v57  ;;  %v27145_v62 = vpop.permute.xlu1 %14906 }
 0x767   :  { %v20106_v25 = vpack.c.bf16 %v15158_v43, %v15158_v43  ;;  %v20107_v17 = vpack.c.bf16 %v15159_v21, %v15159_v21  ;;  %v14905_v60 = vpop.permute.xlu0 %14904  ;;  %v12013_v7 = vrot.slane %v27178_v19, %v20925_v10  ;;  %v12017_v42 = vrot.slane %v27178_v19, %v29058_v28  ;;  %v29481_v21 = vld [vmem:[#allocation70_spill] sm:$0xff] }
 0x768   :  { %v14953_v49 = vsel %vm3743_vm7, %v14905_v60, %v27145_v62  ;;  %v14954_v54 = vsel %vm3743_vm7, %v14903_v2, %v14905_v60  ;;  %14470 = vrot.lane.b32.xlu1 %v26968_v44, %s20188_s17  ;;  %14468 = vrot.lane.b32.xlu0 %v26950_v58, %s20188_s17  ;;  %v29479_v2 = vld [vmem:[#allocation46_spill] sm:$0xff]  ;;  %v12021_v60 = vrot.slane %v27178_v19, %v29449_v9  ;;  %v27233_v11 = vmax.f32 %v11227_v56, 0.0 }
 0x769   :  { %v15160_v30 = vmul.f32 %v15045_v61, %v14954_v54  ;;  %v15161_v48 = vmul.f32 %v15049_v13, %v14953_v49  ;;  %19191 = vmatprep.subr.msk.bf16.mxu0 %vm5007_vm8, %v20107_v17  ;;  %v16233_v63 = vsel %vm5007_vm8, %v20106_v25, 0  ;;  %v11266_v57 = vadd.f32 %v29479_v2, %v25746_v52 }
 0x76a   :  { %16547 = vmatpush1.bf16.msra.mxu0 %v16233_v63  ;;  %v11421_v36 = vpop.permute.xlu1 %11420  ;;  %v11268_v61 = vadd.f32 %v29481_v21, %v25746_v52  ;;  %v11573_v13 = vrot.slane %v27174_v35, %v29449_v9  ;;  %v11577_v25 = vrot.slane %v27174_v35, %v29448_v39  ;;  %v12025_v54 = vrot.slane %v27178_v19, %v29448_v39 }
 0x76b   :  { %v20108_v32 = vpack.c.bf16 %v15160_v30, %v15160_v30  ;;  %v20109_v27 = vpack.c.bf16 %v15161_v48, %v15161_v48  ;;  %v11419_v24 = vpop.permute.xlu0 %11418 }
 0x76c   :  { %14474 = vrot.lane.b32.xlu1 %v27088_v59, %s20188_s17  ;;  %14472 = vrot.lane.b32.xlu0 %v26970_v8, %s20188_s17  ;;  %v11464_v53 = vsel %vm217_vm0, %v11419_v24, %v11421_v36  ;;  %v11465_v29 = vsel %vm217_vm0, %v26904_v26, %v11419_v24 }
 0x76d   :  { %19193 = vmatprep.subr.msk.bf16.mxu1 %vm5007_vm8, %v20109_v27  ;;  %v16239_v55 = vsel %vm5007_vm8, %v20108_v32, 0  ;;  %19192 = vmatmul.mubr.msk.bf16.vlgmr.msra.gmra.mrb[76].mxu0 %vm5003_vm9, %v27183_v50  ;;  %v11674_v31 = vmul.f32 %v11565_v47, %v11465_v29  ;;  %v11675_v30 = vmul.f32 %v11569_v33, %v11464_v53  ;;  %v27244_v47 = vmax.f32 %v11268_v61, 0.0  ;;  %v18879_v53 = vld [vmem:[%s28625_s1 + $0x83] ss:$8 sm:$0xf] }
 0x76e   :  { %16588 = vmatpush1.bf16.msra.mxu1 %v16239_v55  ;;  %v27187_v12 = vpop.permute.xlu1 %11424  ;;  %16652 = vmatprep.mubr.bf16.mxu0 %v29025_v46  ;;  %v27242_v55 = vmax.f32 %v11266_v57, 0.0  ;;  %v18855_v57 = vld [vmem:[%s28625_s1 + $0x82] ss:$8 sm:$0xf] }
 0x76f   :  { %v11423_v14 = vpop.permute.xlu0 %11422  ;;  %v18880_v29 = vld [vmem:[%s28625_s1 + $0x83] ss:$8 sm:$0xf0] }
 0x770   :  { %14918 = vrot.lane.b32.xlu1 %v26968_v44, %s20189_s18  ;;  %14916 = vrot.lane.b32.xlu0 %v26950_v58, %s20189_s18  ;;  %v11462_v15 = vsel %vm217_vm0, %v11423_v14, %v27187_v12 }
 0x771   :  { %19194 = vmatmul.mubr.msk.bf16.vlgmr.msra.gmra.mrb[76].mxu1 %vm5003_vm9, %v27183_v50 }
 0x772   :  { %v11869_v43 = vpop.permute.xlu1 %11868  ;;  %16693 = vmatprep.mubr.bf16.mxu1 %v29025_v46 }
 0x773   :  { %v11867_v17 = vpop.permute.xlu0 %11866 }
 0x774   :  { %v11912_v49 = vsel %vm669_vm1, %v11867_v17, %v11869_v43  ;;  %v11913_v26 = vsel %vm669_vm1, %v26957_v5, %v11867_v17  ;;  %14922 = vrot.lane.b32.xlu1 %v27088_v59, %s20189_s18  ;;  %14920 = vrot.lane.b32.xlu0 %v26970_v8, %s20189_s18  ;;  %v11463_v5 = vsel %vm217_vm0, %v11421_v36, %v11423_v14 }
 0x775   :  { %v12122_v48 = vmul.f32 %v12013_v7, %v11913_v26  ;;  %v12123_v63 = vmul.f32 %v12017_v42, %v11912_v49  ;;  %v11676_v36 = vmul.f32 %v11573_v13, %v11463_v5  ;;  %v11677_v14 = vmul.f32 %v11577_v25, %v11462_v15  ;;  %v18903_v49 = vld [vmem:[%s28625_s1 + $0x84] ss:$8 sm:$0xf] }
 0x776   :  { %v27240_v22 = vpop.permute.xlu1 %11872  ;;  %v27271_v13 = vor.u32 %v18856_v51, %v18855_v57  ;;  %v27273_v25 = vor.u32 %v18880_v29, %v18879_v53  ;;  %v18904_v26 = vld [vmem:[%s28625_s1 + $0x84] ss:$8 sm:$0xf0] }
 0x777   :  { %v19982_v32 = vpack.c.bf16 %v12122_v48, %v11674_v31  ;;  %v11871_v27 = vpop.permute.xlu0 %11870  ;;  %v19983_v24 = vpack.c.bf16 %v12123_v63, %v11675_v30  ;;  %v18928_v31 = vld [vmem:[%s28625_s1 + $0x85] ss:$8 sm:$0xf0] }
 0x778   :  { %v11910_v33 = vsel %vm669_vm1, %v11871_v27, %v27240_v22  ;;  %v11911_v7 = vsel %vm669_vm1, %v11869_v43, %v11871_v27  ;;  %11436 = vrot.lane.b32.xlu1 %v27233_v11, %s20182_s13  ;;  %11434 = vrot.lane.b32.xlu0 %v27088_v59, %s20182_s13  ;;  %v12461_v30 = vrot.slane %v27271_v13, %v20925_v10 }
 0x779   :  { %v12124_v42 = vmul.f32 %v12021_v60, %v11911_v7  ;;  %v12125_v2 = vmul.f32 %v12025_v54, %v11910_v33  ;;  %16620 = vmatprep.subr.bf16.mxu0 %v19983_v24  ;;  %v18927_v54 = vld [vmem:[%s28625_s1 + $0x85] ss:$8 sm:$0xf]  ;;  %v12465_v48 = vrot.slane %v27271_v13, %v29058_v28  ;;  %v12909_v63 = vrot.slane %v27273_v25, %v20925_v10 }
 0x77a   :  { %16621 = vmatpush1.bf16.msra.mxu0 %v19982_v32  ;;  %v12317_v56 = vpop.permute.xlu1 %12316  ;;  %v12913_v15 = vrot.slane %v27273_v25, %v29058_v28  ;;  %v27306_v24 = vor.u32 %v18904_v26, %v18903_v49  ;;  %v12469_v33 = vrot.slane %v27271_v13, %v29449_v9  ;;  %v12473_v7 = vrot.slane %v27271_v13, %v29448_v39 }
 0x77b   :  { %v19984_v43 = vpack.c.bf16 %v12124_v42, %v11676_v36  ;;  %v12315_v21 = vpop.permute.xlu0 %12314  ;;  %v19985_v61 = vpack.c.bf16 %v12125_v2, %v11677_v14  ;;  %v12917_v14 = vrot.slane %v27273_v25, %v29449_v9  ;;  %v27314_v42 = vor.u32 %v18928_v31, %v18927_v54 }
 0x77c   :  { %11440 = vrot.lane.b32.xlu1 %v27244_v47, %s20182_s13  ;;  %11438 = vrot.lane.b32.xlu0 %v27242_v55, %s20182_s13  ;;  %v12360_v5 = vsel %vm1122_vm2, %v12315_v21, %v12317_v56  ;;  %v12361_v32 = vsel %vm1122_vm2, %v26976_v41, %v12315_v21  ;;  %v12921_v57 = vrot.slane %v27273_v25, %v29448_v39 }
 0x77d   :  { %16661 = vmatprep.subr.bf16.mxu1 %v19985_v61  ;;  %v12570_v51 = vmul.f32 %v12461_v30, %v12361_v32  ;;  %v12571_v53 = vmul.f32 %v12465_v48, %v12360_v5  ;;  %v13261_v49 = vrot.slane %v27306_v24, %v20925_v10  ;;  %v13709_v30 = vrot.slane %v27314_v42, %v20925_v10 }
 0x77e   :  { %16662 = vmatpush1.bf16.msra.mxu1 %v19984_v43  ;;  %v27275_v17 = vpop.permute.xlu1 %12320  ;;  %v13265_v48 = vrot.slane %v27306_v24, %v29058_v28 }
 0x77f   :  { %v12319_v60 = vpop.permute.xlu0 %12318 }
 0x780   :  { %11884 = vrot.lane.b32.xlu1 %v27233_v11, %s20183_s30  ;;  %11882 = vrot.lane.b32.xlu0 %v27088_v59, %s20183_s30  ;;  %v12358_v21 = vsel %vm1122_vm2, %v12319_v60, %v27275_v17 }
 0x781   :  { %v12573_v5 = vmul.f32 %v12473_v7, %v12358_v21  ;;  %v13717_v21 = vrot.slane %v27314_v42, %v29449_v9 }
 0x782   :  { %v12765_v27 = vpop.permute.xlu1 %12764 }
 0x783   :  { %v12763_v36 = vpop.permute.xlu0 %12762 }
 0x784   :  { %v12808_v2 = vsel %vm1575_vm3, %v12763_v36, %v12765_v27  ;;  %v12809_v41 = vsel %vm1575_vm3, %v27017_v4, %v12763_v36  ;;  %11888 = vrot.lane.b32.xlu1 %v27244_v47, %s20183_s30  ;;  %11886 = vrot.lane.b32.xlu0 %v27242_v55, %s20183_s30  ;;  %v12359_v4 = vsel %vm1122_vm2, %v12317_v56, %v12319_v60 }
 0x785   :  { %v13018_v29 = vmul.f32 %v12909_v63, %v12809_v41  ;;  %v13019_v43 = vmul.f32 %v12913_v15, %v12808_v2  ;;  %v13713_v60 = vrot.slane %v27314_v42, %v29058_v28  ;;  %v12572_v15 = vmul.f32 %v12469_v33, %v12359_v4 }
 0x786   :  { %v27332_v61 = vpop.permute.xlu1 %12768  ;;  %v13269_v41 = vrot.slane %v27306_v24, %v29449_v9  ;;  %v13721_v4 = vrot.slane %v27314_v42, %v29448_v39 }
 0x787   :  { %v20014_v26 = vpack.c.bf16 %v13018_v29, %v12570_v51  ;;  %v12767_v54 = vpop.permute.xlu0 %12766  ;;  %v20015_v31 = vpack.c.bf16 %v13019_v43, %v12571_v53  ;;  %v13370_v51 = vmul.f32 %v13261_v49, %v26492_v38  ;;  %v13273_v43 = vrot.slane %v27306_v24, %v29448_v39 }
 0x788   :  { %v12806_v63 = vsel %vm1575_vm3, %v12767_v54, %v27332_v61  ;;  %v12807_v56 = vsel %vm1575_vm3, %v12765_v27, %v12767_v54  ;;  %12332 = vrot.lane.b32.xlu1 %v27233_v11, %s20184_s0  ;;  %12330 = vrot.lane.b32.xlu0 %v27088_v59, %s20184_s0  ;;  %v13371_v38 = vmul.f32 %v13265_v48, %v26632_v3 }
 0x789   :  { %v13020_v32 = vmul.f32 %v12917_v14, %v12807_v56  ;;  %v13021_v36 = vmul.f32 %v12921_v57, %v12806_v63  ;;  %16622 = vmatprep.subr.bf16.mxu0 %v20015_v31  ;;  %v18951_v56 = vld [vmem:[%s28625_s1 + $0x86] ss:$8 sm:$0xf] }
 0x78a   :  { %16623 = vmatpush1.bf16.msra.mxu0 %v20014_v26  ;;  %v13567_v2 = vpop.permute.xlu1 %13566 }
 0x78b   :  { %v20016_v27 = vpack.c.bf16 %v13020_v32, %v12572_v15  ;;  %v13565_v53 = vpop.permute.xlu0 %13564  ;;  %v20017_v29 = vpack.c.bf16 %v13021_v36, %v12573_v5  ;;  %v13373_v15 = vmul.f32 %v13273_v43, %v26643_v18  ;;  %v18975_v32 = vld [vmem:[%s28625_s1 + $0x87] ss:$8 sm:$0xf] }
 0x78c   :  { %v13607_v33 = vsel %vm2384_vm4, %v13565_v53, %v13567_v2  ;;  %v13608_v7 = vsel %vm2384_vm4, %v27055_v45, %v13565_v53  ;;  %12336 = vrot.lane.b32.xlu1 %v27244_v47, %s20184_s0  ;;  %12334 = vrot.lane.b32.xlu0 %v27242_v55, %s20184_s0 }
 0x78d   :  { %v13818_v14 = vmul.f32 %v13709_v30, %v13608_v7  ;;  %v13819_v57 = vmul.f32 %v13713_v60, %v13607_v33  ;;  %16663 = vmatprep.subr.bf16.mxu1 %v20017_v29  ;;  %v13372_v30 = vmul.f32 %v13269_v41, %v26641_v1  ;;  %v18952_v60 = vld [vmem:[%s28625_s1 + $0x86] ss:$8 sm:$0xf0]  ;;  %v18976_v1 = vld [vmem:[%s28625_s1 + $0x87] ss:$8 sm:$0xf0] }
 0x78e   :  { %16664 = vmatpush1.bf16.msra.mxu1 %v20016_v27  ;;  %v27370_v49 = vpop.permute.xlu1 %13570  ;;  %v27399_v18 = vor.u32 %v18952_v60, %v18951_v56  ;;  %v27401_v27 = vor.u32 %v18976_v1, %v18975_v32  ;;  %v18999_v33 = vld [vmem:[%s28625_s1 + $0x180] ss:$8 sm:$0xf] }
 0x78f   :  { %v20046_v45 = vpack.c.bf16 %v13818_v14, %v13370_v51  ;;  %v13569_v26 = vpop.permute.xlu0 %13568  ;;  %v20047_v54 = vpack.c.bf16 %v13819_v57, %v13371_v38  ;;  %v29482_v51 = vld [vmem:[#allocation58_spill] sm:$0xff] }
 0x790   :  { %v13605_v31 = vsel %vm2384_vm4, %v13569_v26, %v27370_v49  ;;  %v13606_v3 = vsel %vm2384_vm4, %v13567_v2, %v13569_v26  ;;  %12780 = vrot.lane.b32.xlu1 %v27233_v11, %s20185_s14  ;;  %12778 = vrot.lane.b32.xlu0 %v27088_v59, %s20185_s14  ;;  %v11307_v53 = vadd.f32 %v29482_v51, %v25746_v52  ;;  %v19000_v7 = vld [vmem:[%s28625_s1 + $0x180] ss:$8 sm:$0xf0] }
 0x791   :  { %v13820_v48 = vmul.f32 %v13717_v21, %v13606_v3  ;;  %v13821_v63 = vmul.f32 %v13721_v4, %v13605_v31  ;;  %16624 = vmatprep.subr.bf16.mxu0 %v20047_v54  ;;  %v14157_v38 = vrot.slane %v27399_v18, %v20925_v10  ;;  %v14161_v14 = vrot.slane %v27399_v18, %v29058_v28 }
 0x792   :  { %16625 = vmatpush1.bf16.msra.mxu0 %v20046_v45  ;;  %v14015_v5 = vpop.permute.xlu1 %14014  ;;  %v14605_v57 = vrot.slane %v27401_v27, %v20925_v10  ;;  %v14609_v21 = vrot.slane %v27401_v27, %v29058_v28  ;;  %v27425_v4 = vmax.f32 %v11307_v53, 0.0  ;;  %v14165_v31 = vrot.slane %v27399_v18, %v29449_v9 }
 0x793   :  { %v20048_v36 = vpack.c.bf16 %v13820_v48, %v13372_v30  ;;  %v14013_v2 = vpop.permute.xlu0 %14012  ;;  %v20049_v41 = vpack.c.bf16 %v13821_v63, %v13373_v15  ;;  %v14169_v3 = vrot.slane %v27399_v18, %v29448_v39  ;;  %v14613_v48 = vrot.slane %v27401_v27, %v29449_v9 }
 0x794   :  { %12784 = vrot.lane.b32.xlu1 %v27244_v47, %s20185_s14  ;;  %12782 = vrot.lane.b32.xlu0 %v27242_v55, %s20185_s14  ;;  %v14055_v45 = vsel %vm2837_vm5, %v14013_v2, %v14015_v5  ;;  %v14056_v26 = vsel %vm2837_vm5, %v27074_v23, %v14013_v2  ;;  %v27438_v63 = vor.u32 %v19000_v7, %v18999_v33 }
 0x795   :  { %16665 = vmatprep.subr.bf16.mxu1 %v20049_v41  ;;  %v14617_v60 = vrot.slane %v27401_v27, %v29448_v39  ;;  %v14266_v15 = vmul.f32 %v14157_v38, %v14056_v26  ;;  %v14267_v32 = vmul.f32 %v14161_v14, %v14055_v45 }
 0x796   :  { %16666 = vmatpush1.bf16.msra.mxu1 %v20048_v36  ;;  %v27405_v29 = vpop.permute.xlu1 %14018  ;;  %v15053_v7 = vrot.slane %v27438_v63, %v20925_v10 }
 0x797   :  { %v14017_v43 = vpop.permute.xlu0 %14016 }
 0x798   :  { %13582 = vrot.lane.b32.xlu1 %v27242_v55, %s20186_s15  ;;  %13580 = vrot.lane.b32.xlu0 %v27233_v11, %s20186_s15  ;;  %v14053_v2 = vsel %vm2837_vm5, %v14017_v43, %v27405_v29 }
 0x79a   :  { %v14463_v54 = vpop.permute.xlu1 %14462 }
 0x79b   :  { %v14461_v30 = vpop.permute.xlu0 %14460 }
 0x79c   :  { %v14503_v56 = vsel %vm3290_vm6, %v14461_v30, %v14463_v54  ;;  %v14504_v23 = vsel %vm3290_vm6, %v27117_v20, %v14461_v30  ;;  %13586 = vrot.lane.b32.xlu1 %v27425_v4, %s20186_s15  ;;  %13584 = vrot.lane.b32.xlu0 %v27244_v47, %s20186_s15  ;;  %v14054_v20 = vsel %vm2837_vm5, %v14015_v5, %v14017_v43 }
 0x79d   :  { %v14714_v1 = vmul.f32 %v14605_v57, %v14504_v23  ;;  %v14715_v36 = vmul.f32 %v14609_v21, %v14503_v56  ;;  %v15057_v5 = vrot.slane %v27438_v63, %v29058_v28  ;;  %v14268_v43 = vmul.f32 %v14165_v31, %v14054_v20 }
 0x79e   :  { %v27456_v41 = vpop.permute.xlu1 %14466  ;;  %v14269_v57 = vmul.f32 %v14169_v3, %v14053_v2 }
 0x79f   :  { %v20078_v51 = vpack.c.bf16 %v14714_v1, %v14266_v15  ;;  %v14465_v53 = vpop.permute.xlu0 %14464  ;;  %v20079_v33 = vpack.c.bf16 %v14715_v36, %v14267_v32 }
 0x7a0   :  { %v14501_v38 = vsel %vm3290_vm6, %v14465_v53, %v27456_v41  ;;  %v14502_v14 = vsel %vm3290_vm6, %v14463_v54, %v14465_v53  ;;  %14030 = vrot.lane.b32.xlu1 %v27242_v55, %s20187_s16  ;;  %14028 = vrot.lane.b32.xlu0 %v27233_v11, %s20187_s16 }
 0x7a1   :  { %v14716_v21 = vmul.f32 %v14613_v48, %v14502_v14  ;;  %v14717_v45 = vmul.f32 %v14617_v60, %v14501_v38  ;;  %16626 = vmatprep.subr.bf16.mxu0 %v20079_v33  ;;  %v15061_v48 = vrot.slane %v27438_v63, %v29449_v9  ;;  %v15065_v60 = vrot.slane %v27438_v63, %v29448_v39 }
 0x7a2   :  { %16627 = vmatpush1.bf16.msra.mxu0 %v20078_v51  ;;  %v14911_v26 = vpop.permute.xlu1 %14910 }
 0x7a3   :  { %v20080_v30 = vpack.c.bf16 %v14716_v21, %v14268_v43  ;;  %v14909_v56 = vpop.permute.xlu0 %14908  ;;  %v20081_v23 = vpack.c.bf16 %v14717_v45, %v14269_v57  ;;  %v11581_v45 = vrot.slane %v27174_v35, %v29287_v6 }
 0x7a4   :  { %v14951_v54 = vsel %vm3743_vm7, %v14909_v56, %v14911_v26  ;;  %v14952_v15 = vsel %vm3743_vm7, %v27145_v62, %v14909_v56  ;;  %14034 = vrot.lane.b32.xlu1 %v27425_v4, %s20187_s16  ;;  %14032 = vrot.lane.b32.xlu0 %v27244_v47, %s20187_s16  ;;  %v12033_v56 = vrot.slane %v27178_v19, %v29289_v34 }
 0x7a5   :  { %v15162_v31 = vmul.f32 %v15053_v7, %v14952_v15  ;;  %v15163_v3 = vmul.f32 %v15057_v5, %v14951_v54  ;;  %16667 = vmatprep.subr.bf16.mxu1 %v20081_v23  ;;  %v29483_v23 = vld [vmem:[#allocation10_spill] sm:$0xff] }
 0x7a6   :  { %16668 = vmatpush1.bf16.msra.mxu1 %v20080_v30  ;;  %v27484_v32 = vpop.permute.xlu1 %14914  ;;  %v12029_v30 = vrot.slane %v27178_v19, %v29287_v6  ;;  %v11309_v54 = vadd.f32 %v29483_v23, %v25746_v52 }
 0x7a7   :  { %v20110_v1 = vpack.c.bf16 %v15162_v31, %v15162_v31  ;;  %v20111_v62 = vpack.c.bf16 %v15163_v3, %v15163_v3  ;;  %v14913_v36 = vpop.permute.xlu0 %14912 }
 0x7a8   :  { %v14949_v2 = vsel %vm3743_vm7, %v14913_v36, %v27484_v32  ;;  %v14950_v20 = vsel %vm3743_vm7, %v14911_v26, %v14913_v36  ;;  %14478 = vrot.lane.b32.xlu1 %v27242_v55, %s20188_s17  ;;  %14476 = vrot.lane.b32.xlu0 %v27233_v11, %s20188_s17  ;;  %v11585_v26 = vrot.slane %v27174_v35, %v29289_v34 }
 0x7a9   :  { %v15164_v51 = vmul.f32 %v15061_v48, %v14950_v20  ;;  %v15165_v53 = vmul.f32 %v15065_v60, %v14949_v2  ;;  %19195 = vmatprep.subr.msk.bf16.mxu0 %vm5007_vm8, %v20111_v62  ;;  %v16245_v33 = vsel %vm5007_vm8, %v20110_v1, 0  ;;  %v11589_v48 = vrot.slane %v27174_v35, %v29467_v0 }
 0x7aa   :  { %16629 = vmatpush1.bf16.msra.mxu0 %v16245_v33  ;;  %v11429_v7 = vpop.permute.xlu1 %11428  ;;  %v11593_v60 = vrot.slane %v27174_v35, %v29468_v16  ;;  %v12037_v62 = vrot.slane %v27178_v19, %v29467_v0  ;;  %v12041_v35 = vrot.slane %v27178_v19, %v29468_v16  ;;  %v29484_v33 = vld [vmem:[#allocation67_spill] sm:$0xff] }
 0x7ab   :  { %v20112_v38 = vpack.c.bf16 %v15164_v51, %v15164_v51  ;;  %v20113_v14 = vpack.c.bf16 %v15165_v53, %v15165_v53  ;;  %v11427_v5 = vpop.permute.xlu0 %11426 }
 0x7ac   :  { %14482 = vrot.lane.b32.xlu1 %v27425_v4, %s20188_s17  ;;  %14480 = vrot.lane.b32.xlu0 %v27244_v47, %s20188_s17  ;;  %v11460_v15 = vsel %vm217_vm0, %v11427_v5, %v11429_v7  ;;  %v11461_v31 = vsel %vm217_vm0, %v27187_v12, %v11427_v5 }
 0x7ad   :  { %19196 = vmatmul.mubr.msk.bf16.vlgmr.msra.gmra.mrb[80].mxu0 %vm5003_vm9, %v27183_v50  ;;  %19197 = vmatprep.subr.msk.bf16.mxu1 %vm5007_vm8, %v20113_v14  ;;  %v16251_v43 = vsel %vm5007_vm8, %v20112_v38, 0  ;;  %v11678_v2 = vmul.f32 %v11581_v45, %v11461_v31  ;;  %v11679_v20 = vmul.f32 %v11585_v26, %v11460_v15  ;;  %v11348_v38 = vadd.f32 %v29484_v33, %v25746_v52 }
 0x7ae   :  { %16670 = vmatpush1.bf16.msra.mxu1 %v16251_v43  ;;  %v27505_v57 = vpop.permute.xlu1 %11432  ;;  %16734 = vmatprep.mubr.bf16.mxu0 %v29025_v46  ;;  %v27549_v14 = vmax.f32 %v11309_v54, 0.0  ;;  %v12489_v33 = vrot.slane %v27271_v13, %v29468_v16 }
 0x7af   :  { %v11431_v21 = vpop.permute.xlu0 %11430  ;;  %v27567_v54 = vmax.f32 %v11348_v38, 0.0 }
 0x7b0   :  { %14926 = vrot.lane.b32.xlu1 %v27242_v55, %s20189_s18  ;;  %14924 = vrot.lane.b32.xlu0 %v27233_v11, %s20189_s18  ;;  %v11459_v5 = vsel %vm217_vm0, %v11429_v7, %v11431_v21 }
 0x7b1   :  { %19198 = vmatmul.mubr.msk.bf16.vlgmr.msra.gmra.mrb[80].mxu1 %vm5003_vm9, %v27183_v50 }
 0x7b2   :  { %v11877_v3 = vpop.permute.xlu1 %11876  ;;  %16775 = vmatprep.mubr.bf16.mxu1 %v29025_v46 }
 0x7b3   :  { %v11875_v1 = vpop.permute.xlu0 %11874 }
 0x7b4   :  { %v11908_v36 = vsel %vm669_vm1, %v11875_v1, %v11877_v3  ;;  %v11909_v12 = vsel %vm669_vm1, %v27240_v22, %v11875_v1  ;;  %14930 = vrot.lane.b32.xlu1 %v27425_v4, %s20189_s18  ;;  %14928 = vrot.lane.b32.xlu0 %v27244_v47, %s20189_s18  ;;  %v11458_v22 = vsel %vm217_vm0, %v11431_v21, %v27505_v57 }
 0x7b5   :  { %v12126_v51 = vmul.f32 %v12029_v30, %v11909_v12  ;;  %v12127_v53 = vmul.f32 %v12033_v56, %v11908_v36  ;;  %v11680_v30 = vmul.f32 %v11589_v48, %v11459_v5  ;;  %v11681_v7 = vmul.f32 %v11593_v60, %v11458_v22 }
 0x7b6   :  { %v27556_v43 = vpop.permute.xlu1 %11880  ;;  %v12477_v60 = vrot.slane %v27271_v13, %v29287_v6  ;;  %v12925_v12 = vrot.slane %v27273_v25, %v29287_v6  ;;  %v12933_v22 = vrot.slane %v27273_v25, %v29467_v0 }
 0x7b7   :  { %v19986_v23 = vpack.c.bf16 %v12126_v51, %v11678_v2  ;;  %v11879_v19 = vpop.permute.xlu0 %11878  ;;  %v19987_v45 = vpack.c.bf16 %v12127_v53, %v11679_v20  ;;  %v12485_v53 = vrot.slane %v27271_v13, %v29467_v0 }
 0x7b8   :  { %v11906_v26 = vsel %vm669_vm1, %v11879_v19, %v27556_v43  ;;  %v11907_v52 = vsel %vm669_vm1, %v11877_v3, %v11879_v19  ;;  %11444 = vrot.lane.b32.xlu1 %v27549_v14, %s20182_s13  ;;  %11442 = vrot.lane.b32.xlu0 %v27425_v4, %s20182_s13 }
 0x7b9   :  { %v12128_v21 = vmul.f32 %v12037_v62, %v11907_v52  ;;  %v12129_v56 = vmul.f32 %v12041_v35, %v11906_v26  ;;  %16702 = vmatprep.subr.bf16.mxu0 %v19987_v45  ;;  %v12481_v62 = vrot.slane %v27271_v13, %v29289_v34  ;;  %v12929_v35 = vrot.slane %v27273_v25, %v29289_v34 }
 0x7ba   :  { %16703 = vmatpush1.bf16.msra.mxu0 %v19986_v23  ;;  %v12325_v15 = vpop.permute.xlu1 %12324  ;;  %v12937_v13 = vrot.slane %v27273_v25, %v29468_v16  ;;  %v13725_v25 = vrot.slane %v27314_v42, %v29287_v6 }
 0x7bb   :  { %v19988_v31 = vpack.c.bf16 %v12128_v21, %v11680_v30  ;;  %v12323_v1 = vpop.permute.xlu0 %12322  ;;  %v19989_v36 = vpack.c.bf16 %v12129_v56, %v11681_v7  ;;  %v13277_v7 = vrot.slane %v27306_v24, %v29287_v6 }
 0x7bc   :  { %11890 = vrot.lane.b32.xlu1 %v27425_v4, %s20183_s30  ;;  %11446 = vrot.lane.b32.xlu0 %v27567_v54, %s20182_s13  ;;  %v12356_v2 = vsel %vm1122_vm2, %v12323_v1, %v12325_v15  ;;  %v12357_v20 = vsel %vm1122_vm2, %v27275_v17, %v12323_v1  ;;  %v13281_v1 = vrot.slane %v27306_v24, %v29289_v34 }
 0x7bd   :  { %16743 = vmatprep.subr.bf16.mxu1 %v19989_v36  ;;  %v12574_v17 = vmul.f32 %v12477_v60, %v12357_v20  ;;  %v12575_v19 = vmul.f32 %v12481_v62, %v12356_v2  ;;  %v13285_v20 = vrot.slane %v27306_v24, %v29467_v0 }
 0x7be   :  { %16744 = vmatpush1.bf16.msra.mxu1 %v19988_v31  ;;  %v27573_v3 = vpop.permute.xlu1 %12328 }
 0x7bf   :  { %v12327_v48 = vpop.permute.xlu0 %12326 }
 0x7c0   :  { %11894 = vrot.lane.b32.xlu1 %v27567_v54, %s20183_s30  ;;  %11892 = vrot.lane.b32.xlu0 %v27549_v14, %s20183_s30  ;;  %v12354_v52 = vsel %vm1122_vm2, %v12327_v48, %v27573_v3 }
 0x7c1   :  { %v12577_v62 = vmul.f32 %v12489_v33, %v12354_v52 }
 0x7c2   :  { %v12773_v51 = vpop.permute.xlu1 %12772 }
 0x7c3   :  { %v12771_v38 = vpop.permute.xlu0 %12770 }
 0x7c4   :  { %v12804_v5 = vsel %vm1575_vm3, %v12771_v38, %v12773_v51  ;;  %v12805_v23 = vsel %vm1575_vm3, %v27332_v61, %v12771_v38  ;;  %12340 = vrot.lane.b32.xlu1 %v27549_v14, %s20184_s0  ;;  %12338 = vrot.lane.b32.xlu0 %v27425_v4, %s20184_s0  ;;  %v12355_v61 = vsel %vm1122_vm2, %v12325_v15, %v12327_v48 }
 0x7c5   :  { %v13022_v45 = vmul.f32 %v12925_v12, %v12805_v23  ;;  %v13023_v26 = vmul.f32 %v12929_v35, %v12804_v5  ;;  %v13729_v48 = vrot.slane %v27314_v42, %v29289_v34  ;;  %v12576_v60 = vmul.f32 %v12485_v53, %v12355_v61 }
 0x7c6   :  { %v27614_v30 = vpop.permute.xlu1 %12776  ;;  %v13374_v38 = vmul.f32 %v13277_v7, %v26824_v40  ;;  %v13375_v40 = vmul.f32 %v13281_v1, %v26950_v58 }
 0x7c7   :  { %v20018_v21 = vpack.c.bf16 %v13022_v45, %v12574_v17  ;;  %v12775_v56 = vpop.permute.xlu0 %12774  ;;  %v20019_v31 = vpack.c.bf16 %v13023_v26, %v12575_v19  ;;  %v13289_v17 = vrot.slane %v27306_v24, %v29468_v16  ;;  %v13733_v24 = vrot.slane %v27314_v42, %v29467_v0 }
 0x7c8   :  { %v12802_v36 = vsel %vm1575_vm3, %v12775_v56, %v27614_v30  ;;  %v12803_v15 = vsel %vm1575_vm3, %v12773_v51, %v12775_v56  ;;  %12786 = vrot.lane.b32.xlu1 %v27425_v4, %s20185_s14  ;;  %12342 = vrot.lane.b32.xlu0 %v27567_v54, %s20184_s0  ;;  %v13737_v19 = vrot.slane %v27314_v42, %v29468_v16 }
 0x7c9   :  { %v13024_v12 = vmul.f32 %v12933_v22, %v12803_v15  ;;  %v13025_v35 = vmul.f32 %v12937_v13, %v12802_v36  ;;  %16704 = vmatprep.subr.bf16.mxu0 %v20019_v31  ;;  %v13376_v42 = vmul.f32 %v13285_v20, %v26968_v44  ;;  %v13377_v56 = vmul.f32 %v13289_v17, %v26970_v8  ;;  %v29485_v15 = vld [vmem:[#allocation12_spill] sm:$0xff]  ;;  %v27694_v17 = vpop.f32.mrb[64].mxu0 }
 0x7ca   :  { %16705 = vmatpush1.bf16.msra.mxu0 %v20018_v21  ;;  %v13575_v2 = vpop.permute.xlu1 %13574  ;;  %v14173_v8 = vrot.slane %v27399_v18, %v29287_v6 }
 0x7cb   :  { %v20020_v51 = vpack.c.bf16 %v13024_v12, %v12576_v60  ;;  %v13573_v5 = vpop.permute.xlu0 %13572  ;;  %v20021_v23 = vpack.c.bf16 %v13025_v35, %v12577_v62  ;;  %v14177_v60 = vrot.slane %v27399_v18, %v29289_v34  ;;  %v14621_v62 = vrot.slane %v27401_v27, %v29287_v6 }
 0x7cc   :  { %v13603_v53 = vsel %vm2384_vm4, %v13573_v5, %v13575_v2  ;;  %v13604_v33 = vsel %vm2384_vm4, %v27370_v49, %v13573_v5  ;;  %12790 = vrot.lane.b32.xlu1 %v27567_v54, %s20185_s14  ;;  %12788 = vrot.lane.b32.xlu0 %v27549_v14, %s20185_s14  ;;  %v14625_v12 = vrot.slane %v27401_v27, %v29289_v34 }
 0x7cd   :  { %v13822_v22 = vmul.f32 %v13725_v25, %v13604_v33  ;;  %v13823_v13 = vmul.f32 %v13729_v48, %v13603_v53  ;;  %16745 = vmatprep.subr.bf16.mxu1 %v20021_v23  ;;  %v14629_v23 = vrot.slane %v27401_v27, %v29467_v0  ;;  %v27707_v33 = vpop.f32.mrb[64].mxu1 }
 0x7ce   :  { %16746 = vmatpush1.bf16.msra.mxu1 %v20020_v51  ;;  %v27652_v45 = vpop.permute.xlu1 %13578  ;;  %v14181_v51 = vrot.slane %v27399_v18, %v29467_v0 }
 0x7cf   :  { %v20050_v49 = vpack.c.bf16 %v13822_v22, %v13374_v38  ;;  %v13577_v26 = vpop.permute.xlu0 %13576  ;;  %v20051_v52 = vpack.c.bf16 %v13823_v13, %v13375_v40  ;;  %v14185_v38 = vrot.slane %v27399_v18, %v29468_v16  ;;  %v14633_v18 = vrot.slane %v27401_v27, %v29468_v16  ;;  %v27709_v40 = vpop.f32.mrb[65].mxu0 }
 0x7d0   :  { %v13601_v61 = vsel %vm2384_vm4, %v13577_v26, %v27652_v45  ;;  %v13602_v58 = vsel %vm2384_vm4, %v13575_v2, %v13577_v26  ;;  %13590 = vrot.lane.b32.xlu1 %v27567_v54, %s20186_s15  ;;  %13588 = vrot.lane.b32.xlu0 %v27549_v14, %s20186_s15 }
 0x7d1   :  { %v13824_v7 = vmul.f32 %v13733_v24, %v13602_v58  ;;  %v13825_v21 = vmul.f32 %v13737_v19, %v13601_v61  ;;  %16706 = vmatprep.subr.bf16.mxu0 %v20051_v52 }
 0x7d2   :  { %16707 = vmatpush1.bf16.msra.mxu0 %v20050_v49  ;;  %v14023_v31 = vpop.permute.xlu1 %14022  ;;  %v27711_v49 = vpop.f32.mrb[65].mxu1 }
 0x7d3   :  { %v20052_v25 = vpack.c.bf16 %v13824_v7, %v13376_v42  ;;  %v14021_v1 = vpop.permute.xlu0 %14020  ;;  %v20053_v36 = vpack.c.bf16 %v13825_v21, %v13377_v56  ;;  %29486 = vst [vmem:[#allocation87_spill] sm:$0xff] %v27711_v49  ;;  %v16371_v27 = vpop.f32.mrb[66].mxu1  ;;  %v15069_v21 = vrot.slane %v27438_v63, %v29287_v6 }
 0x7d4   :  { %14036 = vrot.lane.b32.xlu1 %v27549_v14, %s20187_s16  ;;  %13592 = vrot.lane.b32.xlu0 %v29485_v15, %s20186_s15  ;;  %v14051_v35 = vsel %vm2837_vm5, %v14021_v1, %v14023_v31  ;;  %v14052_v2 = vsel %vm2837_vm5, %v27405_v29, %v14021_v1 }
 0x7d5   :  { %16747 = vmatprep.subr.bf16.mxu1 %v20053_v36  ;;  %v14270_v22 = vmul.f32 %v14173_v8, %v14052_v2  ;;  %v14271_v13 = vmul.f32 %v14177_v60, %v14051_v35  ;;  %v16372_v36 = vpop.f32.mrb[67].mxu1 }
 0x7d6   :  { %16748 = vmatpush1.bf16.msra.mxu1 %v20052_v25  ;;  %v27669_v48 = vpop.permute.xlu1 %14026  ;;  %v27735_v35 = vpop.f32.mrb[68].mxu1  ;;  %v18810_v36 = vld [vmem:[%s28625_s1 + $0xc0] ss:$8 sm:$0xf0] }
 0x7d7   :  { %v14025_v44 = vpop.permute.xlu0 %14024  ;;  %29488 = vst [vmem:[#allocation92_spill] sm:$0xff] %v27735_v35 }
 0x7d8   :  { %14040 = vrot.lane.b32.xlu1 %v29485_v15, %s20187_s16  ;;  %14038 = vrot.lane.b32.xlu0 %v27567_v54, %s20187_s16  ;;  %v14049_v26 = vsel %vm2837_vm5, %v14025_v44, %v27669_v48  ;;  %v14050_v52 = vsel %vm2837_vm5, %v14023_v31, %v14025_v44  ;;  %v15073_v31 = vrot.slane %v27438_v63, %v29289_v34 }
 0x7d9   :  { %v14272_v8 = vmul.f32 %v14181_v51, %v14050_v52  ;;  %v14273_v60 = vmul.f32 %v14185_v38, %v14049_v26  ;;  %v15081_v26 = vrot.slane %v27438_v63, %v29468_v16 }
 0x7da   :  { %v14471_v20 = vpop.permute.xlu1 %14470 }
 0x7db   :  { %v14469_v5 = vpop.permute.xlu0 %14468 }
 0x7dc   :  { %v14499_v53 = vsel %vm3290_vm6, %v14469_v5, %v14471_v20  ;;  %v14500_v29 = vsel %vm3290_vm6, %v27456_v41, %v14469_v5  ;;  %14486 = vrot.lane.b32.xlu1 %v27567_v54, %s20188_s17  ;;  %14484 = vrot.lane.b32.xlu0 %v27549_v14, %s20188_s17  ;;  %v16330_v41 = vpop.f32.mrb[66].mxu0  ;;  %v27739_v5 = vpop.f32.mrb[69].mxu1 }
 0x7dd   :  { %v14718_v24 = vmul.f32 %v14621_v62, %v14500_v29  ;;  %v14719_v19 = vmul.f32 %v14625_v12, %v14499_v53  ;;  %v16331_v56 = vpop.f32.mrb[67].mxu0  ;;  %29490 = vst [vmem:[#allocation93_spill] sm:$0xff] %v27739_v5  ;;  %v16453_v38 = vpop.f32.mrb[70].mxu1  ;;  %v15077_v41 = vrot.slane %v27438_v63, %v29467_v0  ;;  %v18809_v63 = vld [vmem:[%s28625_s1 + $0xc0] ss:$8 sm:$0xf] }
 0x7de   :  { %v27718_v61 = vpop.permute.xlu1 %14474  ;;  %v27733_v44 = vpop.f32.mrb[68].mxu0 }
 0x7df   :  { %v20082_v58 = vpack.c.bf16 %v14718_v24, %v14270_v22  ;;  %v14473_v42 = vpop.permute.xlu0 %14472  ;;  %v20083_v7 = vpack.c.bf16 %v14719_v19, %v14271_v13  ;;  %29487 = vst [vmem:[#allocation86_spill] sm:$0xff] %v27733_v44  ;;  %v27737_v2 = vpop.f32.mrb[69].mxu0 }
 0x7e0   :  { %v14497_v25 = vsel %vm3290_vm6, %v14473_v42, %v27718_v61  ;;  %v14498_v1 = vsel %vm3290_vm6, %v14471_v20, %v14473_v42  ;;  %14932 = vrot.lane.b32.xlu1 %v27549_v14, %s20189_s18  ;;  %14488 = vrot.lane.b32.xlu0 %v29485_v15, %s20188_s17  ;;  %29489 = vst [vmem:[#allocation90_spill] sm:$0xff] %v27737_v2  ;;  %v16412_v13 = vpop.f32.mrb[70].mxu0  ;;  %v16454_v52 = vpop.f32.mrb[71].mxu1 }
 0x7e1   :  { %v14720_v62 = vmul.f32 %v14629_v23, %v14498_v1  ;;  %v14721_v12 = vmul.f32 %v14633_v18, %v14497_v25  ;;  %16708 = vmatprep.subr.bf16.mxu0 %v20083_v7  ;;  %v16413_v23 = vpop.f32.mrb[71].mxu0 }
 0x7e2   :  { %16709 = vmatpush1.bf16.msra.mxu0 %v20082_v58  ;;  %v14919_v20 = vpop.permute.xlu1 %14918 }
 0x7e3   :  { %v20084_v53 = vpack.c.bf16 %v14720_v62, %v14272_v8  ;;  %v14917_v29 = vpop.permute.xlu0 %14916  ;;  %v20085_v22 = vpack.c.bf16 %v14721_v12, %v14273_v60  ;;  %v18833_v60 = vld [vmem:[%s28625_s1 + $0xc1] ss:$8 sm:$0xf] }
 0x7e4   :  { %v14947_v24 = vsel %vm3743_vm7, %v14917_v29, %v14919_v20  ;;  %v14948_v51 = vsel %vm3743_vm7, %v27484_v32, %v14917_v29  ;;  %14936 = vrot.lane.b32.xlu1 %v29485_v15, %s20189_s18  ;;  %14934 = vrot.lane.b32.xlu0 %v27567_v54, %s20189_s18  ;;  %v15467_v32 = vld [vmem:[%s28633_s9] sm:$0xff]  ;;  %v27778_v29 = vor.u32 %v18810_v36, %v18809_v63 }
 0x7e5   :  { %v15166_v18 = vmul.f32 %v15069_v21, %v14948_v51  ;;  %v15167_v19 = vmul.f32 %v15073_v31, %v14947_v24  ;;  %16749 = vmatprep.subr.bf16.mxu1 %v20085_v22  ;;  %v18834_v62 = vld [vmem:[%s28625_s1 + $0xc1] ss:$8 sm:$0xf0] }
 0x7e6   :  { %16750 = vmatpush1.bf16.msra.mxu1 %v20084_v53  ;;  %v27757_v27 = vpop.permute.xlu1 %14922  ;;  %v27784_v13 = vor.u32 %v18834_v62, %v18833_v60  ;;  %v11597_v38 = vrot.slane %v27778_v29, %v20925_v10  ;;  %v11601_v23 = vrot.slane %v27778_v29, %v29058_v28  ;;  %v11605_v52 = vrot.slane %v27778_v29, %v29449_v9 }
 0x7e7   :  { %v20114_v58 = vpack.c.bf16 %v15166_v18, %v15166_v18  ;;  %v20115_v42 = vpack.c.bf16 %v15167_v19, %v15167_v19  ;;  %v14921_v7 = vpop.permute.xlu0 %14920 }
 0x7e8   :  { %v14945_v21 = vsel %vm3743_vm7, %v14921_v7, %v27757_v27  ;;  %v14946_v56 = vsel %vm3743_vm7, %v14919_v20, %v14921_v7  ;;  %15470 = vperm.xlu0 %20149, %v15467_v32   ;;  %v12045_v18 = vrot.slane %v27784_v13, %v20925_v10  ;;  %v12049_v19 = vrot.slane %v27784_v13, %v29058_v28 }
 0x7e9   :  { %v15168_v25 = vmul.f32 %v15077_v41, %v14946_v56  ;;  %v15169_v1 = vmul.f32 %v15081_v26, %v14945_v21  ;;  %19199 = vmatprep.subr.msk.bf16.mxu0 %vm5007_vm8, %v20115_v42  ;;  %v16257_v31 = vsel %vm5007_vm8, %v20114_v58, 0  ;;  %v12057_v21 = vrot.slane %v27784_v13, %v29448_v39 }
 0x7ea   :  { %16711 = vmatpush1.bf16.msra.mxu0 %v16257_v31  ;;  %v11437_v8 = vpop.permute.xlu1 %11436 }
 0x7eb   :  { %v20116_v12 = vpack.c.bf16 %v15168_v25, %v15168_v25  ;;  %v20117_v20 = vpack.c.bf16 %v15169_v1, %v15169_v1  ;;  %v11435_v53 = vpop.permute.xlu0 %11434 }
 0x7ec   :  { %v11456_v41 = vsel %vm217_vm0, %v11435_v53, %v11437_v8  ;;  %v11457_v26 = vsel %vm217_vm0, %v27505_v57, %v11435_v53  ;;  %v12053_v57 = vrot.slane %v27784_v13, %v29449_v9 }
 0x7ed   :  { %19200 = vmatmul.mubr.msk.bf16.vlgmr.msra.gmra.mrb[84].mxu0 %vm5003_vm9, %v27183_v50  ;;  %19201 = vmatprep.subr.msk.bf16.mxu1 %vm5007_vm8, %v20117_v20  ;;  %v16263_v22 = vsel %vm5007_vm8, %v20116_v12, 0  ;;  %v11682_v56 = vmul.f32 %v11597_v38, %v11457_v26  ;;  %v11683_v63 = vmul.f32 %v11601_v23, %v11456_v41  ;;  %v18881_v41 = vld [vmem:[%s28625_s1 + $0xc3] ss:$8 sm:$0xf] }
 0x7ee   :  { %16752 = vmatpush1.bf16.msra.mxu1 %v16263_v22  ;;  %v27786_v24 = vpop.permute.xlu1 %11440  ;;  %16816 = vmatprep.mubr.bf16.mxu0 %v29025_v46  ;;  %v18882_v26 = vld [vmem:[%s28625_s1 + $0xc3] ss:$8 sm:$0xf0] }
 0x7ef   :  { %v11439_v51 = vpop.permute.xlu0 %11438 }
 0x7f0   :  { %v11454_v31 = vsel %vm217_vm0, %v11439_v51, %v27786_v24  ;;  %v11455_v36 = vsel %vm217_vm0, %v11437_v8, %v11439_v51  ;;  %v18857_v8 = vld [vmem:[%s28625_s1 + $0xc2] ss:$8 sm:$0xf] }
 0x7f1   :  { %19202 = vmatmul.mubr.msk.bf16.vlgmr.msra.gmra.mrb[84].mxu1 %vm5003_vm9, %v27183_v50  ;;  %v11609_v50 = vrot.slane %v27778_v29, %v29448_v39  ;;  %v11684_v22 = vmul.f32 %v11605_v52, %v11455_v36  ;;  %v18858_v51 = vld [vmem:[%s28625_s1 + $0xc2] ss:$8 sm:$0xf0] }
 0x7f2   :  { %v11885_v32 = vpop.permute.xlu1 %11884  ;;  %16857 = vmatprep.mubr.bf16.mxu1 %v29025_v46 }
 0x7f3   :  { %v11883_v58 = vpop.permute.xlu0 %11882  ;;  %v11685_v38 = vmul.f32 %v11609_v50, %v11454_v31 }
 0x7f4   :  { %v11904_v42 = vsel %vm669_vm1, %v11883_v58, %v11885_v32  ;;  %v11905_v7 = vsel %vm669_vm1, %v27556_v43, %v11883_v58  ;;  %v27842_v58 = vor.u32 %v18858_v51, %v18857_v8 }
 0x7f5   :  { %v12130_v25 = vmul.f32 %v12045_v18, %v11905_v7  ;;  %v12131_v1 = vmul.f32 %v12049_v19, %v11904_v42  ;;  %v27844_v42 = vor.u32 %v18882_v26, %v18881_v41 }
 0x7f6   :  { %v27823_v60 = vpop.permute.xlu1 %11888  ;;  %v12497_v31 = vrot.slane %v27842_v58, %v29058_v28 }
 0x7f7   :  { %v19990_v43 = vpack.c.bf16 %v12130_v25, %v11682_v56  ;;  %v11887_v62 = vpop.permute.xlu0 %11886  ;;  %v19991_v12 = vpack.c.bf16 %v12131_v1, %v11683_v63  ;;  %v18906_v56 = vld [vmem:[%s28625_s1 + $0xc4] ss:$8 sm:$0xf0]  ;;  %v18929_v63 = vld [vmem:[%s28625_s1 + $0xc5] ss:$8 sm:$0xf]  ;;  %v12493_v1 = vrot.slane %v27842_v58, %v20925_v10  ;;  %v12941_v36 = vrot.slane %v27844_v42, %v20925_v10 }
 0x7f8   :  { %v11902_v20 = vsel %vm669_vm1, %v11887_v62, %v27823_v60  ;;  %v11903_v53 = vsel %vm669_vm1, %v11885_v32, %v11887_v62  ;;  %v18930_v62 = vld [vmem:[%s28625_s1 + $0xc5] ss:$8 sm:$0xf0]  ;;  %v12949_v51 = vrot.slane %v27844_v42, %v29449_v9 }
 0x7f9   :  { %v12132_v23 = vmul.f32 %v12053_v57, %v11903_v53  ;;  %v12133_v18 = vmul.f32 %v12057_v21, %v11902_v20  ;;  %16784 = vmatprep.subr.bf16.mxu0 %v19991_v12  ;;  %v18905_v21 = vld [vmem:[%s28625_s1 + $0xc4] ss:$8 sm:$0xf] }
 0x7fa   :  { %16785 = vmatpush1.bf16.msra.mxu0 %v19990_v43  ;;  %v12333_v19 = vpop.permute.xlu1 %12332  ;;  %v12945_v43 = vrot.slane %v27844_v42, %v29058_v28  ;;  %v27883_v41 = vor.u32 %v18906_v56, %v18905_v21 }
 0x7fb   :  { %v19992_v32 = vpack.c.bf16 %v12132_v23, %v11684_v22  ;;  %v12331_v52 = vpop.permute.xlu0 %12330  ;;  %v19993_v50 = vpack.c.bf16 %v12133_v18, %v11685_v38  ;;  %v12501_v23 = vrot.slane %v27842_v58, %v29449_v9  ;;  %v12505_v18 = vrot.slane %v27842_v58, %v29448_v39 }
 0x7fc   :  { %v12352_v20 = vsel %vm1122_vm2, %v12331_v52, %v12333_v19  ;;  %v12353_v53 = vsel %vm1122_vm2, %v27573_v3, %v12331_v52  ;;  %v12953_v52 = vrot.slane %v27844_v42, %v29448_v39 }
 0x7fd   :  { %16825 = vmatprep.subr.bf16.mxu1 %v19993_v50  ;;  %v27892_v50 = vor.u32 %v18930_v62, %v18929_v63  ;;  %v12578_v5 = vmul.f32 %v12493_v1, %v12353_v53  ;;  %v12579_v35 = vmul.f32 %v12497_v31, %v12352_v20  ;;  %v13293_v1 = vrot.slane %v27883_v41, %v20925_v10 }
 0x7fe   :  { %16826 = vmatpush1.bf16.msra.mxu1 %v19992_v32  ;;  %v27846_v7 = vpop.permute.xlu1 %12336  ;;  %v13297_v31 = vrot.slane %v27883_v41, %v29058_v28 }
 0x7ff   :  { %v12335_v57 = vpop.permute.xlu0 %12334 }
 0x800   :  { %v27857_v25 = vpop.f32.mrb[72].mxu0 }
 0x801   :  { %v27870_v12 = vpop.f32.mrb[73].mxu0 }
 0x802   :  { %v12781_v22 = vpop.permute.xlu1 %12780  ;;  %v16494_v38 = vpop.f32.mrb[74].mxu0 }
 0x803   :  { %v12779_v8 = vpop.permute.xlu0 %12778  ;;  %v16495_v26 = vpop.f32.mrb[75].mxu0 }
 0x804   :  { %v12800_v32 = vsel %vm1575_vm3, %v12779_v8, %v12781_v22  ;;  %v12801_v3 = vsel %vm1575_vm3, %v27614_v30, %v12779_v8  ;;  %v27894_v38 = vpop.f32.mrb[72].mxu1  ;;  %v12350_v26 = vsel %vm1122_vm2, %v12335_v57, %v27846_v7  ;;  %v12351_v30 = vsel %vm1122_vm2, %v12333_v19, %v12335_v57 }
 0x805   :  { %v13026_v2 = vmul.f32 %v12941_v36, %v12801_v3  ;;  %v13027_v21 = vmul.f32 %v12945_v43, %v12800_v32  ;;  %v27896_v56 = vpop.f32.mrb[73].mxu1 }
 0x806   :  { %v27903_v8 = vpop.permute.xlu1 %12784  ;;  %v16535_v44 = vpop.f32.mrb[74].mxu1 }
 0x807   :  { %v20022_v63 = vpack.c.bf16 %v13026_v2, %v12578_v5  ;;  %v12783_v62 = vpop.permute.xlu0 %12782  ;;  %v20023_v49 = vpack.c.bf16 %v13027_v21, %v12579_v35  ;;  %v16536_v36 = vpop.f32.mrb[75].mxu1  ;;  %v13741_v44 = vrot.slane %v27892_v50, %v20925_v10  ;;  %v13745_v35 = vrot.slane %v27892_v50, %v29058_v28 }
 0x808   :  { %v12798_v43 = vsel %vm1575_vm3, %v12783_v62, %v27903_v8  ;;  %v12799_v19 = vsel %vm1575_vm3, %v12781_v22, %v12783_v62  ;;  %v12580_v2 = vmul.f32 %v12501_v23, %v12351_v30  ;;  %v12581_v5 = vmul.f32 %v12505_v18, %v12350_v26 }
 0x809   :  { %v13028_v57 = vmul.f32 %v12949_v51, %v12799_v19  ;;  %v13029_v20 = vmul.f32 %v12953_v52, %v12798_v43  ;;  %16786 = vmatprep.subr.bf16.mxu0 %v20023_v49  ;;  %v13301_v36 = vrot.slane %v27883_v41, %v29449_v9  ;;  %v13305_v22 = vrot.slane %v27883_v41, %v29448_v39 }
 0x80a   :  { %16787 = vmatpush1.bf16.msra.mxu0 %v20022_v63  ;;  %v13583_v53 = vpop.permute.xlu1 %13582  ;;  %v13378_v62 = vmul.f32 %v13293_v1, %v27088_v59  ;;  %v13379_v18 = vmul.f32 %v13297_v31, %v27233_v11  ;;  %v13749_v26 = vrot.slane %v27892_v50, %v29449_v9  ;;  %v13753_v30 = vrot.slane %v27892_v50, %v29448_v39 }
 0x80b   :  { %v20024_v32 = vpack.c.bf16 %v13028_v57, %v12580_v2  ;;  %v13581_v3 = vpop.permute.xlu0 %13580  ;;  %v20025_v21 = vpack.c.bf16 %v13029_v20, %v12581_v5  ;;  %v13380_v31 = vmul.f32 %v13301_v36, %v27242_v55  ;;  %v18954_v2 = vld [vmem:[%s28625_s1 + $0xc6] ss:$8 sm:$0xf0]  ;;  %v13381_v5 = vmul.f32 %v13305_v22, %v27244_v47  ;;  %v18977_v20 = vld [vmem:[%s28625_s1 + $0xc7] ss:$8 sm:$0xf] }
 0x80c   :  { %v13599_v23 = vsel %vm2384_vm4, %v13581_v3, %v13583_v53  ;;  %v13600_v49 = vsel %vm2384_vm4, %v27652_v45, %v13581_v3  ;;  %v18978_v55 = vld [vmem:[%s28625_s1 + $0xc7] ss:$8 sm:$0xf0] }
 0x80d   :  { %v13826_v51 = vmul.f32 %v13741_v44, %v13600_v49  ;;  %v13827_v52 = vmul.f32 %v13745_v35, %v13599_v23  ;;  %16827 = vmatprep.subr.bf16.mxu1 %v20025_v21  ;;  %v18953_v35 = vld [vmem:[%s28625_s1 + $0xc6] ss:$8 sm:$0xf]  ;;  %v27956_v36 = vor.u32 %v18978_v55, %v18977_v20 }
 0x80e   :  { %16828 = vmatpush1.bf16.msra.mxu1 %v20024_v32  ;;  %v27933_v59 = vpop.permute.xlu1 %13586  ;;  %v27954_v21 = vor.u32 %v18954_v2, %v18953_v35 }
 0x80f   :  { %v20054_v63 = vpack.c.bf16 %v13826_v51, %v13378_v62  ;;  %v13585_v1 = vpop.permute.xlu0 %13584  ;;  %v20055_v43 = vpack.c.bf16 %v13827_v52, %v13379_v18  ;;  %v14637_v49 = vrot.slane %v27956_v36, %v20925_v10  ;;  %v14641_v18 = vrot.slane %v27956_v36, %v29058_v28  ;;  %v19001_v51 = vld [vmem:[%s28625_s1 + $0x1c0] ss:$8 sm:$0xf] }
 0x810   :  { %v13597_v45 = vsel %vm2384_vm4, %v13585_v1, %v27933_v59  ;;  %v13598_v11 = vsel %vm2384_vm4, %v13583_v53, %v13585_v1  ;;  %v14189_v62 = vrot.slane %v27954_v21, %v20925_v10  ;;  %v14193_v23 = vrot.slane %v27954_v21, %v29058_v28  ;;  %v19002_v52 = vld [vmem:[%s28625_s1 + $0x1c0] ss:$8 sm:$0xf0] }
 0x811   :  { %v13828_v19 = vmul.f32 %v13749_v26, %v13598_v11  ;;  %v13829_v44 = vmul.f32 %v13753_v30, %v13597_v45  ;;  %16788 = vmatprep.subr.bf16.mxu0 %v20055_v43  ;;  %v14197_v1 = vrot.slane %v27954_v21, %v29449_v9  ;;  %v14201_v43 = vrot.slane %v27954_v21, %v29448_v39 }
 0x812   :  { %16789 = vmatpush1.bf16.msra.mxu0 %v20054_v63  ;;  %v14031_v57 = vpop.permute.xlu1 %14030  ;;  %v14645_v11 = vrot.slane %v27956_v36, %v29449_v9 }
 0x813   :  { %v20056_v53 = vpack.c.bf16 %v13828_v19, %v13380_v31  ;;  %v14029_v32 = vpop.permute.xlu0 %14028  ;;  %v20057_v3 = vpack.c.bf16 %v13829_v44, %v13381_v5  ;;  %v27992_v44 = vor.u32 %v19002_v52, %v19001_v51 }
 0x814   :  { %v14047_v26 = vsel %vm2837_vm5, %v14029_v32, %v14031_v57  ;;  %v14048_v30 = vsel %vm2837_vm5, %v27669_v48, %v14029_v32  ;;  %v14649_v48 = vrot.slane %v27956_v36, %v29448_v39 }
 0x815   :  { %16829 = vmatprep.subr.bf16.mxu1 %v20057_v3  ;;  %v14274_v35 = vmul.f32 %v14189_v62, %v14048_v30  ;;  %v14275_v2 = vmul.f32 %v14193_v23, %v14047_v26  ;;  %v15085_v23 = vrot.slane %v27992_v44, %v20925_v10 }
 0x816   :  { %16830 = vmatpush1.bf16.msra.mxu1 %v20056_v53  ;;  %v27958_v47 = vpop.permute.xlu1 %14034 }
 0x817   :  { %v14033_v22 = vpop.permute.xlu0 %14032 }
 0x818   :  { %v14045_v55 = vsel %vm2837_vm5, %v14033_v22, %v27958_v47  ;;  %v14046_v53 = vsel %vm2837_vm5, %v14031_v57, %v14033_v22 }
 0x819   :  { %v14277_v57 = vmul.f32 %v14201_v43, %v14045_v55 }
 0x81a   :  { %v14479_v63 = vpop.permute.xlu1 %14478 }
 0x81b   :  { %v14477_v45 = vpop.permute.xlu0 %14476 }
 0x81c   :  { %v14495_v31 = vsel %vm3290_vm6, %v14477_v45, %v14479_v63  ;;  %v14496_v19 = vsel %vm3290_vm6, %v27718_v61, %v14477_v45 }
 0x81d   :  { %v14722_v5 = vmul.f32 %v14637_v49, %v14496_v19  ;;  %v14723_v20 = vmul.f32 %v14641_v18, %v14495_v31  ;;  %v15089_v49 = vrot.slane %v27992_v44, %v29058_v28  ;;  %v14276_v18 = vmul.f32 %v14197_v1, %v14046_v53 }
 0x81e   :  { %v27999_v32 = vpop.permute.xlu1 %14482  ;;  %v15093_v28 = vrot.slane %v27992_v44, %v29449_v9  ;;  %v15097_v1 = vrot.slane %v27992_v44, %v29448_v39 }
 0x81f   :  { %v20086_v3 = vpack.c.bf16 %v14722_v5, %v14274_v35  ;;  %v14481_v61 = vpop.permute.xlu0 %14480  ;;  %v20087_v45 = vpack.c.bf16 %v14723_v20, %v14275_v2 }
 0x820   :  { %v14493_v51 = vsel %vm3290_vm6, %v14481_v61, %v27999_v32  ;;  %v14494_v62 = vsel %vm3290_vm6, %v14479_v63, %v14481_v61 }
 0x821   :  { %v14724_v22 = vmul.f32 %v14645_v11, %v14494_v62  ;;  %v14725_v52 = vmul.f32 %v14649_v48, %v14493_v51  ;;  %16790 = vmatprep.subr.bf16.mxu0 %v20087_v45  ;;  %v11613_v51 = vrot.slane %v27778_v29, %v29287_v6  ;;  %v12061_v62 = vrot.slane %v27784_v13, %v29287_v6 }
 0x822   :  { %16791 = vmatpush1.bf16.msra.mxu0 %v20086_v3  ;;  %v14927_v26 = vpop.permute.xlu1 %14926 }
 0x823   :  { %v20088_v30 = vpack.c.bf16 %v14724_v22, %v14276_v18  ;;  %v14925_v31 = vpop.permute.xlu0 %14924  ;;  %v20089_v19 = vpack.c.bf16 %v14725_v52, %v14277_v57  ;;  %v11617_v22 = vrot.slane %v27778_v29, %v29289_v34 }
 0x824   :  { %v14943_v35 = vsel %vm3743_vm7, %v14925_v31, %v14927_v26  ;;  %v14944_v10 = vsel %vm3743_vm7, %v27757_v27, %v14925_v31  ;;  %v11625_v31 = vrot.slane %v27778_v29, %v29468_v16 }
 0x825   :  { %v15170_v63 = vmul.f32 %v15085_v23, %v14944_v10  ;;  %v15171_v2 = vmul.f32 %v15089_v49, %v14943_v35  ;;  %16831 = vmatprep.subr.bf16.mxu1 %v20089_v19  ;;  %v28038_v49 = vld [vmem:[%s28632_s8] sm:$0xf]  ;;  %v12073_v19 = vrot.slane %v27784_v13, %v29468_v16  ;;  %v11621_v35 = vrot.slane %v27778_v29, %v29467_v0  ;;  %v29491_v10 = vld [vmem:[#allocation23_spill] sm:$0xff] }
 0x826   :  { %16832 = vmatpush1.bf16.msra.mxu1 %v20088_v30  ;;  %v28019_v43 = vpop.permute.xlu1 %14930 }
 0x827   :  { %v20118_v11 = vpack.c.bf16 %v15170_v63, %v15170_v63  ;;  %v20119_v48 = vpack.c.bf16 %v15171_v2, %v15171_v2  ;;  %v14929_v5 = vpop.permute.xlu0 %14928  ;;  %v12069_v2 = vrot.slane %v27784_v13, %v29467_v0 }
 0x828   :  { %v14941_v20 = vsel %vm3743_vm7, %v14929_v5, %v28019_v43  ;;  %v14942_v27 = vsel %vm3743_vm7, %v14927_v26, %v14929_v5 }
 0x829   :  { %v15172_v55 = vmul.f32 %v15093_v28, %v14942_v27  ;;  %v15173_v53 = vmul.f32 %v15097_v1, %v14941_v20  ;;  %19203 = vmatprep.subr.msk.bf16.mxu0 %vm5007_vm8, %v20119_v48  ;;  %v16269_v9 = vsel %vm5007_vm8, %v20118_v11, 0  ;;  %v29492_v48 = vld [vmem:[#allocation62_spill] sm:$0xff] }
 0x82a   :  { %16793 = vmatpush1.bf16.msra.mxu0 %v16269_v9  ;;  %v11445_v39 = vpop.permute.xlu1 %11444 }
 0x82b   :  { %v20120_v3 = vpack.c.bf16 %v15172_v55, %v15172_v55  ;;  %v20121_v61 = vpack.c.bf16 %v15173_v53, %v15173_v53  ;;  %v11443_v45 = vpop.permute.xlu0 %11442 }
 0x82c   :  { %v11453_v23 = vsel %vm217_vm0, %v27786_v24, %v11443_v45  ;;  %v11452_v28 = vsel %vm217_vm0, %v11443_v45, %v11445_v39 }
 0x82d   :  { %19204 = vmatmul.mubr.msk.bf16.vlgmr.msra.gmra.mrb[88].mxu0 %vm5003_vm9, %v28038_v49  ;;  %19205 = vmatprep.subr.msk.bf16.mxu1 %vm5007_vm8, %v20121_v61  ;;  %v16275_v18 = vsel %vm5007_vm8, %v20120_v3, 0  ;;  %v11686_v26 = vmul.f32 %v11613_v51, %v11453_v23  ;;  %v11687_v9 = vmul.f32 %v11617_v22, %v11452_v28  ;;  %v13313_v22 = vrot.slane %v27883_v41, %v29289_v34 }
 0x82e   :  { %16834 = vmatpush1.bf16.msra.mxu1 %v16275_v18  ;;  %v11891_v57 = vpop.permute.xlu1 %11890  ;;  %16898 = vmatprep.mubr.bf16.mxu0 %v29025_v46 }
 0x82f   :  { %v11901_v24 = vsel %vm669_vm1, %v27823_v60, %v11891_v57  ;;  %v11447_v52 = vpop.permute.xlu0 %11446  ;;  %v12065_v60 = vrot.slane %v27784_v13, %v29289_v34 }
 0x830   :  { %v12134_v30 = vmul.f32 %v12061_v62, %v11901_v24  ;;  %v11450_v63 = vsel %vm217_vm0, %v11447_v52, %v29491_v10  ;;  %v11451_v29 = vsel %vm217_vm0, %v11445_v39, %v11447_v52  ;;  %v12957_v24 = vrot.slane %v27844_v42, %v29287_v6  ;;  %v29493_v10 = vld [vmem:[#allocation81_spill] sm:$0xff] }
 0x831   :  { %19206 = vmatmul.mubr.msk.bf16.vlgmr.msra.gmra.mrb[88].mxu1 %vm5003_vm9, %v28038_v49  ;;  %v11689_v27 = vmul.f32 %v11625_v31, %v11450_v63  ;;  %v11688_v3 = vmul.f32 %v11621_v35, %v11451_v29  ;;  %v12521_v31 = vrot.slane %v27842_v58, %v29468_v16  ;;  %v12517_v35 = vrot.slane %v27842_v58, %v29467_v0 }
 0x832   :  { %v19994_v1 = vpack.c.bf16 %v12134_v30, %v11686_v26  ;;  %v11895_v11 = vpop.permute.xlu1 %11894  ;;  %16939 = vmatprep.mubr.bf16.mxu1 %v29025_v46  ;;  %v12513_v26 = vrot.slane %v27842_v58, %v29289_v34  ;;  %vm17888_vm0 = vcmask 1044484  }
 0x833   :  { %v11898_v5 = vsel %vm669_vm1, %v11895_v11, %v29492_v48  ;;  %v11893_v20 = vpop.permute.xlu0 %11892 }
 0x834   :  { %v12137_v55 = vmul.f32 %v12073_v19, %v11898_v5  ;;  %v11899_v13 = vsel %vm669_vm1, %v11893_v20, %v11895_v11  ;;  %v11900_v53 = vsel %vm669_vm1, %v11891_v57, %v11893_v20  ;;  %v13309_v57 = vrot.slane %v27883_v41, %v29287_v6  ;;  %v29494_v20 = vld [vmem:[#allocation21_spill] sm:$0xff] }
 0x835   :  { %v12135_v61 = vmul.f32 %v12065_v60, %v11900_v53  ;;  %v12136_v39 = vmul.f32 %v12069_v2, %v11899_v13  ;;  %v12969_v19 = vrot.slane %v27844_v42, %v29468_v16  ;;  %v12961_v60 = vrot.slane %v27844_v42, %v29289_v34 }
 0x836   :  { %v12341_v45 = vpop.permute.xlu1 %12340  ;;  %v19997_v51 = vpack.c.bf16 %v12137_v55, %v11689_v27  ;;  %v12965_v2 = vrot.slane %v27844_v42, %v29467_v0  ;;  %v13757_v11 = vrot.slane %v27892_v50, %v29287_v6  ;;  %v13761_v27 = vrot.slane %v27892_v50, %v29289_v34 }
 0x837   :  { %v19996_v46 = vpack.c.bf16 %v12136_v39, %v11688_v3  ;;  %v12339_v62 = vpop.permute.xlu0 %12338  ;;  %v19995_v23 = vpack.c.bf16 %v12135_v61, %v11687_v9  ;;  %vm17890_vm1 = vcmask 1045509  }
 0x838   :  { %16907 = vmatprep.subr.bf16.mxu1 %v19997_v51  ;;  %v12348_v28 = vsel %vm1122_vm2, %v12339_v62, %v12341_v45  ;;  %v12349_v48 = vsel %vm1122_vm2, %v27846_v7, %v12339_v62 }
 0x839   :  { %16866 = vmatprep.subr.bf16.mxu0 %v19995_v23  ;;  %16908 = vmatpush1.bf16.msra.mxu1 %v19996_v46  ;;  %v12583_v7 = vmul.f32 %v12513_v26, %v12348_v28 }
 0x83a   :  { %16867 = vmatpush1.bf16.msra.mxu0 %v19994_v1  ;;  %v12787_v18 = vpop.permute.xlu1 %12786 }
 0x83b   :  { %v12343_v52 = vpop.permute.xlu0 %12342  ;;  %v12797_v30 = vsel %vm1575_vm3, %v27903_v8, %v12787_v18  ;;  %v12509_v8 = vrot.slane %v27842_v58, %v29287_v6 }
 0x83c   :  { %v12346_v63 = vsel %vm1122_vm2, %v12343_v52, %v29493_v10  ;;  %v12347_v1 = vsel %vm1122_vm2, %v12341_v45, %v12343_v52  ;;  %v13030_v5 = vmul.f32 %v12957_v24, %v12797_v30  ;;  %v13317_v24 = vrot.slane %v27883_v41, %v29467_v0 }
 0x83d   :  { %v12585_v55 = vmul.f32 %v12521_v31, %v12346_v63  ;;  %v12584_v61 = vmul.f32 %v12517_v35, %v12347_v1  ;;  %v12582_v46 = vmul.f32 %v12509_v8, %v12349_v48  ;;  %v13321_v52 = vrot.slane %v27883_v41, %v29468_v16 }
 0x83e   :  { %v12791_v29 = vpop.permute.xlu1 %12790  ;;  %v13383_v35 = vmul.f32 %v13313_v22, %v27549_v14  ;;  %v13765_v41 = vrot.slane %v27892_v50, %v29467_v0  ;;  %v13769_v14 = vrot.slane %v27892_v50, %v29468_v16  ;;  %vm17892_vm2 = vcmask 1046534  }
 0x83f   :  { %v12794_v42 = vsel %vm1575_vm3, %v12791_v29, %v29494_v20  ;;  %v12789_v58 = vpop.permute.xlu0 %12788  ;;  %v20026_v63 = vpack.c.bf16 %v13030_v5, %v12582_v46 }
 0x840   :  { %v13033_v13 = vmul.f32 %v12969_v19, %v12794_v42  ;;  %v12795_v53 = vsel %vm1575_vm3, %v12789_v58, %v12791_v29  ;;  %v12796_v9 = vsel %vm1575_vm3, %v12787_v18, %v12789_v58  ;;  %v28121_v3 = vpop.f32.mrb[76].mxu0  ;;  %v13382_v18 = vmul.f32 %v13309_v57, %v27425_v4  ;;  %v29495_v42 = vld [vmem:[#allocation38_spill] sm:$0xff] }
 0x841   :  { %v13031_v39 = vmul.f32 %v12961_v60, %v12796_v9  ;;  %v13032_v45 = vmul.f32 %v12965_v2, %v12795_v53  ;;  %v28123_v51 = vpop.f32.mrb[77].mxu0  ;;  %v13384_v58 = vmul.f32 %v13317_v24, %v27567_v54  ;;  %v14209_v54 = vrot.slane %v27954_v21, %v29289_v34 }
 0x842   :  { %v13591_v62 = vpop.permute.xlu1 %13590  ;;  %v20029_v23 = vpack.c.bf16 %v13033_v13, %v12585_v55  ;;  %v16576_v30 = vpop.f32.mrb[78].mxu0  ;;  %v13385_v55 = vmul.f32 %v13321_v52, %v29485_v15  ;;  %v14657_v15 = vrot.slane %v27956_v36, %v29289_v34  ;;  %v15101_v52 = vrot.slane %v27992_v44, %v29287_v6 }
 0x843   :  { %v20028_v31 = vpack.c.bf16 %v13032_v45, %v12584_v61  ;;  %v13589_v19 = vpop.permute.xlu0 %13588  ;;  %v20027_v26 = vpack.c.bf16 %v13031_v39, %v12583_v7  ;;  %v16577_v10 = vpop.f32.mrb[79].mxu0  ;;  %v14205_v61 = vrot.slane %v27954_v21, %v29287_v6  ;;  %v14653_v45 = vrot.slane %v27956_v36, %v29287_v6 }
 0x844   :  { %v13595_v60 = vsel %vm2384_vm4, %v13589_v19, %v13591_v62  ;;  %v13596_v2 = vsel %vm2384_vm4, %v27933_v59, %v13589_v19  ;;  %16909 = vmatprep.subr.bf16.mxu1 %v20029_v23  ;;  %v28138_v8 = vpop.f32.mrb[76].mxu1  ;;  %v14217_v23 = vrot.slane %v27954_v21, %v29468_v16  ;;  %v14661_v30 = vrot.slane %v27956_v36, %v29467_v0 }
 0x845   :  { %v13830_v4 = vmul.f32 %v13757_v11, %v13596_v2  ;;  %v13831_v57 = vmul.f32 %v13761_v27, %v13595_v60  ;;  %16868 = vmatprep.subr.bf16.mxu0 %v20027_v26  ;;  %16910 = vmatpush1.bf16.msra.mxu1 %v20028_v31  ;;  %v28142_v22 = vpop.f32.mrb[77].mxu1  ;;  %v14665_v26 = vrot.slane %v27956_v36, %v29468_v16  ;;  %vm17894_vm3 = vcmask 1047559  }
 0x846   :  { %16869 = vmatpush1.bf16.msra.mxu0 %v20026_v63  ;;  %v14037_v28 = vpop.permute.xlu1 %14036  ;;  %v16617_v1 = vpop.f32.mrb[78].mxu1 }
 0x847   :  { %v20058_v29 = vpack.c.bf16 %v13830_v4, %v13382_v18  ;;  %v13593_v59 = vpop.permute.xlu0 %13592  ;;  %v20059_v48 = vpack.c.bf16 %v13831_v57, %v13383_v35  ;;  %v16618_v5 = vpop.f32.mrb[79].mxu1  ;;  %v14044_v39 = vsel %vm2837_vm5, %v27958_v47, %v14037_v28  ;;  %v14213_v47 = vrot.slane %v27954_v21, %v29467_v0  ;;  %v29496_v35 = vld [vmem:[#allocation78_spill] sm:$0xff] }
 0x848   :  { %v13594_v20 = vsel %vm2384_vm4, %v13591_v62, %v13593_v59  ;;  %v13625_v11 = vsel %vm2384_vm4, %v13593_v59, %v29495_v42  ;;  %v14278_v31 = vmul.f32 %v14205_v61, %v14044_v39  ;;  %vm17914_vm4 = vcmask 64512  }
 0x849   :  { %v13832_v27 = vmul.f32 %v13765_v41, %v13594_v20  ;;  %v13833_v50 = vmul.f32 %v13769_v14, %v13625_v11  ;;  %16870 = vmatprep.subr.bf16.mxu0 %v20059_v48  ;;  %v15113_v41 = vrot.slane %v27992_v44, %v29468_v16  ;;  %v15105_v14 = vrot.slane %v27992_v44, %v29289_v34  ;;  %v29498_v34 = vld [vmem:[#allocation85_spill] sm:$0xff] }
 0x84a   :  { %16871 = vmatpush1.bf16.msra.mxu0 %v20058_v29  ;;  %v14041_v13 = vpop.permute.xlu1 %14040  ;;  %v29497_v29 = vld [vmem:[#allocation40_spill] sm:$0xff]  ;;  %v15109_v16 = vrot.slane %v27992_v44, %v29467_v0 }
 0x84b   :  { %v20060_v53 = vpack.c.bf16 %v13832_v27, %v13384_v58  ;;  %v14039_v9 = vpop.permute.xlu0 %14038  ;;  %v20061_v7 = vpack.c.bf16 %v13833_v50, %v13385_v55  ;;  %v14073_v21 = vsel %vm2837_vm5, %v14041_v13, %v29496_v35 }
 0x84c   :  { %v14043_v46 = vsel %vm2837_vm5, %v14037_v28, %v14039_v9  ;;  %v14042_v60 = vsel %vm2837_vm5, %v14039_v9, %v14041_v13  ;;  %v14281_v28 = vmul.f32 %v14217_v23, %v14073_v21  ;;  %v20191_v23 = vmov 1934713408  }
 0x84d   :  { %16911 = vmatprep.subr.bf16.mxu1 %v20061_v7  ;;  %v14279_v10 = vmul.f32 %v14209_v54, %v14043_v46  ;;  %v14280_v48 = vmul.f32 %v14213_v47, %v14042_v60  ;;  %v17079_v47 = vunpack.c.l.s4 %v20191_v23  ;;  %v29514_v23 = vld [vmem:[#allocation64_spill] sm:$0xff] }
 0x84e   :  { %16912 = vmatpush1.bf16.msra.mxu1 %v20060_v53  ;;  %v14487_v62 = vpop.permute.xlu1 %14486 }
 0x84f   :  { %v14485_v24 = vpop.permute.xlu0 %14484 }
 0x850   :  { %v14491_v18 = vsel %vm3290_vm6, %v14485_v24, %v14487_v62  ;;  %v14492_v19 = vsel %vm3290_vm6, %v27999_v32, %v14485_v24 }
 0x851   :  { %v14726_v6 = vmul.f32 %v14653_v45, %v14492_v19  ;;  %v14727_v63 = vmul.f32 %v14657_v15, %v14491_v18  ;;  %v20190_v15 = vmov 1983009808  }
 0x852   :  { %v14933_v2 = vpop.permute.xlu1 %14932  ;;  %v17015_v46 = vunpack.c.l.s4 %v20190_v15 }
 0x853   :  { %v20090_v4 = vpack.c.bf16 %v14726_v6, %v14278_v31  ;;  %v14940_v32 = vsel %vm3743_vm7, %v28019_v43, %v14933_v2  ;;  %v14489_v36 = vpop.permute.xlu0 %14488  ;;  %v20091_v57 = vpack.c.bf16 %v14727_v63, %v14279_v10  ;;  %v17080_v31 = vunpack.c.0.s8 %v17079_v47  ;;  %v29500_v6 = vld [vmem:[#allocation22_spill] sm:$0xff]  ;;  %v29501_v63 = vld [vmem:[#allocation20_spill] sm:$0xff] }
 0x854   :  { %v14490_v1 = vsel %vm3290_vm6, %v14487_v62, %v14489_v36  ;;  %v14521_v59 = vsel %vm3290_vm6, %v14489_v36, %v29497_v29  ;;  %v15174_v5 = vmul.f32 %v15101_v52, %v14940_v32  ;;  %v17016_v62 = vunpack.c.0.s8 %v17015_v46  ;;  %v29499_v52 = vld [vmem:[#allocation48_spill] sm:$0xff]  ;;  %v29513_v46 = vld [vmem:[#allocation119_spill] sm:$0xff] }
 0x855   :  { %v14728_v20 = vmul.f32 %v14661_v30, %v14490_v1  ;;  %v14729_v43 = vmul.f32 %v14665_v26, %v14521_v59  ;;  %16872 = vmatprep.subr.bf16.mxu0 %v20091_v57 }
 0x856   :  { %16873 = vmatpush1.bf16.msra.mxu0 %v20090_v4  ;;  %v14937_v42 = vpop.permute.xlu1 %14936  ;;  %v20122_v44 = vpack.c.bf16 %v15174_v5, %v15174_v5  ;;  %v28216_v30 = vsub.s32 %v17016_v62, %v29499_v52 }
 0x857   :  { %v20092_v11 = vpack.c.bf16 %v14728_v20, %v14280_v48  ;;  %v14969_v58 = vsel %vm3743_vm7, %v14937_v42, %v29498_v34  ;;  %v14935_v27 = vpop.permute.xlu0 %14934  ;;  %v20093_v50 = vpack.c.bf16 %v14729_v43, %v14281_v28 }
 0x858   :  { %v15177_v55 = vmul.f32 %v15113_v41, %v14969_v58  ;;  %v14938_v13 = vsel %vm3743_vm7, %v14935_v27, %v14937_v42  ;;  %v14939_v0 = vsel %vm3743_vm7, %v14933_v2, %v14935_v27  ;;  %v16281_v54 = vsel %vm5007_vm8, %v20122_v44, 0 }
 0x859   :  { %v15175_v53 = vmul.f32 %v15105_v14, %v14939_v0  ;;  %v15176_v9 = vmul.f32 %v15109_v16, %v14938_v13  ;;  %16913 = vmatprep.subr.bf16.mxu1 %v20093_v50  ;;  %v28284_v50 = vsub.s32 %v17080_v31, %v29499_v52  ;;  %v29509_v0 = vld [vmem:[#allocation86_spill] sm:$0xff] }
 0x85a   :  { %v20125_v7 = vpack.c.bf16 %v15177_v55, %v15177_v55  ;;  %16914 = vmatpush1.bf16.msra.mxu1 %v20092_v11  ;;  %v29508_v55 = vld [vmem:[#allocation87_spill] sm:$0xff] }
 0x85b   :  { %v20123_v61 = vpack.c.bf16 %v15175_v53, %v15175_v53  ;;  %v20124_v39 = vpack.c.bf16 %v15176_v9, %v15176_v9 }
 0x85c   :  { %19209 = vmatprep.subr.msk.bf16.mxu1 %vm5007_vm8, %v20125_v7  ;;  %v29510_v7 = vld [vmem:[#allocation90_spill] sm:$0xff] }
 0x85d   :  { %19207 = vmatprep.subr.msk.bf16.mxu0 %vm5007_vm8, %v20123_v61  ;;  %v16287_v45 = vsel %vm5007_vm8, %v20124_v39, 0  ;;  %v29511_v39 = vld [vmem:[#allocation92_spill] sm:$0xff] }
 0x85e   :  { %16875 = vmatpush1.bf16.msra.mxu0 %v16281_v54  ;;  %16916 = vmatpush1.bf16.msra.mxu1 %v16287_v45  ;;  %v29512_v45 = vld [vmem:[#allocation93_spill] sm:$0xff] }
 0x861   :  { %19208 = vmatmul.mubr.msk.bf16.vlgmr.msra.gmra.mrb[92].mxu0 %vm5003_vm9, %v28038_v49  ;;  %19210 = vmatmul.mubr.msk.bf16.vlgmr.msra.gmra.mrb[92].mxu1 %vm5003_vm9, %v28038_v49 }
 0x867   :  { %v28213_v24 = vpop.permute.xlu0 %15470 }
 0x868   :  { %v16575_v18 = vadd.f32 %v28123_v51, %v28213_v24  ;;  %v16616_v19 = vadd.f32 %v28142_v22, %v28213_v24  ;;  %v16491_v26 = vadd.f32 %v27857_v25, %v28213_v24  ;;  %v16493_v49 = vadd.f32 %v27870_v12, %v28213_v24  ;;  %v29502_v25 = vld [vmem:[#allocation6_spill] sm:$0xff] }
 0x869   :  { %v16532_v35 = vadd.f32 %v27894_v38, %v28213_v24  ;;  %v16534_v21 = vadd.f32 %v27896_v56, %v28213_v24  ;;  %v16573_v10 = vadd.f32 %v28121_v3, %v28213_v24  ;;  %v16614_v51 = vadd.f32 %v28138_v8, %v28213_v24  ;;  %v29503_v12 = vld [vmem:[#allocation18_spill] sm:$0xff]  ;;  %v29504_v38 = vld [vmem:[#allocation16_spill] sm:$0xff]  ;;  %v29507_v8 = vld [vmem:[#allocation37_spill] sm:$0xff] }
 0x86a   :  { %v16961_v22 = vadd.f32 %v16575_v18, %v29500_v6  ;;  %v16963_v60 = vadd.f32 %v16616_v19, %v29501_v63  ;;  %v28237_v2 = vadd.f32 %v16491_v26, %v29502_v25  ;;  %v28240_v41 = vadd.f32 %v16493_v49, %v29503_v12  ;;  %v29505_v56 = vld [vmem:[#allocation8_spill] sm:$0xff]  ;;  %v29506_v3 = vld [vmem:[#allocation66_spill] sm:$0xff]  ;;  %v29515_v19 = vld [vmem:[#allocation27_spill] sm:$0xff] }
 0x86b   :  { %v28243_v4 = vadd.f32 %v16532_v35, %v29504_v38  ;;  %v28246_v32 = vadd.f32 %v16534_v21, %v29505_v56  ;;  %v28249_v36 = vadd.f32 %v16573_v10, %v29506_v3  ;;  %v28252_v57 = vadd.f32 %v16614_v51, %v29507_v8  ;;  %v29516_v49 = vld [vmem:[#allocation60_spill] sm:$0xff]  ;;  %v29517_v21 = vld [vmem:[#allocation59_spill] sm:$0xff] }
 0x86c   :  { %v16993_v14 = vmax.f32 %v16961_v22, 0.0  ;;  %v16995_v28 = vmax.f32 %v16963_v60, 0.0  ;;  %v16988_v1 = vmax.f32 %v28237_v2, 0.0  ;;  %v16989_v29 = vmax.f32 %v28240_v41, 0.0  ;;  %v29518_v51 = vld [vmem:[#allocation11_spill] sm:$0xff]  ;;  %v29519_v22 = vld [vmem:[#allocation26_spill] sm:$0xff] }
 0x86d   :  { %v16990_v59 = vmax.f32 %v28243_v4, 0.0  ;;  %v16991_v16 = vmax.f32 %v28246_v32, 0.0  ;;  %v16992_v48 = vmax.f32 %v28249_v36, 0.0  ;;  %v16994_v5 = vmax.f32 %v28252_v57, 0.0  ;;  %v29520_v60 = vld [vmem:[#allocation31_spill] sm:$0xff] }
 0x86e   :  { %v17196_v20 = vcombine.low %v16993_v14, %v16995_v28  ;;  %v28260_v43 = vcombine.high %v16993_v14, %v16995_v28  ;;  %v16327_v42 = vadd.f32 %v27694_v17, %v28213_v24  ;;  %v16329_v11 = vadd.f32 %v27709_v40, %v28213_v24 }
 0x86f   :  { %v17148_v34 = vcombine.low %v16988_v1, %v16990_v59  ;;  %v17164_v58 = vcombine.low %v16989_v29, %v16991_v16  ;;  %v17180_v27 = vcombine.low %v16992_v48, %v16994_v5  ;;  %v16368_v17 = vadd.f32 %v27707_v33, %v28213_v24 }
 0x870   :  { %v28281_v40 = vrot.slane %v17196_v20, %v28216_v30  ;;  %v16370_v13 = vadd.f32 %v29508_v55, %v28213_v24  ;;  %v16409_v44 = vadd.f32 %v29509_v0, %v28213_v24  ;;  %v16411_v61 = vadd.f32 %v29510_v7, %v28213_v24 }
 0x871   :  { %v28291_v53 = vrot.slane %v17148_v34, %v28216_v30  ;;  %v28294_v9 = vrot.slane %v17164_v58, %v28216_v30  ;;  %v28297_v33 = vrot.slane %v17180_v27, %v28216_v30  ;;  %v16450_v54 = vadd.f32 %v29511_v39, %v28213_v24 }
 0x872   :  { %v16452_v15 = vadd.f32 %v29512_v45, %v28213_v24  ;;  %v16948_v62 = vadd.f32 %v16327_v42, %v29513_v46  ;;  %v16949_v47 = vadd.f32 %v16329_v11, %v29514_v23  ;;  %v16950_v26 = vadd.f32 %v16368_v17, %v29515_v19 }
 0x873   :  { %v17212_v31 = vcombine.low %v28291_v53, %v28294_v9  ;;  %v17244_v18 = vcombine.low %v28297_v33, %v28281_v40  ;;  %v16951_v35 = vadd.f32 %v16370_v13, %v29516_v49  ;;  %v16952_v10 = vadd.f32 %v16409_v44, %v29517_v21 }
 0x874   :  { %v16953_v6 = vadd.f32 %v16411_v61, %v29518_v51  ;;  %v16954_v63 = vadd.f32 %v16450_v54, %v29519_v22  ;;  %v16955_v25 = vadd.f32 %v16452_v15, %v29520_v60  ;;  %v16980_v56 = vmax.f32 %v16948_v62, 0.0 }
 0x875   :  { %v28318_v12 = vrot.slane %v17212_v31, %v28284_v50  ;;  %v28321_v38 = vrot.slane %v17244_v18, %v28284_v50  ;;  %v16981_v3 = vmax.f32 %v16949_v47, 0.0  ;;  %v16982_v8 = vmax.f32 %v16950_v26, 0.0 }
 0x876   :  { %v16983_v14 = vmax.f32 %v16951_v35, 0.0  ;;  %v16984_v28 = vmax.f32 %v16952_v10, 0.0  ;;  %v16985_v20 = vmax.f32 %v16953_v6, 0.0  ;;  %v16986_v11 = vmax.f32 %v16954_v63, 0.0 }
 0x877   :  { %v17276_v42 = vcombine.low %v28318_v12, %v28321_v38  ;;  %v16987_v34 = vmax.f32 %v16955_v25, 0.0  ;;  %v17277_v58 = vcombine.high %v28318_v12, %v28321_v38  ;;  %v17012_v27 = vcombine.low %v16980_v56, %v16982_v8 }
 0x878   :  { %v17028_v17 = vcombine.low %v16981_v3, %v16983_v14  ;;  %v17013_v55 = vcombine.high %v16980_v56, %v16982_v8  ;;  %v17029_v13 = vcombine.high %v16981_v3, %v16983_v14  ;;  %v17044_v0 = vcombine.low %v16984_v28, %v16986_v11 }
 0x879   :  { %17558 = vadd.xlane.f32.xlu0 %v17276_v42  ;;  %v17060_v44 = vcombine.low %v16985_v20, %v16987_v34  ;;  %v17045_v7 = vcombine.high %v16984_v28, %v16986_v11  ;;  %v17061_v61 = vcombine.high %v16985_v20, %v16987_v34  ;;  %v17020_v39 = vrot.slane %v17012_v27, %v28216_v30 }
 0x87a   :  { %v17036_v54 = vrot.slane %v17028_v17, %v28216_v30  ;;  %v17027_v45 = vrot.slane %v17013_v55, %v28216_v30  ;;  %v17043_v15 = vrot.slane %v17029_v13, %v28216_v30  ;;  %v17052_v46 = vrot.slane %v17044_v0, %v28216_v30  ;;  %v29521_v0 = vld [vmem:[#allocation14_spill] sm:$0xff] }
 0x87b   :  { %v17068_v62 = vrot.slane %v17060_v44, %v28216_v30  ;;  %v17059_v23 = vrot.slane %v17045_v7, %v28216_v30  ;;  %v17075_v47 = vrot.slane %v17061_v61, %v28216_v30  ;;  %v17213_v14 = vcombine.high %v28291_v53, %v28294_v9 }
 0x87c   :  { %v17076_v31 = vcombine.low %v17020_v39, %v17036_v54  ;;  %v17077_v18 = vcombine.high %v17020_v39, %v17036_v54  ;;  %v17092_v19 = vcombine.low %v17027_v45, %v17043_v15  ;;  %v17093_v26 = vcombine.high %v17027_v45, %v17043_v15  ;;  %v29522_v54 = vld [vmem:[#allocation49_spill] sm:$0xff] }
 0x87d   :  { %v17108_v49 = vcombine.low %v17052_v46, %v17068_v62  ;;  %v17109_v35 = vcombine.high %v17052_v46, %v17068_v62  ;;  %v17124_v21 = vcombine.low %v17059_v23, %v17075_v47  ;;  %v17125_v10 = vcombine.high %v17059_v23, %v17075_v47  ;;  %v29523_v47 = vld [vmem:[#allocation47_spill] sm:$0xff] }
 0x87e   :  { %v17084_v51 = vrot.slane %v17076_v31, %v28284_v50  ;;  %v28337_v6 = vrot.slane %v17077_v18, %v28284_v50  ;;  %v28340_v22 = vrot.slane %v17092_v19, %v28284_v50  ;;  %v28343_v63 = vrot.slane %v17093_v26, %v28284_v50  ;;  %v29524_v18 = vld [vmem:[#allocation45_spill] sm:$0xff] }
 0x87f   :  { %v17116_v60 = vrot.slane %v17108_v49, %v28284_v50  ;;  %v28347_v25 = vrot.slane %v17109_v35, %v28284_v50  ;;  %v28350_v56 = vrot.slane %v17124_v21, %v28284_v50  ;;  %v28353_v3 = vrot.slane %v17125_v10, %v28284_v50 }
 0x880   :  { %v16654_v8 = vpop.f32.mrb[80].mxu0  ;;  %v17245_v28 = vcombine.high %v28297_v33, %v28281_v40  ;;  %v17149_v20 = vcombine.high %v16988_v1, %v16990_v59  ;;  %v17165_v42 = vcombine.high %v16989_v29, %v16991_v16  ;;  %v17211_v59 = vrot.slane %v28260_v43, %v28216_v30 }
 0x881   :  { %v17140_v11 = vcombine.low %v17084_v51, %v17116_v60  ;;  %v17141_v34 = vcombine.high %v17084_v51, %v17116_v60  ;;  %v16655_v27 = vadd.f32 %v16654_v8, %v28213_v24  ;;  %v16656_v17 = vpop.f32.mrb[81].mxu0  ;;  %v17142_v53 = vcombine.low %v28337_v6, %v28347_v25 }
 0x882   :  { %v16657_v40 = vadd.f32 %v16656_v17, %v28213_v24  ;;  %v16658_v9 = vpop.f32.mrb[82].mxu0  ;;  %v17143_v2 = vcombine.high %v28337_v6, %v28347_v25  ;;  %v17144_v4 = vcombine.low %v28340_v22, %v28350_v56  ;;  %v17145_v41 = vcombine.high %v28340_v22, %v28350_v56 }
 0x883   :  { %17556 = vadd.xlane.f32.xlu1 %v17140_v11  ;;  %17564 = vadd.xlane.f32.xlu0 %v17141_v34  ;;  %v16659_v32 = vpop.f32.mrb[83].mxu0  ;;  %v17146_v1 = vcombine.low %v28343_v63, %v28353_v3  ;;  %v17147_v29 = vcombine.high %v28343_v63, %v28353_v3  ;;  %v28384_v33 = vrot.slane %v17213_v14, %v28284_v50 }
 0x884   :  { %v16695_v16 = vpop.f32.mrb[80].mxu1  ;;  %v28387_v55 = vrot.slane %v17245_v28, %v28284_v50  ;;  %v17163_v13 = vrot.slane %v17149_v20, %v28216_v30  ;;  %v16964_v44 = vadd.f32 %v16655_v27, %v29521_v0  ;;  %v17179_v39 = vrot.slane %v17165_v42, %v28216_v30 }
 0x885   :  { %v16696_v7 = vadd.f32 %v16695_v16, %v28213_v24  ;;  %v16697_v61 = vpop.f32.mrb[81].mxu1  ;;  %v17181_v43 = vcombine.high %v16992_v48, %v16994_v5  ;;  %v16965_v45 = vadd.f32 %v16657_v40, %v29522_v54 }
 0x886   :  { %v16698_v15 = vadd.f32 %v16697_v61, %v28213_v24  ;;  %v16699_v46 = vpop.f32.mrb[82].mxu1  ;;  %v17278_v62 = vcombine.low %v28384_v33, %v28387_v55  ;;  %v17279_v23 = vcombine.high %v28384_v33, %v28387_v55  ;;  %v17228_v48 = vcombine.low %v17163_v13, %v17179_v39 }
 0x887   :  { %17566 = vadd.xlane.f32.xlu1 %v17277_v58  ;;  %v16966_v57 = vadd.f32 %v16696_v7, %v29523_v47  ;;  %v16700_v31 = vpop.f32.mrb[83].mxu1  ;;  %v17195_v36 = vrot.slane %v17181_v43, %v28216_v30  ;;  %v17229_v5 = vcombine.high %v17163_v13, %v17179_v39  ;;  %v16996_v26 = vmax.f32 %v16964_v44, 0.0 }
 0x888   :  { %v16967_v19 = vadd.f32 %v16698_v15, %v29524_v18  ;;  %v28410_v35 = vrot.slane %v17228_v48, %v28284_v50  ;;  %v16997_v10 = vmax.f32 %v16965_v45, 0.0  ;;  %v29525_v15 = vld [vmem:[#allocation73_spill] sm:$0xff]  ;;  %v29527_v18 = vld [vmem:[#allocation84_spill] sm:$0xff] }
 0x889   :  { %v16998_v49 = vmax.f32 %v16966_v57, 0.0  ;;  %v17260_v21 = vcombine.low %v17195_v36, %v17211_v59  ;;  %v17261_v60 = vcombine.high %v17195_v36, %v17211_v59  ;;  %v28416_v8 = vrot.slane %v17229_v5, %v28284_v50  ;;  %v29526_v31 = vld [vmem:[#allocation89_spill] sm:$0xff] }
 0x88a   :  { %v16999_v51 = vmax.f32 %v16967_v19, 0.0 }
 0x88b   :  { %v17284_v12 = vcombine.low %v16996_v26, %v16998_v49  ;;  %v17285_v38 = vcombine.high %v16996_v26, %v16998_v49  ;;  %v28413_v58 = vrot.slane %v17260_v21, %v28284_v50  ;;  %v28419_v20 = vrot.slane %v17261_v60, %v28284_v50  ;;  %v29528_v49 = vld [vmem:[#allocation83_spill] sm:$0xff] }
 0x88c   :  { %v17300_v14 = vcombine.low %v16997_v10, %v16999_v51  ;;  %v17301_v28 = vcombine.high %v16997_v10, %v16999_v51 }
 0x88d   :  { %v17292_v42 = vrot.slane %v17284_v12, %v28216_v30  ;;  %v17299_v11 = vrot.slane %v17285_v38, %v28216_v30  ;;  %v17280_v34 = vcombine.low %v28410_v35, %v28413_v58  ;;  %v17281_v27 = vcombine.high %v28410_v35, %v28413_v58 }
 0x88e   :  { %v17308_v17 = vrot.slane %v17300_v14, %v28216_v30  ;;  %v17315_v40 = vrot.slane %v17301_v28, %v28216_v30  ;;  %v17282_v9 = vcombine.low %v28416_v8, %v28419_v20  ;;  %v17283_v32 = vcombine.high %v28416_v8, %v28419_v20 }
 0x890   :  { %v17348_v59 = vcombine.low %v17292_v42, %v17308_v17  ;;  %v17349_v16 = vcombine.high %v17292_v42, %v17308_v17  ;;  %v17364_v13 = vcombine.low %v17299_v11, %v17315_v40  ;;  %v17365_v0 = vcombine.high %v17299_v11, %v17315_v40 }
 0x8c0   :  { %v16736_v44 = vpop.f32.mrb[84].mxu0 }
 0x8c1   :  { %v16737_v7 = vadd.f32 %v16736_v44, %v28213_v24  ;;  %v16738_v61 = vpop.f32.mrb[85].mxu0 }
 0x8c2   :  { %v16739_v39 = vadd.f32 %v16738_v61, %v28213_v24  ;;  %v16740_v43 = vpop.f32.mrb[86].mxu0 }
 0x8c3   :  { %v16741_v54 = vpop.f32.mrb[87].mxu0  ;;  %v16968_v46 = vadd.f32 %v16737_v7, %v29525_v15 }
 0x8c4   :  { %v16777_v45 = vpop.f32.mrb[84].mxu1  ;;  %v16969_v36 = vadd.f32 %v16739_v39, %v29526_v31  ;;  %v17356_v54 = vrot.slane %v17348_v59, %v28284_v50  ;;  %v17372_v31 = vrot.slane %v17364_v13, %v28284_v50 }
 0x8c5   :  { %v16778_v47 = vadd.f32 %v16777_v45, %v28213_v24  ;;  %v16779_v57 = vpop.f32.mrb[85].mxu1  ;;  %v17000_v10 = vmax.f32 %v16968_v46, 0.0  ;;  %v17363_v45 = vrot.slane %v17349_v16, %v28284_v50 }
 0x8c6   :  { %v16780_v48 = vadd.f32 %v16779_v57, %v28213_v24  ;;  %v16781_v5 = vpop.f32.mrb[86].mxu1  ;;  %v17001_v60 = vmax.f32 %v16969_v36, 0.0  ;;  %v17379_v36 = vrot.slane %v17365_v0, %v28284_v50 }
 0x8c7   :  { %v16970_v19 = vadd.f32 %v16778_v47, %v29527_v18  ;;  %v16782_v26 = vpop.f32.mrb[87].mxu1 }
 0x8c8   :  { %v16971_v21 = vadd.f32 %v16780_v48, %v29528_v49 }
 0x8c9   :  { %v17002_v51 = vmax.f32 %v16970_v19, 0.0 }
 0x8ca   :  { %v17003_v12 = vmax.f32 %v16971_v21, 0.0  ;;  %v29529_v21 = vld [vmem:[#allocation97_spill] sm:$0xff] }
 0x8cb   :  { %v17316_v38 = vcombine.low %v17000_v10, %v17002_v51  ;;  %v17317_v14 = vcombine.high %v17000_v10, %v17002_v51 }
 0x8cc   :  { %v17332_v28 = vcombine.low %v17001_v60, %v17003_v12  ;;  %v17333_v42 = vcombine.high %v17001_v60, %v17003_v12  ;;  %v29531_v12 = vld [vmem:[#allocation107_spill] sm:$0xff] }
 0x8cd   :  { %v17324_v11 = vrot.slane %v17316_v38, %v28216_v30  ;;  %v17331_v17 = vrot.slane %v17317_v14, %v28216_v30 }
 0x8ce   :  { %v17340_v40 = vrot.slane %v17332_v28, %v28216_v30  ;;  %v17347_v44 = vrot.slane %v17333_v42, %v28216_v30  ;;  %v29532_v28 = vld [vmem:[#allocation106_spill] sm:$0xff] }
 0x8d0   :  { %v17380_v7 = vcombine.low %v17324_v11, %v17340_v40  ;;  %v17381_v61 = vcombine.high %v17324_v11, %v17340_v40  ;;  %v17396_v39 = vcombine.low %v17331_v17, %v17347_v44  ;;  %v17397_v43 = vcombine.high %v17331_v17, %v17347_v44 }
 0x8d2   :  { %v17388_v15 = vrot.slane %v17380_v7, %v28284_v50  ;;  %v17395_v46 = vrot.slane %v17381_v61, %v28284_v50  ;;  %v17404_v47 = vrot.slane %v17396_v39, %v28284_v50  ;;  %v17411_v57 = vrot.slane %v17397_v43, %v28284_v50 }
 0x8d4   :  { %v17412_v48 = vcombine.low %v17356_v54, %v17388_v15  ;;  %v17413_v5 = vcombine.high %v17356_v54, %v17388_v15  ;;  %v17414_v18 = vcombine.low %v17363_v45, %v17395_v46  ;;  %v17415_v19 = vcombine.high %v17363_v45, %v17395_v46 }
 0x8d5   :  { %v17416_v26 = vcombine.low %v17372_v31, %v17404_v47  ;;  %v17417_v59 = vcombine.high %v17372_v31, %v17404_v47  ;;  %v17418_v49 = vcombine.low %v17379_v36, %v17411_v57  ;;  %v17419_v16 = vcombine.high %v17379_v36, %v17411_v57 }
 0x8d6   :  { %17560 = vadd.xlane.f32.xlu0 %v17412_v48 }
 0x8da   :  { %17568 = vadd.xlane.f32.xlu0 %v17413_v5 }
 0x8de   :  { %17572 = vadd.xlane.f32.xlu0 %v17142_v53 }
 0x8e2   :  { %17576 = vadd.xlane.f32.xlu0 %v17414_v18 }
 0x8e6   :  { %17580 = vadd.xlane.f32.xlu0 %v17143_v2 }
 0x8ea   :  { %17584 = vadd.xlane.f32.xlu0 %v17415_v19 }
 0x8ee   :  { %17588 = vadd.xlane.f32.xlu0 %v17144_v4 }
 0x8f2   :  { %17592 = vadd.xlane.f32.xlu0 %v17416_v26 }
 0x8f6   :  { %17596 = vadd.xlane.f32.xlu0 %v17145_v41  ;;  %v29530_v41 = vld [vmem:[#allocation110_spill] sm:$0xff] }
 0x8fa   :  { %17600 = vadd.xlane.f32.xlu0 %v17417_v59 }
 0x8fe   :  { %17604 = vadd.xlane.f32.xlu0 %v17146_v1 }
 0x900   :  { %v16818_v53 = vpop.f32.mrb[88].mxu0 }
 0x901   :  { %v16819_v13 = vadd.f32 %v16818_v53, %v28213_v24  ;;  %v16820_v6 = vpop.f32.mrb[89].mxu0 }
 0x902   :  { %v16821_v25 = vadd.f32 %v16820_v6, %v28213_v24  ;;  %17608 = vadd.xlane.f32.xlu0 %v17418_v49  ;;  %v16822_v2 = vpop.f32.mrb[90].mxu0 }
 0x903   :  { %v16823_v0 = vpop.f32.mrb[91].mxu0  ;;  %v16972_v10 = vadd.f32 %v16819_v13, %v29529_v21  ;;  %v29534_v13 = vld [vmem:[#allocation143_spill] sm:$0xff]  ;;  %v29536_v21 = vld [vmem:[#allocation125_spill] sm:$0xff] }
 0x904   :  { %v16859_v4 = vpop.f32.mrb[88].mxu1  ;;  %v16973_v51 = vadd.f32 %v16821_v25, %v29530_v41  ;;  %v29535_v0 = vld [vmem:[#allocation146_spill] sm:$0xff] }
 0x905   :  { %v16860_v22 = vadd.f32 %v16859_v4, %v28213_v24  ;;  %v16861_v56 = vpop.f32.mrb[89].mxu1  ;;  %v17004_v11 = vmax.f32 %v16972_v10, 0.0 }
 0x906   :  { %v16862_v60 = vadd.f32 %v16861_v56, %v28213_v24  ;;  %17612 = vadd.xlane.f32.xlu0 %v17147_v29  ;;  %v16863_v1 = vpop.f32.mrb[90].mxu1  ;;  %v17005_v40 = vmax.f32 %v16973_v51, 0.0  ;;  %v17559_v55 = vpop.xlane.xlu0 %17558 }
 0x907   :  { %v16974_v38 = vadd.f32 %v16860_v22, %v29531_v12  ;;  %v16864_v14 = vpop.f32.mrb[91].mxu1 }
 0x908   :  { %v16975_v42 = vadd.f32 %v16862_v60, %v29532_v28 }
 0x909   :  { %v17006_v17 = vmax.f32 %v16974_v38, 0.0 }
 0x90a   :  { %v17007_v44 = vmax.f32 %v16975_v42, 0.0  ;;  %17616 = vadd.xlane.f32.xlu0 %v17419_v16  ;;  %v29533_v16 = vld [vmem:[#allocation120_spill] sm:$0xff] }
 0x90b   :  { %v17420_v7 = vcombine.low %v17004_v11, %v17006_v17  ;;  %v17421_v61 = vcombine.high %v17004_v11, %v17006_v17 }
 0x90c   :  { %v17436_v39 = vcombine.low %v17005_v40, %v17007_v44  ;;  %v17437_v43 = vcombine.high %v17005_v40, %v17007_v44 }
 0x90d   :  { %v17428_v54 = vrot.slane %v17420_v7, %v28216_v30  ;;  %v17435_v63 = vrot.slane %v17421_v61, %v28216_v30 }
 0x90e   :  { %v17444_v3 = vrot.slane %v17436_v39, %v28216_v30  ;;  %v17451_v29 = vrot.slane %v17437_v43, %v28216_v30 }
 0x910   :  { %v17484_v45 = vcombine.low %v17428_v54, %v17444_v3  ;;  %v17485_v15 = vcombine.high %v17428_v54, %v17444_v3  ;;  %v17500_v46 = vcombine.low %v17435_v63, %v17451_v29  ;;  %v17501_v47 = vcombine.high %v17435_v63, %v17451_v29 }
 0x912   :  { %v17492_v7 = vrot.slane %v17484_v45, %v28284_v50  ;;  %v17499_v61 = vrot.slane %v17485_v15, %v28284_v50  ;;  %v17508_v3 = vrot.slane %v17500_v46, %v28284_v50 }
 0x934   :  { %v16900_v57 = vpop.f32.mrb[92].mxu0  ;;  %v16941_v31 = vpop.f32.mrb[92].mxu1 }
 0x935   :  { %v16901_v36 = vadd.f32 %v16900_v57, %v28213_v24  ;;  %v16942_v48 = vadd.f32 %v16941_v31, %v28213_v24  ;;  %v16902_v5 = vpop.f32.mrb[93].mxu0  ;;  %v16943_v18 = vpop.f32.mrb[93].mxu1 }
 0x936   :  { %v16903_v19 = vadd.f32 %v16902_v5, %v28213_v24  ;;  %v16944_v26 = vadd.f32 %v16943_v18, %v28213_v24  ;;  %v16904_v59 = vpop.f32.mrb[94].mxu0  ;;  %v16945_v49 = vpop.f32.mrb[94].mxu1 }
 0x937   :  { %v16976_v53 = vadd.f32 %v16901_v36, %v29533_v16  ;;  %v16978_v6 = vadd.f32 %v16942_v48, %v29534_v13  ;;  %v16905_v25 = vpop.f32.mrb[95].mxu0  ;;  %v16946_v2 = vpop.f32.mrb[95].mxu1  ;;  %v17621_v49 = vmul.f32 0.0078125, %v17559_v55 }
 0x938   :  { %v16977_v4 = vadd.f32 %v16903_v19, %v29535_v0  ;;  %v16979_v10 = vadd.f32 %v16944_v26, %v29536_v21  ;;  %v17728_v2 = vadd.s32 4294967288, %v20745_v37 }
 0x939   :  { %v17008_v22 = vmax.f32 %v16976_v53, 0.0  ;;  %v17010_v56 = vmax.f32 %v16978_v6, 0.0 }
 0x93a   :  { %v17009_v41 = vmax.f32 %v16977_v4, 0.0  ;;  %v17011_v51 = vmax.f32 %v16979_v10, 0.0 }
 0x93b   :  { %v17452_v60 = vcombine.low %v17008_v22, %v17010_v56  ;;  %v17453_v1 = vcombine.high %v17008_v22, %v17010_v56  ;;  %v28529_v22 = vsub.s32 %v20745_v37, %v29499_v52  ;;  %v28532_v56 = vsub.s32 %v17728_v2, %v29499_v52 }
 0x93c   :  { %v17468_v12 = vcombine.low %v17009_v41, %v17011_v51  ;;  %v17469_v24 = vcombine.high %v17009_v41, %v17011_v51 }
 0x93d   :  { %v17460_v38 = vrot.slane %v17452_v60, %v28216_v30  ;;  %v17467_v14 = vrot.slane %v17453_v1, %v28216_v30 }
 0x93e   :  { %v17476_v28 = vrot.slane %v17468_v12, %v28216_v30  ;;  %v17483_v42 = vrot.slane %v17469_v24, %v28216_v30  ;;  %v17515_v30 = vrot.slane %v17501_v47, %v28284_v50 }
 0x940   :  { %v17516_v11 = vcombine.low %v17460_v38, %v17476_v28  ;;  %v17517_v17 = vcombine.high %v17460_v38, %v17476_v28  ;;  %v17532_v40 = vcombine.low %v17467_v14, %v17483_v42  ;;  %v17533_v44 = vcombine.high %v17467_v14, %v17483_v42 }
 0x942   :  { %v17524_v39 = vrot.slane %v17516_v11, %v28284_v50  ;;  %v17531_v43 = vrot.slane %v17517_v17, %v28284_v50  ;;  %v17540_v54 = vrot.slane %v17532_v40, %v28284_v50  ;;  %v17547_v63 = vrot.slane %v17533_v44, %v28284_v50  ;;  %v17668_v50 = vld [vmem:[%s28634_s10] sm:$0xf] }
 0x943   :  { %20135 = vmatprep.subr.msk.bf16.mxu0 %vm5007_vm8, %v17668_v50  ;;  %v17922_v33 = vsel %vm5007_vm8, %v17668_v50, 0  ;;  %v17735_v40 = vadd.s32 4294967280, %v20745_v37  ;;  %v17742_v44 = vadd.s32 4294967272, %v20745_v37 }
 0x944   :  { %v17548_v29 = vcombine.low %v17492_v7, %v17524_v39  ;;  %v17549_v57 = vcombine.high %v17492_v7, %v17524_v39  ;;  %v17550_v31 = vcombine.low %v17499_v61, %v17531_v43  ;;  %v17551_v36 = vcombine.high %v17499_v61, %v17531_v43  ;;  %20130 = vmatpush3.bf16.msra.mxu0 %v17922_v33 }
 0x945   :  { %v17552_v48 = vcombine.low %v17508_v3, %v17540_v54  ;;  %v17553_v45 = vcombine.high %v17508_v3, %v17540_v54  ;;  %v17554_v5 = vcombine.low %v17515_v30, %v17547_v63  ;;  %v17555_v15 = vcombine.high %v17515_v30, %v17547_v63 }
 0x946   :  { %17562 = vadd.xlane.f32.xlu1 %v17548_v29 }
 0x94a   :  { %17570 = vadd.xlane.f32.xlu1 %v17549_v57  ;;  %v28542_v57 = vsub.s32 %v17735_v40, %v29499_v52 }
 0x94e   :  { %17574 = vadd.xlane.f32.xlu1 %v17278_v62  ;;  %v17565_v62 = vpop.xlane.xlu0 %17564 }
 0x94f   :  { %v17624_v13 = vmul.f32 0.0078125, %v17565_v62 }
 0x952   :  { %17578 = vadd.xlane.f32.xlu1 %v17550_v31  ;;  %v28545_v31 = vsub.s32 %v17742_v44, %v29499_v52 }
 0x956   :  { %17582 = vadd.xlane.f32.xlu1 %v17279_v23 }
 0x95a   :  { %17586 = vadd.xlane.f32.xlu1 %v17551_v36 }
 0x95e   :  { %17590 = vadd.xlane.f32.xlu1 %v17280_v34 }
 0x962   :  { %17594 = vadd.xlane.f32.xlu1 %v17552_v48 }
 0x963   :  { %v17561_v23 = vpop.xlane.xlu0 %17560 }
 0x964   :  { %v17622_v14 = vmul.f32 0.0078125, %v17561_v23 }
 0x966   :  { %17598 = vadd.xlane.f32.xlu1 %v17281_v27 }
 0x967   :  { %v17569_v35 = vpop.xlane.xlu0 %17568 }
 0x968   :  { %v17626_v11 = vmul.f32 0.0078125, %v17569_v35 }
 0x96a   :  { %17602 = vadd.xlane.f32.xlu1 %v17553_v45 }
 0x96b   :  { %v17573_v58 = vpop.xlane.xlu0 %17572 }
 0x96c   :  { %v17628_v30 = vmul.f32 0.0078125, %v17573_v58 }
 0x96e   :  { %17606 = vadd.xlane.f32.xlu1 %v17282_v9  ;;  %v17557_v9 = vpop.xlane.xlu1 %17556 }
 0x96f   :  { %v17577_v34 = vpop.xlane.xlu0 %17576  ;;  %v17620_v16 = vmul.f32 0.0078125, %v17557_v9 }
 0x970   :  { %v17630_v45 = vmul.f32 0.0078125, %v17577_v34 }
 0x971   :  { %v17652_v0 = vpack.c.bf16 %v17621_v49, %v17620_v16 }
 0x972   :  { %17610 = vadd.xlane.f32.xlu1 %v17554_v5  ;;  %v17567_v20 = vpop.xlane.xlu1 %17566 }
 0x973   :  { %v17581_v27 = vpop.xlane.xlu0 %17580  ;;  %v17625_v6 = vmul.f32 0.0078125, %v17567_v20  ;;  %v17692_v41 = vunpack.c.l.b16 %v17652_v0  ;;  %v17693_v51 = vunpack.c.h.b16 %v17652_v0 }
 0x974   :  { %v17632_v33 = vmul.f32 0.0078125, %v17581_v27 }
 0x975   :  { %v17654_v4 = vpack.c.bf16 %v17625_v6, %v17624_v13  ;;  %v17727_v28 = vrot.slane %v17692_v41, %v28529_v22  ;;  %v17732_v42 = vrot.slane %v17693_v51, %v28532_v56 }
 0x976   :  { %17614 = vadd.xlane.f32.xlu1 %v17283_v32 }
 0x977   :  { %v17585_v8 = vpop.xlane.xlu0 %17584  ;;  %v17696_v1 = vunpack.c.l.b16 %v17654_v4  ;;  %v17697_v12 = vunpack.c.h.b16 %v17654_v4  ;;  %v17734_v3 = vsel %vm17733_vm10, %v17732_v42, %v17727_v28 }
 0x978   :  { %v17634_v55 = vmul.f32 0.0078125, %v17585_v8 }
 0x979   :  { %v17752_v61 = vrot.slane %v17696_v1, %v28529_v22  ;;  %v17756_v39 = vrot.slane %v17697_v12, %v28532_v56 }
 0x97a   :  { %17618 = vadd.xlane.f32.xlu1 %v17555_v15 }
 0x97b   :  { %v17589_v32 = vpop.xlane.xlu0 %17588  ;;  %v17757_v48 = vsel %vm17733_vm10, %v17756_v39, %v17752_v61 }
 0x97c   :  { %v17636_v62 = vmul.f32 0.0078125, %v17589_v32 }
 0x97f   :  { %v17593_v47 = vpop.xlane.xlu0 %17592 }
 0x980   :  { %v17638_v23 = vmul.f32 0.0078125, %v17593_v47 }
 0x983   :  { %v17597_v26 = vpop.xlane.xlu0 %17596 }
 0x984   :  { %v17640_v58 = vmul.f32 0.0078125, %v17597_v26 }
 0x987   :  { %v17601_v53 = vpop.xlane.xlu0 %17600 }
 0x988   :  { %v17642_v9 = vmul.f32 0.0078125, %v17601_v53 }
 0x98b   :  { %v17605_v10 = vpop.xlane.xlu0 %17604 }
 0x98c   :  { %v17644_v52 = vmul.f32 0.0078125, %v17605_v10 }
 0x98f   :  { %v17609_v17 = vpop.xlane.xlu0 %17608 }
 0x990   :  { %v17646_v27 = vmul.f32 0.0078125, %v17609_v17 }
 0x993   :  { %v17613_v35 = vpop.xlane.xlu0 %17612 }
 0x994   :  { %v28550_v8 = vmul.f32 0.0078125, %v17613_v35 }
 0x997   :  { %v17617_v0 = vpop.xlane.xlu0 %17616 }
 0x9d3   :  { %v17563_v46 = vpop.xlane.xlu1 %17562 }
 0x9d4   :  { %v17623_v60 = vmul.f32 0.0078125, %v17563_v46 }
 0x9d6   :  { %v17653_v7 = vpack.c.bf16 %v17623_v60, %v17622_v14 }
 0x9d7   :  { %v17571_v18 = vpop.xlane.xlu1 %17570 }
 0x9d8   :  { %v17627_v24 = vmul.f32 0.0078125, %v17571_v18  ;;  %v17694_v37 = vunpack.c.l.b16 %v17653_v7  ;;  %v17695_v20 = vunpack.c.h.b16 %v17653_v7 }
 0x9da   :  { %v17655_v43 = vpack.c.bf16 %v17627_v24, %v17626_v11  ;;  %v17739_v18 = vrot.slane %v17694_v37, %v28542_v57  ;;  %v17746_v26 = vrot.slane %v17695_v20, %v28545_v31  ;;  %v17650_v11 = vmul.f32 0.0078125, %v17617_v0 }
 0x9db   :  { %v17575_v19 = vpop.xlane.xlu1 %17574 }
 0x9dc   :  { %v17629_v54 = vmul.f32 0.0078125, %v17575_v19  ;;  %v17698_v5 = vunpack.c.l.b16 %v17655_v43  ;;  %v17699_v19 = vunpack.c.h.b16 %v17655_v43  ;;  %v17741_v4 = vsel %vm17740_vm11, %v17739_v18, %v17734_v3 }
 0x9dd   :  { %v28560_v7 = vsel %vm17747_vm12, %v17746_v26, %v17741_v4 }
 0x9de   :  { %v17656_v15 = vpack.c.bf16 %v17629_v54, %v17628_v30  ;;  %v17761_v34 = vrot.slane %v17698_v5, %v28542_v57  ;;  %v17766_v10 = vrot.slane %v17699_v19, %v28545_v31 }
 0x9df   :  { %v17579_v59 = vpop.xlane.xlu1 %17578 }
 0x9e0   :  { %v17631_v29 = vmul.f32 0.0078125, %v17579_v59  ;;  %v17700_v49 = vunpack.c.l.b16 %v17656_v15  ;;  %v17701_v32 = vunpack.c.h.b16 %v17656_v15 }
 0x9e2   :  { %v17657_v46 = vpack.c.bf16 %v17631_v29, %v17630_v45  ;;  %v17771_v60 = vrot.slane %v17700_v49, %v28529_v22 }
 0x9e3   :  { %v17583_v25 = vpop.xlane.xlu1 %17582 }
 0x9e4   :  { %v17633_v36 = vmul.f32 0.0078125, %v17583_v25  ;;  %v17702_v53 = vunpack.c.l.b16 %v17657_v46  ;;  %v17703_v14 = vunpack.c.h.b16 %v17657_v46 }
 0x9e6   :  { %v17658_v59 = vpack.c.bf16 %v17633_v36, %v17632_v33  ;;  %v17780_v17 = vrot.slane %v17702_v53, %v28542_v57  ;;  %v17785_v36 = vrot.slane %v17703_v14, %v28545_v31 }
 0x9e7   :  { %v17587_v21 = vpop.xlane.xlu1 %17586 }
 0x9e8   :  { %v17635_v16 = vmul.f32 0.0078125, %v17587_v21  ;;  %v17704_v41 = vunpack.c.l.b16 %v17658_v59  ;;  %v17705_v51 = vunpack.c.h.b16 %v17658_v59  ;;  %v17762_v21 = vsel %vm17740_vm11, %v17761_v34, %v17757_v48 }
 0x9e9   :  { %v17767_v54 = vsel %vm17747_vm12, %v17766_v10, %v17762_v21 }
 0x9ea   :  { %v17659_v1 = vpack.c.bf16 %v17635_v16, %v17634_v55  ;;  %v17790_v61 = vrot.slane %v17704_v41, %v28529_v22  ;;  %v17794_v39 = vrot.slane %v17705_v51, %v28532_v56 }
 0x9eb   :  { %v17591_v38 = vpop.xlane.xlu1 %17590 }
 0x9ec   :  { %v17637_v13 = vmul.f32 0.0078125, %v17591_v38  ;;  %v17775_v38 = vrot.slane %v17701_v32, %v28532_v56  ;;  %v17795_v55 = vsel %vm17733_vm10, %v17794_v39, %v17790_v61  ;;  %v17883_v61 = vsel %vm17882_vm13, %v17767_v54, %v28560_v7 }
 0x9ee   :  { %v17660_v12 = vpack.c.bf16 %v17637_v13, %v17636_v62  ;;  %v17776_v37 = vsel %vm17733_vm10, %v17775_v38, %v17771_v60 }
 0x9ef   :  { %v17595_v63 = vpop.xlane.xlu1 %17594  ;;  %v17781_v5 = vsel %vm17740_vm11, %v17780_v17, %v17776_v37 }
 0x9f0   :  { %v17639_v47 = vmul.f32 0.0078125, %v17595_v63  ;;  %v17706_v63 = vunpack.c.l.b16 %v17659_v1  ;;  %v17708_v3 = vunpack.c.l.b16 %v17660_v12  ;;  %v17709_v30 = vunpack.c.h.b16 %v17660_v12 }
 0x9f1   :  { %v17786_v60 = vsel %vm17747_vm12, %v17785_v36, %v17781_v5 }
 0x9f2   :  { %v17661_v28 = vpack.c.bf16 %v17639_v47, %v17638_v23  ;;  %v17809_v20 = vrot.slane %v17708_v3, %v28529_v22  ;;  %v17813_v46 = vrot.slane %v17709_v30, %v28532_v56  ;;  %v17885_v3 = vsel %vm17884_vm14, %v17786_v60, %v17883_v61 }
 0x9f3   :  { %v17599_v50 = vpop.xlane.xlu1 %17598 }
 0x9f4   :  { %v17641_v25 = vmul.f32 0.0078125, %v17599_v50  ;;  %v17710_v48 = vunpack.c.l.b16 %v17661_v28  ;;  %v17711_v18 = vunpack.c.h.b16 %v17661_v28 }
 0x9f6   :  { %v17662_v40 = vpack.c.bf16 %v17641_v25, %v17640_v58  ;;  %v17707_v58 = vunpack.c.h.b16 %v17659_v1  ;;  %v17818_v19 = vrot.slane %v17710_v48, %v28542_v57  ;;  %v17823_v10 = vrot.slane %v17711_v18, %v28545_v31 }
 0x9f7   :  { %v17603_v6 = vpop.xlane.xlu1 %17602 }
 0x9f8   :  { %v17643_v2 = vmul.f32 0.0078125, %v17603_v6  ;;  %v17712_v15 = vunpack.c.l.b16 %v17662_v40  ;;  %v17713_v50 = vunpack.c.h.b16 %v17662_v40  ;;  %v17804_v25 = vrot.slane %v17707_v58, %v28545_v31 }
 0x9fa   :  { %v17663_v44 = vpack.c.bf16 %v17643_v2, %v17642_v9  ;;  %v17799_v9 = vrot.slane %v17706_v63, %v28542_v57  ;;  %v17828_v49 = vrot.slane %v17712_v15, %v28529_v22  ;;  %v17832_v16 = vrot.slane %v17713_v50, %v28532_v56 }
 0x9fb   :  { %v17607_v24 = vpop.xlane.xlu1 %17606  ;;  %v17814_v2 = vsel %vm17733_vm10, %v17813_v46, %v17809_v20 }
 0x9fc   :  { %v17645_v42 = vmul.f32 0.0078125, %v17607_v24  ;;  %v17714_v33 = vunpack.c.l.b16 %v17663_v44  ;;  %v17715_v13 = vunpack.c.h.b16 %v17663_v44  ;;  %v17800_v53 = vsel %vm17740_vm11, %v17799_v9, %v17795_v55 }
 0x9fd   :  { %v17819_v1 = vsel %vm17740_vm11, %v17818_v19, %v17814_v2 }
 0x9fe   :  { %v17664_v43 = vpack.c.bf16 %v17645_v42, %v17644_v52  ;;  %v17837_v6 = vrot.slane %v17714_v33, %v28542_v57  ;;  %v17842_v12 = vrot.slane %v17715_v13, %v28545_v31  ;;  %v17805_v42 = vsel %vm17747_vm12, %v17804_v25, %v17800_v53 }
 0x9ff   :  { %v17611_v29 = vpop.xlane.xlu1 %17610  ;;  %v17824_v39 = vsel %vm17747_vm12, %v17823_v10, %v17819_v1 }
 0xa00   :  { %v17647_v45 = vmul.f32 0.0078125, %v17611_v29  ;;  %v17716_v62 = vunpack.c.l.b16 %v17664_v43  ;;  %v17717_v23 = vunpack.c.h.b16 %v17664_v43 }
 0xa02   :  { %v17665_v35 = vpack.c.bf16 %v17647_v45, %v17646_v27  ;;  %v17847_v27 = vrot.slane %v17716_v62, %v28529_v22  ;;  %v17851_v32 = vrot.slane %v17717_v23, %v28532_v56 }
 0xa03   :  { %v17615_v52 = vpop.xlane.xlu1 %17614 }
 0xa04   :  { %v17718_v59 = vunpack.c.l.b16 %v17665_v35  ;;  %v17649_v34 = vmul.f32 0.0078125, %v17615_v52  ;;  %v17719_v47 = vunpack.c.h.b16 %v17665_v35  ;;  %v17852_v38 = vsel %vm17733_vm10, %v17851_v32, %v17847_v27 }
 0xa06   :  { %v17666_v26 = vpack.c.bf16 %v17649_v34, %v28550_v8  ;;  %v17856_v0 = vrot.slane %v17718_v59, %v28542_v57  ;;  %v17833_v8 = vsel %vm17733_vm10, %v17832_v16, %v17828_v49  ;;  %v17861_v14 = vrot.slane %v17719_v47, %v28545_v31 }
 0xa07   :  { %v17619_v4 = vpop.xlane.xlu1 %17618  ;;  %v17838_v24 = vsel %vm17740_vm11, %v17837_v6, %v17833_v8 }
 0xa08   :  { %v17720_v41 = vunpack.c.l.b16 %v17666_v26  ;;  %v17721_v51 = vunpack.c.h.b16 %v17666_v26  ;;  %v17651_v21 = vmul.f32 0.0078125, %v17619_v4  ;;  %v17857_v17 = vsel %vm17740_vm11, %v17856_v0, %v17852_v38 }
 0xa09   :  { %v17843_v30 = vsel %vm17747_vm12, %v17842_v12, %v17838_v24  ;;  %v17862_v29 = vsel %vm17747_vm12, %v17861_v14, %v17857_v17 }
 0xa0a   :  { %v17667_v28 = vpack.c.bf16 %v17651_v21, %v17650_v11  ;;  %v17866_v40 = vrot.slane %v17720_v41, %v28529_v22  ;;  %v17870_v44 = vrot.slane %v17721_v51, %v28532_v56  ;;  %v17887_v11 = vsel %vm17886_vm15, %v17805_v42, %v17885_v3 }
 0xa0b   :  { %v17889_v7 = vsel %vm17888_vm0, %v17824_v39, %v17887_v11 }
 0xa0c   :  { %v17722_v43 = vunpack.c.l.b16 %v17667_v28  ;;  %v17723_v63 = vunpack.c.h.b16 %v17667_v28  ;;  %v17871_v54 = vsel %vm17733_vm10, %v17870_v44, %v17866_v40  ;;  %v17891_v36 = vsel %vm17890_vm1, %v17843_v30, %v17889_v7 }
 0xa0d   :  { %v17893_v45 = vsel %vm17892_vm2, %v17862_v29, %v17891_v36 }
 0xa0e   :  { %v17875_v22 = vrot.slane %v17722_v43, %v28542_v57  ;;  %v17880_v56 = vrot.slane %v17723_v63, %v28545_v31  ;;  %v19211_v31 = vld [vmem:[%s28635_s11] ss:$0 sm:$0xff] }
 0xa10   :  { %v17876_v37 = vsel %vm17740_vm11, %v17875_v22, %v17871_v54 }
 0xa11   :  { %v17881_v48 = vsel %vm17747_vm12, %v17880_v56, %v17876_v37 }
 0xa12   :  { %v17895_v5 = vsel %vm17894_vm3, %v17881_v48, %v17893_v45 }
 0xa13   :  { %v17896_v15 = vpack.c.b16 %v17895_v5, %v17895_v5 }
 0xa15   :  { %17898 = vxpose.xlu0.c.b16.start.end [1/1] (short) (narrow) %v17896_v15, 32 }
 0xa7b   :  { %v17906_v50 = vpop.trf.xlu0 }
 0xa7c   :  { %20131 = vmatprep.mubr.msk.bf16.mxu0 %vm17914_vm4, %v17906_v50 }
 0xa7f   :  { %v17907_v57 = vpop.trf.xlu0 }
 0xa80   :  { %20132 = vmatmul.mubr.msk.bf16.vlgmr.msra.gmra.mrb[96].mxu0 %vm17914_vm4, %v17907_v57 }
 0xb53   :  { %v20133_v33 = vpop.f32.mrb[96].mxu0 }
 0xb54   :  { %v17967_v55 = vadd.f32 %v20133_v33, %v19211_v31  ;;  %v17958_v62 = vpop.f32.mrb[97].mxu0 }
 0xb55   :  { %v17959_v23 = vadd.f32 %v19211_v31, %v17958_v62  ;;  %v20134_v35 = vpop.f32.mrb[98].mxu0 }
 0xb56   :  { %17975 = vst [vmem:[#allocation3 + $0x10] sm:$0xff] %v17967_v55  ;;  %v17970_v58 = vadd.f32 %v20134_v35, %v19211_v31  ;;  %v17961_v9 = vpop.f32.mrb[99].mxu0 }
 0xb57   :  { %17973 = vst [vmem:[#allocation3] sm:$0xff] %v17959_v23  ;;  %v17962_v20 = vadd.f32 %v19211_v31, %v17961_v9 }
 0xb58   :  { %17976 = vst [vmem:[#allocation3 + $0x18] sm:$0xff] %v17970_v58 }
 0xb59   :  { %17974 = vst [vmem:[#allocation3 + $0x8] sm:$0xff] %v17962_v20 }
 0xb5a   :  { %20168 = shalt.err (!%p20165_p4)
}
 0xb5b   :  { %s20169_s5 = scalar_lea.hbm %s28636_s12, 512 }
 0xb5c   :  { %p20170_p5 = scmp.ne.s32.totalorder %s28636_s12, %s20169_s5  ;;  %p20173_p6 = scmp.lt.u32.totalorder %s20169_s5, %s28636_s12 }
 0xb5e   :  { %p20175_p7 = pnand %p20173_p6, %p20170_p5 }
 0xb60   :  { %20178 = shalt.err (!%p20175_p7)
}
 0xb61   :  { %s20193_s13 = smov 128  }
 0xb62   :  { %17988 = dma.vmem_to_hbm [thread:$0]  %s17983_s2, 512, %s28636_s12, [#allocation4], %s20193_s13, %s20193_s13, %s20183_s30  }
 0xb63   :  { %20179 = dma.done.wait [#allocation4], 512  }
 0xb64   :  { %20180 = vsyncadd [#allocation4], 4294966784 }
 0xb65   :  { %17992 = vsyncpa [#allocation4], 1 }

</bundles_post_ra>
